<compile_context>
chip_gen: v7x
topology: tpu7x:2x2x1
jax: 0.10.0
libtpu: 0.0.40
codegen_flags: <defaults>
</compile_context>

<pallas_src>
import functools

import jax
import jax.numpy as jnp
from jax.experimental import pallas as pl
from jax.experimental.pallas import tpu as pltpu

EPS = 1e-5


# ----------------------------- fused kernel ---------------------------------

def _resblock_kernel(x_ref, p_ref, sh_ref, bw1_ref, c1_ref, g1_ref, be1_ref,
                     bw2_ref, c2_ref, g2_ref, be2_ref, o_ref, *, inv_r):
    """Whole ResidualBlock2d on one lane-dense (N*H, W*C) VMEM block."""
    x = x_ref[...]                                            # (NH, WC) f32

    def relu_bn(v, gamma, beta):
        # ReLU then training-mode BatchNorm2d (batch stats, biased variance),
        # one pass over the data, folded into a single scale * v + shift.
        y = jnp.maximum(v, 0.0)
        s = jnp.dot(jnp.sum(y, axis=0, keepdims=True), p_ref[...],
                    preferred_element_type=jnp.float32) * inv_r      # E[y]  per channel (per lane)
        ss = jnp.dot(jnp.sum(y * y, axis=0, keepdims=True), p_ref[...],
                     preferred_element_type=jnp.float32) * inv_r     # E[y^2]
        var = ss - s * s
        scale = gamma * jax.lax.rsqrt(var + EPS)
        shift = beta - s * scale
        return y * scale + shift

    # ReLU -> BN1
    y = relu_bn(x, g1_ref[...], be1_ref[...])

    # 3x3 conv, padding=1:  sum over the 3 kernel rows of
    #   (boundary-masked H-shift/select matmul) @ (banded W-shift + channel-mix weight)
    h = c1_ref[...] + jnp.dot(
        jnp.dot(sh_ref[0], y, preferred_element_type=jnp.float32),
        bw1_ref[0], preferred_element_type=jnp.float32)
    for kh in (1, 2):
        h = h + jnp.dot(
            jnp.dot(sh_ref[kh], y, preferred_element_type=jnp.float32),
            bw1_ref[kh], preferred_element_type=jnp.float32)

    # ReLU -> BN2
    y2 = relu_bn(h, g2_ref[...], be2_ref[...])

    # 1x1 conv (block-diagonal matmul) + bias, then residual add.
    z = jnp.dot(y2, bw2_ref[...], preferred_element_type=jnp.float32) + c2_ref[...]
    o_ref[...] = x + z


def _full_spec(shape):
    nd = len(shape)
    return pl.BlockSpec(shape, lambda *_, _nd=nd: (0,) * _nd)


def residual_block_forward(x_nchw, prep):
    """x: (N, C, H, W) float32 (PyTorch layout), prep: output of prepare_params."""
    N, C, H, W = x_nchw.shape
    NH, WC = N * H, W * C
    # Single layout transform at the module boundary: NCHW -> (N*H, W*C) lane-dense.
    x2 = jnp.transpose(x_nchw, (0, 2, 3, 1)).reshape(NH, WC)

    operands = (x2, prep["P"], prep["SH"], prep["BW1"],
                prep["c1"], prep["g1"], prep["be1"],
                prep["BW2"], prep["c2"], prep["g2"], prep["be2"])

    out2 = pl.pallas_call(
        functools.partial(_resblock_kernel, inv_r=1.0 / float(N * H * W)),
        out_shape=jax.ShapeDtypeStruct((NH, WC), jnp.float32),
        in_specs=[_full_spec(op.shape) for op in operands],
        out_specs=_full_spec((NH, WC)),
        compiler_params=pltpu.CompilerParams(vmem_limit_bytes=32 * 1024 * 1024),
    )(*operands)

    return jnp.transpose(out2.reshape(N, H, W, C), (0, 3, 1, 2))


# ------------------- weight-only preprocessing (plain JAX) -------------------

def prepare_params(params, N, C, H, W):
    """Build the shift / band / projector matrices once from the weights."""
    NH, WC = N * H, W * C
    f32 = jnp.float32

    # Per-channel reduce+broadcast projector: P[(j,c),(j',c')] = [c == c'].
    P = jnp.tile(jnp.eye(C, dtype=f32), (W, W))                        # (WC, WC)

    # H-shift/select matrices, one per kernel row kh:
    #   (SH[kh] @ y)[n*H + i] = y[n*H + i + kh - 1] inside the image, 0 at the
    #   zero-padding boundary (never crosses images).
    i = jnp.arange(NH) % H
    sh = []
    for kh in range(3):
        d = kh - 1
        valid = ((i + d) >= 0) & ((i + d) < H)
        sh.append(jnp.eye(NH, k=d, dtype=f32) * valid.astype(f32)[:, None])
    SH = jnp.stack(sh)                                                 # (3, NH, NH)

    # Banded (W*C, W*C) weights, one per kernel row of the 3x3 conv:
    #   BW1[kh][(jin,cin),(jout,cout)] = w1[cout, cin, kh, jin - jout + 1]
    # (zero outside the band), which implements the kw shift with zero padding.
    w_hwio = jnp.transpose(params["w1"], (2, 3, 1, 0))                 # (kh, kw, cin, cout)
    eyes = jnp.stack([jnp.eye(W, k=1 - kw, dtype=f32) for kw in range(3)])
    BW1 = jnp.einsum("kpq,hkio->hpiqo", eyes, w_hwio).reshape(3, WC, WC)

    # Block-diagonal (W*C, W*C) weight for the 1x1 conv.
    w2_io = jnp.transpose(params["w2"].reshape(C, C))                  # (cin, cout)
    BW2 = jnp.einsum("pq,io->piqo", jnp.eye(W, dtype=f32), w2_io).reshape(WC, WC)

    # Per-lane (tiled over W) bias / BN affine vectors.
    def tile(v):
        return jnp.tile(v.astype(f32), W).reshape(1, WC)

    return dict(P=P, SH=SH, BW1=BW1, BW2=BW2,
                c1=tile(params["b1"]), g1=tile(params["bn1_g"]), be1=tile(params["bn1_b"]),
                c2=tile(params["b2"]), g2=tile(params["bn2_g"]), be2=tile(params["bn2_b"]))


# --------------------------- params & reference ------------------------------

def init_params(key, dim):
    k1, k2, k3, k4 = jax.random.split(key, 4)
    b3 = 1.0 / (dim * 9) ** 0.5
    b1 = 1.0 / float(dim) ** 0.5
    return dict(
        bn1_g=jnp.ones((dim,), jnp.float32), bn1_b=jnp.zeros((dim,), jnp.float32),
        w1=jax.random.uniform(k1, (dim, dim, 3, 3), jnp.float32, -b3, b3),
        b1=jax.random.uniform(k2, (dim,), jnp.float32, -b3, b3),
        bn2_g=jnp.ones((dim,), jnp.float32), bn2_b=jnp.zeros((dim,), jnp.float32),
        w2=jax.random.uniform(k3, (dim, dim, 1, 1), jnp.float32, -b1, b1),
        b2=jax.random.uniform(k4, (dim,), jnp.float32, -b1, b1),
    )


def residual_block_reference(x, params):
    """Plain-JAX reference matching the PyTorch module in training mode."""
    def bn(y, g, b):
        mean = jnp.mean(y, axis=(0, 2, 3), keepdims=True)
        var = jnp.mean(jnp.square(y - mean), axis=(0, 2, 3), keepdims=True)
        return (y - mean) * jax.lax.rsqrt(var + EPS) * g.reshape(1, -1, 1, 1) \
            + b.reshape(1, -1, 1, 1)

    def conv(y, w, b, pad):
        out = jax.lax.conv_general_dilated(
            y, w, (1, 1), ((pad, pad), (pad, pad)),
            dimension_numbers=("NCHW", "OIHW", "NCHW"))
        return out + b.reshape(1, -1, 1, 1)

    h = bn(jnp.maximum(x, 0.0), params["bn1_g"], params["bn1_b"])
    h = conv(h, params["w1"], params["b1"], 1)
    h = bn(jnp.maximum(h, 0.0), params["bn2_g"], params["bn2_b"])
    h = conv(h, params["w2"], params["b2"], 0)
    return x + h


# --------------------------------- main --------------------------------------

if __name__ == "__main__":
    batch, channels, spatial = 2, 32, 16          # ResidualBlock2d(input_dim=32)

    root = jax.random.PRNGKey(0)
    k_param, k_x = jax.random.split(root)
    params = init_params(k_param, channels)
    x = jax.random.normal(k_x, (batch, channels, spatial, spatial), jnp.float32)

    prep = prepare_params(params, batch, channels, spatial, spatial)

    fwd = jax.jit(residual_block_forward)
    out = fwd(x, prep)
    jax.block_until_ready(out)

    assert out.shape == x.shape
    ref = residual_block_reference(x, params)
    err = float(jnp.max(jnp.abs(out - ref)))
    assert err < 5e-2, f"max abs err vs reference: {err}"
    print("KERNEL_OK")
</pallas_src>

<mosaic_0001>
module attributes {stable_mosaic.version = 11 : i64} {
  func.func @_resblock_kernel(%arg0: memref<32x512xf32, #tpu.memory_space<vmem>>, %arg1: memref<512x512xf32, #tpu.memory_space<vmem>>, %arg2: memref<3x32x32xf32, #tpu.memory_space<vmem>>, %arg3: memref<3x512x512xf32, #tpu.memory_space<vmem>>, %arg4: memref<1x512xf32, #tpu.memory_space<vmem>>, %arg5: memref<1x512xf32, #tpu.memory_space<vmem>>, %arg6: memref<1x512xf32, #tpu.memory_space<vmem>>, %arg7: memref<512x512xf32, #tpu.memory_space<vmem>>, %arg8: memref<1x512xf32, #tpu.memory_space<vmem>>, %arg9: memref<1x512xf32, #tpu.memory_space<vmem>>, %arg10: memref<1x512xf32, #tpu.memory_space<vmem>>, %arg11: memref<32x512xf32, #tpu.memory_space<vmem>>) attributes {dimension_semantics = [], scalar_prefetch = 0 : i64, scratch_operands = 0 : i64, tpu.core_type = #tpu.core_type<tc>} {
    %c0 = arith.constant 0 : index
    %c0_0 = arith.constant 0 : index
    %0 = vector.load %arg0[%c0, %c0_0] : memref<32x512xf32, #tpu.memory_space<vmem>>, vector<32x512xf32>
    %c0_1 = arith.constant 0 : index
    %c0_2 = arith.constant 0 : index
    %1 = vector.load %arg5[%c0_1, %c0_2] : memref<1x512xf32, #tpu.memory_space<vmem>>, vector<1x512xf32>
    %c0_3 = arith.constant 0 : index
    %c0_4 = arith.constant 0 : index
    %2 = vector.load %arg6[%c0_3, %c0_4] : memref<1x512xf32, #tpu.memory_space<vmem>>, vector<1x512xf32>
    %cst = arith.constant 0.000000e+00 : f32
    %3 = vector.broadcast %cst : f32 to vector<32x512xf32>
    %4 = arith.maximumf %0, %3 : vector<32x512xf32>
    %cst_5 = arith.constant dense<0.000000e+00> : vector<512xf32>
    %5 = vector.multi_reduction <add>, %4, %cst_5 [0] : vector<32x512xf32> to vector<512xf32>
    %6 = vector.shape_cast %5 : vector<512xf32> to vector<1x512xf32>
    %c0_6 = arith.constant 0 : index
    %c0_7 = arith.constant 0 : index
    %7 = vector.load %arg1[%c0_6, %c0_7] : memref<512x512xf32, #tpu.memory_space<vmem>>, vector<512x512xf32>
    %cst_8 = arith.constant dense<0.000000e+00> : vector<1x512xf32>
    %8 = tpu.matmul %6, %7, %cst_8 {dimension_numbers = #tpu.dot_dimension_numbers<[1], [0], [0], [1], [0, 0, 1, 1], [], []>} : vector<1x512xf32>, vector<512x512xf32>, vector<1x512xf32> -> vector<1x512xf32>
    %cst_9 = arith.constant 0.001953125 : f32
    %9 = vector.broadcast %cst_9 : f32 to vector<1x512xf32>
    %10 = arith.mulf %8, %9 : vector<1x512xf32>
    %11 = arith.mulf %4, %4 : vector<32x512xf32>
    %cst_10 = arith.constant dense<0.000000e+00> : vector<512xf32>
    %12 = vector.multi_reduction <add>, %11, %cst_10 [0] : vector<32x512xf32> to vector<512xf32>
    %13 = vector.shape_cast %12 : vector<512xf32> to vector<1x512xf32>
    %c0_11 = arith.constant 0 : index
    %c0_12 = arith.constant 0 : index
    %14 = vector.load %arg1[%c0_11, %c0_12] : memref<512x512xf32, #tpu.memory_space<vmem>>, vector<512x512xf32>
    %cst_13 = arith.constant dense<0.000000e+00> : vector<1x512xf32>
    %15 = tpu.matmul %13, %14, %cst_13 {dimension_numbers = #tpu.dot_dimension_numbers<[1], [0], [0], [1], [0, 0, 1, 1], [], []>} : vector<1x512xf32>, vector<512x512xf32>, vector<1x512xf32> -> vector<1x512xf32>
    %cst_14 = arith.constant 0.001953125 : f32
    %16 = vector.broadcast %cst_14 : f32 to vector<1x512xf32>
    %17 = arith.mulf %15, %16 : vector<1x512xf32>
    %18 = arith.mulf %10, %10 : vector<1x512xf32>
    %19 = arith.subf %17, %18 : vector<1x512xf32>
    %cst_15 = arith.constant 9.99999974E-6 : f32
    %20 = vector.broadcast %cst_15 : f32 to vector<1x512xf32>
    %21 = arith.addf %19, %20 : vector<1x512xf32>
    %22 = math.rsqrt %21 : vector<1x512xf32>
    %23 = arith.mulf %1, %22 : vector<1x512xf32>
    %24 = arith.mulf %10, %23 : vector<1x512xf32>
    %25 = arith.subf %2, %24 : vector<1x512xf32>
    %26 = vector.broadcast %23 : vector<1x512xf32> to vector<32x512xf32>
    %27 = arith.mulf %4, %26 : vector<32x512xf32>
    %28 = vector.broadcast %25 : vector<1x512xf32> to vector<32x512xf32>
    %29 = arith.addf %27, %28 : vector<32x512xf32>
    %c0_16 = arith.constant 0 : index
    %c0_17 = arith.constant 0 : index
    %30 = vector.load %arg4[%c0_16, %c0_17] : memref<1x512xf32, #tpu.memory_space<vmem>>, vector<1x512xf32>
    %c0_18 = arith.constant 0 : index
    %c0_19 = arith.constant 0 : index
    %c0_20 = arith.constant 0 : index
    %31 = vector.load %arg2[%c0_18, %c0_19, %c0_20] : memref<3x32x32xf32, #tpu.memory_space<vmem>>, vector<1x32x32xf32>
    %32 = vector.shape_cast %31 : vector<1x32x32xf32> to vector<32x32xf32>
    %cst_21 = arith.constant dense<0.000000e+00> : vector<32x512xf32>
    %33 = tpu.matmul %32, %29, %cst_21 {dimension_numbers = #tpu.dot_dimension_numbers<[1], [0], [0], [1], [0, 0, 1, 1], [], []>} : vector<32x32xf32>, vector<32x512xf32>, vector<32x512xf32> -> vector<32x512xf32>
    %c0_22 = arith.constant 0 : index
    %c0_23 = arith.constant 0 : index
    %c0_24 = arith.constant 0 : index
    %34 = vector.load %arg3[%c0_22, %c0_23, %c0_24] : memref<3x512x512xf32, #tpu.memory_space<vmem>>, vector<1x512x512xf32>
    %35 = vector.shape_cast %34 : vector<1x512x512xf32> to vector<512x512xf32>
    %cst_25 = arith.constant dense<0.000000e+00> : vector<32x512xf32>
    %36 = tpu.matmul %33, %35, %cst_25 {dimension_numbers = #tpu.dot_dimension_numbers<[1], [0], [0], [1], [0, 0, 1, 1], [], []>} : vector<32x512xf32>, vector<512x512xf32>, vector<32x512xf32> -> vector<32x512xf32>
    %37 = vector.broadcast %30 : vector<1x512xf32> to vector<32x512xf32>
    %38 = arith.addf %37, %36 : vector<32x512xf32>
    %c1 = arith.constant 1 : index
    %c0_26 = arith.constant 0 : index
    %c0_27 = arith.constant 0 : index
    %39 = vector.load %arg2[%c1, %c0_26, %c0_27] : memref<3x32x32xf32, #tpu.memory_space<vmem>>, vector<1x32x32xf32>
    %40 = vector.shape_cast %39 : vector<1x32x32xf32> to vector<32x32xf32>
    %cst_28 = arith.constant dense<0.000000e+00> : vector<32x512xf32>
    %41 = tpu.matmul %40, %29, %cst_28 {dimension_numbers = #tpu.dot_dimension_numbers<[1], [0], [0], [1], [0, 0, 1, 1], [], []>} : vector<32x32xf32>, vector<32x512xf32>, vector<32x512xf32> -> vector<32x512xf32>
    %c1_29 = arith.constant 1 : index
    %c0_30 = arith.constant 0 : index
    %c0_31 = arith.constant 0 : index
    %42 = vector.load %arg3[%c1_29, %c0_30, %c0_31] : memref<3x512x512xf32, #tpu.memory_space<vmem>>, vector<1x512x512xf32>
    %43 = vector.shape_cast %42 : vector<1x512x512xf32> to vector<512x512xf32>
    %cst_32 = arith.constant dense<0.000000e+00> : vector<32x512xf32>
    %44 = tpu.matmul %41, %43, %cst_32 {dimension_numbers = #tpu.dot_dimension_numbers<[1], [0], [0], [1], [0, 0, 1, 1], [], []>} : vector<32x512xf32>, vector<512x512xf32>, vector<32x512xf32> -> vector<32x512xf32>
    %45 = arith.addf %38, %44 : vector<32x512xf32>
    %c2 = arith.constant 2 : index
    %c0_33 = arith.constant 0 : index
    %c0_34 = arith.constant 0 : index
    %46 = vector.load %arg2[%c2, %c0_33, %c0_34] : memref<3x32x32xf32, #tpu.memory_space<vmem>>, vector<1x32x32xf32>
    %47 = vector.shape_cast %46 : vector<1x32x32xf32> to vector<32x32xf32>
    %cst_35 = arith.constant dense<0.000000e+00> : vector<32x512xf32>
    %48 = tpu.matmul %47, %29, %cst_35 {dimension_numbers = #tpu.dot_dimension_numbers<[1], [0], [0], [1], [0, 0, 1, 1], [], []>} : vector<32x32xf32>, vector<32x512xf32>, vector<32x512xf32> -> vector<32x512xf32>
    %c2_36 = arith.constant 2 : index
    %c0_37 = arith.constant 0 : index
    %c0_38 = arith.constant 0 : index
    %49 = vector.load %arg3[%c2_36, %c0_37, %c0_38] : memref<3x512x512xf32, #tpu.memory_space<vmem>>, vector<1x512x512xf32>
    %50 = vector.shape_cast %49 : vector<1x512x512xf32> to vector<512x512xf32>
    %cst_39 = arith.constant dense<0.000000e+00> : vector<32x512xf32>
    %51 = tpu.matmul %48, %50, %cst_39 {dimension_numbers = #tpu.dot_dimension_numbers<[1], [0], [0], [1], [0, 0, 1, 1], [], []>} : vector<32x512xf32>, vector<512x512xf32>, vector<32x512xf32> -> vector<32x512xf32>
    %52 = arith.addf %45, %51 : vector<32x512xf32>
    %c0_40 = arith.constant 0 : index
    %c0_41 = arith.constant 0 : index
    %53 = vector.load %arg9[%c0_40, %c0_41] : memref<1x512xf32, #tpu.memory_space<vmem>>, vector<1x512xf32>
    %c0_42 = arith.constant 0 : index
    %c0_43 = arith.constant 0 : index
    %54 = vector.load %arg10[%c0_42, %c0_43] : memref<1x512xf32, #tpu.memory_space<vmem>>, vector<1x512xf32>
    %cst_44 = arith.constant 0.000000e+00 : f32
    %55 = vector.broadcast %cst_44 : f32 to vector<32x512xf32>
    %56 = arith.maximumf %52, %55 : vector<32x512xf32>
    %cst_45 = arith.constant dense<0.000000e+00> : vector<512xf32>
    %57 = vector.multi_reduction <add>, %56, %cst_45 [0] : vector<32x512xf32> to vector<512xf32>
    %58 = vector.shape_cast %57 : vector<512xf32> to vector<1x512xf32>
    %c0_46 = arith.constant 0 : index
    %c0_47 = arith.constant 0 : index
    %59 = vector.load %arg1[%c0_46, %c0_47] : memref<512x512xf32, #tpu.memory_space<vmem>>, vector<512x512xf32>
    %cst_48 = arith.constant dense<0.000000e+00> : vector<1x512xf32>
    %60 = tpu.matmul %58, %59, %cst_48 {dimension_numbers = #tpu.dot_dimension_numbers<[1], [0], [0], [1], [0, 0, 1, 1], [], []>} : vector<1x512xf32>, vector<512x512xf32>, vector<1x512xf32> -> vector<1x512xf32>
    %cst_49 = arith.constant 0.001953125 : f32
    %61 = vector.broadcast %cst_49 : f32 to vector<1x512xf32>
    %62 = arith.mulf %60, %61 : vector<1x512xf32>
    %63 = arith.mulf %56, %56 : vector<32x512xf32>
    %cst_50 = arith.constant dense<0.000000e+00> : vector<512xf32>
    %64 = vector.multi_reduction <add>, %63, %cst_50 [0] : vector<32x512xf32> to vector<512xf32>
    %65 = vector.shape_cast %64 : vector<512xf32> to vector<1x512xf32>
    %c0_51 = arith.constant 0 : index
    %c0_52 = arith.constant 0 : index
    %66 = vector.load %arg1[%c0_51, %c0_52] : memref<512x512xf32, #tpu.memory_space<vmem>>, vector<512x512xf32>
    %cst_53 = arith.constant dense<0.000000e+00> : vector<1x512xf32>
    %67 = tpu.matmul %65, %66, %cst_53 {dimension_numbers = #tpu.dot_dimension_numbers<[1], [0], [0], [1], [0, 0, 1, 1], [], []>} : vector<1x512xf32>, vector<512x512xf32>, vector<1x512xf32> -> vector<1x512xf32>
    %cst_54 = arith.constant 0.001953125 : f32
    %68 = vector.broadcast %cst_54 : f32 to vector<1x512xf32>
    %69 = arith.mulf %67, %68 : vector<1x512xf32>
    %70 = arith.mulf %62, %62 : vector<1x512xf32>
    %71 = arith.subf %69, %70 : vector<1x512xf32>
    %cst_55 = arith.constant 9.99999974E-6 : f32
    %72 = vector.broadcast %cst_55 : f32 to vector<1x512xf32>
    %73 = arith.addf %71, %72 : vector<1x512xf32>
    %74 = math.rsqrt %73 : vector<1x512xf32>
    %75 = arith.mulf %53, %74 : vector<1x512xf32>
    %76 = arith.mulf %62, %75 : vector<1x512xf32>
    %77 = arith.subf %54, %76 : vector<1x512xf32>
    %78 = vector.broadcast %75 : vector<1x512xf32> to vector<32x512xf32>
    %79 = arith.mulf %56, %78 : vector<32x512xf32>
    %80 = vector.broadcast %77 : vector<1x512xf32> to vector<32x512xf32>
    %81 = arith.addf %79, %80 : vector<32x512xf32>
    %c0_56 = arith.constant 0 : index
    %c0_57 = arith.constant 0 : index
    %82 = vector.load %arg7[%c0_56, %c0_57] : memref<512x512xf32, #tpu.memory_space<vmem>>, vector<512x512xf32>
    %cst_58 = arith.constant dense<0.000000e+00> : vector<32x512xf32>
    %83 = tpu.matmul %81, %82, %cst_58 {dimension_numbers = #tpu.dot_dimension_numbers<[1], [0], [0], [1], [0, 0, 1, 1], [], []>} : vector<32x512xf32>, vector<512x512xf32>, vector<32x512xf32> -> vector<32x512xf32>
    %c0_59 = arith.constant 0 : index
    %c0_60 = arith.constant 0 : index
    %84 = vector.load %arg8[%c0_59, %c0_60] : memref<1x512xf32, #tpu.memory_space<vmem>>, vector<1x512xf32>
    %85 = vector.broadcast %84 : vector<1x512xf32> to vector<32x512xf32>
    %86 = arith.addf %83, %85 : vector<32x512xf32>
    %87 = arith.addf %0, %86 : vector<32x512xf32>
    %c0_61 = arith.constant 0 : index
    %c0_62 = arith.constant 0 : index
    %88 = vector.load %arg11[%c0_61, %c0_62] : memref<32x512xf32, #tpu.memory_space<vmem>>, vector<32x512xf32>
    tpu.vector_store %arg11[%c0_61, %c0_62], %87 {strides = array<i32>} : memref<32x512xf32, #tpu.memory_space<vmem>>, vector<32x512xf32>,
    return
  }
}

</mosaic_0001>

<bundles_post_ra>
// kernel: residual_block_forward.1
= control target key start
LH: loop header
LB: loop body
LE: loop exit
PB: predicated region body
PF: predicated region fallthrough
CT: control target
= control target key end

     0   :  { %16 = vsyncpa [#allocation3], 0  ;;  %s9485_s0 = inlined_call_operand.vmem [shape: f32[32,512], index: 0, kind: input, shape index: {}]   ;;  %s9486_s1 = inlined_call_operand.hbm [shape: f32[512,512], index: 1, kind: input, shape index: {}]   ;;  %s9487_s2 = inlined_call_operand.hbm [shape: f32[3,32,32], index: 2, kind: input, shape index: {}]   ;;  %s9488_s3 = inlined_call_operand.hbm [shape: f32[3,512,512], index: 3, kind: input, shape index: {}]   ;;  %s9489_s4 = inlined_call_operand.hbm [shape: f32[1,512], index: 4, kind: input, shape index: {}]   ;;  %s9490_s5 = inlined_call_operand.hbm [shape: f32[1,512], index: 5, kind: input, shape index: {}]   ;;  %s9491_s6 = inlined_call_operand.hbm [shape: f32[1,512], index: 6, kind: input, shape index: {}]   ;;  %s9492_s7 = inlined_call_operand.hbm [shape: f32[512,512], index: 7, kind: input, shape index: {}]   ;;  %s9493_s8 = inlined_call_operand.hbm [shape: f32[1,512], index: 8, kind: input, shape index: {}]   ;;  %s9494_s9 = inlined_call_operand.hbm [shape: f32[1,512], index: 9, kind: input, shape index: {}]   ;;  %s9495_s10 = inlined_call_operand.hbm [shape: f32[1,512], index: 10, kind: input, shape index: {}]   ;;  %s9496_s11 = inlined_call_operand.vmem [shape: f32[32,512], index: 11, kind: output, shape index: {}]  }
   0x1   :  { %17 = vsyncpa [#allocation5], 0 }
   0x2   :  { %18 = vsyncpa [#allocation8], 0 }
   0x3   :  { %19 = vsyncpa [#allocation11], 0 }
   0x4   :  { %20 = vsyncpa [#allocation14], 0 }
   0x5   :  { %21 = vsyncpa [#allocation17], 0  ;;  %s7819_s17 = smov [#allocation4]   ;;  %s7587_s21 = scalar_lea.hbm %s9487_s2, 1536 }
   0x6   :  { %s41_s18 = sshll.u32 %s7819_s17, 4  ;;  %p7588_p0 = scmp.ne.s32.totalorder %s9487_s2, %s7587_s21  ;;  %s42_s18 = int_to_ptr.vmem [resolvable:$true] %s41_s18 }
   0x7   :  { %p7591_p1 = scmp.lt.u32.totalorder %s7587_s21, %s9487_s2 }
   0x9   :  { %p7593_p2 = pnand %p7591_p1, %p7588_p0 }
   0xb   :  { %7596 = shalt.err (!%p7593_p2)
}
   0xc   :  { %s7597_s26 = scalar_lea.vmem %s42_s18, 1536  ;;  %p7602_p4 = scmp.lt.s32.totalorder %s42_s18, %s42_s18 }
   0xd   :  { %p7598_p3 = scmp.ne.s32.totalorder %s42_s18, %s7597_s26  ;;  %p7603_p5 = scmp.lt.s32.totalorder %s7597_s26, %s7597_s26 }
   0xf   :  { %p7604_p6 = por %p7603_p5, %p7602_p4 }
  0x11   :  { %p7605_p7 = pnand %p7604_p6, %p7598_p3 }
  0x13   :  { %7608 = shalt.err (!%p7605_p7)
}
  0x14   :  { %s7820_s27 = smov 128   ;;  %s7821_s28 = smov 8  }
  0x15   :  { %47 = dma.hbm_to_vmem [thread:$0]  %s9487_s2, 1536, %s42_s18, [#allocation5], %s7820_s27, %s7820_s27, %s7821_s28  }
  0x16   :  { %s7822_s12 = smov [#allocation7]   ;;  %s7823_s14 = smov [#allocation10]  }
  0x17   :  { %s66_s13 = sshll.u32 %s7822_s12, 4  ;;  %s86_s15 = sshll.u32 %s7823_s14, 4  ;;  %s67_s13 = int_to_ptr.vmem [resolvable:$true] %s66_s13  ;;  %s87_s15 = int_to_ptr.vmem [resolvable:$true] %s86_s15 }
  0x18   :  { %s7609_s19 = scalar_lea.hbm %s9489_s4, 64 }
  0x19   :  { %p7610_p8 = scmp.ne.s32.totalorder %s9489_s4, %s7609_s19  ;;  %p7613_p9 = scmp.lt.u32.totalorder %s7609_s19, %s9489_s4 }
  0x1b   :  { %p7615_p10 = pnand %p7613_p9, %p7610_p8 }
  0x1d   :  { %7618 = shalt.err (!%p7615_p10)
}
  0x1e   :  { %s7619_s2 = scalar_lea.vmem %s67_s13, 64  ;;  %p7624_p12 = scmp.lt.s32.totalorder %s67_s13, %s67_s13 }
  0x1f   :  { %p7620_p11 = scmp.ne.s32.totalorder %s67_s13, %s7619_s2  ;;  %p7625_p13 = scmp.lt.s32.totalorder %s7619_s2, %s7619_s2 }
  0x21   :  { %p7626_p0 = por %p7625_p13, %p7624_p12 }
  0x23   :  { %p7627_p1 = pnand %p7626_p0, %p7620_p11 }
  0x25   :  { %7630 = shalt.err (!%p7627_p1)
}
  0x26   :  { %69 = dma.hbm_to_vmem [thread:$0]  %s9489_s4, 64, %s67_s13, [#allocation8]  }
  0x27   :  { %s7631_s27 = scalar_lea.hbm %s9491_s6, 64 }
  0x28   :  { %p7632_p2 = scmp.ne.s32.totalorder %s9491_s6, %s7631_s27  ;;  %p7635_p3 = scmp.lt.u32.totalorder %s7631_s27, %s9491_s6 }
  0x2a   :  { %p7637_p4 = pnand %p7635_p3, %p7632_p2 }
  0x2c   :  { %7640 = shalt.err (!%p7637_p4)
}
  0x2d   :  { %s7641_s14 = scalar_lea.vmem %s87_s15, 64  ;;  %p7646_p6 = scmp.lt.s32.totalorder %s87_s15, %s87_s15 }
  0x2e   :  { %p7642_p5 = scmp.ne.s32.totalorder %s87_s15, %s7641_s14  ;;  %p7647_p7 = scmp.lt.s32.totalorder %s7641_s14, %s7641_s14 }
  0x30   :  { %p7648_p8 = por %p7647_p7, %p7646_p6 }
  0x32   :  { %p7649_p9 = pnand %p7648_p8, %p7642_p5 }
  0x34   :  { %7652 = shalt.err (!%p7649_p9)
}
  0x35   :  { %89 = dma.hbm_to_vmem [thread:$0]  %s9491_s6, 64, %s87_s15, [#allocation11]  }
  0x36   :  { %s7824_s16 = smov [#allocation13]   ;;  %s7825_s19 = smov [#allocation2]  }
  0x37   :  { %s108_s17 = sshll.u32 %s7824_s16, 4  ;;  %s29_s20 = sshll.u32 %s7825_s19, 4  ;;  %s109_s17 = int_to_ptr.vmem [resolvable:$true] %s108_s17  ;;  %s30_s20 = int_to_ptr.vmem [resolvable:$true] %s29_s20 }
  0x38   :  { %s7653_s23 = scalar_lea.hbm %s9493_s8, 64 }
  0x39   :  { %p7654_p10 = scmp.ne.s32.totalorder %s9493_s8, %s7653_s23  ;;  %p7657_p11 = scmp.lt.u32.totalorder %s7653_s23, %s9493_s8 }
  0x3b   :  { %p7659_p12 = pnand %p7657_p11, %p7654_p10 }
  0x3d   :  { %7662 = shalt.err (!%p7659_p12)
}
  0x3e   :  { %s7663_s6 = scalar_lea.vmem %s109_s17, 64  ;;  %p7668_p0 = scmp.lt.s32.totalorder %s109_s17, %s109_s17 }
  0x3f   :  { %p7664_p13 = scmp.ne.s32.totalorder %s109_s17, %s7663_s6  ;;  %p7669_p1 = scmp.lt.s32.totalorder %s7663_s6, %s7663_s6 }
  0x41   :  { %p7670_p2 = por %p7669_p1, %p7668_p0 }
  0x43   :  { %p7671_p3 = pnand %p7670_p2, %p7664_p13 }
  0x45   :  { %7674 = shalt.err (!%p7671_p3)
}
  0x46   :  { %111 = dma.hbm_to_vmem [thread:$0]  %s9493_s8, 64, %s109_s17, [#allocation14]  }
  0x47   :  { %s7675_s29 = scalar_lea.hbm %s9486_s1, 32768 }
  0x48   :  { %p7676_p4 = scmp.ne.s32.totalorder %s9486_s1, %s7675_s29  ;;  %p7679_p5 = scmp.lt.u32.totalorder %s7675_s29, %s9486_s1 }
  0x4a   :  { %p7681_p6 = pnand %p7679_p5, %p7676_p4 }
  0x4c   :  { %7684 = shalt.err (!%p7681_p6)
}
  0x4d   :  { %s7685_s13 = scalar_lea.vmem %s30_s20, 32768  ;;  %p7690_p8 = scmp.lt.s32.totalorder %s30_s20, %s30_s20 }
  0x4e   :  { %p7686_p7 = scmp.ne.s32.totalorder %s30_s20, %s7685_s13  ;;  %p7691_p9 = scmp.lt.s32.totalorder %s7685_s13, %s7685_s13 }
  0x50   :  { %p7692_p10 = por %p7691_p9, %p7690_p8 }
  0x52   :  { %p7693_p11 = pnand %p7692_p10, %p7686_p7 }
  0x54   :  { %7696 = shalt.err (!%p7693_p11)
}
  0x55   :  { %s7826_s8 = smov 512   ;;  %s7827_s16 = smov 32  }
  0x56   :  { %35 = dma.hbm_to_vmem [thread:$0]  %s9486_s1, 32768, %s30_s20, [#allocation3], %s7826_s8, %s7826_s8, %s7827_s16  }
  0x57   :  { %s7828_s21 = smov [#allocation6]   ;;  %s7829_s23 = smov [#allocation9]  }
  0x58   :  { %s53_s22 = sshll.u32 %s7828_s21, 4  ;;  %s76_s2 = sshll.u32 %s7829_s23, 4  ;;  %s54_s22 = int_to_ptr.vmem [resolvable:$true] %s53_s22  ;;  %s77_s2 = int_to_ptr.vmem [resolvable:$true] %s76_s2 }
  0x59   :  { %s7697_s25 = scalar_lea.hbm %s9488_s3, 98304 }
  0x5a   :  { %p7698_p12 = scmp.ne.s32.totalorder %s9488_s3, %s7697_s25  ;;  %p7701_p13 = scmp.lt.u32.totalorder %s7697_s25, %s9488_s3 }
  0x5c   :  { %p7703_p0 = pnand %p7701_p13, %p7698_p12 }
  0x5e   :  { %7706 = shalt.err (!%p7703_p0)
}
  0x5f   :  { %s7707_s1 = scalar_lea.vmem %s54_s22, 98304  ;;  %p7712_p2 = scmp.lt.s32.totalorder %s54_s22, %s54_s22 }
  0x60   :  { %p7708_p1 = scmp.ne.s32.totalorder %s54_s22, %s7707_s1  ;;  %p7713_p3 = scmp.lt.s32.totalorder %s7707_s1, %s7707_s1 }
  0x62   :  { %p7714_p4 = por %p7713_p3, %p7712_p2 }
  0x64   :  { %p7715_p5 = pnand %p7714_p4, %p7708_p1 }
  0x66   :  { %7718 = shalt.err (!%p7715_p5)
}
  0x67   :  { %59 = dma.hbm_to_vmem [thread:$0]  %s9488_s3, 98304, %s54_s22, [#allocation5], %s7826_s8, %s7826_s8, %s7827_s16  }
  0x68   :  { %s7719_s12 = scalar_lea.hbm %s9490_s5, 64 }
  0x69   :  { %p7720_p6 = scmp.ne.s32.totalorder %s9490_s5, %s7719_s12  ;;  %p7723_p7 = scmp.lt.u32.totalorder %s7719_s12, %s9490_s5 }
  0x6b   :  { %p7725_p8 = pnand %p7723_p7, %p7720_p6 }
  0x6d   :  { %7728 = shalt.err (!%p7725_p8)
}
  0x6e   :  { %s7729_s19 = scalar_lea.vmem %s77_s2, 64  ;;  %p7734_p10 = scmp.lt.s32.totalorder %s77_s2, %s77_s2 }
  0x6f   :  { %p7730_p9 = scmp.ne.s32.totalorder %s77_s2, %s7729_s19  ;;  %p7735_p11 = scmp.lt.s32.totalorder %s7729_s19, %s7729_s19 }
  0x71   :  { %p7736_p12 = por %p7735_p11, %p7734_p10 }
  0x73   :  { %p7737_p13 = pnand %p7736_p12, %p7730_p9 }
  0x75   :  { %7740 = shalt.err (!%p7737_p13)
}
  0x76   :  { %79 = dma.hbm_to_vmem [thread:$0]  %s9490_s5, 64, %s77_s2, [#allocation8]  }
  0x77   :  { %s7830_s22 = smov [#allocation12]   ;;  %s7831_s18 = smov [#allocation15]  }
  0x78   :  { %s95_s23 = sshll.u32 %s7830_s22, 4  ;;  %s118_s24 = sshll.u32 %s7831_s18, 4  ;;  %s96_s23 = int_to_ptr.vmem [resolvable:$true] %s95_s23  ;;  %s119_s24 = int_to_ptr.vmem [resolvable:$true] %s118_s24 }
  0x79   :  { %s7741_s15 = scalar_lea.hbm %s9492_s7, 32768 }
  0x7a   :  { %p7742_p0 = scmp.ne.s32.totalorder %s9492_s7, %s7741_s15  ;;  %p7745_p1 = scmp.lt.u32.totalorder %s7741_s15, %s9492_s7 }
  0x7c   :  { %p7747_p2 = pnand %p7745_p1, %p7742_p0 }
  0x7e   :  { %7750 = shalt.err (!%p7747_p2)
}
  0x7f   :  { %s7751_s5 = scalar_lea.vmem %s96_s23, 32768  ;;  %p7756_p4 = scmp.lt.s32.totalorder %s96_s23, %s96_s23 }
  0x80   :  { %p7752_p3 = scmp.ne.s32.totalorder %s96_s23, %s7751_s5  ;;  %p7757_p5 = scmp.lt.s32.totalorder %s7751_s5, %s7751_s5 }
  0x82   :  { %p7758_p6 = por %p7757_p5, %p7756_p4 }
  0x84   :  { %p7759_p7 = pnand %p7758_p6, %p7752_p3 }
  0x86   :  { %7762 = shalt.err (!%p7759_p7)
}
  0x87   :  { %101 = dma.hbm_to_vmem [thread:$0]  %s9492_s7, 32768, %s96_s23, [#allocation11], %s7826_s8, %s7826_s8, %s7827_s16  }
  0x88   :  { %s7763_s12 = scalar_lea.hbm %s9494_s9, 64 }
  0x89   :  { %p7764_p8 = scmp.ne.s32.totalorder %s9494_s9, %s7763_s12  ;;  %p7767_p9 = scmp.lt.u32.totalorder %s7763_s12, %s9494_s9 }
  0x8b   :  { %p7769_p10 = pnand %p7767_p9, %p7764_p8 }
  0x8d   :  { %7772 = shalt.err (!%p7769_p10)
}
  0x8e   :  { %s7773_s19 = scalar_lea.vmem %s119_s24, 64  ;;  %p7778_p12 = scmp.lt.s32.totalorder %s119_s24, %s119_s24 }
  0x8f   :  { %p7774_p11 = scmp.ne.s32.totalorder %s119_s24, %s7773_s19  ;;  %p7779_p13 = scmp.lt.s32.totalorder %s7773_s19, %s7773_s19 }
  0x91   :  { %p7780_p0 = por %p7779_p13, %p7778_p12 }
  0x93   :  { %p7781_p1 = pnand %p7780_p0, %p7774_p11 }
  0x95   :  { %7784 = shalt.err (!%p7781_p1)
}
  0x96   :  { %121 = dma.hbm_to_vmem [thread:$0]  %s9494_s9, 64, %s119_s24, [#allocation14]  }
  0x97   :  { %s7832_s16 = smov [#allocation16]   ;;  %s7785_s23 = scalar_lea.hbm %s9495_s10, 64 }
  0x98   :  { %s128_s3 = sshll.u32 %s7832_s16, 4  ;;  %p7786_p2 = scmp.ne.s32.totalorder %s9495_s10, %s7785_s23  ;;  %s129_s3 = int_to_ptr.vmem [resolvable:$true] %s128_s3 }
  0x99   :  { %p7789_p3 = scmp.lt.u32.totalorder %s7785_s23, %s9495_s10 }
  0x9b   :  { %p7791_p4 = pnand %p7789_p3, %p7786_p2 }
  0x9d   :  { %7794 = shalt.err (!%p7791_p4)
}
  0x9e   :  { %s7795_s26 = scalar_lea.vmem %s129_s3, 64  ;;  %p7800_p6 = scmp.lt.s32.totalorder %s129_s3, %s129_s3 }
  0x9f   :  { %p7796_p5 = scmp.ne.s32.totalorder %s129_s3, %s7795_s26  ;;  %p7801_p7 = scmp.lt.s32.totalorder %s7795_s26, %s7795_s26 }
  0xa1   :  { %p7802_p8 = por %p7801_p7, %p7800_p6 }
  0xa3   :  { %p7803_p9 = pnand %p7802_p8, %p7796_p5 }
  0xa5   :  { %7806 = shalt.err (!%p7803_p9)
}
  0xa6   :  { %131 = dma.hbm_to_vmem [thread:$0]  %s9495_s10, 64, %s129_s3, [#allocation17]  }
  0xa7   :  { %7807 = dma.done.wait [#allocation3], 32768  }
  0xa8   :  { %7808 = vsyncadd [#allocation3], 4294934528 }
  0xa9   :  { %7809 = dma.done.wait [#allocation5], 99840  }
  0xaa   :  { %7810 = vsyncadd [#allocation5], 4294867456 }
  0xab   :  { %7811 = dma.done.wait [#allocation8], 128  }
  0xac   :  { %7812 = vsyncadd [#allocation8], 4294967168 }
  0xad   :  { %7813 = dma.done.wait [#allocation11], 32832  }
  0xae   :  { %7814 = vsyncadd [#allocation11], 4294934464 }
  0xaf   :  { %7815 = dma.done.wait [#allocation14], 128  }
  0xb0   :  { %7816 = vsyncadd [#allocation14], 4294967168 }
  0xb1   :  { %7817 = dma.done.wait [#allocation17], 64  }
  0xb2   :  { %7818 = vsyncadd [#allocation17], 4294967232  ;;  %v233_v0 = vld [vmem:[#allocation2 + $0x8] sm:$0xff]  ;;  %v235_v2 = vld [vmem:[#allocation2 + $0x18] sm:$0xff]  ;;  %vm1275_vm0 = vcmask 261120  }
  0xb3   :  { %v237_v1 = vld [vmem:[#allocation2 + $0x28] sm:$0xff]  ;;  %v239_v4 = vld [vmem:[#allocation2 + $0x38] sm:$0xff]  ;;  %v232_v5 = vld [vmem:[#allocation2] sm:$0xff] }
  0xb4   :  { %v8024_v3 = vpack.c.bf16 %v237_v1, %v233_v0  ;;  %v236_v6 = vld [vmem:[#allocation2 + $0x20] sm:$0xff]  ;;  %v8026_v7 = vpack.c.bf16 %v239_v4, %v235_v2  ;;  %v234_v9 = vld [vmem:[#allocation2 + $0x10] sm:$0xff]  ;;  %v241_v11 = vld [vmem:[#allocation2 + $0x48] sm:$0xff] }
  0xb5   :  { %v8028_v8 = vpack.c.bf16 %v236_v6, %v232_v5  ;;  %v238_v10 = vld [vmem:[#allocation2 + $0x30] sm:$0xff]  ;;  %v245_v13 = vld [vmem:[#allocation2 + $0x68] sm:$0xff]  ;;  %v243_v14 = vld [vmem:[#allocation2 + $0x58] sm:$0xff] }
  0xb6   :  { %5300 = vmatprep.subr.bf16.mxu0 %v8024_v3  ;;  %v8031_v12 = vpack.c.bf16 %v238_v10, %v234_v9  ;;  %v247_v15 = vld [vmem:[#allocation2 + $0x78] sm:$0xff]  ;;  %5428 = vmatprep.subr.bf16.mxu1 %v8026_v7  ;;  %v8035_v16 = vpack.c.bf16 %v245_v13, %v241_v11  ;;  %v240_v18 = vld [vmem:[#allocation2 + $0x40] sm:$0xff]  ;;  %v242_v20 = vld [vmem:[#allocation2 + $0x50] sm:$0xff] }
  0xb7   :  { %5302 = vmatpush1.bf16.msra.mxu0 %v8028_v8  ;;  %v8037_v17 = vpack.c.bf16 %v247_v15, %v243_v14  ;;  %v244_v19 = vld [vmem:[#allocation2 + $0x60] sm:$0xff]  ;;  %v246_v22 = vld [vmem:[#allocation2 + $0x70] sm:$0xff]  ;;  %v249_v23 = vld [vmem:[#allocation2 + $0x88] sm:$0xff] }
  0xb8   :  { %5430 = vmatpush1.bf16.msra.mxu1 %v8031_v12  ;;  %v8040_v21 = vpack.c.bf16 %v244_v19, %v240_v18  ;;  %v253_v24 = vld [vmem:[#allocation2 + $0xa8] sm:$0xff]  ;;  %5304 = vmatprep.subr.bf16.mxu0 %v8035_v16  ;;  %v8044_v25 = vpack.c.bf16 %v246_v22, %v242_v20  ;;  %v251_v27 = vld [vmem:[#allocation2 + $0x98] sm:$0xff]  ;;  %v248_v29 = vld [vmem:[#allocation2 + $0x80] sm:$0xff] }
  0xb9   :  { %5432 = vmatprep.subr.bf16.mxu1 %v8037_v17  ;;  %v8046_v26 = vpack.c.bf16 %v253_v24, %v249_v23  ;;  %v255_v28 = vld [vmem:[#allocation2 + $0xb8] sm:$0xff]  ;;  %v252_v31 = vld [vmem:[#allocation2 + $0xa0] sm:$0xff]  ;;  %v250_v32 = vld [vmem:[#allocation2 + $0x90] sm:$0xff] }
  0xba   :  { %v8048_v30 = vpack.c.bf16 %v255_v28, %v251_v27  ;;  %v254_v33 = vld [vmem:[#allocation2 + $0xb0] sm:$0xff]  ;;  %v8051_v34 = vpack.c.bf16 %v252_v31, %v248_v29  ;;  %v257_v35 = vld [vmem:[#allocation2 + $0xc8] sm:$0xff]  ;;  %v259_v37 = vld [vmem:[#allocation2 + $0xd8] sm:$0xff] }
  0xbb   :  { %5306 = vmatpush1.bf16.msra.mxu0 %v8040_v21  ;;  %v261_v36 = vld [vmem:[#allocation2 + $0xe8] sm:$0xff]  ;;  %v8055_v38 = vpack.c.bf16 %v254_v33, %v250_v32  ;;  %v263_v40 = vld [vmem:[#allocation2 + $0xf8] sm:$0xff]  ;;  %v256_v41 = vld [vmem:[#allocation2 + $0xc0] sm:$0xff] }
  0xbc   :  { %5434 = vmatpush1.bf16.msra.mxu1 %v8044_v25  ;;  %5308 = vmatprep.subr.bf16.mxu0 %v8046_v26  ;;  %v8057_v39 = vpack.c.bf16 %v261_v36, %v257_v35  ;;  %v260_v42 = vld [vmem:[#allocation2 + $0xe0] sm:$0xff]  ;;  %v8060_v43 = vpack.c.bf16 %v263_v40, %v259_v37  ;;  %v258_v44 = vld [vmem:[#allocation2 + $0xd0] sm:$0xff]  ;;  %v265_v46 = vld [vmem:[#allocation2 + $0x108] sm:$0xff] }
  0xbd   :  { %5436 = vmatprep.subr.bf16.mxu1 %v8048_v30  ;;  %v262_v45 = vld [vmem:[#allocation2 + $0xf0] sm:$0xff]  ;;  %v269_v47 = vld [vmem:[#allocation2 + $0x128] sm:$0xff]  ;;  %v267_v48 = vld [vmem:[#allocation2 + $0x118] sm:$0xff]  ;;  %v8063_v50 = vpack.c.bf16 %v260_v42, %v256_v41 }
  0xbe   :  { %v271_v49 = vld [vmem:[#allocation2 + $0x138] sm:$0xff]  ;;  %v8067_v51 = vpack.c.bf16 %v262_v45, %v258_v44  ;;  %v8069_v52 = vpack.c.bf16 %v269_v47, %v265_v46  ;;  %v264_v53 = vld [vmem:[#allocation2 + $0x100] sm:$0xff]  ;;  %v266_v55 = vld [vmem:[#allocation2 + $0x110] sm:$0xff] }
  0xbf   :  { %5310 = vmatpush1.bf16.msra.mxu0 %v8051_v34  ;;  %v268_v54 = vld [vmem:[#allocation2 + $0x120] sm:$0xff]  ;;  %v8072_v56 = vpack.c.bf16 %v271_v49, %v267_v48  ;;  %v270_v57 = vld [vmem:[#allocation2 + $0x130] sm:$0xff]  ;;  %v273_v58 = vld [vmem:[#allocation2 + $0x148] sm:$0xff] }
  0xc0   :  { %5438 = vmatpush1.bf16.msra.mxu1 %v8055_v38  ;;  %5312 = vmatprep.subr.bf16.mxu0 %v8057_v39  ;;  %v277_v59 = vld [vmem:[#allocation2 + $0x168] sm:$0xff]  ;;  %v275_v60 = vld [vmem:[#allocation2 + $0x158] sm:$0xff]  ;;  %v8075_v62 = vpack.c.bf16 %v268_v54, %v264_v53  ;;  %v8079_v63 = vpack.c.bf16 %v270_v57, %v266_v55  ;;  %v272_v1 = vld [vmem:[#allocation2 + $0x140] sm:$0xff] }
  0xc1   :  { %5440 = vmatprep.subr.bf16.mxu1 %v8060_v43  ;;  %v279_v61 = vld [vmem:[#allocation2 + $0x178] sm:$0xff]  ;;  %v8081_v0 = vpack.c.bf16 %v277_v59, %v273_v58  ;;  %v276_v2 = vld [vmem:[#allocation2 + $0x160] sm:$0xff]  ;;  %v274_v4 = vld [vmem:[#allocation2 + $0x150] sm:$0xff] }
  0xc2   :  { %v8084_v5 = vpack.c.bf16 %v279_v61, %v275_v60  ;;  %v278_v6 = vld [vmem:[#allocation2 + $0x170] sm:$0xff]  ;;  %v281_v9 = vld [vmem:[#allocation2 + $0x188] sm:$0xff]  ;;  %v283_v11 = vld [vmem:[#allocation2 + $0x198] sm:$0xff]  ;;  %v8087_v14 = vpack.c.bf16 %v276_v2, %v272_v1 }
  0xc3   :  { %5314 = vmatpush1.bf16.msra.mxu0 %v8063_v50  ;;  %v285_v10 = vld [vmem:[#allocation2 + $0x1a8] sm:$0xff]  ;;  %v287_v13 = vld [vmem:[#allocation2 + $0x1b8] sm:$0xff]  ;;  %v8091_v15 = vpack.c.bf16 %v278_v6, %v274_v4  ;;  %v280_v19 = vld [vmem:[#allocation2 + $0x180] sm:$0xff] }
  0xc4   :  { %5442 = vmatpush1.bf16.msra.mxu1 %v8067_v51  ;;  %5316 = vmatprep.subr.bf16.mxu0 %v8069_v52  ;;  %9759 = vst [vmem:[#allocation24_spill] sm:$0xff] %v8084_v5  ;;  %9760 = vst [vmem:[#allocation25_spill] sm:$0xff] %v8087_v14  ;;  %v8093_v18 = vpack.c.bf16 %v285_v10, %v281_v9  ;;  %v284_v20 = vld [vmem:[#allocation2 + $0x1a0] sm:$0xff]  ;;  %v282_v22 = vld [vmem:[#allocation2 + $0x190] sm:$0xff]  ;;  %v8096_v23 = vpack.c.bf16 %v287_v13, %v283_v11 }
  0xc5   :  { %5444 = vmatprep.subr.bf16.mxu1 %v8072_v56  ;;  %9761 = vst [vmem:[#allocation26_spill] sm:$0xff] %v8091_v15  ;;  %v286_v24 = vld [vmem:[#allocation2 + $0x1b0] sm:$0xff]  ;;  %v289_v27 = vld [vmem:[#allocation2 + $0x1c8] sm:$0xff]  ;;  %v291_v29 = vld [vmem:[#allocation2 + $0x1d8] sm:$0xff]  ;;  %v8099_v32 = vpack.c.bf16 %v284_v20, %v280_v19 }
  0xc6   :  { %9762 = vst [vmem:[#allocation27_spill] sm:$0xff] %v8093_v18  ;;  %9763 = vst [vmem:[#allocation28_spill] sm:$0xff] %v8096_v23  ;;  %v293_v28 = vld [vmem:[#allocation2 + $0x1e8] sm:$0xff]  ;;  %v295_v31 = vld [vmem:[#allocation2 + $0x1f8] sm:$0xff]  ;;  %v8103_v33 = vpack.c.bf16 %v286_v24, %v282_v22 }
  0xc7   :  { %5318 = vmatpush1.bf16.msra.mxu0 %v8075_v62  ;;  %9764 = vst [vmem:[#allocation29_spill] sm:$0xff] %v8099_v32  ;;  %v8105_v35 = vpack.c.bf16 %v293_v28, %v289_v27  ;;  %v288_v36 = vld [vmem:[#allocation2 + $0x1c0] sm:$0xff]  ;;  %v290_v40 = vld [vmem:[#allocation2 + $0x1d0] sm:$0xff]  ;;  %v8108_v41 = vpack.c.bf16 %v295_v31, %v291_v29  ;;  %v297_v44 = vld [vmem:[#allocation2 + $0x208] sm:$0xff] }
  0xc8   :  { %5446 = vmatpush1.bf16.msra.mxu1 %v8079_v63  ;;  %5320 = vmatprep.subr.bf16.mxu0 %v8081_v0  ;;  %9765 = vst [vmem:[#allocation30_spill] sm:$0xff] %v8103_v33  ;;  %v292_v37 = vld [vmem:[#allocation2 + $0x1e0] sm:$0xff]  ;;  %v294_v42 = vld [vmem:[#allocation2 + $0x1f0] sm:$0xff]  ;;  %v301_v45 = vld [vmem:[#allocation2 + $0x228] sm:$0xff] }
  0xc9   :  { %5448 = vmatprep.subr.bf16.mxu1 %v8084_v5  ;;  %9766 = vst [vmem:[#allocation31_spill] sm:$0xff] %v8105_v35  ;;  %9767 = vst [vmem:[#allocation32_spill] sm:$0xff] %v8108_v41  ;;  %v299_v46 = vld [vmem:[#allocation2 + $0x218] sm:$0xff]  ;;  %v8111_v48 = vpack.c.bf16 %v292_v37, %v288_v36  ;;  %v8115_v49 = vpack.c.bf16 %v294_v42, %v290_v40  ;;  %v8117_v53 = vpack.c.bf16 %v301_v45, %v297_v44  ;;  %v296_v54 = vld [vmem:[#allocation2 + $0x200] sm:$0xff] }
  0xca   :  { %v303_v47 = vld [vmem:[#allocation2 + $0x238] sm:$0xff]  ;;  %v300_v55 = vld [vmem:[#allocation2 + $0x220] sm:$0xff]  ;;  %v298_v57 = vld [vmem:[#allocation2 + $0x210] sm:$0xff] }
  0xcb   :  { %5322 = vmatpush1.bf16.msra.mxu0 %v8087_v14  ;;  %9768 = vst [vmem:[#allocation33_spill] sm:$0xff] %v8111_v48  ;;  %9769 = vst [vmem:[#allocation34_spill] sm:$0xff] %v8115_v49  ;;  %v8120_v58 = vpack.c.bf16 %v303_v47, %v299_v46  ;;  %v302_v59 = vld [vmem:[#allocation2 + $0x230] sm:$0xff]  ;;  %v305_v60 = vld [vmem:[#allocation2 + $0x248] sm:$0xff]  ;;  %v8123_v4 = vpack.c.bf16 %v300_v55, %v296_v54 }
  0xcc   :  { %5450 = vmatpush1.bf16.msra.mxu1 %v8091_v15  ;;  %5324 = vmatprep.subr.bf16.mxu0 %v8093_v18  ;;  %9770 = vst [vmem:[#allocation35_spill] sm:$0xff] %v8117_v53  ;;  %v309_v61 = vld [vmem:[#allocation2 + $0x268] sm:$0xff]  ;;  %v307_v1 = vld [vmem:[#allocation2 + $0x258] sm:$0xff]  ;;  %v8127_v6 = vpack.c.bf16 %v302_v59, %v298_v57  ;;  %v304_v10 = vld [vmem:[#allocation2 + $0x240] sm:$0xff] }
  0xcd   :  { %5452 = vmatprep.subr.bf16.mxu1 %v8096_v23  ;;  %9771 = vst [vmem:[#allocation36_spill] sm:$0xff] %v8120_v58  ;;  %v311_v2 = vld [vmem:[#allocation2 + $0x278] sm:$0xff]  ;;  %9772 = vst [vmem:[#allocation37_spill] sm:$0xff] %v8123_v4  ;;  %v8129_v9 = vpack.c.bf16 %v309_v61, %v305_v60  ;;  %v308_v11 = vld [vmem:[#allocation2 + $0x260] sm:$0xff] }
  0xce   :  { %9773 = vst [vmem:[#allocation38_spill] sm:$0xff] %v8127_v6  ;;  %v306_v13 = vld [vmem:[#allocation2 + $0x250] sm:$0xff]  ;;  %v8132_v19 = vpack.c.bf16 %v311_v2, %v307_v1  ;;  %v313_v22 = vld [vmem:[#allocation2 + $0x288] sm:$0xff]  ;;  %v315_v27 = vld [vmem:[#allocation2 + $0x298] sm:$0xff]  ;;  %v8135_v29 = vpack.c.bf16 %v308_v11, %v304_v10 }
  0xcf   :  { %5326 = vmatpush1.bf16.msra.mxu0 %v8099_v32  ;;  %9774 = vst [vmem:[#allocation39_spill] sm:$0xff] %v8129_v9  ;;  %v310_v20 = vld [vmem:[#allocation2 + $0x270] sm:$0xff]  ;;  %v317_v24 = vld [vmem:[#allocation2 + $0x2a8] sm:$0xff]  ;;  %v319_v28 = vld [vmem:[#allocation2 + $0x2b8] sm:$0xff] }
  0xd0   :  { %5454 = vmatpush1.bf16.msra.mxu1 %v8103_v33  ;;  %5328 = vmatprep.subr.bf16.mxu0 %v8105_v35  ;;  %9775 = vst [vmem:[#allocation40_spill] sm:$0xff] %v8132_v19  ;;  %9776 = vst [vmem:[#allocation41_spill] sm:$0xff] %v8135_v29  ;;  %v8139_v31 = vpack.c.bf16 %v310_v20, %v306_v13  ;;  %v8141_v36 = vpack.c.bf16 %v317_v24, %v313_v22  ;;  %v312_v37 = vld [vmem:[#allocation2 + $0x280] sm:$0xff]  ;;  %v314_v42 = vld [vmem:[#allocation2 + $0x290] sm:$0xff] }
  0xd1   :  { %5456 = vmatprep.subr.bf16.mxu1 %v8108_v41  ;;  %v316_v40 = vld [vmem:[#allocation2 + $0x2a0] sm:$0xff]  ;;  %v8144_v44 = vpack.c.bf16 %v319_v28, %v315_v27  ;;  %v318_v45 = vld [vmem:[#allocation2 + $0x2b0] sm:$0xff]  ;;  %v321_v46 = vld [vmem:[#allocation2 + $0x2c8] sm:$0xff] }
  0xd2   :  { %9777 = vst [vmem:[#allocation42_spill] sm:$0xff] %v8139_v31  ;;  %9778 = vst [vmem:[#allocation43_spill] sm:$0xff] %v8141_v36  ;;  %v325_v47 = vld [vmem:[#allocation2 + $0x2e8] sm:$0xff]  ;;  %v323_v54 = vld [vmem:[#allocation2 + $0x2d8] sm:$0xff]  ;;  %v8147_v57 = vpack.c.bf16 %v316_v40, %v312_v37  ;;  %v8151_v1 = vpack.c.bf16 %v318_v45, %v314_v42 }
  0xd3   :  { %5330 = vmatpush1.bf16.msra.mxu0 %v8111_v48  ;;  %9779 = vst [vmem:[#allocation44_spill] sm:$0xff] %v8144_v44  ;;  %v327_v55 = vld [vmem:[#allocation2 + $0x2f8] sm:$0xff]  ;;  %v320_v59 = vld [vmem:[#allocation2 + $0x2c0] sm:$0xff]  ;;  %v322_v61 = vld [vmem:[#allocation2 + $0x2d0] sm:$0xff]  ;;  %v8153_v2 = vpack.c.bf16 %v325_v47, %v321_v46 }
  0xd4   :  { %5458 = vmatpush1.bf16.msra.mxu1 %v8115_v49  ;;  %5332 = vmatprep.subr.bf16.mxu0 %v8117_v53  ;;  %9780 = vst [vmem:[#allocation45_spill] sm:$0xff] %v8147_v57  ;;  %v324_v60 = vld [vmem:[#allocation2 + $0x2e0] sm:$0xff]  ;;  %9781 = vst [vmem:[#allocation46_spill] sm:$0xff] %v8151_v1  ;;  %v326_v10 = vld [vmem:[#allocation2 + $0x2f0] sm:$0xff]  ;;  %v8156_v20 = vpack.c.bf16 %v327_v55, %v323_v54 }
  0xd5   :  { %5460 = vmatprep.subr.bf16.mxu1 %v8120_v58  ;;  %9782 = vst [vmem:[#allocation47_spill] sm:$0xff] %v8153_v2  ;;  %v329_v11 = vld [vmem:[#allocation2 + $0x308] sm:$0xff]  ;;  %v331_v22 = vld [vmem:[#allocation2 + $0x318] sm:$0xff]  ;;  %v328_v28 = vld [vmem:[#allocation2 + $0x300] sm:$0xff]  ;;  %v8173_v46 = vpack.c.bf16 %v324_v60, %v320_v59 }
  0xd6   :  { %v333_v13 = vld [vmem:[#allocation2 + $0x328] sm:$0xff]  ;;  %9783 = vst [vmem:[#allocation48_spill] sm:$0xff] %v8156_v20  ;;  %v335_v24 = vld [vmem:[#allocation2 + $0x338] sm:$0xff]  ;;  %v332_v47 = vld [vmem:[#allocation2 + $0x320] sm:$0xff] }
  0xd7   :  { %5334 = vmatpush1.bf16.msra.mxu0 %v8123_v4  ;;  %v163_v27 = vld [vmem:[%s9485_s0 + $0x8] sm:$0xff]  ;;  %9785 = vst [vmem:[#allocation50_spill] sm:$0xff] %v8173_v46  ;;  %v330_v54 = vld [vmem:[#allocation2 + $0x310] sm:$0xff]  ;;  %v162_v59 = vld [vmem:[%s9485_s0] sm:$0xff] }
  0xd8   :  { %5462 = vmatpush1.bf16.msra.mxu1 %v8127_v6  ;;  %5336 = vmatprep.subr.bf16.mxu0 %v8129_v9  ;;  %v167_v37 = vld [vmem:[%s9485_s0 + $0x28] sm:$0xff]  ;;  %v8170_v45 = vmax.f32 %v163_v27, 0.0  ;;  %v334_v55 = vld [vmem:[#allocation2 + $0x330] sm:$0xff]  ;;  %v8185_v27 = vpack.c.bf16 %v335_v24, %v331_v22  ;;  %v166_v60 = vld [vmem:[%s9485_s0 + $0x20] sm:$0xff] }
  0xd9   :  { %5464 = vmatprep.subr.bf16.mxu1 %v8132_v19  ;;  %v171_v40 = vld [vmem:[%s9485_s0 + $0x48] sm:$0xff]  ;;  %v8206_v22 = vmax.f32 %v166_v60, 0.0  ;;  %v339_v24 = vld [vmem:[#allocation2 + $0x358] sm:$0xff]  ;;  %v340_v6 = vld [vmem:[#allocation2 + $0x360] sm:$0xff] }
  0xda   :  { %v175_v42 = vld [vmem:[%s9485_s0 + $0x68] sm:$0xff]  ;;  %9784 = vst [vmem:[#allocation49_spill] sm:$0xff] %v8170_v45  ;;  %9790 = vst [vmem:[#allocation55_spill] sm:$0xff] %v8185_v27  ;;  %v347_v58 = vld [vmem:[#allocation2 + $0x398] sm:$0xff] }
  0xdb   :  { %5338 = vmatpush1.bf16.msra.mxu0 %v8135_v29  ;;  %v8183_v29 = vpack.c.bf16 %v333_v13, %v329_v11  ;;  %v174_v11 = vld [vmem:[%s9485_s0 + $0x60] sm:$0xff]  ;;  %v8204_v13 = vmax.f32 %v162_v59, 0.0  ;;  %v8220_v59 = vpack.c.bf16 %v334_v55, %v330_v54 }
  0xdc   :  { %5466 = vmatpush1.bf16.msra.mxu1 %v8139_v31  ;;  %5340 = vmatprep.subr.bf16.mxu0 %v8141_v36  ;;  %v8177_v36 = vmax.f32 %v171_v40, 0.0  ;;  %v8181_v31 = vpack.c.bf16 %v326_v10, %v322_v61  ;;  %v8194_v40 = vmax.f32 %v175_v42, 0.0  ;;  %v170_v10 = vld [vmem:[%s9485_s0 + $0x40] sm:$0xff]  ;;  %v8211_v42 = vpack.c.bf16 %v332_v47, %v328_v28  ;;  %v342_v47 = vld [vmem:[#allocation2 + $0x370] sm:$0xff] }
  0xdd   :  { %5468 = vmatprep.subr.bf16.mxu1 %v8144_v44  ;;  %v8175_v44 = vmax.f32 %v167_v37, 0.0  ;;  %9789 = vst [vmem:[#allocation54_spill] sm:$0xff] %v8183_v29  ;;  %v341_v37 = vld [vmem:[#allocation2 + $0x368] sm:$0xff]  ;;  %v8214_v19 = vmax.f32 %v174_v11, 0.0  ;;  %v196_v9 = vadd.f32 %v8206_v22, %v8204_v13  ;;  %9795 = vst [vmem:[#allocation60_spill] sm:$0xff] %v8220_v59 }
  0xde   :  { %9787 = vst [vmem:[#allocation52_spill] sm:$0xff] %v8177_v36  ;;  %9788 = vst [vmem:[#allocation53_spill] sm:$0xff] %v8181_v31  ;;  %v349_v11 = vld [vmem:[#allocation2 + $0x3a8] sm:$0xff] }
  0xdf   :  { %5342 = vmatpush1.bf16.msra.mxu0 %v8147_v57  ;;  %9786 = vst [vmem:[#allocation51_spill] sm:$0xff] %v8175_v44  ;;  %v337_v57 = vld [vmem:[#allocation2 + $0x348] sm:$0xff]  ;;  %9791 = vst [vmem:[#allocation56_spill] sm:$0xff] %v8194_v40  ;;  %v205_v61 = vadd.f32 %v8175_v44, %v8170_v45 }
  0xe0   :  { %5470 = vmatpush1.bf16.msra.mxu1 %v8151_v1  ;;  %5344 = vmatprep.subr.bf16.mxu0 %v8153_v2  ;;  %v8208_v2 = vmax.f32 %v170_v10, 0.0  ;;  %9793 = vst [vmem:[#allocation58_spill] sm:$0xff] %v8211_v42  ;;  %9794 = vst [vmem:[#allocation59_spill] sm:$0xff] %v8214_v19  ;;  %v8222_v60 = vpack.c.bf16 %v341_v37, %v337_v57  ;;  %v336_v10 = vld [vmem:[#allocation2 + $0x340] sm:$0xff] }
  0xe1   :  { %5472 = vmatprep.subr.bf16.mxu1 %v8156_v20  ;;  %v343_v20 = vld [vmem:[#allocation2 + $0x378] sm:$0xff]  ;;  %v206_v1 = vadd.f32 %v205_v61, %v8177_v36  ;;  %v345_v61 = vld [vmem:[#allocation2 + $0x388] sm:$0xff]  ;;  %v8230_v57 = vpack.c.bf16 %v340_v6, %v336_v10  ;;  %v350_v6 = vld [vmem:[#allocation2 + $0x3b0] sm:$0xff] }
  0xe2   :  { %9792 = vst [vmem:[#allocation57_spill] sm:$0xff] %v8208_v2  ;;  %9796 = vst [vmem:[#allocation61_spill] sm:$0xff] %v8222_v60  ;;  %v8225_v28 = vpack.c.bf16 %v343_v20, %v339_v24  ;;  %v8237_v37 = vpack.c.bf16 %v349_v11, %v345_v61  ;;  %v348_v24 = vld [vmem:[#allocation2 + $0x3a0] sm:$0xff]  ;;  %v353_v10 = vld [vmem:[#allocation2 + $0x3c8] sm:$0xff] }
  0xe3   :  { %5346 = vmatpush1.bf16.msra.mxu0 %v8173_v46  ;;  %v338_v46 = vld [vmem:[#allocation2 + $0x350] sm:$0xff]  ;;  %v207_v4 = vadd.f32 %v206_v1, %v8194_v40  ;;  %9798 = vst [vmem:[#allocation63_spill] sm:$0xff] %v8230_v57  ;;  %v344_v1 = vld [vmem:[#allocation2 + $0x380] sm:$0xff] }
  0xe4   :  { %5474 = vmatpush1.bf16.msra.mxu1 %v8181_v31  ;;  %5348 = vmatprep.subr.bf16.mxu0 %v8183_v29  ;;  %9797 = vst [vmem:[#allocation62_spill] sm:$0xff] %v8225_v28  ;;  %v197_v31 = vadd.f32 %v196_v9, %v8208_v2  ;;  %v351_v29 = vld [vmem:[#allocation2 + $0x3b8] sm:$0xff]  ;;  %v8235_v20 = vpack.c.bf16 %v342_v47, %v338_v46  ;;  %9800 = vst [vmem:[#allocation65_spill] sm:$0xff] %v8237_v37  ;;  %v346_v9 = vld [vmem:[#allocation2 + $0x390] sm:$0xff] }
  0xe5   :  { %5476 = vmatprep.subr.bf16.mxu1 %v8185_v27  ;;  %v208_v54 = vrot.slane %v207_v4, 4  ;;  %v8240_v27 = vpack.c.bf16 %v351_v29, %v347_v58  ;;  %v8243_v46 = vpack.c.bf16 %v348_v24, %v344_v1  ;;  %v8247_v11 = vpack.c.bf16 %v350_v6, %v346_v9  ;;  %v352_v29 = vld [vmem:[#allocation2 + $0x3c0] sm:$0xff]  ;;  %v361_v24 = vld [vmem:[#allocation2 + $0x408] sm:$0xff] }
  0xe6   :  { %v198_v55 = vadd.f32 %v197_v31, %v8214_v19  ;;  %9799 = vst [vmem:[#allocation64_spill] sm:$0xff] %v8235_v20  ;;  %v355_v19 = vld [vmem:[#allocation2 + $0x3d8] sm:$0xff]  ;;  %v437_v2 = vld [vmem:[#allocation2 + $0x668] sm:$0xff] }
  0xe7   :  { %5350 = vmatpush1.bf16.msra.mxu0 %v8211_v42  ;;  %9801 = vst [vmem:[#allocation66_spill] sm:$0xff] %v8240_v27  ;;  %v357_v42 = vld [vmem:[#allocation2 + $0x3e8] sm:$0xff]  ;;  %v209_v53 = vadd.f32 %v208_v54, %v207_v4  ;;  %9802 = vst [vmem:[#allocation67_spill] sm:$0xff] %v8243_v46  ;;  %v354_v4 = vld [vmem:[#allocation2 + $0x3d0] sm:$0xff] }
  0xe8   :  { %5478 = vmatpush1.bf16.msra.mxu1 %v8220_v59  ;;  %5352 = vmatprep.subr.bf16.mxu0 %v8222_v60  ;;  %v199_v31 = vrot.slane %v198_v55, 4  ;;  %v359_v59 = vld [vmem:[#allocation2 + $0x3f8] sm:$0xff]  ;;  %9803 = vst [vmem:[#allocation68_spill] sm:$0xff] %v8247_v11  ;;  %v8249_v58 = vpack.c.bf16 %v357_v42, %v353_v10  ;;  %v365_v60 = vld [vmem:[#allocation2 + $0x428] sm:$0xff] }
  0xe9   :  { %5480 = vmatprep.subr.bf16.mxu1 %v8225_v28  ;;  %v210_v47 = vrot.slane %v209_v53, 2  ;;  %v356_v28 = vld [vmem:[#allocation2 + $0x3e0] sm:$0xff]  ;;  %v8252_v54 = vpack.c.bf16 %v359_v59, %v355_v19  ;;  %v8261_v19 = vpack.c.bf16 %v365_v60, %v361_v24 }
  0xea   :  { %v200_v61 = vadd.f32 %v199_v31, %v198_v55  ;;  %9804 = vst [vmem:[#allocation69_spill] sm:$0xff] %v8249_v58  ;;  %v363_v31 = vld [vmem:[#allocation2 + $0x418] sm:$0xff]  ;;  %v8255_v9 = vpack.c.bf16 %v356_v28, %v352_v29  ;;  %v364_v59 = vld [vmem:[#allocation2 + $0x420] sm:$0xff]  ;;  %v366_v29 = vld [vmem:[#allocation2 + $0x430] sm:$0xff] }
  0xeb   :  { %5354 = vmatpush1.bf16.msra.mxu0 %v8230_v57  ;;  %9805 = vst [vmem:[#allocation70_spill] sm:$0xff] %v8252_v54  ;;  %v358_v57 = vld [vmem:[#allocation2 + $0x3f0] sm:$0xff]  ;;  %v211_v1 = vadd.f32 %v210_v47, %v209_v53  ;;  %9808 = vst [vmem:[#allocation73_spill] sm:$0xff] %v8261_v19  ;;  %v360_v53 = vld [vmem:[#allocation2 + $0x400] sm:$0xff] }
  0xec   :  { %5482 = vmatpush1.bf16.msra.mxu1 %v8235_v20  ;;  %5356 = vmatprep.subr.bf16.mxu0 %v8237_v37  ;;  %v201_v55 = vrot.slane %v200_v61, 2  ;;  %v367_v20 = vld [vmem:[#allocation2 + $0x438] sm:$0xff]  ;;  %9806 = vst [vmem:[#allocation71_spill] sm:$0xff] %v8255_v9  ;;  %v8259_v10 = vpack.c.bf16 %v358_v57, %v354_v4  ;;  %v362_v47 = vld [vmem:[#allocation2 + $0x410] sm:$0xff]  ;;  %v8267_v60 = vpack.c.bf16 %v364_v59, %v360_v53  ;;  %v372_v24 = vld [vmem:[#allocation2 + $0x460] sm:$0xff] }
  0xed   :  { %5484 = vmatprep.subr.bf16.mxu1 %v8240_v27  ;;  %v212_v42 = vrot.slane %v211_v1, 1  ;;  %v8264_v37 = vpack.c.bf16 %v367_v20, %v363_v31  ;;  %v8271_v4 = vpack.c.bf16 %v366_v29, %v362_v47  ;;  %v370_v31 = vld [vmem:[#allocation2 + $0x450] sm:$0xff]  ;;  %v381_v53 = vld [vmem:[#allocation2 + $0x4a8] sm:$0xff]  ;;  %v379_v59 = vld [vmem:[#allocation2 + $0x498] sm:$0xff] }
  0xee   :  { %v202_v6 = vadd.f32 %v201_v55, %v200_v61  ;;  %9807 = vst [vmem:[#allocation72_spill] sm:$0xff] %v8259_v10  ;;  %v373_v61 = vld [vmem:[#allocation2 + $0x468] sm:$0xff]  ;;  %v371_v55 = vld [vmem:[#allocation2 + $0x458] sm:$0xff]  ;;  %9810 = vst [vmem:[#allocation75_spill] sm:$0xff] %v8267_v60 }
  0xef   :  { %5358 = vmatpush1.bf16.msra.mxu0 %v8243_v46  ;;  %v213_v27 = vadd.f32 %v212_v42, %v211_v1  ;;  %9809 = vst [vmem:[#allocation74_spill] sm:$0xff] %v8264_v37  ;;  %v369_v46 = vld [vmem:[#allocation2 + $0x448] sm:$0xff]  ;;  %9811 = vst [vmem:[#allocation76_spill] sm:$0xff] %v8271_v4  ;;  %v368_v1 = vld [vmem:[#allocation2 + $0x440] sm:$0xff] }
  0xf0   :  { %5486 = vmatpush1.bf16.msra.mxu1 %v8247_v11  ;;  %5360 = vmatprep.subr.bf16.mxu0 %v8249_v58  ;;  %v203_v28 = vrot.slane %v202_v6, 1  ;;  %v375_v11 = vld [vmem:[#allocation2 + $0x478] sm:$0xff]  ;;  %v8273_v20 = vpack.c.bf16 %v373_v61, %v369_v46  ;;  %v8279_v47 = vpack.c.bf16 %v372_v24, %v368_v1  ;;  %v380_v29 = vld [vmem:[#allocation2 + $0x4a0] sm:$0xff]  ;;  %v378_v61 = vld [vmem:[#allocation2 + $0x490] sm:$0xff] }
  0xf1   :  { %5488 = vmatprep.subr.bf16.mxu1 %v8252_v54  ;;  %552 = vmatprep.mubr.f32.mxu0 %v213_v27  ;;  %v8276_v42 = vpack.c.bf16 %v375_v11, %v371_v55  ;;  %v376_v11 = vld [vmem:[#allocation2 + $0x480] sm:$0xff]  ;;  %v387_v1 = vld [vmem:[#allocation2 + $0x4d8] sm:$0xff] }
  0xf2   :  { %v204_v57 = vadd.f32 %v203_v28, %v202_v6  ;;  %9812 = vst [vmem:[#allocation77_spill] sm:$0xff] %v8273_v20  ;;  %694 = vmatprep.mubr.f32.mxu1 %v213_v27  ;;  %v377_v6 = vld [vmem:[#allocation2 + $0x488] sm:$0xff]  ;;  %v383_v28 = vld [vmem:[#allocation2 + $0x4b8] sm:$0xff]  ;;  %9814 = vst [vmem:[#allocation79_spill] sm:$0xff] %v8279_v47 }
  0xf3   :  { %5362 = vmatpush1.bf16.msra.mxu0 %v8255_v9  ;;  %9813 = vst [vmem:[#allocation78_spill] sm:$0xff] %v8276_v42  ;;  %v374_v9 = vld [vmem:[#allocation2 + $0x470] sm:$0xff]  ;;  %v8285_v46 = vpack.c.bf16 %v381_v53, %v377_v6  ;;  %v8288_v55 = vpack.c.bf16 %v383_v28, %v379_v59  ;;  %v391_v24 = vld [vmem:[#allocation2 + $0x4f8] sm:$0xff]  ;;  %v384_v6 = vld [vmem:[#allocation2 + $0x4c0] sm:$0xff] }
  0xf4   :  { %5490 = vmatpush1.bf16.msra.mxu1 %v8259_v10  ;;  %5364 = vmatprep.subr.bf16.mxu0 %v8261_v19  ;;  %v8283_v27 = vpack.c.bf16 %v374_v9, %v370_v31  ;;  %v388_v53 = vld [vmem:[#allocation2 + $0x4e0] sm:$0xff]  ;;  %v386_v59 = vld [vmem:[#allocation2 + $0x4d0] sm:$0xff]  ;;  %v8300_v28 = vpack.c.bf16 %v391_v24, %v387_v1 }
  0xf5   :  { %5492 = vmatprep.subr.bf16.mxu1 %v8264_v37  ;;  %9816 = vst [vmem:[#allocation81_spill] sm:$0xff] %v8285_v46  ;;  %9817 = vst [vmem:[#allocation82_spill] sm:$0xff] %v8288_v55  ;;  %v382_v37 = vld [vmem:[#allocation2 + $0x4b0] sm:$0xff]  ;;  %v416_v19 = vld [vmem:[#allocation2 + $0x5c0] sm:$0xff] }
  0xf6   :  { %553 = vmatmul.mubr.f32.vlgmr.msra.gmra.mrb[0].mxu0 %v204_v57  ;;  %9815 = vst [vmem:[#allocation80_spill] sm:$0xff] %v8283_v27  ;;  %v8295_v9 = vpack.c.bf16 %v382_v37, %v378_v61  ;;  %9821 = vst [vmem:[#allocation86_spill] sm:$0xff] %v8300_v28  ;;  %v392_v61 = vld [vmem:[#allocation2 + $0x500] sm:$0xff]  ;;  %v394_v1 = vld [vmem:[#allocation2 + $0x510] sm:$0xff] }
  0xf7   :  { %5366 = vmatpush1.bf16.msra.mxu0 %v8267_v60  ;;  %695 = vmatmul.mubr.f32.vlgmr.msra.gmra.mrb[0].mxu1 %v204_v57  ;;  %v385_v60 = vld [vmem:[#allocation2 + $0x4c8] sm:$0xff]  ;;  %v420_v10 = vld [vmem:[#allocation2 + $0x5e0] sm:$0xff] }
  0xf8   :  { %5494 = vmatpush1.bf16.msra.mxu1 %v8271_v4  ;;  %5368 = vmatprep.subr.bf16.mxu0 %v8273_v20  ;;  %v389_v57 = vld [vmem:[#allocation2 + $0x4e8] sm:$0xff]  ;;  %v8291_v4 = vpack.c.bf16 %v380_v29, %v376_v11  ;;  %9819 = vst [vmem:[#allocation84_spill] sm:$0xff] %v8295_v9  ;;  %v395_v11 = vld [vmem:[#allocation2 + $0x518] sm:$0xff]  ;;  %v8383_v49 = vpack.c.bf16 %v420_v10, %v416_v19  ;;  %v430_v19 = vld [vmem:[#allocation2 + $0x630] sm:$0xff] }
  0xf9   :  { %5496 = vmatprep.subr.bf16.mxu1 %v8276_v42  ;;  %v8297_v31 = vpack.c.bf16 %v389_v57, %v385_v60  ;;  %v390_v42 = vld [vmem:[#allocation2 + $0x4f0] sm:$0xff]  ;;  %v393_v20 = vld [vmem:[#allocation2 + $0x508] sm:$0xff]  ;;  %v399_v29 = vld [vmem:[#allocation2 + $0x538] sm:$0xff] }
  0xfa   :  { %9818 = vst [vmem:[#allocation83_spill] sm:$0xff] %v8291_v4  ;;  %v8307_v37 = vpack.c.bf16 %v390_v42, %v386_v59  ;;  %v396_v57 = vld [vmem:[#allocation2 + $0x520] sm:$0xff]  ;;  %v8312_v24 = vpack.c.bf16 %v399_v29, %v395_v11  ;;  %v402_v11 = vld [vmem:[#allocation2 + $0x550] sm:$0xff]  ;;  %9842 = vst [vmem:[#allocation107_spill] sm:$0xff] %v8383_v49 }
  0xfb   :  { %5370 = vmatpush1.bf16.msra.mxu0 %v8279_v47  ;;  %9820 = vst [vmem:[#allocation85_spill] sm:$0xff] %v8297_v31  ;;  %v397_v47 = vld [vmem:[#allocation2 + $0x528] sm:$0xff]  ;;  %v404_v59 = vld [vmem:[#allocation2 + $0x560] sm:$0xff] }
  0xfc   :  { %5498 = vmatpush1.bf16.msra.mxu1 %v8283_v27  ;;  %5372 = vmatprep.subr.bf16.mxu0 %v8285_v46  ;;  %v8303_v27 = vpack.c.bf16 %v388_v53, %v384_v6  ;;  %9823 = vst [vmem:[#allocation88_spill] sm:$0xff] %v8307_v37  ;;  %v8309_v60 = vpack.c.bf16 %v397_v47, %v393_v20  ;;  %9825 = vst [vmem:[#allocation90_spill] sm:$0xff] %v8312_v24  ;;  %v401_v46 = vld [vmem:[#allocation2 + $0x548] sm:$0xff]  ;;  %v403_v6 = vld [vmem:[#allocation2 + $0x558] sm:$0xff] }
  0xfd   :  { %5500 = vmatprep.subr.bf16.mxu1 %v8288_v55  ;;  %v398_v55 = vld [vmem:[#allocation2 + $0x530] sm:$0xff]  ;;  %v407_v53 = vld [vmem:[#allocation2 + $0x578] sm:$0xff]  ;;  %v400_v47 = vld [vmem:[#allocation2 + $0x540] sm:$0xff] }
  0xfe   :  { %9822 = vst [vmem:[#allocation87_spill] sm:$0xff] %v8303_v27  ;;  %9824 = vst [vmem:[#allocation89_spill] sm:$0xff] %v8309_v60  ;;  %v8319_v20 = vpack.c.bf16 %v398_v55, %v394_v1  ;;  %v8324_v29 = vpack.c.bf16 %v407_v53, %v403_v6  ;;  %v408_v55 = vld [vmem:[#allocation2 + $0x580] sm:$0xff]  ;;  %v410_v6 = vld [vmem:[#allocation2 + $0x590] sm:$0xff] }
  0xff   :  { %5374 = vmatpush1.bf16.msra.mxu0 %v8291_v4  ;;  %v405_v4 = vld [vmem:[#allocation2 + $0x568] sm:$0xff]  ;;  %v412_v1 = vld [vmem:[#allocation2 + $0x5a0] sm:$0xff]  ;;  %v414_v53 = vld [vmem:[#allocation2 + $0x5b0] sm:$0xff] }
 0x100   :  { %5502 = vmatpush1.bf16.msra.mxu1 %v8295_v9  ;;  %5376 = vmatprep.subr.bf16.mxu0 %v8297_v31  ;;  %v8315_v9 = vpack.c.bf16 %v396_v57, %v392_v61  ;;  %9827 = vst [vmem:[#allocation92_spill] sm:$0xff] %v8319_v20  ;;  %v8321_v42 = vpack.c.bf16 %v405_v4, %v401_v46  ;;  %9829 = vst [vmem:[#allocation94_spill] sm:$0xff] %v8324_v29  ;;  %v409_v31 = vld [vmem:[#allocation2 + $0x588] sm:$0xff]  ;;  %v411_v61 = vld [vmem:[#allocation2 + $0x598] sm:$0xff] }
 0x101   :  { %5504 = vmatprep.subr.bf16.mxu1 %v8300_v28  ;;  %v406_v28 = vld [vmem:[#allocation2 + $0x570] sm:$0xff]  ;;  %v415_v57 = vld [vmem:[#allocation2 + $0x5b8] sm:$0xff] }
 0x102   :  { %9826 = vst [vmem:[#allocation91_spill] sm:$0xff] %v8315_v9  ;;  %9828 = vst [vmem:[#allocation93_spill] sm:$0xff] %v8321_v42  ;;  %v8331_v4 = vpack.c.bf16 %v406_v28, %v402_v11  ;;  %v8341_v28 = vpack.c.bf16 %v414_v53, %v410_v6  ;;  %v169_v11 = vld [vmem:[%s9485_s0 + $0x38] sm:$0xff] }
 0x103   :  { %5378 = vmatpush1.bf16.msra.mxu0 %v8303_v27  ;;  %v413_v27 = vld [vmem:[#allocation2 + $0x5a8] sm:$0xff]  ;;  %v8361_v6 = vmax.f32 %v169_v11, 0.0  ;;  %v431_v11 = vld [vmem:[#allocation2 + $0x638] sm:$0xff] }
 0x104   :  { %5506 = vmatpush1.bf16.msra.mxu1 %v8307_v37  ;;  %5380 = vmatprep.subr.bf16.mxu0 %v8309_v60  ;;  %v8327_v37 = vpack.c.bf16 %v404_v59, %v400_v47  ;;  %9831 = vst [vmem:[#allocation96_spill] sm:$0xff] %v8331_v4  ;;  %v8333_v46 = vpack.c.bf16 %v413_v27, %v409_v31  ;;  %v417_v60 = vld [vmem:[#allocation2 + $0x5c8] sm:$0xff]  ;;  %v419_v47 = vld [vmem:[#allocation2 + $0x5d8] sm:$0xff]  ;;  %9835 = vst [vmem:[#allocation100_spill] sm:$0xff] %v8341_v28 }
 0x105   :  { %5508 = vmatprep.subr.bf16.mxu1 %v8312_v24  ;;  %v8336_v24 = vpack.c.bf16 %v415_v57, %v411_v61  ;;  %v423_v59 = vld [vmem:[#allocation2 + $0x5f8] sm:$0xff]  ;;  %v418_v27 = vld [vmem:[#allocation2 + $0x5d0] sm:$0xff] }
 0x106   :  { %9830 = vst [vmem:[#allocation95_spill] sm:$0xff] %v8327_v37  ;;  %9832 = vst [vmem:[#allocation97_spill] sm:$0xff] %v8333_v46  ;;  %v165_v31 = vld [vmem:[%s9485_s0 + $0x18] sm:$0xff] }
 0x107   :  { %5382 = vmatpush1.bf16.msra.mxu0 %v8315_v9  ;;  %9833 = vst [vmem:[#allocation98_spill] sm:$0xff] %v8336_v24  ;;  %v421_v9 = vld [vmem:[#allocation2 + $0x5e8] sm:$0xff]  ;;  %v173_v61 = vld [vmem:[%s9485_s0 + $0x58] sm:$0xff] }
 0x108   :  { %5510 = vmatpush1.bf16.msra.mxu1 %v8319_v20  ;;  %5384 = vmatprep.subr.bf16.mxu0 %v8321_v42  ;;  %v8339_v42 = vpack.c.bf16 %v412_v1, %v408_v55  ;;  %v8354_v57 = vpack.c.bf16 %v421_v9, %v417_v60  ;;  %v177_v55 = vld [vmem:[%s9485_s0 + $0x78] sm:$0xff]  ;;  %v8359_v1 = vmax.f32 %v165_v31, 0.0  ;;  %v8363_v53 = vmax.f32 %v173_v61, 0.0  ;;  %v422_v60 = vld [vmem:[#allocation2 + $0x5f0] sm:$0xff]  ;;  %v429_v31 = vld [vmem:[#allocation2 + $0x628] sm:$0xff] }
 0x109   :  { %5512 = vmatprep.subr.bf16.mxu1 %v8324_v29  ;;  %v8372_v9 = vpack.c.bf16 %v423_v59, %v419_v47  ;;  %v427_v29 = vld [vmem:[#allocation2 + $0x618] sm:$0xff]  ;;  %v8374_v20 = vmax.f32 %v177_v55, 0.0  ;;  %v172_v47 = vld [vmem:[%s9485_s0 + $0x50] sm:$0xff]  ;;  %v8390_v59 = vpack.c.bf16 %v422_v60, %v418_v27  ;;  %v781_v27 = vmul.f32 %v8175_v44, %v8175_v44 }
 0x10a   :  { %9834 = vst [vmem:[#allocation99_spill] sm:$0xff] %v8339_v42  ;;  %9836 = vst [vmem:[#allocation101_spill] sm:$0xff] %v8354_v57  ;;  %v223_v61 = vadd.f32 %v8361_v6, %v8359_v1  ;;  %v8396_v10 = vpack.c.bf16 %v431_v11, %v427_v29  ;;  %v439_v60 = vld [vmem:[#allocation2 + $0x678] sm:$0xff]  ;;  %v176_v11 = vld [vmem:[%s9485_s0 + $0x70] sm:$0xff] }
 0x10b   :  { %5386 = vmatpush1.bf16.msra.mxu0 %v8327_v37  ;;  %9837 = vst [vmem:[#allocation102_spill] sm:$0xff] %v8363_v53  ;;  %v164_v37 = vld [vmem:[%s9485_s0 + $0x10] sm:$0xff]  ;;  %9838 = vst [vmem:[#allocation103_spill] sm:$0xff] %v8372_v9 }
 0x10c   :  { %5514 = vmatpush1.bf16.msra.mxu1 %v8331_v4  ;;  %5388 = vmatprep.subr.bf16.mxu0 %v8333_v46  ;;  %v168_v46 = vld [vmem:[%s9485_s0 + $0x30] sm:$0xff]  ;;  %v425_v4 = vld [vmem:[#allocation2 + $0x608] sm:$0xff]  ;;  %9839 = vst [vmem:[#allocation104_spill] sm:$0xff] %v8374_v20  ;;  %v8378_v54 = vmax.f32 %v164_v37, 0.0  ;;  %9843 = vst [vmem:[#allocation108_spill] sm:$0xff] %v8390_v59  ;;  %v224_v48 = vadd.f32 %v223_v61, %v8363_v53 }
 0x10d   :  { %5516 = vmatprep.subr.bf16.mxu1 %v8336_v24  ;;  %v8380_v58 = vmax.f32 %v168_v46, 0.0  ;;  %v8392_v55 = vpack.c.bf16 %v429_v31, %v425_v4  ;;  %v424_v37 = vld [vmem:[#allocation2 + $0x600] sm:$0xff]  ;;  %v426_v46 = vld [vmem:[#allocation2 + $0x610] sm:$0xff]  ;;  %9845 = vst [vmem:[#allocation110_spill] sm:$0xff] %v8396_v10  ;;  %v435_v4 = vld [vmem:[#allocation2 + $0x658] sm:$0xff] }
 0x10e   :  { %9840 = vst [vmem:[#allocation105_spill] sm:$0xff] %v8378_v54  ;;  %v428_v24 = vld [vmem:[#allocation2 + $0x620] sm:$0xff]  ;;  %v225_v31 = vadd.f32 %v224_v48, %v8374_v20  ;;  %v8415_v44 = vpack.c.bf16 %v430_v19, %v426_v46  ;;  %v447_v46 = vld [vmem:[#allocation2 + $0x6b8] sm:$0xff] }
 0x10f   :  { %9841 = vst [vmem:[#allocation106_spill] sm:$0xff] %v8380_v58  ;;  %5390 = vmatpush1.bf16.msra.mxu0 %v8339_v42  ;;  %9844 = vst [vmem:[#allocation109_spill] sm:$0xff] %v8392_v55  ;;  %v433_v42 = vld [vmem:[#allocation2 + $0x648] sm:$0xff]  ;;  %v214_v61 = vadd.f32 %v8380_v58, %v8378_v54  ;;  %v8408_v29 = vpack.c.bf16 %v428_v24, %v424_v37  ;;  %v8420_v24 = vpack.c.bf16 %v439_v60, %v435_v4  ;;  %v438_v37 = vld [vmem:[#allocation2 + $0x670] sm:$0xff] }
 0x110   :  { %5518 = vmatpush1.bf16.msra.mxu1 %v8341_v28  ;;  %5392 = vmatprep.subr.bf16.mxu0 %v8354_v57  ;;  %v777_v28 = vmul.f32 %v8170_v45, %v8170_v45  ;;  %v8403_v57 = vmax.f32 %v172_v47, 0.0  ;;  %9847 = vst [vmem:[#allocation112_spill] sm:$0xff] %v8415_v44  ;;  %v8417_v48 = vpack.c.bf16 %v437_v2, %v433_v42  ;;  %v432_v47 = vld [vmem:[#allocation2 + $0x640] sm:$0xff]  ;;  %v226_v58 = vrot.slane %v225_v31, 4  ;;  %v445_v54 = vld [vmem:[#allocation2 + $0x6a8] sm:$0xff] }
 0x111   :  { %5520 = vmatprep.subr.bf16.mxu1 %v8372_v9  ;;  %9846 = vst [vmem:[#allocation111_spill] sm:$0xff] %v8408_v29  ;;  %v436_v45 = vld [vmem:[#allocation2 + $0x660] sm:$0xff]  ;;  %v434_v9 = vld [vmem:[#allocation2 + $0x650] sm:$0xff]  ;;  %9849 = vst [vmem:[#allocation114_spill] sm:$0xff] %v8420_v24  ;;  %v8424_v2 = vmax.f32 %v176_v11, 0.0 }
 0x112   :  { %9848 = vst [vmem:[#allocation113_spill] sm:$0xff] %v8417_v48  ;;  %v801_v20 = vadd.f32 %v781_v27, %v777_v28  ;;  %v227_v19 = vadd.f32 %v226_v58, %v225_v31  ;;  %v215_v42 = vadd.f32 %v214_v61, %v8403_v57  ;;  %v8428_v53 = vpack.c.bf16 %v436_v45, %v432_v47  ;;  %v440_v28 = vld [vmem:[#allocation2 + $0x680] sm:$0xff]  ;;  %v446_v61 = vld [vmem:[#allocation2 + $0x6b0] sm:$0xff]  ;;  %v449_v11 = vld [vmem:[#allocation2 + $0x6c8] sm:$0xff] }
 0x113   :  { %5394 = vmatpush1.bf16.msra.mxu0 %v8383_v49  ;;  %v441_v49 = vld [vmem:[#allocation2 + $0x688] sm:$0xff]  ;;  %v8432_v4 = vpack.c.bf16 %v438_v37, %v434_v9  ;;  %v444_v27 = vld [vmem:[#allocation2 + $0x6a0] sm:$0xff]  ;;  %v789_v47 = vmul.f32 %v8194_v40, %v8194_v40  ;;  %v455_v9 = vld [vmem:[#allocation2 + $0x6f8] sm:$0xff] }
 0x114   :  { %5522 = vmatpush1.bf16.msra.mxu1 %v8390_v59  ;;  %5396 = vmatprep.subr.bf16.mxu0 %v8392_v55  ;;  %v785_v59 = vmul.f32 %v8177_v36, %v8177_v36  ;;  %v443_v55 = vld [vmem:[#allocation2 + $0x698] sm:$0xff]  ;;  %9850 = vst [vmem:[#allocation115_spill] sm:$0xff] %v8428_v53  ;;  %v8434_v60 = vpack.c.bf16 %v445_v54, %v441_v49  ;;  %v442_v36 = vld [vmem:[#allocation2 + $0x690] sm:$0xff]  ;;  %v228_v58 = vrot.slane %v227_v19, 2  ;;  %v453_v45 = vld [vmem:[#allocation2 + $0x6e8] sm:$0xff] }
 0x115   :  { %5524 = vmatprep.subr.bf16.mxu1 %v8396_v10  ;;  %9851 = vst [vmem:[#allocation116_spill] sm:$0xff] %v8432_v4  ;;  %v8437_v31 = vpack.c.bf16 %v447_v46, %v443_v55  ;;  %v216_v49 = vadd.f32 %v215_v42, %v8424_v2  ;;  %v8443_v54 = vpack.c.bf16 %v444_v27, %v440_v28  ;;  %v452_v40 = vld [vmem:[#allocation2 + $0x6e0] sm:$0xff]  ;;  %v454_v42 = vld [vmem:[#allocation2 + $0x6f0] sm:$0xff]  ;;  %v461_v28 = vld [vmem:[#allocation2 + $0x728] sm:$0xff] }
 0x116   :  { %9852 = vst [vmem:[#allocation117_spill] sm:$0xff] %v8434_v60  ;;  %v229_v37 = vadd.f32 %v228_v58, %v227_v19  ;;  %v8447_v55 = vpack.c.bf16 %v446_v61, %v442_v36  ;;  %v8449_v46 = vpack.c.bf16 %v453_v45, %v449_v11  ;;  %v457_v58 = vld [vmem:[#allocation2 + $0x708] sm:$0xff]  ;;  %v456_v11 = vld [vmem:[#allocation2 + $0x700] sm:$0xff] }
 0x117   :  { %5398 = vmatpush1.bf16.msra.mxu0 %v8408_v29  ;;  %9853 = vst [vmem:[#allocation118_spill] sm:$0xff] %v8437_v31  ;;  %9854 = vst [vmem:[#allocation119_spill] sm:$0xff] %v8443_v54  ;;  %v460_v45 = vld [vmem:[#allocation2 + $0x720] sm:$0xff] }
 0x118   :  { %5526 = vmatpush1.bf16.msra.mxu1 %v8415_v44  ;;  %5400 = vmatprep.subr.bf16.mxu0 %v8417_v48  ;;  %v802_v44 = vadd.f32 %v801_v20, %v785_v59  ;;  %v451_v48 = vld [vmem:[#allocation2 + $0x6d8] sm:$0xff]  ;;  %9855 = vst [vmem:[#allocation120_spill] sm:$0xff] %v8447_v55  ;;  %9856 = vst [vmem:[#allocation121_spill] sm:$0xff] %v8449_v46  ;;  %v450_v20 = vld [vmem:[#allocation2 + $0x6d0] sm:$0xff]  ;;  %v230_v59 = vrot.slane %v229_v37, 1 }
 0x119   :  { %5528 = vmatprep.subr.bf16.mxu1 %v8420_v24  ;;  %v448_v24 = vld [vmem:[#allocation2 + $0x6c0] sm:$0xff]  ;;  %v8452_v19 = vpack.c.bf16 %v455_v9, %v451_v48  ;;  %v8459_v61 = vpack.c.bf16 %v454_v42, %v450_v20  ;;  %v8461_v48 = vpack.c.bf16 %v461_v28, %v457_v58  ;;  %v458_v9 = vld [vmem:[#allocation2 + $0x710] sm:$0xff]  ;;  %v8467_v20 = vpack.c.bf16 %v460_v45, %v456_v11  ;;  %v475_v45 = vld [vmem:[#allocation2 + $0x798] sm:$0xff] }
 0x11a   :  { %v803_v27 = vadd.f32 %v802_v44, %v789_v47  ;;  %v231_v29 = vadd.f32 %v230_v59, %v229_v37  ;;  %v8455_v36 = vpack.c.bf16 %v452_v40, %v448_v24  ;;  %v462_v47 = vld [vmem:[#allocation2 + $0x730] sm:$0xff]  ;;  %v465_v37 = vld [vmem:[#allocation2 + $0x748] sm:$0xff]  ;;  %v467_v24 = vld [vmem:[#allocation2 + $0x758] sm:$0xff] }
 0x11b   :  { %5402 = vmatpush1.bf16.msra.mxu0 %v8428_v53  ;;  %9857 = vst [vmem:[#allocation122_spill] sm:$0xff] %v8452_v19  ;;  %v459_v53 = vld [vmem:[#allocation2 + $0x718] sm:$0xff]  ;;  %9859 = vst [vmem:[#allocation124_spill] sm:$0xff] %v8459_v61  ;;  %v469_v59 = vld [vmem:[#allocation2 + $0x768] sm:$0xff]  ;;  %v8471_v42 = vpack.c.bf16 %v462_v47, %v458_v9 }
 0x11c   :  { %5530 = vmatpush1.bf16.msra.mxu1 %v8432_v4  ;;  %5404 = vmatprep.subr.bf16.mxu0 %v8434_v60  ;;  %v463_v4 = vld [vmem:[#allocation2 + $0x738] sm:$0xff]  ;;  %v217_v60 = vrot.slane %v216_v49, 4  ;;  %9858 = vst [vmem:[#allocation123_spill] sm:$0xff] %v8455_v36  ;;  %9860 = vst [vmem:[#allocation125_spill] sm:$0xff] %v8461_v48  ;;  %v804_v40 = vrot.slane %v803_v27, 4  ;;  %v468_v58 = vld [vmem:[#allocation2 + $0x760] sm:$0xff] }
 0x11d   :  { %5532 = vmatprep.subr.bf16.mxu1 %v8437_v31  ;;  %v8464_v44 = vpack.c.bf16 %v463_v4, %v459_v53  ;;  %623 = vmatprep.mubr.f32.mxu0 %v231_v29  ;;  %9862 = vst [vmem:[#allocation127_spill] sm:$0xff] %v8467_v20  ;;  %9863 = vst [vmem:[#allocation128_spill] sm:$0xff] %v8471_v42  ;;  %v8473_v53 = vpack.c.bf16 %v469_v59, %v465_v37  ;;  %v464_v4 = vld [vmem:[#allocation2 + $0x740] sm:$0xff]  ;;  %v466_v28 = vld [vmem:[#allocation2 + $0x750] sm:$0xff] }
 0x11e   :  { %765 = vmatprep.mubr.f32.mxu1 %v231_v29  ;;  %v470_v29 = vld [vmem:[#allocation2 + $0x770] sm:$0xff]  ;;  %v805_v11 = vadd.f32 %v804_v40, %v803_v27  ;;  %v8479_v9 = vpack.c.bf16 %v468_v58, %v464_v4  ;;  %v476_v59 = vld [vmem:[#allocation2 + $0x7a0] sm:$0xff]  ;;  %v483_v58 = vld [vmem:[#allocation2 + $0x7d8] sm:$0xff] }
 0x11f   :  { %5406 = vmatpush1.bf16.msra.mxu0 %v8443_v54  ;;  %9861 = vst [vmem:[#allocation126_spill] sm:$0xff] %v8464_v44  ;;  %9864 = vst [vmem:[#allocation129_spill] sm:$0xff] %v8473_v53  ;;  %v8483_v47 = vpack.c.bf16 %v470_v29, %v466_v28  ;;  %v478_v40 = vld [vmem:[#allocation2 + $0x7b0] sm:$0xff] }
 0x120   :  { %5534 = vmatpush1.bf16.msra.mxu1 %v8447_v55  ;;  %5408 = vmatprep.subr.bf16.mxu0 %v8449_v46  ;;  %v471_v55 = vld [vmem:[#allocation2 + $0x778] sm:$0xff]  ;;  %v218_v46 = vadd.f32 %v217_v60, %v216_v49  ;;  %v473_v60 = vld [vmem:[#allocation2 + $0x788] sm:$0xff]  ;;  %9866 = vst [vmem:[#allocation131_spill] sm:$0xff] %v8479_v9  ;;  %v806_v4 = vrot.slane %v805_v11, 2 }
 0x121   :  { %5536 = vmatprep.subr.bf16.mxu1 %v8452_v19  ;;  %v8476_v19 = vpack.c.bf16 %v471_v55, %v467_v24  ;;  %v477_v49 = vld [vmem:[#allocation2 + $0x7a8] sm:$0xff]  ;;  %9867 = vst [vmem:[#allocation132_spill] sm:$0xff] %v8483_v47  ;;  %v472_v55 = vld [vmem:[#allocation2 + $0x780] sm:$0xff]  ;;  %v474_v24 = vld [vmem:[#allocation2 + $0x790] sm:$0xff] }
 0x122   :  { %v8485_v37 = vpack.c.bf16 %v477_v49, %v473_v60  ;;  %v8491_v28 = vpack.c.bf16 %v476_v59, %v472_v55  ;;  %v8495_v29 = vpack.c.bf16 %v478_v40, %v474_v24  ;;  %v484_v49 = vld [vmem:[#allocation2 + $0x7e0] sm:$0xff] }
 0x123   :  { %5410 = vmatpush1.bf16.msra.mxu0 %v8455_v36  ;;  %9865 = vst [vmem:[#allocation130_spill] sm:$0xff] %v8476_v19  ;;  %v479_v36 = vld [vmem:[#allocation2 + $0x7b8] sm:$0xff]  ;;  %v9876_v24 = vld [vmem:[#allocation57_spill] sm:$0xff] }
 0x124   :  { %5538 = vmatpush1.bf16.msra.mxu1 %v8459_v61  ;;  %5412 = vmatprep.subr.bf16.mxu0 %v8461_v48  ;;  %v219_v61 = vrot.slane %v218_v46, 2  ;;  %9868 = vst [vmem:[#allocation133_spill] sm:$0xff] %v8485_v37  ;;  %v8488_v27 = vpack.c.bf16 %v479_v36, %v475_v45  ;;  %v487_v48 = vld [vmem:[#allocation2 + $0x7f8] sm:$0xff]  ;;  %9870 = vst [vmem:[#allocation135_spill] sm:$0xff] %v8491_v28  ;;  %v480_v36 = vld [vmem:[#allocation2 + $0x7c0] sm:$0xff]  ;;  %v784_v40 = vmul.f32 %v9876_v24, %v9876_v24 }
 0x125   :  { %5540 = vmatprep.subr.bf16.mxu1 %v8464_v44  ;;  %v481_v44 = vld [vmem:[#allocation2 + $0x7c8] sm:$0xff]  ;;  %9871 = vst [vmem:[#allocation136_spill] sm:$0xff] %v8495_v29  ;;  %v8500_v45 = vpack.c.bf16 %v487_v48, %v483_v58  ;;  %v8503_v55 = vpack.c.bf16 %v484_v49, %v480_v36  ;;  %v9877_v58 = vld [vmem:[#allocation33_spill] sm:$0xff]  ;;  %v9879_v49 = vld [vmem:[#allocation35_spill] sm:$0xff] }
 0x126   :  { %9869 = vst [vmem:[#allocation134_spill] sm:$0xff] %v8488_v27  ;;  %v9878_v36 = vld [vmem:[#allocation34_spill] sm:$0xff] }
 0x127   :  { %5414 = vmatpush1.bf16.msra.mxu0 %v8467_v20  ;;  %v485_v20 = vld [vmem:[#allocation2 + $0x7e8] sm:$0xff]  ;;  %9873 = vst [vmem:[#allocation138_spill] sm:$0xff] %v8500_v45  ;;  %9874 = vst [vmem:[#allocation139_spill] sm:$0xff] %v8503_v55 }
 0x128   :  { %5542 = vmatpush1.bf16.msra.mxu1 %v8471_v42  ;;  %5416 = vmatprep.subr.bf16.mxu0 %v8473_v53  ;;  %v220_v42 = vadd.f32 %v219_v61, %v218_v46  ;;  %v8497_v60 = vpack.c.bf16 %v485_v20, %v481_v44  ;;  %v486_v46 = vld [vmem:[#allocation2 + $0x7f0] sm:$0xff]  ;;  %v807_v61 = vadd.f32 %v806_v4, %v805_v11 }
 0x129   :  { %5544 = vmatprep.subr.bf16.mxu1 %v8476_v19  ;;  %v482_v19 = vld [vmem:[#allocation2 + $0x7d0] sm:$0xff]  ;;  %v779_v11 = vmul.f32 %v8359_v1, %v8359_v1 }
 0x12a   :  { %9872 = vst [vmem:[#allocation137_spill] sm:$0xff] %v8497_v60  ;;  %v8507_v44 = vpack.c.bf16 %v486_v46, %v482_v19  ;;  %v808_v20 = vrot.slane %v807_v61, 1  ;;  %v776_v19 = vmul.f32 %v8204_v13, %v8204_v13  ;;  %v9880_v46 = vld [vmem:[#allocation36_spill] sm:$0xff] }
 0x12b   :  { %5418 = vmatpush1.bf16.msra.mxu0 %v8479_v9  ;;  %v221_v9 = vrot.slane %v220_v42, 1 }
 0x12c   :  { %5546 = vmatpush1.bf16.msra.mxu1 %v8483_v47  ;;  %5420 = vmatprep.subr.bf16.mxu0 %v8485_v37  ;;  %9875 = vst [vmem:[#allocation140_spill] sm:$0xff] %v8507_v44  ;;  %v809_v48 = vadd.f32 %v808_v20, %v807_v61  ;;  %v9881_v61 = vld [vmem:[#allocation102_spill] sm:$0xff] }
 0x12d   :  { %5548 = vmatprep.subr.bf16.mxu1 %v8488_v27  ;;  %v222_v59 = vadd.f32 %v221_v9, %v220_v42  ;;  %v780_v42 = vmul.f32 %v8206_v22, %v8206_v22  ;;  %v783_v9 = vmul.f32 %v8361_v6, %v8361_v6  ;;  %v787_v20 = vmul.f32 %v9881_v61, %v9881_v61 }
 0x12f   :  { %5422 = vmatpush1.bf16.msra.mxu0 %v8491_v28  ;;  %v792_v4 = vadd.f32 %v780_v42, %v776_v19  ;;  %v9885_v19 = vld [vmem:[#allocation39_spill] sm:$0xff]  ;;  %v9886_v42 = vld [vmem:[#allocation40_spill] sm:$0xff] }
 0x130   :  { %5550 = vmatpush1.bf16.msra.mxu1 %v8495_v29  ;;  %5424 = vmatprep.subr.bf16.mxu0 %v8497_v60 }
 0x131   :  { %5552 = vmatprep.subr.bf16.mxu1 %v8500_v45 }
 0x133   :  { %5426 = vmatpush1.bf16.msra.mxu0 %v8503_v55 }
 0x134   :  { %5554 = vmatpush1.bf16.msra.mxu1 %v8507_v44  ;;  %5556 = vmatprep.subr.bf16.mxu0 %v8024_v3 }
 0x135   :  { %5684 = vmatprep.subr.bf16.mxu1 %v8026_v7 }
 0x136   :  { %624 = vmatmul.mubr.f32.vlgmr.msra.gmra.mrb[0].mxu0 %v222_v59 }
 0x137   :  { %766 = vmatmul.mubr.f32.vlgmr.msra.gmra.mrb[0].mxu1 %v222_v59  ;;  %5558 = vmatpush1.bf16.msra.mxu0 %v8028_v8  ;;  %v819_v59 = vadd.f32 %v783_v9, %v779_v11  ;;  %v9889_v11 = vld [vmem:[#allocation42_spill] sm:$0xff]  ;;  %v9890_v9 = vld [vmem:[#allocation43_spill] sm:$0xff] }
 0x138   :  { %5686 = vmatpush1.bf16.msra.mxu1 %v8031_v12  ;;  %5560 = vmatprep.subr.bf16.mxu0 %v8035_v16 }
 0x139   :  { %5688 = vmatprep.subr.bf16.mxu1 %v8037_v17  ;;  %892 = vmatprep.mubr.f32.mxu0 %v809_v48 }
 0x13a   :  { %1034 = vmatprep.mubr.f32.mxu1 %v809_v48  ;;  %v9882_v48 = vld [vmem:[#allocation59_spill] sm:$0xff] }
 0x13b   :  { %5562 = vmatpush1.bf16.msra.mxu0 %v8040_v21 }
 0x13c   :  { %5690 = vmatpush1.bf16.msra.mxu1 %v8044_v25  ;;  %5564 = vmatprep.subr.bf16.mxu0 %v8046_v26 }
 0x13d   :  { %5692 = vmatprep.subr.bf16.mxu1 %v8048_v30 }
 0x13f   :  { %5566 = vmatpush1.bf16.msra.mxu0 %v8051_v34 }
 0x140   :  { %5694 = vmatpush1.bf16.msra.mxu1 %v8055_v38  ;;  %5568 = vmatprep.subr.bf16.mxu0 %v8057_v39 }
 0x141   :  { %5696 = vmatprep.subr.bf16.mxu1 %v8060_v43 }
 0x143   :  { %5570 = vmatpush1.bf16.msra.mxu0 %v8063_v50 }
 0x144   :  { %5698 = vmatpush1.bf16.msra.mxu1 %v8067_v51  ;;  %5572 = vmatprep.subr.bf16.mxu0 %v8069_v52 }
 0x145   :  { %5700 = vmatprep.subr.bf16.mxu1 %v8072_v56 }
 0x147   :  { %5574 = vmatpush1.bf16.msra.mxu0 %v8075_v62 }
 0x148   :  { %5702 = vmatpush1.bf16.msra.mxu1 %v8079_v63  ;;  %5576 = vmatprep.subr.bf16.mxu0 %v8081_v0 }
 0x149   :  { %5704 = vmatprep.subr.bf16.mxu1 %v8084_v5  ;;  %v1649_v5 = vld [vmem:[#allocation6 + $0x5b8] sm:$0xff] }
 0x14b   :  { %5578 = vmatpush1.bf16.msra.mxu0 %v8087_v14  ;;  %v1645_v14 = vld [vmem:[#allocation6 + $0x598] sm:$0xff] }
 0x14c   :  { %5706 = vmatpush1.bf16.msra.mxu1 %v8091_v15  ;;  %5580 = vmatprep.subr.bf16.mxu0 %v8093_v18  ;;  %v9895_v18 = vld [vmem:[#allocation48_spill] sm:$0xff] }
 0x14d   :  { %5708 = vmatprep.subr.bf16.mxu1 %v8096_v23  ;;  %v9888_v23 = vld [vmem:[#allocation41_spill] sm:$0xff] }
 0x14f   :  { %5582 = vmatpush1.bf16.msra.mxu0 %v8099_v32  ;;  %v9884_v32 = vld [vmem:[#allocation38_spill] sm:$0xff] }
 0x150   :  { %5710 = vmatpush1.bf16.msra.mxu1 %v8103_v33  ;;  %5584 = vmatprep.subr.bf16.mxu0 %v8105_v35  ;;  %v793_v35 = vadd.f32 %v792_v4, %v784_v40  ;;  %v9883_v33 = vld [vmem:[#allocation37_spill] sm:$0xff]  ;;  %v9891_v40 = vld [vmem:[#allocation44_spill] sm:$0xff] }
 0x151   :  { %5712 = vmatprep.subr.bf16.mxu1 %v8108_v41  ;;  %v788_v41 = vmul.f32 %v9882_v48, %v9882_v48 }
 0x153   :  { %5586 = vmatpush1.bf16.msra.mxu0 %v9877_v58  ;;  %v794_v58 = vadd.f32 %v793_v35, %v788_v41  ;;  %v9896_v41 = vld [vmem:[#allocation50_spill] sm:$0xff] }
 0x154   :  { %5714 = vmatpush1.bf16.msra.mxu1 %v9878_v36  ;;  %5588 = vmatprep.subr.bf16.mxu0 %v9879_v49  ;;  %v9887_v36 = vld [vmem:[#allocation104_spill] sm:$0xff] }
 0x155   :  { %5716 = vmatprep.subr.bf16.mxu1 %v9880_v46  ;;  %v791_v49 = vmul.f32 %v9887_v36, %v9887_v36  ;;  %v820_v46 = vadd.f32 %v819_v59, %v787_v20  ;;  %v9897_v59 = vld [vmem:[#allocation53_spill] sm:$0xff] }
 0x157   :  { %5590 = vmatpush1.bf16.msra.mxu0 %v9883_v33  ;;  %v821_v4 = vadd.f32 %v820_v46, %v791_v49  ;;  %v795_v33 = vrot.slane %v794_v58, 4 }
 0x158   :  { %5718 = vmatpush1.bf16.msra.mxu1 %v9884_v32  ;;  %5592 = vmatprep.subr.bf16.mxu0 %v9885_v19  ;;  %v9892_v32 = vld [vmem:[#allocation45_spill] sm:$0xff]  ;;  %v9893_v19 = vld [vmem:[#allocation46_spill] sm:$0xff] }
 0x159   :  { %5720 = vmatprep.subr.bf16.mxu1 %v9886_v42  ;;  %v9894_v42 = vld [vmem:[#allocation47_spill] sm:$0xff]  ;;  %v822_v20 = vrot.slane %v821_v4, 4  ;;  %v796_v35 = vadd.f32 %v795_v33, %v794_v58 }
 0x15a   :  { %v9904_v58 = vld [vmem:[#allocation63_spill] sm:$0xff] }
 0x15b   :  { %5594 = vmatpush1.bf16.msra.mxu0 %v9888_v23  ;;  %v823_v49 = vadd.f32 %v822_v20, %v821_v4  ;;  %v797_v46 = vrot.slane %v796_v35, 2 }
 0x15c   :  { %5722 = vmatpush1.bf16.msra.mxu1 %v9889_v11  ;;  %5596 = vmatprep.subr.bf16.mxu0 %v9890_v9  ;;  %v9898_v11 = vld [vmem:[#allocation54_spill] sm:$0xff]  ;;  %v9899_v9 = vld [vmem:[#allocation55_spill] sm:$0xff] }
 0x15d   :  { %5724 = vmatprep.subr.bf16.mxu1 %v9891_v40  ;;  %v9900_v40 = vld [vmem:[#allocation58_spill] sm:$0xff]  ;;  %v798_v33 = vadd.f32 %v797_v46, %v796_v35  ;;  %v9912_v46 = vld [vmem:[#allocation71_spill] sm:$0xff] }
 0x15f   :  { %5598 = vmatpush1.bf16.msra.mxu0 %v9892_v32  ;;  %v9901_v32 = vld [vmem:[#allocation60_spill] sm:$0xff]  ;;  %v799_v20 = vrot.slane %v798_v33, 1 }
 0x160   :  { %5726 = vmatpush1.bf16.msra.mxu1 %v9893_v19  ;;  %5600 = vmatprep.subr.bf16.mxu0 %v9894_v42  ;;  %v9902_v19 = vld [vmem:[#allocation61_spill] sm:$0xff]  ;;  %v9903_v42 = vld [vmem:[#allocation62_spill] sm:$0xff] }
 0x161   :  { %5728 = vmatprep.subr.bf16.mxu1 %v9895_v18  ;;  %v824_v18 = vrot.slane %v823_v49, 2  ;;  %v800_v35 = vadd.f32 %v799_v20, %v798_v33  ;;  %v9920_v33 = vld [vmem:[#allocation79_spill] sm:$0xff]  ;;  %v9921_v20 = vld [vmem:[#allocation80_spill] sm:$0xff] }
 0x163   :  { %5602 = vmatpush1.bf16.msra.mxu0 %v9896_v41  ;;  %v9905_v41 = vld [vmem:[#allocation64_spill] sm:$0xff]  ;;  %v825_v4 = vadd.f32 %v824_v18, %v823_v49  ;;  %v9916_v49 = vld [vmem:[#allocation75_spill] sm:$0xff] }
 0x164   :  { %5730 = vmatpush1.bf16.msra.mxu1 %v9897_v59  ;;  %5604 = vmatprep.subr.bf16.mxu0 %v9898_v11  ;;  %v9906_v59 = vld [vmem:[#allocation65_spill] sm:$0xff]  ;;  %v9907_v11 = vld [vmem:[#allocation66_spill] sm:$0xff] }
 0x165   :  { %5732 = vmatprep.subr.bf16.mxu1 %v9899_v9  ;;  %v9908_v9 = vld [vmem:[#allocation67_spill] sm:$0xff] }
 0x167   :  { %5606 = vmatpush1.bf16.msra.mxu0 %v9900_v40  ;;  %v9909_v40 = vld [vmem:[#allocation68_spill] sm:$0xff] }
 0x168   :  { %5734 = vmatpush1.bf16.msra.mxu1 %v9901_v32  ;;  %5608 = vmatprep.subr.bf16.mxu0 %v9902_v19  ;;  %v9910_v32 = vld [vmem:[#allocation69_spill] sm:$0xff]  ;;  %v9911_v19 = vld [vmem:[#allocation70_spill] sm:$0xff] }
 0x169   :  { %5736 = vmatprep.subr.bf16.mxu1 %v9903_v42  ;;  %v826_v42 = vrot.slane %v825_v4, 1 }
 0x16b   :  { %5610 = vmatpush1.bf16.msra.mxu0 %v9904_v58  ;;  %v9913_v58 = vld [vmem:[#allocation72_spill] sm:$0xff]  ;;  %v827_v18 = vadd.f32 %v826_v42, %v825_v4  ;;  %v9924_v42 = vld [vmem:[#allocation83_spill] sm:$0xff] }
 0x16c   :  { %5738 = vmatpush1.bf16.msra.mxu1 %v9905_v41  ;;  %5612 = vmatprep.subr.bf16.mxu0 %v9906_v59  ;;  %v9914_v41 = vld [vmem:[#allocation73_spill] sm:$0xff]  ;;  %v9915_v59 = vld [vmem:[#allocation74_spill] sm:$0xff]  ;;  %v9925_v4 = vld [vmem:[#allocation84_spill] sm:$0xff] }
 0x16d   :  { %5740 = vmatprep.subr.bf16.mxu1 %v9907_v11 }
 0x16f   :  { %5614 = vmatpush1.bf16.msra.mxu0 %v9908_v9  ;;  %v9952_v9 = vld [vmem:[#allocation114_spill] sm:$0xff] }
 0x170   :  { %5742 = vmatpush1.bf16.msra.mxu1 %v9909_v40  ;;  %5616 = vmatprep.subr.bf16.mxu0 %v9910_v32  ;;  %v9917_v40 = vld [vmem:[#allocation76_spill] sm:$0xff]  ;;  %v9918_v32 = vld [vmem:[#allocation77_spill] sm:$0xff] }
 0x171   :  { %5744 = vmatprep.subr.bf16.mxu1 %v9911_v19  ;;  %v9919_v19 = vld [vmem:[#allocation78_spill] sm:$0xff] }
 0x173   :  { %5618 = vmatpush1.bf16.msra.mxu0 %v9912_v46  ;;  %v9949_v46 = vld [vmem:[#allocation111_spill] sm:$0xff] }
 0x174   :  { %5746 = vmatpush1.bf16.msra.mxu1 %v9913_v58  ;;  %5620 = vmatprep.subr.bf16.mxu0 %v9914_v41  ;;  %v9922_v41 = vld [vmem:[#allocation81_spill] sm:$0xff] }
 0x175   :  { %5748 = vmatprep.subr.bf16.mxu1 %v9915_v59  ;;  %v9923_v59 = vld [vmem:[#allocation82_spill] sm:$0xff]  ;;  %v9948_v58 = vld [vmem:[#allocation109_spill] sm:$0xff] }
 0x176   :  { %893 = vmatmul.mubr.f32.vlgmr.msra.gmra.mrb[2].mxu0 %v800_v35 }
 0x177   :  { %5622 = vmatpush1.bf16.msra.mxu0 %v9916_v49  ;;  %1035 = vmatmul.mubr.f32.vlgmr.msra.gmra.mrb[2].mxu1 %v800_v35  ;;  %v9926_v35 = vld [vmem:[#allocation85_spill] sm:$0xff]  ;;  %v9942_v49 = vld [vmem:[#allocation99_spill] sm:$0xff] }
 0x178   :  { %5750 = vmatpush1.bf16.msra.mxu1 %v9917_v40  ;;  %5624 = vmatprep.subr.bf16.mxu0 %v9918_v32  ;;  %v9927_v40 = vld [vmem:[#allocation86_spill] sm:$0xff]  ;;  %v9928_v32 = vld [vmem:[#allocation87_spill] sm:$0xff] }
 0x179   :  { %5752 = vmatprep.subr.bf16.mxu1 %v9919_v19  ;;  %963 = vmatprep.mubr.f32.mxu0 %v827_v18  ;;  %v9929_v19 = vld [vmem:[#allocation88_spill] sm:$0xff] }
 0x17a   :  { %1105 = vmatprep.mubr.f32.mxu1 %v827_v18  ;;  %v9930_v18 = vld [vmem:[#allocation89_spill] sm:$0xff] }
 0x17b   :  { %5626 = vmatpush1.bf16.msra.mxu0 %v9920_v33  ;;  %v9931_v33 = vld [vmem:[#allocation90_spill] sm:$0xff] }
 0x17c   :  { %5754 = vmatpush1.bf16.msra.mxu1 %v9921_v20  ;;  %5628 = vmatprep.subr.bf16.mxu0 %v9922_v41  ;;  %v9932_v20 = vld [vmem:[#allocation91_spill] sm:$0xff]  ;;  %v9933_v41 = vld [vmem:[#allocation92_spill] sm:$0xff] }
 0x17d   :  { %5756 = vmatprep.subr.bf16.mxu1 %v9923_v59  ;;  %v9934_v59 = vld [vmem:[#allocation93_spill] sm:$0xff] }
 0x17f   :  { %5630 = vmatpush1.bf16.msra.mxu0 %v9924_v42  ;;  %v9935_v42 = vld [vmem:[#allocation94_spill] sm:$0xff] }
 0x180   :  { %5758 = vmatpush1.bf16.msra.mxu1 %v9925_v4  ;;  %5632 = vmatprep.subr.bf16.mxu0 %v9926_v35  ;;  %v9936_v4 = vld [vmem:[#allocation95_spill] sm:$0xff]  ;;  %v9937_v35 = vld [vmem:[#allocation96_spill] sm:$0xff] }
 0x181   :  { %5760 = vmatprep.subr.bf16.mxu1 %v9927_v40  ;;  %v9938_v40 = vld [vmem:[#allocation97_spill] sm:$0xff] }
 0x183   :  { %5634 = vmatpush1.bf16.msra.mxu0 %v9928_v32  ;;  %v9939_v32 = vld [vmem:[#allocation98_spill] sm:$0xff] }
 0x184   :  { %5762 = vmatpush1.bf16.msra.mxu1 %v9929_v19  ;;  %5636 = vmatprep.subr.bf16.mxu0 %v9930_v18  ;;  %v9940_v19 = vld [vmem:[#allocation105_spill] sm:$0xff] }
 0x185   :  { %5764 = vmatprep.subr.bf16.mxu1 %v9931_v33  ;;  %v778_v18 = vmul.f32 %v9940_v19, %v9940_v19  ;;  %v9941_v33 = vld [vmem:[#allocation106_spill] sm:$0xff] }
 0x187   :  { %5638 = vmatpush1.bf16.msra.mxu0 %v9932_v20  ;;  %v782_v20 = vmul.f32 %v9941_v33, %v9941_v33 }
 0x188   :  { %5766 = vmatpush1.bf16.msra.mxu1 %v9933_v41  ;;  %5640 = vmatprep.subr.bf16.mxu0 %v9934_v59  ;;  %v9943_v41 = vld [vmem:[#allocation100_spill] sm:$0xff]  ;;  %v9944_v59 = vld [vmem:[#allocation101_spill] sm:$0xff] }
 0x189   :  { %5768 = vmatprep.subr.bf16.mxu1 %v9935_v42  ;;  %v9945_v42 = vld [vmem:[#allocation103_spill] sm:$0xff] }
 0x18b   :  { %5642 = vmatpush1.bf16.msra.mxu0 %v9936_v4  ;;  %v9946_v4 = vld [vmem:[#allocation107_spill] sm:$0xff] }
 0x18c   :  { %5770 = vmatpush1.bf16.msra.mxu1 %v9937_v35  ;;  %5644 = vmatprep.subr.bf16.mxu0 %v9938_v40  ;;  %v786_v35 = vmul.f32 %v8403_v57, %v8403_v57  ;;  %v810_v40 = vadd.f32 %v782_v20, %v778_v18  ;;  %v9953_v18 = vld [vmem:[#allocation115_spill] sm:$0xff] }
 0x18d   :  { %5772 = vmatprep.subr.bf16.mxu1 %v9939_v32  ;;  %v9947_v32 = vld [vmem:[#allocation108_spill] sm:$0xff] }
 0x18f   :  { %5646 = vmatpush1.bf16.msra.mxu0 %v9942_v49  ;;  %v790_v49 = vmul.f32 %v8424_v2, %v8424_v2 }
 0x190   :  { %5774 = vmatpush1.bf16.msra.mxu1 %v9943_v41  ;;  %5648 = vmatprep.subr.bf16.mxu0 %v9944_v59  ;;  %v811_v41 = vadd.f32 %v810_v40, %v786_v35  ;;  %v9950_v59 = vld [vmem:[#allocation112_spill] sm:$0xff]  ;;  %v9957_v35 = vld [vmem:[#allocation121_spill] sm:$0xff] }
 0x191   :  { %5776 = vmatprep.subr.bf16.mxu1 %v9945_v42  ;;  %v9951_v42 = vld [vmem:[#allocation113_spill] sm:$0xff]  ;;  %v9956_v40 = vld [vmem:[#allocation120_spill] sm:$0xff] }
 0x192   :  { %v812_v20 = vadd.f32 %v811_v41, %v790_v49  ;;  %v9960_v41 = vld [vmem:[#allocation124_spill] sm:$0xff]  ;;  %v9961_v49 = vld [vmem:[#allocation125_spill] sm:$0xff] }
 0x193   :  { %5650 = vmatpush1.bf16.msra.mxu0 %v9946_v4  ;;  %v1141_v4 = vlaneseq }
 0x194   :  { %5778 = vmatpush1.bf16.msra.mxu1 %v9947_v32  ;;  %5652 = vmatprep.subr.bf16.mxu0 %v9948_v58  ;;  %v9954_v32 = vld [vmem:[#allocation116_spill] sm:$0xff]  ;;  %v9955_v58 = vld [vmem:[#allocation117_spill] sm:$0xff] }
 0x195   :  { %5780 = vmatprep.subr.bf16.mxu1 %v8396_v10  ;;  %v813_v10 = vrot.slane %v812_v20, 4 }
 0x197   :  { %5654 = vmatpush1.bf16.msra.mxu0 %v9949_v46 }
 0x198   :  { %5782 = vmatpush1.bf16.msra.mxu1 %v9950_v59  ;;  %5656 = vmatprep.subr.bf16.mxu0 %v9951_v42  ;;  %v9958_v59 = vld [vmem:[#allocation122_spill] sm:$0xff]  ;;  %v814_v42 = vadd.f32 %v813_v10, %v812_v20 }
 0x199   :  { %5784 = vmatprep.subr.bf16.mxu1 %v9952_v9  ;;  %v9959_v9 = vld [vmem:[#allocation123_spill] sm:$0xff] }
 0x19b   :  { %5658 = vmatpush1.bf16.msra.mxu0 %v9953_v18  ;;  %v9964_v18 = vld [vmem:[#allocation128_spill] sm:$0xff] }
 0x19c   :  { %5786 = vmatpush1.bf16.msra.mxu1 %v9954_v32  ;;  %5660 = vmatprep.subr.bf16.mxu0 %v9955_v58  ;;  %v9962_v32 = vld [vmem:[#allocation126_spill] sm:$0xff]  ;;  %v815_v58 = vrot.slane %v814_v42, 2 }
 0x19d   :  { %5788 = vmatprep.subr.bf16.mxu1 %v8437_v31  ;;  %v9963_v31 = vld [vmem:[#allocation127_spill] sm:$0xff] }
 0x19f   :  { %5662 = vmatpush1.bf16.msra.mxu0 %v8443_v54 }
 0x1a0   :  { %5790 = vmatpush1.bf16.msra.mxu1 %v9956_v40  ;;  %5664 = vmatprep.subr.bf16.mxu0 %v9957_v35  ;;  %v9965_v40 = vld [vmem:[#allocation130_spill] sm:$0xff]  ;;  %v816_v35 = vadd.f32 %v815_v58, %v814_v42 }
 0x1a1   :  { %5792 = vmatprep.subr.bf16.mxu1 %v9958_v59  ;;  %v9966_v59 = vld [vmem:[#allocation131_spill] sm:$0xff] }
 0x1a2   :  { %v817_v10 = vrot.slane %v816_v35, 1 }
 0x1a3   :  { %5666 = vmatpush1.bf16.msra.mxu0 %v9959_v9 }
 0x1a4   :  { %5794 = vmatpush1.bf16.msra.mxu1 %v9960_v41  ;;  %5668 = vmatprep.subr.bf16.mxu0 %v9961_v49  ;;  %v818_v20 = vadd.f32 %v817_v10, %v816_v35 }
 0x1a5   :  { %5796 = vmatprep.subr.bf16.mxu1 %v9962_v32 }
 0x1a7   :  { %5670 = vmatpush1.bf16.msra.mxu0 %v9963_v31 }
 0x1a8   :  { %5798 = vmatpush1.bf16.msra.mxu1 %v9964_v18  ;;  %5672 = vmatprep.subr.bf16.mxu0 %v8473_v53 }
 0x1a9   :  { %5800 = vmatprep.subr.bf16.mxu1 %v9965_v40 }
 0x1ab   :  { %5674 = vmatpush1.bf16.msra.mxu0 %v9966_v59 }
 0x1ac   :  { %5802 = vmatpush1.bf16.msra.mxu1 %v8483_v47  ;;  %5676 = vmatprep.subr.bf16.mxu0 %v8485_v37  ;;  %v9721_v47 = vmov 0.0  }
 0x1ad   :  { %5804 = vmatprep.subr.bf16.mxu1 %v8488_v27 }
 0x1af   :  { %5678 = vmatpush1.bf16.msra.mxu0 %v8491_v28 }
 0x1b0   :  { %5806 = vmatpush1.bf16.msra.mxu1 %v8495_v29  ;;  %5680 = vmatprep.subr.bf16.mxu0 %v8497_v60 }
 0x1b1   :  { %5808 = vmatprep.subr.bf16.mxu1 %v8500_v45 }
 0x1b3   :  { %5682 = vmatpush1.bf16.msra.mxu0 %v8503_v55 }
 0x1b4   :  { %5810 = vmatpush1.bf16.msra.mxu1 %v8507_v44 }
 0x1b6   :  { %964 = vmatmul.mubr.f32.vlgmr.msra.gmra.mrb[2].mxu0 %v818_v20 }
 0x1b7   :  { %1106 = vmatmul.mubr.f32.vlgmr.msra.gmra.mrb[2].mxu1 %v818_v20  ;;  %1352 = vmatprep.mubr.f32.mxu0 %v9721_v47 }
 0x1b8   :  { %1441 = vmatprep.mubr.f32.mxu1 %v9721_v47 }
 0x209   :  { %v625_v58 = vpop.f32.mrb[0].mxu0 }
 0x20a   :  { %v767_v42 = vpop.f32.mrb[0].mxu1  ;;  %v627_v37 = vpop.f32.mrb[1].mxu0  ;;  %v772_v29 = vmul.f32 0.001953125, %v625_v58 }
 0x20b   :  { %v769_v27 = vpop.f32.mrb[1].mxu1  ;;  %v774_v60 = vmul.f32 0.001953125, %v767_v42  ;;  %v773_v28 = vmul.f32 0.001953125, %v627_v37 }
 0x20c   :  { %v775_v45 = vmul.f32 0.001953125, %v769_v27  ;;  %v1116_v10 = vmul.f32 %v772_v29, %v772_v29 }
 0x20d   :  { %v1118_v40 = vmul.f32 %v774_v60, %v774_v60  ;;  %v1117_v20 = vmul.f32 %v773_v28, %v773_v28 }
 0x20e   :  { %v1119_v32 = vmul.f32 %v775_v45, %v775_v45 }
 0x289   :  { %v965_v35 = vpop.f32.mrb[2].mxu0 }
 0x28a   :  { %v1112_v55 = vmul.f32 0.001953125, %v965_v35  ;;  %v1107_v59 = vpop.f32.mrb[2].mxu1  ;;  %v967_v44 = vpop.f32.mrb[3].mxu0  ;;  %v7834_v35 = vmov 1966171168  }
 0x28b   :  { %v1114_v53 = vmul.f32 0.001953125, %v1107_v59  ;;  %v1113_v18 = vmul.f32 0.001953125, %v967_v44  ;;  %v1109_v31 = vpop.f32.mrb[3].mxu1  ;;  %v1139_v46 = vunpack.c.l.s4 %v7834_v35  ;;  %v1142_v44 = vshrl.u32 %v1141_v4, 7 }
 0x28c   :  { %v1120_v49 = vsub.f32 %v1112_v55, %v1116_v10  ;;  %v1115_v41 = vmul.f32 0.001953125, %v1109_v31 }
 0x28d   :  { %v1122_v9 = vsub.f32 %v1114_v53, %v1118_v40  ;;  %v1121_v54 = vsub.f32 %v1113_v18, %v1117_v20  ;;  %v1140_v59 = vunpack.c.0.s8 %v1139_v46  ;;  %v178_v40 = vld [vmem:[#allocation9] sm:$0xf]  ;;  %v8673_v46 = vsub.s32 2, %v1142_v44 }
 0x28e   :  { %v1124_v47 = vadd.f32 1e-05, %v1120_v49  ;;  %v1123_v58 = vsub.f32 %v1115_v41, %v1119_v32  ;;  %v8670_v41 = vsub.s32 0, %v1142_v44  ;;  %v8675_v4 = vsub.s32 3, %v1142_v44 }
 0x28f   :  { %v1126_v42 = vadd.f32 1e-05, %v1122_v9  ;;  %v1125_v37 = vadd.f32 1e-05, %v1121_v54  ;;  %v8666_v55 = vsub.s32 %v1140_v59, %v1142_v44  ;;  %9969 = vst [vmem:[#allocation59_spill] sm:$0xff] %v8673_v46  ;;  %v8677_v10 = vsub.s32 1, %v1142_v44 }
 0x290   :  { %7555 = vrsqrt.f32 %v1124_v47  ;;  %v1127_v27 = vadd.f32 1e-05, %v1123_v58  ;;  %9968 = vst [vmem:[#allocation102_spill] sm:$0xff] %v8670_v41  ;;  %9970 = vst [vmem:[#allocation104_spill] sm:$0xff] %v8675_v4 }
 0x291   :  { %7557 = vrsqrt.f32 %v1126_v42  ;;  %9967 = vst [vmem:[#allocation57_spill] sm:$0xff] %v8666_v55  ;;  %9971 = vst [vmem:[#allocation105_spill] sm:$0xff] %v8677_v10 }
 0x292   :  { %7559 = vrsqrt.f32 %v1125_v37 }
 0x293   :  { %7561 = vrsqrt.f32 %v1127_v27 }
 0x29a   :  { %v7556_v11 = vpop.eup %7555 }
 0x29b   :  { %v7558_v23 = vpop.eup %7557 }
 0x29c   :  { %v7560_v31 = vpop.eup %7559 }
 0x29d   :  { %v7562_v53 = vpop.eup %7561  ;;  %v1136_v18 = vcombine.low %v7556_v11, %v7560_v31 }
 0x29e   :  { %v1137_v32 = vcombine.low %v7558_v23, %v7562_v53 }
 0x29f   :  { %v1144_v54 = vrot.slane %v1136_v18, %v8666_v55 }
 0x2a0   :  { %v1151_v47 = vrot.slane %v1137_v32, %v8666_v55 }
 0x2a2   :  { %v1152_v9 = vcombine.low %v1144_v54, %v1151_v47  ;;  %v179_v54 = vld [vmem:[#allocation10] sm:$0xf] }
 0x2a4   :  { %v1159_v49 = vrot.slane %v1152_v9, %v8666_v55  ;;  %v9972_v9 = vld [vmem:[#allocation49_spill] sm:$0xff] }
 0x2a6   :  { %v1161_v20 = vmul.f32 %v1159_v49, %v178_v40  ;;  %v9973_v49 = vld [vmem:[#allocation51_spill] sm:$0xff] }
 0x2a8   :  { %v1166_v11 = vrot.slane %v1161_v20, %v8670_v41  ;;  %v1174_v23 = vrot.slane %v1161_v20, %v8673_v46  ;;  %v1178_v58 = vrot.slane %v1161_v20, %v8675_v4  ;;  %v1170_v42 = vrot.slane %v1161_v20, %v8677_v10 }
 0x2aa   :  { %v1183_v37 = vmul.f32 %v1166_v11, %v772_v29  ;;  %v1184_v27 = vmul.f32 %v1170_v42, %v773_v28  ;;  %v1185_v35 = vmul.f32 %v1174_v23, %v774_v60  ;;  %v1186_v59 = vmul.f32 %v1178_v58, %v775_v45 }
 0x2ab   :  { %v1218_v40 = vmul.f32 %v1170_v42, %v9972_v9  ;;  %v1222_v15 = vmul.f32 %v1170_v42, %v9973_v49  ;;  %v1220_v20 = vmul.f32 %v1178_v58, %v8359_v1  ;;  %v1224_v28 = vmul.f32 %v1178_v58, %v8361_v6 }
 0x2ac   :  { %v1191_v31 = vcombine.low %v1183_v37, %v1184_v27  ;;  %v1192_v53 = vcombine.low %v1185_v35, %v1186_v59  ;;  %v1217_v29 = vmul.f32 %v1166_v11, %v8204_v13  ;;  %v1221_v45 = vmul.f32 %v1166_v11, %v8206_v22  ;;  %v9974_v35 = vld [vmem:[#allocation52_spill] sm:$0xff] }
 0x2ad   :  { %v1219_v37 = vmul.f32 %v1174_v23, %v9940_v19  ;;  %v1223_v27 = vmul.f32 %v1174_v23, %v9941_v33  ;;  %v1226_v59 = vmul.f32 %v1170_v42, %v9974_v35  ;;  %v1225_v19 = vmul.f32 %v1166_v11, %v9876_v24 }
 0x2ae   :  { %v1199_v18 = vrot.slane %v1191_v31, %v8666_v55  ;;  %v1206_v44 = vrot.slane %v1192_v53, %v8666_v55  ;;  %v9975_v31 = vld [vmem:[#allocation56_spill] sm:$0xff]  ;;  %v1229_v33 = vmul.f32 %v1166_v11, %v9882_v48 }
 0x2af   :  { %v1230_v53 = vmul.f32 %v1170_v42, %v9975_v31  ;;  %v1231_v42 = vmul.f32 %v1174_v23, %v8424_v2 }
 0x2b0   :  { %v1207_v32 = vcombine.low %v1199_v18, %v1206_v44  ;;  %v1228_v18 = vmul.f32 %v1178_v58, %v9881_v61  ;;  %v1232_v44 = vmul.f32 %v1178_v58, %v9887_v36 }
 0x2b2   :  { %v1214_v47 = vrot.slane %v1207_v32, %v8666_v55  ;;  %v1227_v32 = vmul.f32 %v1174_v23, %v8403_v57  ;;  %v1469_v23 = vld [vmem:[#allocation6 + $0x18] sm:$0xff] }
 0x2b4   :  { %v1216_v60 = vsub.f32 %v179_v54, %v1214_v47 }
 0x2b6   :  { %v1241_v1 = vrot.slane %v1216_v60, %v8677_v10  ;;  %v1249_v6 = vrot.slane %v1216_v60, %v8675_v4  ;;  %v1237_v13 = vrot.slane %v1216_v60, %v8670_v41  ;;  %v1245_v22 = vrot.slane %v1216_v60, %v8673_v46  ;;  %v1467_v46 = vld [vmem:[#allocation6 + $0x8] sm:$0xff] }
 0x2b7   :  { %v1635_v10 = vld [vmem:[#allocation6 + $0x548] sm:$0xff] }
 0x2b8   :  { %v1255_v54 = vadd.f32 %v1241_v1, %v1218_v40  ;;  %v1259_v61 = vadd.f32 %v1241_v1, %v1222_v15  ;;  %v1257_v47 = vadd.f32 %v1249_v6, %v1220_v20  ;;  %v1261_v36 = vadd.f32 %v1249_v6, %v1224_v28  ;;  %v1471_v15 = vld [vmem:[#allocation6 + $0x28] sm:$0xff]  ;;  %v1473_v40 = vld [vmem:[#allocation6 + $0x38] sm:$0xff] }
 0x2b9   :  { %v1254_v58 = vadd.f32 %v1237_v13, %v1217_v29  ;;  %v1258_v9 = vadd.f32 %v1237_v13, %v1221_v45  ;;  %v1256_v49 = vadd.f32 %v1245_v22, %v1219_v37  ;;  %v1260_v35 = vadd.f32 %v1245_v22, %v1223_v27 }
 0x2ba   :  { %v8706_v31 = vpack.c.bf16 %v1259_v61, %v1255_v54  ;;  %v8708_v55 = vpack.c.bf16 %v1261_v36, %v1257_v47  ;;  %v1263_v60 = vadd.f32 %v1241_v1, %v1226_v59  ;;  %v1267_v24 = vadd.f32 %v1241_v1, %v1230_v53  ;;  %v1470_v1 = vld [vmem:[#allocation6 + $0x20] sm:$0xff]  ;;  %v1479_v54 = vld [vmem:[#allocation6 + $0x68] sm:$0xff]  ;;  %v1477_v61 = vld [vmem:[#allocation6 + $0x58] sm:$0xff] }
 0x2bb   :  { %v8710_v48 = vpack.c.bf16 %v1258_v9, %v1254_v58  ;;  %v8712_v57 = vpack.c.bf16 %v1260_v35, %v1256_v49  ;;  %v1265_v2 = vadd.f32 %v1249_v6, %v1228_v18  ;;  %v1269_v11 = vadd.f32 %v1249_v6, %v1232_v44  ;;  %v1466_v44 = vld [vmem:[#allocation6] sm:$0xff]  ;;  %v1481_v47 = vld [vmem:[#allocation6 + $0x78] sm:$0xff]  ;;  %v1476_v49 = vld [vmem:[#allocation6 + $0x50] sm:$0xff] }
 0x2bc   :  { %5812 = vmatprep.subr.bf16.mxu0 %v8706_v31  ;;  %5820 = vmatprep.subr.bf16.mxu1 %v8708_v55  ;;  %v8716_v20 = vpack.c.bf16 %v1267_v24, %v1263_v60  ;;  %v1262_v28 = vadd.f32 %v1237_v13, %v1225_v19  ;;  %v1266_v29 = vadd.f32 %v1237_v13, %v1229_v33  ;;  %v1468_v13 = vld [vmem:[#allocation6 + $0x10] sm:$0xff]  ;;  %v1475_v33 = vld [vmem:[#allocation6 + $0x48] sm:$0xff]  ;;  %v1478_v36 = vld [vmem:[#allocation6 + $0x60] sm:$0xff] }
 0x2bd   :  { %5814 = vmatpush1.bf16.msra.mxu0 %v8710_v48  ;;  %5822 = vmatpush1.bf16.msra.mxu1 %v8712_v57  ;;  %v8720_v45 = vpack.c.bf16 %v1269_v11, %v1265_v2  ;;  %v1264_v37 = vadd.f32 %v1245_v22, %v1227_v32  ;;  %v1268_v27 = vadd.f32 %v1245_v22, %v1231_v42  ;;  %v1472_v19 = vld [vmem:[#allocation6 + $0x30] sm:$0xff]  ;;  %v1271_v22 = vld [vmem:[#allocation4] sm:$0xff]  ;;  %v1483_v60 = vld [vmem:[#allocation6 + $0x88] sm:$0xff] }
 0x2be   :  { %5816 = vmatprep.subr.bf16.mxu0 %v8716_v20  ;;  %v8723_v59 = vpack.c.bf16 %v1266_v29, %v1262_v28  ;;  %v5827_v53 = vpack.c.bf16 %v1471_v15, %v1467_v46  ;;  %v5955_v18 = vpack.c.bf16 %v1473_v40, %v1469_v23  ;;  %v5829_v46 = vpack.c.bf16 %v1470_v1, %v1466_v44  ;;  %v1474_v42 = vld [vmem:[#allocation6 + $0x40] sm:$0xff]  ;;  %v1480_v35 = vld [vmem:[#allocation6 + $0x70] sm:$0xff]  ;;  %v1487_v24 = vld [vmem:[#allocation6 + $0xa8] sm:$0xff] }
 0x2bf   :  { %5824 = vmatprep.subr.bf16.mxu1 %v8720_v45  ;;  %v8726_v6 = vpack.c.bf16 %v1268_v27, %v1264_v37  ;;  %v5957_v32 = vpack.c.bf16 %v1472_v19, %v1468_v13  ;;  %v5831_v58 = vpack.c.bf16 %v1479_v54, %v1475_v33  ;;  %v5959_v9 = vpack.c.bf16 %v1481_v47, %v1477_v61  ;;  %v1485_v2 = vld [vmem:[#allocation6 + $0x98] sm:$0xff]  ;;  %v1272_v23 = vld [vmem:[#allocation4 + $0x8] sm:$0xff]  ;;  %v1482_v29 = vld [vmem:[#allocation6 + $0x80] sm:$0xff] }
 0x2c0   :  { %v1489_v11 = vld [vmem:[#allocation6 + $0xb8] sm:$0xff]  ;;  %v9976_v15 = vmov 0.0   ;;  %v5833_v40 = vpack.c.bf16 %v1478_v36, %v1474_v42  ;;  %v5961_v28 = vpack.c.bf16 %v1480_v35, %v1476_v49  ;;  %v1486_v37 = vld [vmem:[#allocation6 + $0xa0] sm:$0xff]  ;;  %v5835_v27 = vpack.c.bf16 %v1487_v24, %v1483_v60  ;;  %v1488_v44 = vld [vmem:[#allocation6 + $0xb0] sm:$0xff] }
 0x2c1   :  { %5818 = vmatpush1.bf16.msra.mxu0 %v8723_v59  ;;  %5826 = vmatpush1.bf16.msra.mxu1 %v8726_v6  ;;  %v1491_v1 = vld [vmem:[#allocation6 + $0xc8] sm:$0xff]  ;;  %v1493_v19 = vld [vmem:[#allocation6 + $0xd8] sm:$0xff]  ;;  %v1273_v54 = vld [vmem:[#allocation4 + $0x10] sm:$0xff]  ;;  %v5837_v61 = vpack.c.bf16 %v1486_v37, %v1482_v29 }
 0x2c2   :  { %5828 = vmatprep.subr.bf16.mxu0 %v5827_v53  ;;  %5956 = vmatprep.subr.bf16.mxu1 %v5955_v18  ;;  %v5963_v53 = vpack.c.bf16 %v1489_v11, %v1485_v2  ;;  %v1484_v18 = vld [vmem:[#allocation6 + $0x90] sm:$0xff]  ;;  %v1495_v13 = vld [vmem:[#allocation6 + $0xe8] sm:$0xff]  ;;  %v1497_v33 = vld [vmem:[#allocation6 + $0xf8] sm:$0xff] }
 0x2c3   :  { %v5965_v47 = vpack.c.bf16 %v1488_v44, %v1484_v18  ;;  %v5967_v42 = vpack.c.bf16 %v1497_v33, %v1493_v19  ;;  %v1492_v36 = vld [vmem:[#allocation6 + $0xd0] sm:$0xff]  ;;  %v1503_v49 = vld [vmem:[#allocation6 + $0x128] sm:$0xff]  ;;  %v1501_v35 = vld [vmem:[#allocation6 + $0x118] sm:$0xff] }
 0x2c4   :  { %5275 = vmatmul.mubr.msk.f32.vlgmr.msra.gmra.mrb[4].mxu0 %vm1275_vm0, %v1271_v22  ;;  %5279 = vmatmul.mubr.msk.f32.vlgmr.msra.gmra.mrb[4].mxu1 %vm1275_vm0, %v1271_v22  ;;  %v1490_v22 = vld [vmem:[#allocation6 + $0xc0] sm:$0xff]  ;;  %v1505_v60 = vld [vmem:[#allocation6 + $0x138] sm:$0xff]  ;;  %v1500_v37 = vld [vmem:[#allocation6 + $0x110] sm:$0xff] }
 0x2c5   :  { %1358 = vmatprep.mubr.f32.mxu0 %v9976_v15  ;;  %1447 = vmatprep.mubr.f32.mxu1 %v9976_v15  ;;  %v1274_v24 = vld [vmem:[#allocation4 + $0x18] sm:$0xff]  ;;  %v5971_v29 = vpack.c.bf16 %v1505_v60, %v1501_v35  ;;  %v1511_v18 = vld [vmem:[#allocation6 + $0x168] sm:$0xff]  ;;  %v1506_v33 = vld [vmem:[#allocation6 + $0x140] sm:$0xff] }
 0x2c6   :  { %5830 = vmatpush1.bf16.msra.mxu0 %v5829_v46  ;;  %5958 = vmatpush1.bf16.msra.mxu1 %v5957_v32  ;;  %v1494_v46 = vld [vmem:[#allocation6 + $0xe0] sm:$0xff]  ;;  %v5839_v32 = vpack.c.bf16 %v1495_v13, %v1491_v1  ;;  %v1509_v44 = vld [vmem:[#allocation6 + $0x158] sm:$0xff] }
 0x2c7   :  { %5832 = vmatprep.subr.bf16.mxu0 %v5831_v58  ;;  %5960 = vmatprep.subr.bf16.mxu1 %v5959_v9  ;;  %v1496_v58 = vld [vmem:[#allocation6 + $0xf0] sm:$0xff]  ;;  %v1499_v9 = vld [vmem:[#allocation6 + $0x108] sm:$0xff]  ;;  %v5841_v2 = vpack.c.bf16 %v1494_v46, %v1490_v22  ;;  %v1513_v1 = vld [vmem:[#allocation6 + $0x178] sm:$0xff] }
 0x2c8   :  { %5276 = vmatmul.mubr.msk.f32.gmra.mrb[6].mxu0 %vm1275_vm0, %v1272_v23  ;;  %5280 = vmatmul.mubr.msk.f32.gmra.mrb[6].mxu1 %vm1275_vm0, %v1272_v23  ;;  %v5969_v11 = vpack.c.bf16 %v1496_v58, %v1492_v36  ;;  %v1498_v23 = vld [vmem:[#allocation6 + $0x100] sm:$0xff]  ;;  %v1508_v22 = vld [vmem:[#allocation6 + $0x150] sm:$0xff]  ;;  %v1517_v36 = vld [vmem:[#allocation6 + $0x198] sm:$0xff] }
 0x2c9   :  { %1364 = vmatprep.mubr.f32.mxu0 %v9976_v15  ;;  %1453 = vmatprep.mubr.f32.mxu1 %v9976_v15  ;;  %v1512_v46 = vld [vmem:[#allocation6 + $0x170] sm:$0xff]  ;;  %v1521_v58 = vld [vmem:[#allocation6 + $0x1b8] sm:$0xff]  ;;  %v1514_v35 = vld [vmem:[#allocation6 + $0x180] sm:$0xff] }
 0x2ca   :  { %5834 = vmatpush1.bf16.msra.mxu0 %v5833_v40  ;;  %5962 = vmatpush1.bf16.msra.mxu1 %v5961_v28  ;;  %v1502_v40 = vld [vmem:[#allocation6 + $0x120] sm:$0xff]  ;;  %v5843_v28 = vpack.c.bf16 %v1503_v49, %v1499_v9  ;;  %v5977_v49 = vpack.c.bf16 %v1512_v46, %v1508_v22  ;;  %v1537_v22 = vld [vmem:[#allocation6 + $0x238] sm:$0xff] }
 0x2cb   :  { %5836 = vmatprep.subr.bf16.mxu0 %v5835_v27  ;;  %5964 = vmatprep.subr.bf16.mxu1 %v5963_v53  ;;  %v1504_v27 = vld [vmem:[#allocation6 + $0x130] sm:$0xff]  ;;  %v1507_v53 = vld [vmem:[#allocation6 + $0x148] sm:$0xff]  ;;  %v5845_v13 = vpack.c.bf16 %v1502_v40, %v1498_v23  ;;  %v1518_v60 = vld [vmem:[#allocation6 + $0x1a0] sm:$0xff] }
 0x2cc   :  { %5277 = vmatmul.mubr.msk.f32.gmra.mrb[8].mxu0 %vm1275_vm0, %v1273_v54  ;;  %5281 = vmatmul.mubr.msk.f32.gmra.mrb[8].mxu1 %vm1275_vm0, %v1273_v54  ;;  %v5973_v19 = vpack.c.bf16 %v1504_v27, %v1500_v37  ;;  %v1510_v54 = vld [vmem:[#allocation6 + $0x160] sm:$0xff]  ;;  %v1520_v23 = vld [vmem:[#allocation6 + $0x1b0] sm:$0xff]  ;;  %v1523_v40 = vld [vmem:[#allocation6 + $0x1c8] sm:$0xff]  ;;  %v5853_v27 = vpack.c.bf16 %v1518_v60, %v1514_v35 }
 0x2cd   :  { %1370 = vmatprep.mubr.f32.mxu0 %v9976_v15  ;;  %1459 = vmatprep.mubr.f32.mxu1 %v9976_v15  ;;  %v5849_v9 = vpack.c.bf16 %v1510_v54, %v1506_v33  ;;  %v1529_v37 = vld [vmem:[#allocation6 + $0x1f8] sm:$0xff]  ;;  %v1528_v33 = vld [vmem:[#allocation6 + $0x1f0] sm:$0xff]  ;;  %v1531_v54 = vld [vmem:[#allocation6 + $0x208] sm:$0xff] }
 0x2ce   :  { %5838 = vmatpush1.bf16.msra.mxu0 %v5837_v61  ;;  %5966 = vmatpush1.bf16.msra.mxu1 %v5965_v47  ;;  %v5847_v61 = vpack.c.bf16 %v1511_v18, %v1507_v53  ;;  %v5975_v47 = vpack.c.bf16 %v1513_v1, %v1509_v44  ;;  %v1522_v18 = vld [vmem:[#allocation6 + $0x1c0] sm:$0xff]  ;;  %v1536_v35 = vld [vmem:[#allocation6 + $0x230] sm:$0xff]  ;;  %v1539_v60 = vld [vmem:[#allocation6 + $0x248] sm:$0xff] }
 0x2cf   :  { %5840 = vmatprep.subr.bf16.mxu0 %v5839_v32  ;;  %5968 = vmatprep.subr.bf16.mxu1 %v5967_v42  ;;  %v1515_v32 = vld [vmem:[#allocation6 + $0x188] sm:$0xff]  ;;  %v1526_v44 = vld [vmem:[#allocation6 + $0x1e0] sm:$0xff] }
 0x2d0   :  { %5278 = vmatmul.mubr.msk.f32.gmra.mrb[10].mxu0 %vm1275_vm0, %v1274_v24  ;;  %5282 = vmatmul.mubr.msk.f32.gmra.mrb[10].mxu1 %vm1275_vm0, %v1274_v24  ;;  %v1519_v42 = vld [vmem:[#allocation6 + $0x1a8] sm:$0xff]  ;;  %v5857_v46 = vpack.c.bf16 %v1526_v44, %v1522_v18  ;;  %v1544_v18 = vld [vmem:[#allocation6 + $0x270] sm:$0xff] }
 0x2d1   :  { %v5851_v24 = vpack.c.bf16 %v1519_v42, %v1515_v32  ;;  %v1530_v42 = vld [vmem:[#allocation6 + $0x200] sm:$0xff]  ;;  %v1547_v44 = vld [vmem:[#allocation6 + $0x288] sm:$0xff] }
 0x2d2   :  { %5842 = vmatpush1.bf16.msra.mxu0 %v5841_v2  ;;  %5970 = vmatpush1.bf16.msra.mxu1 %v5969_v11  ;;  %v5979_v2 = vpack.c.bf16 %v1521_v58, %v1517_v36  ;;  %v1516_v11 = vld [vmem:[#allocation6 + $0x190] sm:$0xff]  ;;  %v1534_v36 = vld [vmem:[#allocation6 + $0x220] sm:$0xff] }
 0x2d3   :  { %5844 = vmatprep.subr.bf16.mxu0 %v5843_v28  ;;  %5972 = vmatprep.subr.bf16.mxu1 %v5971_v29  ;;  %v1527_v28 = vld [vmem:[#allocation6 + $0x1e8] sm:$0xff]  ;;  %v1525_v29 = vld [vmem:[#allocation6 + $0x1d8] sm:$0xff]  ;;  %v5981_v53 = vpack.c.bf16 %v1520_v23, %v1516_v11  ;;  %v5861_v23 = vpack.c.bf16 %v1534_v36, %v1530_v42  ;;  %v1552_v42 = vld [vmem:[#allocation6 + $0x2b0] sm:$0xff] }
 0x2d4   :  { %v5855_v1 = vpack.c.bf16 %v1527_v28, %v1523_v40  ;;  %v1545_v11 = vld [vmem:[#allocation6 + $0x278] sm:$0xff]  ;;  %v1538_v28 = vld [vmem:[#allocation6 + $0x240] sm:$0xff]  ;;  %v1555_v36 = vld [vmem:[#allocation6 + $0x2c8] sm:$0xff] }
 0x2d6   :  { %5846 = vmatpush1.bf16.msra.mxu0 %v5845_v13  ;;  %5974 = vmatpush1.bf16.msra.mxu1 %v5973_v19  ;;  %v5983_v13 = vpack.c.bf16 %v1529_v37, %v1525_v29  ;;  %v1524_v19 = vld [vmem:[#allocation6 + $0x1d0] sm:$0xff]  ;;  %v1542_v29 = vld [vmem:[#allocation6 + $0x260] sm:$0xff] }
 0x2d7   :  { %5848 = vmatprep.subr.bf16.mxu0 %v5847_v61  ;;  %5976 = vmatprep.subr.bf16.mxu1 %v5975_v47  ;;  %v1535_v61 = vld [vmem:[#allocation6 + $0x228] sm:$0xff]  ;;  %v1533_v47 = vld [vmem:[#allocation6 + $0x218] sm:$0xff]  ;;  %v5985_v32 = vpack.c.bf16 %v1528_v33, %v1524_v19  ;;  %v5865_v33 = vpack.c.bf16 %v1542_v29, %v1538_v28  ;;  %v1560_v28 = vld [vmem:[#allocation6 + $0x2f0] sm:$0xff] }
 0x2d8   :  { %v5859_v58 = vpack.c.bf16 %v1535_v61, %v1531_v54  ;;  %v1553_v19 = vld [vmem:[#allocation6 + $0x2b8] sm:$0xff]  ;;  %v1546_v61 = vld [vmem:[#allocation6 + $0x280] sm:$0xff]  ;;  %v1563_v29 = vld [vmem:[#allocation6 + $0x308] sm:$0xff] }
 0x2da   :  { %5850 = vmatpush1.bf16.msra.mxu0 %v5849_v9  ;;  %5978 = vmatpush1.bf16.msra.mxu1 %v5977_v49  ;;  %v5987_v9 = vpack.c.bf16 %v1537_v22, %v1533_v47  ;;  %v1532_v49 = vld [vmem:[#allocation6 + $0x210] sm:$0xff]  ;;  %v1550_v47 = vld [vmem:[#allocation6 + $0x2a0] sm:$0xff] }
 0x2db   :  { %5852 = vmatprep.subr.bf16.mxu0 %v5851_v24  ;;  %5980 = vmatprep.subr.bf16.mxu1 %v5979_v2  ;;  %v1543_v24 = vld [vmem:[#allocation6 + $0x268] sm:$0xff]  ;;  %v1541_v2 = vld [vmem:[#allocation6 + $0x258] sm:$0xff]  ;;  %v5989_v40 = vpack.c.bf16 %v1536_v35, %v1532_v49  ;;  %v5869_v35 = vpack.c.bf16 %v1550_v47, %v1546_v61  ;;  %v1568_v61 = vld [vmem:[#allocation6 + $0x330] sm:$0xff] }
 0x2dc   :  { %v5863_v37 = vpack.c.bf16 %v1543_v24, %v1539_v60  ;;  %v1561_v49 = vld [vmem:[#allocation6 + $0x2f8] sm:$0xff]  ;;  %v1554_v24 = vld [vmem:[#allocation6 + $0x2c0] sm:$0xff]  ;;  %v1571_v47 = vld [vmem:[#allocation6 + $0x348] sm:$0xff] }
 0x2de   :  { %5854 = vmatpush1.bf16.msra.mxu0 %v5853_v27  ;;  %5982 = vmatpush1.bf16.msra.mxu1 %v5981_v53  ;;  %v5991_v27 = vpack.c.bf16 %v1545_v11, %v1541_v2  ;;  %v1540_v53 = vld [vmem:[#allocation6 + $0x250] sm:$0xff]  ;;  %v1558_v2 = vld [vmem:[#allocation6 + $0x2e0] sm:$0xff] }
 0x2df   :  { %5856 = vmatprep.subr.bf16.mxu0 %v5855_v1  ;;  %5984 = vmatprep.subr.bf16.mxu1 %v5983_v13  ;;  %v1551_v1 = vld [vmem:[#allocation6 + $0x2a8] sm:$0xff]  ;;  %v1549_v13 = vld [vmem:[#allocation6 + $0x298] sm:$0xff]  ;;  %v5993_v54 = vpack.c.bf16 %v1544_v18, %v1540_v53  ;;  %v5873_v18 = vpack.c.bf16 %v1558_v2, %v1554_v24  ;;  %v1576_v24 = vld [vmem:[#allocation6 + $0x370] sm:$0xff] }
 0x2e0   :  { %v5867_v22 = vpack.c.bf16 %v1551_v1, %v1547_v44  ;;  %v1569_v53 = vld [vmem:[#allocation6 + $0x338] sm:$0xff]  ;;  %v1562_v1 = vld [vmem:[#allocation6 + $0x300] sm:$0xff]  ;;  %v1579_v2 = vld [vmem:[#allocation6 + $0x388] sm:$0xff] }
 0x2e2   :  { %5858 = vmatpush1.bf16.msra.mxu0 %v5857_v46  ;;  %5986 = vmatpush1.bf16.msra.mxu1 %v5985_v32  ;;  %v5995_v46 = vpack.c.bf16 %v1553_v19, %v1549_v13  ;;  %v1548_v32 = vld [vmem:[#allocation6 + $0x290] sm:$0xff]  ;;  %v1566_v13 = vld [vmem:[#allocation6 + $0x320] sm:$0xff] }
 0x2e3   :  { %5860 = vmatprep.subr.bf16.mxu0 %v5859_v58  ;;  %5988 = vmatprep.subr.bf16.mxu1 %v5987_v9  ;;  %v1559_v58 = vld [vmem:[#allocation6 + $0x2e8] sm:$0xff]  ;;  %v1557_v9 = vld [vmem:[#allocation6 + $0x2d8] sm:$0xff]  ;;  %v5997_v60 = vpack.c.bf16 %v1552_v42, %v1548_v32  ;;  %v5877_v42 = vpack.c.bf16 %v1566_v13, %v1562_v1  ;;  %v1584_v1 = vld [vmem:[#allocation6 + $0x3b0] sm:$0xff] }
 0x2e4   :  { %v5871_v11 = vpack.c.bf16 %v1559_v58, %v1555_v36  ;;  %v1577_v32 = vld [vmem:[#allocation6 + $0x378] sm:$0xff]  ;;  %v1570_v58 = vld [vmem:[#allocation6 + $0x340] sm:$0xff]  ;;  %v1587_v13 = vld [vmem:[#allocation6 + $0x3c8] sm:$0xff] }
 0x2e6   :  { %5862 = vmatpush1.bf16.msra.mxu0 %v5861_v23  ;;  %5990 = vmatpush1.bf16.msra.mxu1 %v5989_v40  ;;  %v5999_v23 = vpack.c.bf16 %v1561_v49, %v1557_v9  ;;  %v1556_v40 = vld [vmem:[#allocation6 + $0x2d0] sm:$0xff]  ;;  %v1574_v9 = vld [vmem:[#allocation6 + $0x360] sm:$0xff] }
 0x2e7   :  { %5864 = vmatprep.subr.bf16.mxu0 %v5863_v37  ;;  %5992 = vmatprep.subr.bf16.mxu1 %v5991_v27  ;;  %v1567_v37 = vld [vmem:[#allocation6 + $0x328] sm:$0xff]  ;;  %v1565_v27 = vld [vmem:[#allocation6 + $0x318] sm:$0xff]  ;;  %v6001_v44 = vpack.c.bf16 %v1560_v28, %v1556_v40  ;;  %v5881_v28 = vpack.c.bf16 %v1574_v9, %v1570_v58  ;;  %v1592_v58 = vld [vmem:[#allocation6 + $0x3f0] sm:$0xff] }
 0x2e8   :  { %v5875_v19 = vpack.c.bf16 %v1567_v37, %v1563_v29  ;;  %v1585_v40 = vld [vmem:[#allocation6 + $0x3b8] sm:$0xff]  ;;  %v1578_v37 = vld [vmem:[#allocation6 + $0x380] sm:$0xff] }
 0x2ea   :  { %5866 = vmatpush1.bf16.msra.mxu0 %v5865_v33  ;;  %5994 = vmatpush1.bf16.msra.mxu1 %v5993_v54  ;;  %v6003_v33 = vpack.c.bf16 %v1569_v53, %v1565_v27  ;;  %v1564_v54 = vld [vmem:[#allocation6 + $0x310] sm:$0xff]  ;;  %v1582_v27 = vld [vmem:[#allocation6 + $0x3a0] sm:$0xff] }
 0x2eb   :  { %5868 = vmatprep.subr.bf16.mxu0 %v5867_v22  ;;  %5996 = vmatprep.subr.bf16.mxu1 %v5995_v46  ;;  %v1575_v22 = vld [vmem:[#allocation6 + $0x368] sm:$0xff]  ;;  %v1573_v46 = vld [vmem:[#allocation6 + $0x358] sm:$0xff]  ;;  %v6005_v36 = vpack.c.bf16 %v1568_v61, %v1564_v54  ;;  %v5885_v61 = vpack.c.bf16 %v1582_v27, %v1578_v37  ;;  %v1600_v37 = vld [vmem:[#allocation6 + $0x430] sm:$0xff] }
 0x2ec   :  { %v5879_v49 = vpack.c.bf16 %v1575_v22, %v1571_v47  ;;  %v1593_v54 = vld [vmem:[#allocation6 + $0x3f8] sm:$0xff]  ;;  %v1586_v22 = vld [vmem:[#allocation6 + $0x3c0] sm:$0xff]  ;;  %v1603_v27 = vld [vmem:[#allocation6 + $0x448] sm:$0xff] }
 0x2ee   :  { %5870 = vmatpush1.bf16.msra.mxu0 %v5869_v35  ;;  %5998 = vmatpush1.bf16.msra.mxu1 %v5997_v60  ;;  %v6007_v35 = vpack.c.bf16 %v1577_v32, %v1573_v46  ;;  %v1572_v60 = vld [vmem:[#allocation6 + $0x350] sm:$0xff] }
 0x2ef   :  { %5872 = vmatprep.subr.bf16.mxu0 %v5871_v11  ;;  %6000 = vmatprep.subr.bf16.mxu1 %v5999_v23  ;;  %v1583_v11 = vld [vmem:[#allocation6 + $0x3a8] sm:$0xff]  ;;  %v1581_v23 = vld [vmem:[#allocation6 + $0x398] sm:$0xff]  ;;  %v6009_v29 = vpack.c.bf16 %v1576_v24, %v1572_v60 }
 0x2f0   :  { %v5883_v53 = vpack.c.bf16 %v1583_v11, %v1579_v2  ;;  %v1599_v60 = vld [vmem:[#allocation6 + $0x428] sm:$0xff]  ;;  %v1597_v24 = vld [vmem:[#allocation6 + $0x418] sm:$0xff] }
 0x2f1   :  { %v1601_v11 = vld [vmem:[#allocation6 + $0x438] sm:$0xff] }
 0x2f2   :  { %5874 = vmatpush1.bf16.msra.mxu0 %v5873_v18  ;;  %6002 = vmatpush1.bf16.msra.mxu1 %v6001_v44  ;;  %v6011_v18 = vpack.c.bf16 %v1585_v40, %v1581_v23  ;;  %v1580_v44 = vld [vmem:[#allocation6 + $0x390] sm:$0xff]  ;;  %v6019_v23 = vpack.c.bf16 %v1601_v11, %v1597_v24  ;;  %v1594_v40 = vld [vmem:[#allocation6 + $0x400] sm:$0xff] }
 0x2f3   :  { %5876 = vmatprep.subr.bf16.mxu0 %v5875_v19  ;;  %6004 = vmatprep.subr.bf16.mxu1 %v6003_v33  ;;  %v1591_v19 = vld [vmem:[#allocation6 + $0x3e8] sm:$0xff]  ;;  %v1589_v33 = vld [vmem:[#allocation6 + $0x3d8] sm:$0xff]  ;;  %v6013_v47 = vpack.c.bf16 %v1584_v1, %v1580_v44  ;;  %v1614_v11 = vld [vmem:[#allocation6 + $0x4a0] sm:$0xff] }
 0x2f4   :  { %v5887_v46 = vpack.c.bf16 %v1591_v19, %v1587_v13  ;;  %v6015_v32 = vpack.c.bf16 %v1593_v54, %v1589_v33  ;;  %v1609_v44 = vld [vmem:[#allocation6 + $0x478] sm:$0xff]  ;;  %v1602_v33 = vld [vmem:[#allocation6 + $0x440] sm:$0xff] }
 0x2f5   :  { %v1606_v54 = vld [vmem:[#allocation6 + $0x460] sm:$0xff] }
 0x2f6   :  { %5878 = vmatpush1.bf16.msra.mxu0 %v5877_v42  ;;  %6006 = vmatpush1.bf16.msra.mxu1 %v6005_v36  ;;  %v1590_v42 = vld [vmem:[#allocation6 + $0x3e0] sm:$0xff]  ;;  %v1588_v36 = vld [vmem:[#allocation6 + $0x3d0] sm:$0xff] }
 0x2f7   :  { %5880 = vmatprep.subr.bf16.mxu0 %v5879_v49  ;;  %6008 = vmatprep.subr.bf16.mxu1 %v6007_v35  ;;  %v5889_v9 = vpack.c.bf16 %v1590_v42, %v1586_v22  ;;  %v6017_v49 = vpack.c.bf16 %v1592_v58, %v1588_v36  ;;  %v1595_v35 = vld [vmem:[#allocation6 + $0x408] sm:$0xff]  ;;  %v1608_v42 = vld [vmem:[#allocation6 + $0x470] sm:$0xff] }
 0x2f8   :  { %v5891_v2 = vpack.c.bf16 %v1599_v60, %v1595_v35  ;;  %v1611_v36 = vld [vmem:[#allocation6 + $0x488] sm:$0xff]  ;;  %v1617_v35 = vld [vmem:[#allocation6 + $0x4b8] sm:$0xff]  ;;  %v5897_v60 = vpack.c.bf16 %v1606_v54, %v1602_v33 }
 0x2fa   :  { %5882 = vmatpush1.bf16.msra.mxu0 %v5881_v28  ;;  %6010 = vmatpush1.bf16.msra.mxu1 %v6009_v29  ;;  %v1598_v28 = vld [vmem:[#allocation6 + $0x420] sm:$0xff]  ;;  %v1596_v29 = vld [vmem:[#allocation6 + $0x410] sm:$0xff] }
 0x2fb   :  { %5884 = vmatprep.subr.bf16.mxu0 %v5883_v53  ;;  %6012 = vmatprep.subr.bf16.mxu1 %v6011_v18  ;;  %v1607_v53 = vld [vmem:[#allocation6 + $0x468] sm:$0xff]  ;;  %v1605_v18 = vld [vmem:[#allocation6 + $0x458] sm:$0xff]  ;;  %v5893_v13 = vpack.c.bf16 %v1598_v28, %v1594_v40  ;;  %v6021_v19 = vpack.c.bf16 %v1600_v37, %v1596_v29  ;;  %v1612_v37 = vld [vmem:[#allocation6 + $0x490] sm:$0xff] }
 0x2fc   :  { %v5895_v22 = vpack.c.bf16 %v1607_v53, %v1603_v27  ;;  %v1616_v27 = vld [vmem:[#allocation6 + $0x4b0] sm:$0xff]  ;;  %v1619_v53 = vld [vmem:[#allocation6 + $0x4c8] sm:$0xff] }
 0x2fd   :  { %v6029_v54 = vpack.c.bf16 %v1616_v27, %v1612_v37 }
 0x2fe   :  { %5886 = vmatpush1.bf16.msra.mxu0 %v5885_v61  ;;  %6014 = vmatpush1.bf16.msra.mxu1 %v6013_v47 }
 0x2ff   :  { %5888 = vmatprep.subr.bf16.mxu0 %v5887_v46  ;;  %6016 = vmatprep.subr.bf16.mxu1 %v6015_v32  ;;  %v6023_v46 = vpack.c.bf16 %v1609_v44, %v1605_v18  ;;  %v1604_v32 = vld [vmem:[#allocation6 + $0x450] sm:$0xff] }
 0x300   :  { %v6025_v24 = vpack.c.bf16 %v1608_v42, %v1604_v32 }
 0x302   :  { %5890 = vmatpush1.bf16.msra.mxu0 %v5889_v9  ;;  %6018 = vmatpush1.bf16.msra.mxu1 %v6017_v49  ;;  %v1615_v9 = vld [vmem:[#allocation6 + $0x4a8] sm:$0xff]  ;;  %v1613_v49 = vld [vmem:[#allocation6 + $0x498] sm:$0xff] }
 0x303   :  { %5892 = vmatprep.subr.bf16.mxu0 %v5891_v2  ;;  %6020 = vmatprep.subr.bf16.mxu1 %v6019_v23  ;;  %v1610_v2 = vld [vmem:[#allocation6 + $0x480] sm:$0xff]  ;;  %v5899_v28 = vpack.c.bf16 %v1615_v9, %v1611_v36  ;;  %v6027_v29 = vpack.c.bf16 %v1617_v35, %v1613_v49  ;;  %v1620_v9 = vld [vmem:[#allocation6 + $0x4d0] sm:$0xff]  ;;  %v1627_v35 = vld [vmem:[#allocation6 + $0x508] sm:$0xff] }
 0x304   :  { %v5901_v33 = vpack.c.bf16 %v1614_v11, %v1610_v2  ;;  %v1624_v49 = vld [vmem:[#allocation6 + $0x4f0] sm:$0xff] }
 0x305   :  { %v6033_v11 = vpack.c.bf16 %v1624_v49, %v1620_v9 }
 0x397   :  { %v1354_v1 = vpop.f32.mrb[4].mxu0  ;;  %v8744_v61 = vpop.f32.mrb[4].mxu1 }
 0x398   :  { %v1356_v47 = vpop.f32.mrb[5].mxu0  ;;  %v8746_v58 = vpop.f32.mrb[5].mxu1 }
 0x399   :  { %1786 = vmatprep.mubr.f32.mxu0 %v1356_v47  ;;  %1964 = vmatprep.mubr.f32.mxu1 %v1356_v47  ;;  %v1618_v47 = vld [vmem:[#allocation6 + $0x4c0] sm:$0xff] }
 0x39a   :  { %1787 = vmatmul.mubr.f32.vlgmr.msra.gmra.mrb[12].mxu0 %v1354_v1  ;;  %1965 = vmatmul.mubr.f32.vlgmr.msra.gmra.mrb[12].mxu1 %v1354_v1  ;;  %v1623_v1 = vld [vmem:[#allocation6 + $0x4e8] sm:$0xff] }
 0x39b   :  { %5894 = vmatpush1.bf16.msra.mxu0 %v5893_v13  ;;  %6022 = vmatpush1.bf16.msra.mxu1 %v6021_v19  ;;  %v1360_v23 = vpop.f32.mrb[6].mxu0  ;;  %v8748_v40 = vpop.f32.mrb[6].mxu1  ;;  %v1621_v13 = vld [vmem:[#allocation6 + $0x4d8] sm:$0xff]  ;;  %v5903_v42 = vpack.c.bf16 %v1623_v1, %v1619_v53 }
 0x39c   :  { %5896 = vmatprep.subr.bf16.mxu0 %v5895_v22  ;;  %6024 = vmatprep.subr.bf16.mxu1 %v6023_v46  ;;  %v1362_v18 = vpop.f32.mrb[7].mxu0  ;;  %v8750_v44 = vpop.f32.mrb[7].mxu1  ;;  %v1625_v19 = vld [vmem:[#allocation6 + $0x4f8] sm:$0xff]  ;;  %v1622_v22 = vld [vmem:[#allocation6 + $0x4e0] sm:$0xff] }
 0x39d   :  { %1792 = vmatprep.mubr.f32.mxu0 %v1362_v18  ;;  %1970 = vmatprep.mubr.f32.mxu1 %v1362_v18  ;;  %v6031_v36 = vpack.c.bf16 %v1625_v19, %v1621_v13  ;;  %v5905_v2 = vpack.c.bf16 %v1622_v22, %v1618_v47  ;;  %v1628_v13 = vld [vmem:[#allocation6 + $0x510] sm:$0xff] }
 0x39e   :  { %1793 = vmatmul.mubr.f32.gmra.mrb[14].mxu0 %v1360_v23  ;;  %1971 = vmatmul.mubr.f32.gmra.mrb[14].mxu1 %v1360_v23  ;;  %v1631_v23 = vld [vmem:[#allocation6 + $0x528] sm:$0xff]  ;;  %v1632_v19 = vld [vmem:[#allocation6 + $0x530] sm:$0xff] }
 0x39f   :  { %5898 = vmatpush1.bf16.msra.mxu0 %v5897_v60  ;;  %6026 = vmatpush1.bf16.msra.mxu1 %v6025_v24  ;;  %v1366_v46 = vpop.f32.mrb[8].mxu0  ;;  %v8752_v32 = vpop.f32.mrb[8].mxu1  ;;  %v1629_v60 = vld [vmem:[#allocation6 + $0x518] sm:$0xff]  ;;  %v5907_v53 = vpack.c.bf16 %v1631_v23, %v1627_v35  ;;  %v6037_v22 = vpack.c.bf16 %v1632_v19, %v1628_v13  ;;  %v1636_v35 = vld [vmem:[#allocation6 + $0x550] sm:$0xff]  ;;  %v1655_v13 = vld [vmem:[#allocation6 + $0x5e8] sm:$0xff] }
 0x3a0   :  { %5900 = vmatprep.subr.bf16.mxu0 %v5899_v28  ;;  %6028 = vmatprep.subr.bf16.mxu1 %v6027_v29  ;;  %v1368_v4 = vpop.f32.mrb[9].mxu0  ;;  %v8754_v18 = vpop.f32.mrb[9].mxu1  ;;  %v1633_v24 = vld [vmem:[#allocation6 + $0x538] sm:$0xff]  ;;  %v1626_v28 = vld [vmem:[#allocation6 + $0x500] sm:$0xff]  ;;  %v1640_v23 = vld [vmem:[#allocation6 + $0x570] sm:$0xff] }
 0x3a1   :  { %1798 = vmatprep.mubr.f32.mxu0 %v1368_v4  ;;  %1976 = vmatprep.mubr.f32.mxu1 %v1368_v4  ;;  %v1630_v29 = vld [vmem:[#allocation6 + $0x520] sm:$0xff]  ;;  %v6035_v1 = vpack.c.bf16 %v1633_v24, %v1629_v60  ;;  %v1643_v60 = vld [vmem:[#allocation6 + $0x588] sm:$0xff]  ;;  %v1653_v19 = vld [vmem:[#allocation6 + $0x5d8] sm:$0xff] }
 0x3a2   :  { %1799 = vmatmul.mubr.f32.gmra.mrb[16].mxu0 %v1366_v46  ;;  %1977 = vmatmul.mubr.f32.gmra.mrb[16].mxu1 %v1366_v46  ;;  %v1639_v46 = vld [vmem:[#allocation6 + $0x568] sm:$0xff]  ;;  %v5909_v47 = vpack.c.bf16 %v1630_v29, %v1626_v28  ;;  %v1646_v28 = vld [vmem:[#allocation6 + $0x5a0] sm:$0xff]  ;;  %v6043_v29 = vpack.c.bf16 %v1649_v5, %v1645_v14  ;;  %v1661_v14 = vld [vmem:[#allocation6 + $0x618] sm:$0xff] }
 0x3a3   :  { %5902 = vmatpush1.bf16.msra.mxu0 %v5901_v33  ;;  %6030 = vmatpush1.bf16.msra.mxu1 %v6029_v54  ;;  %v1372_v37 = vpop.f32.mrb[10].mxu0  ;;  %v8756_v27 = vpop.f32.mrb[10].mxu1  ;;  %v1637_v33 = vld [vmem:[#allocation6 + $0x558] sm:$0xff]  ;;  %v5911_v9 = vpack.c.bf16 %v1639_v46, %v1635_v10  ;;  %v1647_v24 = vld [vmem:[#allocation6 + $0x5a8] sm:$0xff] }
 0x3a4   :  { %5904 = vmatprep.subr.bf16.mxu0 %v5903_v42  ;;  %6032 = vmatprep.subr.bf16.mxu1 %v6031_v36  ;;  %v1374_v41 = vpop.f32.mrb[11].mxu0  ;;  %v8758_v4 = vpop.f32.mrb[11].mxu1  ;;  %v1641_v54 = vld [vmem:[#allocation6 + $0x578] sm:$0xff]  ;;  %v1634_v42 = vld [vmem:[#allocation6 + $0x540] sm:$0xff]  ;;  %v5915_v10 = vpack.c.bf16 %v1647_v24, %v1643_v60  ;;  %v1663_v5 = vld [vmem:[#allocation6 + $0x628] sm:$0xff] }
 0x3a5   :  { %1804 = vmatprep.mubr.f32.mxu0 %v1374_v41  ;;  %1982 = vmatprep.mubr.f32.mxu1 %v1374_v41  ;;  %v1638_v36 = vld [vmem:[#allocation6 + $0x560] sm:$0xff]  ;;  %v6039_v49 = vpack.c.bf16 %v1641_v54, %v1637_v33  ;;  %v1657_v46 = vld [vmem:[#allocation6 + $0x5f8] sm:$0xff] }
 0x3a6   :  { %1805 = vmatmul.mubr.f32.gmra.mrb[18].mxu0 %v1372_v37  ;;  %1983 = vmatmul.mubr.f32.gmra.mrb[18].mxu1 %v1372_v37  ;;  %v5913_v41 = vpack.c.bf16 %v1638_v36, %v1634_v42  ;;  %v1644_v37 = vld [vmem:[#allocation6 + $0x590] sm:$0xff]  ;;  %v1650_v54 = vld [vmem:[#allocation6 + $0x5c0] sm:$0xff]  ;;  %v6047_v42 = vpack.c.bf16 %v1657_v46, %v1653_v19 }
 0x3a7   :  { %5906 = vmatpush1.bf16.msra.mxu0 %v5905_v2  ;;  %6034 = vmatpush1.bf16.msra.mxu1 %v6033_v11  ;;  %v6041_v2 = vpack.c.bf16 %v1640_v23, %v1636_v35  ;;  %v1642_v11 = vld [vmem:[#allocation6 + $0x580] sm:$0xff]  ;;  %v1652_v36 = vld [vmem:[#allocation6 + $0x5d0] sm:$0xff]  ;;  %v1665_v35 = vld [vmem:[#allocation6 + $0x638] sm:$0xff] }
 0x3a8   :  { %5908 = vmatprep.subr.bf16.mxu0 %v5907_v53  ;;  %6036 = vmatprep.subr.bf16.mxu1 %v6035_v1  ;;  %v1648_v53 = vld [vmem:[#allocation6 + $0x5b0] sm:$0xff]  ;;  %v1651_v1 = vld [vmem:[#allocation6 + $0x5c8] sm:$0xff]  ;;  %v5917_v33 = vpack.c.bf16 %v1646_v28, %v1642_v11  ;;  %v1658_v24 = vld [vmem:[#allocation6 + $0x600] sm:$0xff]  ;;  %v6051_v11 = vpack.c.bf16 %v1665_v35, %v1661_v14 }
 0x3a9   :  { %1875 = vmatprep.mubr.f32.mxu0 %v8746_v58  ;;  %2053 = vmatprep.mubr.f32.mxu1 %v8746_v58  ;;  %v6045_v58 = vpack.c.bf16 %v1648_v53, %v1644_v37  ;;  %v1660_v28 = vld [vmem:[#allocation6 + $0x610] sm:$0xff]  ;;  %v1671_v37 = vld [vmem:[#allocation6 + $0x668] sm:$0xff]  ;;  %v1669_v53 = vld [vmem:[#allocation6 + $0x658] sm:$0xff] }
 0x3aa   :  { %v1666_v46 = vld [vmem:[#allocation6 + $0x640] sm:$0xff] }
 0x3ab   :  { %5910 = vmatpush1.bf16.msra.mxu0 %v5909_v47  ;;  %6038 = vmatpush1.bf16.msra.mxu1 %v6037_v22  ;;  %v1654_v47 = vld [vmem:[#allocation6 + $0x5e0] sm:$0xff]  ;;  %v5919_v22 = vpack.c.bf16 %v1655_v13, %v1651_v1  ;;  %v1673_v1 = vld [vmem:[#allocation6 + $0x678] sm:$0xff] }
 0x3ac   :  { %5912 = vmatprep.subr.bf16.mxu0 %v5911_v9  ;;  %6040 = vmatprep.subr.bf16.mxu1 %v6039_v49  ;;  %v1656_v9 = vld [vmem:[#allocation6 + $0x5f0] sm:$0xff]  ;;  %v1659_v49 = vld [vmem:[#allocation6 + $0x608] sm:$0xff]  ;;  %v5921_v23 = vpack.c.bf16 %v1654_v47, %v1650_v54  ;;  %v6055_v54 = vpack.c.bf16 %v1673_v1, %v1669_v53  ;;  %v1674_v35 = vld [vmem:[#allocation6 + $0x680] sm:$0xff] }
 0x3ad   :  { %v6049_v60 = vpack.c.bf16 %v1656_v9, %v1652_v36  ;;  %v1668_v47 = vld [vmem:[#allocation6 + $0x650] sm:$0xff]  ;;  %v1679_v36 = vld [vmem:[#allocation6 + $0x6a8] sm:$0xff]  ;;  %v1677_v9 = vld [vmem:[#allocation6 + $0x698] sm:$0xff] }
 0x3ae   :  { %v1682_v1 = vld [vmem:[#allocation6 + $0x6c0] sm:$0xff] }
 0x3af   :  { %5914 = vmatpush1.bf16.msra.mxu0 %v5913_v41  ;;  %6042 = vmatpush1.bf16.msra.mxu1 %v6041_v2  ;;  %v1662_v41 = vld [vmem:[#allocation6 + $0x620] sm:$0xff]  ;;  %v5923_v2 = vpack.c.bf16 %v1663_v5, %v1659_v49  ;;  %v1681_v49 = vld [vmem:[#allocation6 + $0x6b8] sm:$0xff] }
 0x3b0   :  { %5916 = vmatprep.subr.bf16.mxu0 %v5915_v10  ;;  %6044 = vmatprep.subr.bf16.mxu1 %v6043_v29  ;;  %v1664_v10 = vld [vmem:[#allocation6 + $0x630] sm:$0xff]  ;;  %v1667_v29 = vld [vmem:[#allocation6 + $0x648] sm:$0xff]  ;;  %v5925_v13 = vpack.c.bf16 %v1662_v41, %v1658_v24  ;;  %v6059_v24 = vpack.c.bf16 %v1681_v49, %v1677_v9  ;;  %v1690_v49 = vld [vmem:[#allocation6 + $0x700] sm:$0xff] }
 0x3b1   :  { %v6053_v19 = vpack.c.bf16 %v1664_v10, %v1660_v28  ;;  %v1676_v41 = vld [vmem:[#allocation6 + $0x690] sm:$0xff]  ;;  %v1687_v28 = vld [vmem:[#allocation6 + $0x6e8] sm:$0xff]  ;;  %v1685_v10 = vld [vmem:[#allocation6 + $0x6d8] sm:$0xff] }
 0x3b3   :  { %5918 = vmatpush1.bf16.msra.mxu0 %v5917_v33  ;;  %6046 = vmatpush1.bf16.msra.mxu1 %v6045_v58  ;;  %v1670_v33 = vld [vmem:[#allocation6 + $0x660] sm:$0xff]  ;;  %v5927_v58 = vpack.c.bf16 %v1671_v37, %v1667_v29  ;;  %v1689_v29 = vld [vmem:[#allocation6 + $0x6f8] sm:$0xff] }
 0x3b4   :  { %5920 = vmatprep.subr.bf16.mxu0 %v5919_v22  ;;  %6048 = vmatprep.subr.bf16.mxu1 %v6047_v42  ;;  %v1672_v22 = vld [vmem:[#allocation6 + $0x670] sm:$0xff]  ;;  %v1675_v42 = vld [vmem:[#allocation6 + $0x688] sm:$0xff]  ;;  %v5929_v5 = vpack.c.bf16 %v1670_v33, %v1666_v46  ;;  %v6063_v46 = vpack.c.bf16 %v1689_v29, %v1685_v10  ;;  %v1698_v29 = vld [vmem:[#allocation6 + $0x740] sm:$0xff] }
 0x3b5   :  { %v6057_v14 = vpack.c.bf16 %v1672_v22, %v1668_v47  ;;  %v1684_v33 = vld [vmem:[#allocation6 + $0x6d0] sm:$0xff]  ;;  %v1695_v47 = vld [vmem:[#allocation6 + $0x728] sm:$0xff]  ;;  %v1693_v22 = vld [vmem:[#allocation6 + $0x718] sm:$0xff] }
 0x3b7   :  { %5922 = vmatpush1.bf16.msra.mxu0 %v5921_v23  ;;  %6050 = vmatpush1.bf16.msra.mxu1 %v6049_v60  ;;  %v1678_v23 = vld [vmem:[#allocation6 + $0x6a0] sm:$0xff]  ;;  %v5931_v60 = vpack.c.bf16 %v1679_v36, %v1675_v42  ;;  %v1697_v42 = vld [vmem:[#allocation6 + $0x738] sm:$0xff] }
 0x3b8   :  { %5924 = vmatprep.subr.bf16.mxu0 %v5923_v2  ;;  %6052 = vmatprep.subr.bf16.mxu1 %v6051_v11  ;;  %v1680_v2 = vld [vmem:[#allocation6 + $0x6b0] sm:$0xff]  ;;  %v1683_v11 = vld [vmem:[#allocation6 + $0x6c8] sm:$0xff]  ;;  %v5933_v37 = vpack.c.bf16 %v1678_v23, %v1674_v35  ;;  %v6067_v35 = vpack.c.bf16 %v1697_v42, %v1693_v22  ;;  %v1706_v42 = vld [vmem:[#allocation6 + $0x780] sm:$0xff] }
 0x3b9   :  { %v6061_v53 = vpack.c.bf16 %v1680_v2, %v1676_v41  ;;  %v1692_v23 = vld [vmem:[#allocation6 + $0x710] sm:$0xff]  ;;  %v1703_v41 = vld [vmem:[#allocation6 + $0x768] sm:$0xff]  ;;  %v1701_v2 = vld [vmem:[#allocation6 + $0x758] sm:$0xff] }
 0x3bb   :  { %5926 = vmatpush1.bf16.msra.mxu0 %v5925_v13  ;;  %6054 = vmatpush1.bf16.msra.mxu1 %v6053_v19  ;;  %v1686_v13 = vld [vmem:[#allocation6 + $0x6e0] sm:$0xff]  ;;  %v5935_v19 = vpack.c.bf16 %v1687_v28, %v1683_v11  ;;  %v1705_v11 = vld [vmem:[#allocation6 + $0x778] sm:$0xff] }
 0x3bc   :  { %5928 = vmatprep.subr.bf16.mxu0 %v5927_v58  ;;  %6056 = vmatprep.subr.bf16.mxu1 %v6055_v54  ;;  %v1688_v58 = vld [vmem:[#allocation6 + $0x6f0] sm:$0xff]  ;;  %v1691_v54 = vld [vmem:[#allocation6 + $0x708] sm:$0xff]  ;;  %v5937_v36 = vpack.c.bf16 %v1686_v13, %v1682_v1  ;;  %v6071_v1 = vpack.c.bf16 %v1705_v11, %v1701_v2  ;;  %v1714_v11 = vld [vmem:[#allocation6 + $0x7c0] sm:$0xff] }
 0x3bd   :  { %v6065_v9 = vpack.c.bf16 %v1688_v58, %v1684_v33  ;;  %v1700_v13 = vld [vmem:[#allocation6 + $0x750] sm:$0xff]  ;;  %v1711_v33 = vld [vmem:[#allocation6 + $0x7a8] sm:$0xff]  ;;  %v1709_v58 = vld [vmem:[#allocation6 + $0x798] sm:$0xff] }
 0x3bf   :  { %5930 = vmatpush1.bf16.msra.mxu0 %v5929_v5  ;;  %6058 = vmatpush1.bf16.msra.mxu1 %v6057_v14  ;;  %v1694_v5 = vld [vmem:[#allocation6 + $0x720] sm:$0xff]  ;;  %v5939_v14 = vpack.c.bf16 %v1695_v47, %v1691_v54  ;;  %v1713_v54 = vld [vmem:[#allocation6 + $0x7b8] sm:$0xff] }
 0x3c0   :  { %5932 = vmatprep.subr.bf16.mxu0 %v5931_v60  ;;  %6060 = vmatprep.subr.bf16.mxu1 %v6059_v24  ;;  %v1696_v60 = vld [vmem:[#allocation6 + $0x730] sm:$0xff]  ;;  %v1699_v24 = vld [vmem:[#allocation6 + $0x748] sm:$0xff]  ;;  %v5941_v28 = vpack.c.bf16 %v1694_v5, %v1690_v49  ;;  %v6075_v49 = vpack.c.bf16 %v1713_v54, %v1709_v58  ;;  %v2318_v58 = vld [vmem:[#allocation6 + $0x838] sm:$0xff] }
 0x3c1   :  { %v6069_v10 = vpack.c.bf16 %v1696_v60, %v1692_v23  ;;  %v1708_v5 = vld [vmem:[#allocation6 + $0x790] sm:$0xff]  ;;  %v1719_v23 = vld [vmem:[#allocation6 + $0x7e8] sm:$0xff]  ;;  %v1717_v60 = vld [vmem:[#allocation6 + $0x7d8] sm:$0xff] }
 0x3c3   :  { %5934 = vmatpush1.bf16.msra.mxu0 %v5933_v37  ;;  %6062 = vmatpush1.bf16.msra.mxu1 %v6061_v53  ;;  %v1702_v37 = vld [vmem:[#allocation6 + $0x760] sm:$0xff]  ;;  %v5943_v53 = vpack.c.bf16 %v1703_v41, %v1699_v24  ;;  %v1721_v24 = vld [vmem:[#allocation6 + $0x7f8] sm:$0xff] }
 0x3c4   :  { %5936 = vmatprep.subr.bf16.mxu0 %v5935_v19  ;;  %6064 = vmatprep.subr.bf16.mxu1 %v6063_v46  ;;  %v1704_v19 = vld [vmem:[#allocation6 + $0x770] sm:$0xff]  ;;  %v1707_v46 = vld [vmem:[#allocation6 + $0x788] sm:$0xff]  ;;  %v5945_v47 = vpack.c.bf16 %v1702_v37, %v1698_v29  ;;  %v1718_v29 = vld [vmem:[#allocation6 + $0x7e0] sm:$0xff] }
 0x3c5   :  { %v6073_v22 = vpack.c.bf16 %v1704_v19, %v1700_v13  ;;  %v1716_v37 = vld [vmem:[#allocation6 + $0x7d0] sm:$0xff]  ;;  %v2312_v19 = vld [vmem:[#allocation6 + $0x808] sm:$0xff] }
 0x3c7   :  { %5938 = vmatpush1.bf16.msra.mxu0 %v5937_v36  ;;  %6066 = vmatpush1.bf16.msra.mxu1 %v6065_v9  ;;  %v1710_v36 = vld [vmem:[#allocation6 + $0x7a0] sm:$0xff]  ;;  %v5947_v9 = vpack.c.bf16 %v1711_v33, %v1707_v46  ;;  %v2316_v46 = vld [vmem:[#allocation6 + $0x828] sm:$0xff]  ;;  %v2314_v33 = vld [vmem:[#allocation6 + $0x818] sm:$0xff] }
 0x3c8   :  { %5940 = vmatprep.subr.bf16.mxu0 %v5939_v14  ;;  %6068 = vmatprep.subr.bf16.mxu1 %v6067_v35  ;;  %v1712_v14 = vld [vmem:[#allocation6 + $0x7b0] sm:$0xff]  ;;  %v1715_v35 = vld [vmem:[#allocation6 + $0x7c8] sm:$0xff]  ;;  %v5949_v41 = vpack.c.bf16 %v1710_v36, %v1706_v42  ;;  %v6099_v54 = vpack.c.bf16 %v2316_v46, %v2312_v19  ;;  %v2322_v36 = vld [vmem:[#allocation6 + $0x858] sm:$0xff] }
 0x3c9   :  { %v6077_v2 = vpack.c.bf16 %v1712_v14, %v1708_v5  ;;  %v2320_v42 = vld [vmem:[#allocation6 + $0x848] sm:$0xff]  ;;  %v2323_v14 = vld [vmem:[#allocation6 + $0x860] sm:$0xff]  ;;  %v2329_v19 = vld [vmem:[#allocation6 + $0x890] sm:$0xff] }
 0x3ca   :  { %v2333_v46 = vld [vmem:[#allocation6 + $0x8b0] sm:$0xff] }
 0x3cb   :  { %5942 = vmatpush1.bf16.msra.mxu0 %v5941_v28  ;;  %6070 = vmatpush1.bf16.msra.mxu1 %v6069_v10  ;;  %v5951_v28 = vpack.c.bf16 %v1719_v23, %v1715_v35  ;;  %v6079_v10 = vpack.c.bf16 %v1721_v24, %v1717_v60  ;;  %v2321_v60 = vld [vmem:[#allocation6 + $0x850] sm:$0xff] }
 0x3cc   :  { %5944 = vmatprep.subr.bf16.mxu0 %v5943_v53  ;;  %6072 = vmatprep.subr.bf16.mxu1 %v6071_v1  ;;  %v1720_v53 = vld [vmem:[#allocation6 + $0x7f0] sm:$0xff]  ;;  %v5953_v1 = vpack.c.bf16 %v1718_v29, %v1714_v11  ;;  %v2334_v11 = vld [vmem:[#allocation6 + $0x8b8] sm:$0xff] }
 0x3cd   :  { %v6081_v13 = vpack.c.bf16 %v1720_v53, %v1716_v37  ;;  %v2325_v24 = vld [vmem:[#allocation6 + $0x870] sm:$0xff]  ;;  %v2327_v37 = vld [vmem:[#allocation6 + $0x880] sm:$0xff] }
 0x3ce   :  { %v6233_v29 = vpack.c.bf16 %v2325_v24, %v2321_v60  ;;  %v2331_v53 = vld [vmem:[#allocation6 + $0x8a0] sm:$0xff] }
 0x3cf   :  { %5946 = vmatpush1.bf16.msra.mxu0 %v5945_v47  ;;  %6074 = vmatpush1.bf16.msra.mxu1 %v6073_v22  ;;  %v6227_v47 = vpack.c.bf16 %v2318_v58, %v2314_v33  ;;  %v2317_v22 = vld [vmem:[#allocation6 + $0x830] sm:$0xff]  ;;  %v2336_v33 = vld [vmem:[#allocation6 + $0x8c8] sm:$0xff]  ;;  %v2343_v24 = vld [vmem:[#allocation6 + $0x900] sm:$0xff] }
 0x3d0   :  { %5948 = vmatprep.subr.bf16.mxu0 %v5947_v9  ;;  %6076 = vmatprep.subr.bf16.mxu1 %v6075_v49  ;;  %v2326_v9 = vld [vmem:[#allocation6 + $0x878] sm:$0xff]  ;;  %v2116_v49 = vld [vmem:[#allocation4 + $0x20] sm:$0xff]  ;;  %v2340_v58 = vld [vmem:[#allocation6 + $0x8e8] sm:$0xff] }
 0x3d1   :  { %v6231_v23 = vpack.c.bf16 %v2326_v9, %v2322_v36  ;;  %v2337_v9 = vld [vmem:[#allocation6 + $0x8d0] sm:$0xff] }
 0x3d3   :  { %5950 = vmatpush1.bf16.msra.mxu0 %v5949_v41  ;;  %6078 = vmatpush1.bf16.msra.mxu1 %v6077_v2  ;;  %v2328_v41 = vld [vmem:[#allocation6 + $0x888] sm:$0xff]  ;;  %v2330_v2 = vld [vmem:[#allocation6 + $0x898] sm:$0xff] }
 0x3d4   :  { %5952 = vmatprep.subr.bf16.mxu0 %v5951_v28  ;;  %6080 = vmatprep.subr.bf16.mxu1 %v6079_v10  ;;  %v2117_v28 = vld [vmem:[#allocation4 + $0x28] sm:$0xff] }
 0x3d7   :  { %5954 = vmatpush1.bf16.msra.mxu0 %v5953_v1  ;;  %6082 = vmatpush1.bf16.msra.mxu1 %v6081_v13  ;;  %v6235_v13 = vpack.c.bf16 %v2334_v11, %v2330_v2  ;;  %v2345_v11 = vld [vmem:[#allocation6 + $0x910] sm:$0xff] }
 0x3d8   :  { %6084 = vmatprep.subr.bf16.mxu0 %v8706_v31  ;;  %6092 = vmatprep.subr.bf16.mxu1 %v8708_v55 }
 0x3da   :  { %1876 = vmatmul.mubr.f32.vlgmr.msra.gmra.mrb[12].mxu0 %v8744_v61  ;;  %2054 = vmatmul.mubr.f32.vlgmr.msra.gmra.mrb[12].mxu1 %v8744_v61  ;;  %v2311_v61 = vld [vmem:[#allocation6 + $0x800] sm:$0xff] }
 0x3db   :  { %6086 = vmatpush1.bf16.msra.mxu0 %v8710_v48  ;;  %6094 = vmatpush1.bf16.msra.mxu1 %v8712_v57 }
 0x3dc   :  { %1881 = vmatprep.mubr.f32.mxu0 %v8750_v44  ;;  %2059 = vmatprep.mubr.f32.mxu1 %v8750_v44  ;;  %v2313_v44 = vld [vmem:[#allocation6 + $0x810] sm:$0xff] }
 0x3dd   :  { %6088 = vmatprep.subr.bf16.mxu0 %v8716_v20  ;;  %6096 = vmatprep.subr.bf16.mxu1 %v8720_v45  ;;  %v6229_v5 = vpack.c.bf16 %v2317_v22, %v2313_v44  ;;  %v6237_v44 = vpack.c.bf16 %v2333_v46, %v2329_v19  ;;  %v2335_v22 = vld [vmem:[#allocation6 + $0x8c0] sm:$0xff] }
 0x3de   :  { %1882 = vmatmul.mubr.f32.gmra.mrb[14].mxu0 %v8748_v40  ;;  %2060 = vmatmul.mubr.f32.gmra.mrb[14].mxu1 %v8748_v40  ;;  %v2315_v40 = vld [vmem:[#allocation6 + $0x820] sm:$0xff] }
 0x3df   :  { %6090 = vmatpush1.bf16.msra.mxu0 %v8723_v59  ;;  %6098 = vmatpush1.bf16.msra.mxu1 %v8726_v6  ;;  %v2351_v19 = vld [vmem:[#allocation6 + $0x940] sm:$0xff] }
 0x3e0   :  { %1887 = vmatprep.mubr.f32.mxu0 %v8754_v18  ;;  %2065 = vmatprep.mubr.f32.mxu1 %v8754_v18  ;;  %v2324_v18 = vld [vmem:[#allocation6 + $0x868] sm:$0xff]  ;;  %v2355_v46 = vld [vmem:[#allocation6 + $0x960] sm:$0xff] }
 0x3e1   :  { %6100 = vmatprep.subr.bf16.mxu0 %v6099_v54  ;;  %6228 = vmatprep.subr.bf16.mxu1 %v6227_v47  ;;  %v6103_v35 = vpack.c.bf16 %v2324_v18, %v2320_v42  ;;  %v2338_v54 = vld [vmem:[#allocation6 + $0x8d8] sm:$0xff]  ;;  %v2339_v42 = vld [vmem:[#allocation6 + $0x8e0] sm:$0xff]  ;;  %v6111_v18 = vpack.c.bf16 %v2340_v58, %v2336_v33 }
 0x3e2   :  { %1888 = vmatmul.mubr.f32.gmra.mrb[16].mxu0 %v8752_v32  ;;  %2066 = vmatmul.mubr.f32.gmra.mrb[16].mxu1 %v8752_v32  ;;  %v6101_v32 = vpack.c.bf16 %v2315_v40, %v2311_v61  ;;  %v2342_v47 = vld [vmem:[#allocation6 + $0x8f8] sm:$0xff]  ;;  %v2118_v61 = vld [vmem:[#allocation4 + $0x30] sm:$0xff]  ;;  %v6109_v40 = vpack.c.bf16 %v2331_v53, %v2327_v37 }
 0x3e3   :  { %1893 = vmatprep.mubr.f32.mxu0 %v8758_v4  ;;  %2071 = vmatprep.mubr.f32.mxu1 %v8758_v4  ;;  %v2319_v4 = vld [vmem:[#allocation6 + $0x840] sm:$0xff]  ;;  %v6239_v36 = vpack.c.bf16 %v2342_v47, %v2338_v54  ;;  %v2354_v37 = vld [vmem:[#allocation6 + $0x958] sm:$0xff]  ;;  %v2353_v54 = vld [vmem:[#allocation6 + $0x950] sm:$0xff] }
 0x3e4   :  { %v6105_v10 = vpack.c.bf16 %v2323_v14, %v2319_v4  ;;  %v2346_v4 = vld [vmem:[#allocation6 + $0x918] sm:$0xff]  ;;  %v2357_v47 = vld [vmem:[#allocation6 + $0x970] sm:$0xff] }
 0x3e5   :  { %v2350_v14 = vld [vmem:[#allocation6 + $0x938] sm:$0xff] }
 0x3e6   :  { %1894 = vmatmul.mubr.f32.gmra.mrb[18].mxu0 %v8756_v27  ;;  %2072 = vmatmul.mubr.f32.gmra.mrb[18].mxu1 %v8756_v27  ;;  %v2332_v27 = vld [vmem:[#allocation6 + $0x8a8] sm:$0xff]  ;;  %v6243_v2 = vpack.c.bf16 %v2350_v14, %v2346_v4  ;;  %v2358_v53 = vld [vmem:[#allocation6 + $0x978] sm:$0xff]  ;;  %v2365_v4 = vld [vmem:[#allocation6 + $0x9b0] sm:$0xff] }
 0x3e7   :  { %2196 = vmatprep.mubr.f32.mxu0 %v9976_v15  ;;  %2285 = vmatprep.mubr.f32.mxu1 %v9976_v15  ;;  %v6107_v1 = vpack.c.bf16 %v2332_v27, %v2328_v41  ;;  %v2347_v41 = vld [vmem:[#allocation6 + $0x920] sm:$0xff]  ;;  %v6247_v58 = vpack.c.bf16 %v2358_v53, %v2354_v37  ;;  %v2368_v14 = vld [vmem:[#allocation6 + $0x9c8] sm:$0xff] }
 0x3e8   :  { %v2376_v37 = vld [vmem:[#allocation6 + $0xa08] sm:$0xff] }
 0x3e9   :  { %v2380_v53 = vld [vmem:[#allocation6 + $0xa28] sm:$0xff] }
 0x3ea   :  { %5283 = vmatmul.mubr.msk.f32.vlgmr.msra.gmra.mrb[20].mxu0 %vm1275_vm0, %v2116_v49  ;;  %5287 = vmatmul.mubr.msk.f32.vlgmr.msra.gmra.mrb[20].mxu1 %vm1275_vm0, %v2116_v49  ;;  %v2341_v49 = vld [vmem:[#allocation6 + $0x8f0] sm:$0xff] }
 0x3eb   :  { %2202 = vmatprep.mubr.f32.mxu0 %v9976_v15  ;;  %2291 = vmatprep.mubr.f32.mxu1 %v9976_v15  ;;  %v6241_v60 = vpack.c.bf16 %v2341_v49, %v2337_v9  ;;  %v2363_v9 = vld [vmem:[#allocation6 + $0x9a0] sm:$0xff] }
 0x3ec   :  { %6102 = vmatpush1.bf16.msra.mxu0 %v6101_v32  ;;  %6230 = vmatpush1.bf16.msra.mxu1 %v6229_v5  ;;  %v2344_v32 = vld [vmem:[#allocation6 + $0x908] sm:$0xff] }
 0x3ed   :  { %6104 = vmatprep.subr.bf16.mxu0 %v6103_v35  ;;  %6232 = vmatprep.subr.bf16.mxu1 %v6231_v23  ;;  %v2348_v5 = vld [vmem:[#allocation6 + $0x928] sm:$0xff]  ;;  %v2119_v35 = vld [vmem:[#allocation4 + $0x38] sm:$0xff]  ;;  %v6113_v23 = vpack.c.bf16 %v2339_v42, %v2335_v22  ;;  %v6121_v42 = vpack.c.bf16 %v2355_v46, %v2351_v19 }
 0x3ee   :  { %5284 = vmatmul.mubr.msk.f32.gmra.mrb[22].mxu0 %vm1275_vm0, %v2117_v28  ;;  %5288 = vmatmul.mubr.msk.f32.gmra.mrb[22].mxu1 %vm1275_vm0, %v2117_v28  ;;  %v6115_v27 = vpack.c.bf16 %v2348_v5, %v2344_v32  ;;  %v2349_v28 = vld [vmem:[#allocation6 + $0x930] sm:$0xff]  ;;  %v2366_v22 = vld [vmem:[#allocation6 + $0x9b8] sm:$0xff] }
 0x3ef   :  { %2208 = vmatprep.mubr.f32.mxu0 %v9976_v15  ;;  %2297 = vmatprep.mubr.f32.mxu1 %v9976_v15  ;;  %v2361_v5 = vld [vmem:[#allocation6 + $0x990] sm:$0xff] }
 0x3f0   :  { %6106 = vmatpush1.bf16.msra.mxu0 %v6105_v10  ;;  %6234 = vmatpush1.bf16.msra.mxu1 %v6233_v29  ;;  %v2352_v10 = vld [vmem:[#allocation6 + $0x948] sm:$0xff] }
 0x3f1   :  { %6108 = vmatprep.subr.bf16.mxu0 %v6107_v1  ;;  %6236 = vmatprep.subr.bf16.mxu1 %v6235_v13  ;;  %v2356_v29 = vld [vmem:[#allocation6 + $0x968] sm:$0xff]  ;;  %v6117_v1 = vpack.c.bf16 %v2347_v41, %v2343_v24  ;;  %v6245_v13 = vpack.c.bf16 %v2349_v28, %v2345_v11  ;;  %v6253_v41 = vpack.c.bf16 %v2365_v4, %v2361_v5 }
 0x3f2   :  { %5285 = vmatmul.mubr.msk.f32.gmra.mrb[24].mxu0 %vm1275_vm0, %v2118_v61  ;;  %5289 = vmatmul.mubr.msk.f32.gmra.mrb[24].mxu1 %vm1275_vm0, %v2118_v61  ;;  %v6119_v33 = vpack.c.bf16 %v2356_v29, %v2352_v10  ;;  %v2360_v61 = vld [vmem:[#allocation6 + $0x988] sm:$0xff]  ;;  %v2369_v10 = vld [vmem:[#allocation6 + $0x9d0] sm:$0xff] }
 0x3f3   :  { %2214 = vmatprep.mubr.f32.mxu0 %v9976_v15  ;;  %2303 = vmatprep.mubr.f32.mxu1 %v9976_v15  ;;  %v2373_v29 = vld [vmem:[#allocation6 + $0x9f0] sm:$0xff] }
 0x3f4   :  { %6110 = vmatpush1.bf16.msra.mxu0 %v6109_v40  ;;  %6238 = vmatpush1.bf16.msra.mxu1 %v6237_v44  ;;  %v2364_v40 = vld [vmem:[#allocation6 + $0x9a8] sm:$0xff]  ;;  %v2362_v44 = vld [vmem:[#allocation6 + $0x998] sm:$0xff]  ;;  %v6257_v46 = vpack.c.bf16 %v2373_v29, %v2369_v10 }
 0x3f5   :  { %6112 = vmatprep.subr.bf16.mxu0 %v6111_v18  ;;  %6240 = vmatprep.subr.bf16.mxu1 %v6239_v36  ;;  %v6249_v18 = vpack.c.bf16 %v2357_v47, %v2353_v54  ;;  %v2359_v36 = vld [vmem:[#allocation6 + $0x980] sm:$0xff]  ;;  %v6123_v49 = vpack.c.bf16 %v2364_v40, %v2360_v61  ;;  %v6251_v32 = vpack.c.bf16 %v2366_v22, %v2362_v44  ;;  %v2377_v61 = vld [vmem:[#allocation6 + $0xa10] sm:$0xff]  ;;  %v2384_v44 = vld [vmem:[#allocation6 + $0xa48] sm:$0xff] }
 0x3f6   :  { %5286 = vmatmul.mubr.msk.f32.gmra.mrb[26].mxu0 %vm1275_vm0, %v2119_v35  ;;  %5290 = vmatmul.mubr.msk.f32.gmra.mrb[26].mxu1 %vm1275_vm0, %v2119_v35  ;;  %v2372_v35 = vld [vmem:[#allocation6 + $0x9e8] sm:$0xff]  ;;  %v6125_v24 = vpack.c.bf16 %v2363_v9, %v2359_v36  ;;  %v6131_v54 = vpack.c.bf16 %v2380_v53, %v2376_v37  ;;  %v2381_v40 = vld [vmem:[#allocation6 + $0xa30] sm:$0xff] }
 0x3f7   :  { %v6127_v11 = vpack.c.bf16 %v2372_v35, %v2368_v14  ;;  %v2388_v22 = vld [vmem:[#allocation6 + $0xa68] sm:$0xff]  ;;  %v6261_v9 = vpack.c.bf16 %v2381_v40, %v2377_v61  ;;  %v2385_v14 = vld [vmem:[#allocation6 + $0xa50] sm:$0xff] }
 0x3f8   :  { %6114 = vmatpush1.bf16.msra.mxu0 %v6113_v23  ;;  %6242 = vmatpush1.bf16.msra.mxu1 %v6241_v60  ;;  %v2370_v23 = vld [vmem:[#allocation6 + $0x9d8] sm:$0xff]  ;;  %v6135_v5 = vpack.c.bf16 %v2388_v22, %v2384_v44  ;;  %v2389_v35 = vld [vmem:[#allocation6 + $0xa70] sm:$0xff] }
 0x3f9   :  { %6116 = vmatprep.subr.bf16.mxu0 %v6115_v27  ;;  %6244 = vmatprep.subr.bf16.mxu1 %v6243_v2  ;;  %v2374_v60 = vld [vmem:[#allocation6 + $0x9f8] sm:$0xff]  ;;  %v2367_v27 = vld [vmem:[#allocation6 + $0x9c0] sm:$0xff]  ;;  %v2393_v37 = vld [vmem:[#allocation6 + $0xa90] sm:$0xff] }
 0x3fa   :  { %v2371_v2 = vld [vmem:[#allocation6 + $0x9e0] sm:$0xff]  ;;  %v6255_v28 = vpack.c.bf16 %v2374_v60, %v2370_v23  ;;  %v2392_v23 = vld [vmem:[#allocation6 + $0xa88] sm:$0xff]  ;;  %v2397_v53 = vld [vmem:[#allocation6 + $0xab0] sm:$0xff] }
 0x3fb   :  { %v6129_v19 = vpack.c.bf16 %v2371_v2, %v2367_v27  ;;  %v2396_v60 = vld [vmem:[#allocation6 + $0xaa8] sm:$0xff]  ;;  %v6265_v2 = vpack.c.bf16 %v2389_v35, %v2385_v14  ;;  %v2401_v44 = vld [vmem:[#allocation6 + $0xad0] sm:$0xff] }
 0x3fc   :  { %6118 = vmatpush1.bf16.msra.mxu0 %v6117_v1  ;;  %6246 = vmatpush1.bf16.msra.mxu1 %v6245_v13  ;;  %v2378_v1 = vld [vmem:[#allocation6 + $0xa18] sm:$0xff]  ;;  %v6139_v10 = vpack.c.bf16 %v2396_v60, %v2392_v23  ;;  %v2405_v22 = vld [vmem:[#allocation6 + $0xaf0] sm:$0xff] }
 0x3fd   :  { %6120 = vmatprep.subr.bf16.mxu0 %v6119_v33  ;;  %6248 = vmatprep.subr.bf16.mxu1 %v6247_v58  ;;  %v2382_v13 = vld [vmem:[#allocation6 + $0xa38] sm:$0xff]  ;;  %v2375_v33 = vld [vmem:[#allocation6 + $0xa00] sm:$0xff]  ;;  %v2409_v23 = vld [vmem:[#allocation6 + $0xb10] sm:$0xff] }
 0x3fe   :  { %v2379_v58 = vld [vmem:[#allocation6 + $0xa20] sm:$0xff]  ;;  %v6259_v47 = vpack.c.bf16 %v2382_v13, %v2378_v1  ;;  %v2400_v1 = vld [vmem:[#allocation6 + $0xac8] sm:$0xff]  ;;  %v2413_v60 = vld [vmem:[#allocation6 + $0xb30] sm:$0xff] }
 0x3ff   :  { %v6133_v36 = vpack.c.bf16 %v2379_v58, %v2375_v33  ;;  %v2404_v13 = vld [vmem:[#allocation6 + $0xae8] sm:$0xff]  ;;  %v6269_v58 = vpack.c.bf16 %v2397_v53, %v2393_v37 }
 0x400   :  { %6122 = vmatpush1.bf16.msra.mxu0 %v6121_v42  ;;  %6250 = vmatpush1.bf16.msra.mxu1 %v6249_v18  ;;  %v2386_v42 = vld [vmem:[#allocation6 + $0xa58] sm:$0xff]  ;;  %v6143_v61 = vpack.c.bf16 %v2404_v13, %v2400_v1  ;;  %v2417_v1 = vld [vmem:[#allocation6 + $0xb50] sm:$0xff] }
 0x401   :  { %6124 = vmatprep.subr.bf16.mxu0 %v6123_v49  ;;  %6252 = vmatprep.subr.bf16.mxu1 %v6251_v32  ;;  %v2390_v18 = vld [vmem:[#allocation6 + $0xa78] sm:$0xff]  ;;  %v2383_v49 = vld [vmem:[#allocation6 + $0xa40] sm:$0xff]  ;;  %v2421_v13 = vld [vmem:[#allocation6 + $0xb70] sm:$0xff] }
 0x402   :  { %v2387_v32 = vld [vmem:[#allocation6 + $0xa60] sm:$0xff]  ;;  %v6263_v4 = vpack.c.bf16 %v2390_v18, %v2386_v42  ;;  %v2408_v42 = vld [vmem:[#allocation6 + $0xb08] sm:$0xff] }
 0x403   :  { %v6137_v27 = vpack.c.bf16 %v2387_v32, %v2383_v49  ;;  %v2412_v18 = vld [vmem:[#allocation6 + $0xb28] sm:$0xff]  ;;  %v6273_v32 = vpack.c.bf16 %v2405_v22, %v2401_v44 }
 0x404   :  { %6126 = vmatpush1.bf16.msra.mxu0 %v6125_v24  ;;  %6254 = vmatpush1.bf16.msra.mxu1 %v6253_v41  ;;  %v2394_v24 = vld [vmem:[#allocation6 + $0xa98] sm:$0xff]  ;;  %v6147_v14 = vpack.c.bf16 %v2412_v18, %v2408_v42  ;;  %v2425_v42 = vld [vmem:[#allocation6 + $0xb90] sm:$0xff] }
 0x405   :  { %6128 = vmatprep.subr.bf16.mxu0 %v6127_v11  ;;  %6256 = vmatprep.subr.bf16.mxu1 %v6255_v28  ;;  %v2398_v41 = vld [vmem:[#allocation6 + $0xab8] sm:$0xff]  ;;  %v2391_v11 = vld [vmem:[#allocation6 + $0xa80] sm:$0xff]  ;;  %v2429_v18 = vld [vmem:[#allocation6 + $0xbb0] sm:$0xff] }
 0x406   :  { %v2395_v28 = vld [vmem:[#allocation6 + $0xaa0] sm:$0xff]  ;;  %v6267_v29 = vpack.c.bf16 %v2398_v41, %v2394_v24  ;;  %v2416_v24 = vld [vmem:[#allocation6 + $0xb48] sm:$0xff] }
 0x407   :  { %v6141_v33 = vpack.c.bf16 %v2395_v28, %v2391_v11  ;;  %v2420_v41 = vld [vmem:[#allocation6 + $0xb68] sm:$0xff]  ;;  %v6277_v28 = vpack.c.bf16 %v2413_v60, %v2409_v23  ;;  %v2435_v60 = vld [vmem:[#allocation6 + $0xbe0] sm:$0xff] }
 0x408   :  { %6130 = vmatpush1.bf16.msra.mxu0 %v6129_v19  ;;  %6258 = vmatpush1.bf16.msra.mxu1 %v6257_v46  ;;  %v2402_v19 = vld [vmem:[#allocation6 + $0xad8] sm:$0xff]  ;;  %v6151_v37 = vpack.c.bf16 %v2420_v41, %v2416_v24  ;;  %v2433_v24 = vld [vmem:[#allocation6 + $0xbd0] sm:$0xff] }
 0x409   :  { %6132 = vmatprep.subr.bf16.mxu0 %v6131_v54  ;;  %6260 = vmatprep.subr.bf16.mxu1 %v6259_v47  ;;  %v2406_v46 = vld [vmem:[#allocation6 + $0xaf8] sm:$0xff]  ;;  %v2399_v54 = vld [vmem:[#allocation6 + $0xac0] sm:$0xff]  ;;  %v2437_v41 = vld [vmem:[#allocation6 + $0xbf0] sm:$0xff] }
 0x40a   :  { %v2403_v47 = vld [vmem:[#allocation6 + $0xae0] sm:$0xff]  ;;  %v6271_v40 = vpack.c.bf16 %v2406_v46, %v2402_v19  ;;  %v2424_v19 = vld [vmem:[#allocation6 + $0xb88] sm:$0xff] }
 0x40b   :  { %v6145_v49 = vpack.c.bf16 %v2403_v47, %v2399_v54  ;;  %v2428_v46 = vld [vmem:[#allocation6 + $0xba8] sm:$0xff]  ;;  %v6281_v47 = vpack.c.bf16 %v2421_v13, %v2417_v1  ;;  %v2439_v1 = vld [vmem:[#allocation6 + $0xc00] sm:$0xff] }
 0x40c   :  { %6134 = vmatpush1.bf16.msra.mxu0 %v6133_v36  ;;  %6262 = vmatpush1.bf16.msra.mxu1 %v6261_v9  ;;  %v2410_v36 = vld [vmem:[#allocation6 + $0xb18] sm:$0xff]  ;;  %v6155_v44 = vpack.c.bf16 %v2428_v46, %v2424_v19  ;;  %v2443_v13 = vld [vmem:[#allocation6 + $0xc20] sm:$0xff]  ;;  %v2441_v19 = vld [vmem:[#allocation6 + $0xc10] sm:$0xff] }
 0x40d   :  { %6136 = vmatprep.subr.bf16.mxu0 %v6135_v5  ;;  %6264 = vmatprep.subr.bf16.mxu1 %v6263_v4  ;;  %v2414_v9 = vld [vmem:[#allocation6 + $0xb38] sm:$0xff]  ;;  %v2407_v5 = vld [vmem:[#allocation6 + $0xb00] sm:$0xff]  ;;  %v2445_v46 = vld [vmem:[#allocation6 + $0xc30] sm:$0xff] }
 0x40e   :  { %v2411_v4 = vld [vmem:[#allocation6 + $0xb20] sm:$0xff]  ;;  %v6275_v35 = vpack.c.bf16 %v2414_v9, %v2410_v36  ;;  %v2432_v36 = vld [vmem:[#allocation6 + $0xbc8] sm:$0xff] }
 0x40f   :  { %v6149_v11 = vpack.c.bf16 %v2411_v4, %v2407_v5  ;;  %v2436_v9 = vld [vmem:[#allocation6 + $0xbe8] sm:$0xff]  ;;  %v6285_v4 = vpack.c.bf16 %v2429_v18, %v2425_v42  ;;  %v2451_v42 = vld [vmem:[#allocation6 + $0xc60] sm:$0xff] }
 0x410   :  { %6138 = vmatpush1.bf16.msra.mxu0 %v6137_v27  ;;  %6266 = vmatpush1.bf16.msra.mxu1 %v6265_v2  ;;  %v2418_v27 = vld [vmem:[#allocation6 + $0xb58] sm:$0xff] }
 0x411   :  { %6140 = vmatprep.subr.bf16.mxu0 %v6139_v10  ;;  %6268 = vmatprep.subr.bf16.mxu1 %v6267_v29  ;;  %v2422_v2 = vld [vmem:[#allocation6 + $0xb78] sm:$0xff]  ;;  %v2415_v10 = vld [vmem:[#allocation6 + $0xb40] sm:$0xff] }
 0x412   :  { %v2419_v29 = vld [vmem:[#allocation6 + $0xb60] sm:$0xff]  ;;  %v6279_v53 = vpack.c.bf16 %v2422_v2, %v2418_v27  ;;  %v6289_v2 = vpack.c.bf16 %v2437_v41, %v2433_v24 }
 0x413   :  { %v6153_v54 = vpack.c.bf16 %v2419_v29, %v2415_v10  ;;  %v2442_v10 = vld [vmem:[#allocation6 + $0xc18] sm:$0xff] }
 0x414   :  { %6142 = vmatpush1.bf16.msra.mxu0 %v6141_v33  ;;  %6270 = vmatpush1.bf16.msra.mxu1 %v6269_v58  ;;  %v2426_v33 = vld [vmem:[#allocation6 + $0xb98] sm:$0xff] }
 0x415   :  { %6144 = vmatprep.subr.bf16.mxu0 %v6143_v61  ;;  %6272 = vmatprep.subr.bf16.mxu1 %v6271_v40  ;;  %v2430_v58 = vld [vmem:[#allocation6 + $0xbb8] sm:$0xff]  ;;  %v2423_v61 = vld [vmem:[#allocation6 + $0xb80] sm:$0xff] }
 0x416   :  { %v2427_v40 = vld [vmem:[#allocation6 + $0xba0] sm:$0xff]  ;;  %v6283_v22 = vpack.c.bf16 %v2430_v58, %v2426_v33  ;;  %v2448_v33 = vld [vmem:[#allocation6 + $0xc48] sm:$0xff] }
 0x417   :  { %v6157_v5 = vpack.c.bf16 %v2427_v40, %v2423_v61  ;;  %v2452_v58 = vld [vmem:[#allocation6 + $0xc68] sm:$0xff]  ;;  %v6165_v40 = vpack.c.bf16 %v2443_v13, %v2439_v1 }
 0x418   :  { %6146 = vmatpush1.bf16.msra.mxu0 %v6145_v49  ;;  %6274 = vmatpush1.bf16.msra.mxu1 %v6273_v32  ;;  %v2434_v49 = vld [vmem:[#allocation6 + $0xbd8] sm:$0xff]  ;;  %v2464_v1 = vld [vmem:[#allocation6 + $0xcc8] sm:$0xff] }
 0x419   :  { %6148 = vmatprep.subr.bf16.mxu0 %v6147_v14  ;;  %6276 = vmatprep.subr.bf16.mxu1 %v6275_v35  ;;  %v2438_v32 = vld [vmem:[#allocation6 + $0xbf8] sm:$0xff]  ;;  %v2431_v14 = vld [vmem:[#allocation6 + $0xbc0] sm:$0xff]  ;;  %v6159_v35 = vpack.c.bf16 %v2436_v9, %v2432_v36  ;;  %v6167_v9 = vpack.c.bf16 %v2452_v58, %v2448_v33 }
 0x41a   :  { %v6287_v23 = vpack.c.bf16 %v2438_v32, %v2434_v49  ;;  %v6161_v27 = vpack.c.bf16 %v2435_v60, %v2431_v14  ;;  %v2449_v32 = vld [vmem:[#allocation6 + $0xc50] sm:$0xff]  ;;  %v2462_v60 = vld [vmem:[#allocation6 + $0xcb8] sm:$0xff] }
 0x41b   :  { %v2466_v33 = vld [vmem:[#allocation6 + $0xcd8] sm:$0xff] }
 0x41c   :  { %6150 = vmatpush1.bf16.msra.mxu0 %v6149_v11  ;;  %6278 = vmatpush1.bf16.msra.mxu1 %v6277_v28  ;;  %v2440_v11 = vld [vmem:[#allocation6 + $0xc08] sm:$0xff]  ;;  %v2470_v58 = vld [vmem:[#allocation6 + $0xcf8] sm:$0xff] }
 0x41d   :  { %6152 = vmatprep.subr.bf16.mxu0 %v6151_v37  ;;  %6280 = vmatprep.subr.bf16.mxu1 %v6279_v53  ;;  %v2444_v28 = vld [vmem:[#allocation6 + $0xc28] sm:$0xff]  ;;  %v2446_v37 = vld [vmem:[#allocation6 + $0xc38] sm:$0xff] }
 0x41e   :  { %v6163_v29 = vpack.c.bf16 %v2444_v28, %v2440_v11  ;;  %v6291_v53 = vpack.c.bf16 %v2446_v37, %v2442_v10  ;;  %v2457_v37 = vld [vmem:[#allocation6 + $0xc90] sm:$0xff] }
 0x420   :  { %6154 = vmatpush1.bf16.msra.mxu0 %v6153_v54  ;;  %6282 = vmatpush1.bf16.msra.mxu1 %v6281_v47  ;;  %v2450_v54 = vld [vmem:[#allocation6 + $0xc58] sm:$0xff] }
 0x421   :  { %6156 = vmatprep.subr.bf16.mxu0 %v6155_v44  ;;  %6284 = vmatprep.subr.bf16.mxu1 %v6283_v22  ;;  %v2454_v47 = vld [vmem:[#allocation6 + $0xc78] sm:$0xff]  ;;  %v6293_v44 = vpack.c.bf16 %v2445_v46, %v2441_v19  ;;  %v2447_v22 = vld [vmem:[#allocation6 + $0xc40] sm:$0xff]  ;;  %v2468_v46 = vld [vmem:[#allocation6 + $0xce8] sm:$0xff] }
 0x422   :  { %v6295_v49 = vpack.c.bf16 %v2454_v47, %v2450_v54  ;;  %v6169_v24 = vpack.c.bf16 %v2451_v42, %v2447_v22  ;;  %v6175_v42 = vpack.c.bf16 %v2468_v46, %v2464_v1  ;;  %v2477_v1 = vld [vmem:[#allocation6 + $0xd30] sm:$0xff] }
 0x424   :  { %6158 = vmatpush1.bf16.msra.mxu0 %v6157_v5  ;;  %6286 = vmatpush1.bf16.msra.mxu1 %v6285_v4  ;;  %v2453_v5 = vld [vmem:[#allocation6 + $0xc70] sm:$0xff]  ;;  %v2456_v4 = vld [vmem:[#allocation6 + $0xc88] sm:$0xff] }
 0x425   :  { %6160 = vmatprep.subr.bf16.mxu0 %v6159_v35  ;;  %6288 = vmatprep.subr.bf16.mxu1 %v6287_v23  ;;  %v2460_v35 = vld [vmem:[#allocation6 + $0xca8] sm:$0xff]  ;;  %v2458_v23 = vld [vmem:[#allocation6 + $0xc98] sm:$0xff]  ;;  %v6297_v41 = vpack.c.bf16 %v2453_v5, %v2449_v32 }
 0x426   :  { %v6171_v10 = vpack.c.bf16 %v2460_v35, %v2456_v4  ;;  %v2472_v32 = vld [vmem:[#allocation6 + $0xd08] sm:$0xff] }
 0x427   :  { %v2476_v35 = vld [vmem:[#allocation6 + $0xd28] sm:$0xff] }
 0x428   :  { %6162 = vmatpush1.bf16.msra.mxu0 %v6161_v27  ;;  %6290 = vmatpush1.bf16.msra.mxu1 %v6289_v2  ;;  %v2455_v27 = vld [vmem:[#allocation6 + $0xc80] sm:$0xff] }
 0x429   :  { %6164 = vmatprep.subr.bf16.mxu0 %v6163_v29  ;;  %6292 = vmatprep.subr.bf16.mxu1 %v6291_v53  ;;  %v2459_v2 = vld [vmem:[#allocation6 + $0xca0] sm:$0xff]  ;;  %v6299_v29 = vpack.c.bf16 %v2462_v60, %v2458_v23  ;;  %v2461_v53 = vld [vmem:[#allocation6 + $0xcb0] sm:$0xff]  ;;  %v2474_v23 = vld [vmem:[#allocation6 + $0xd18] sm:$0xff] }
 0x42a   :  { %v6173_v54 = vpack.c.bf16 %v2459_v2, %v2455_v27  ;;  %v6301_v47 = vpack.c.bf16 %v2461_v53, %v2457_v37  ;;  %v2478_v60 = vld [vmem:[#allocation6 + $0xd38] sm:$0xff]  ;;  %v2471_v27 = vld [vmem:[#allocation6 + $0xd00] sm:$0xff]  ;;  %v2473_v53 = vld [vmem:[#allocation6 + $0xd10] sm:$0xff] }
 0x42b   :  { %v2475_v2 = vld [vmem:[#allocation6 + $0xd20] sm:$0xff]  ;;  %v6307_v37 = vpack.c.bf16 %v2478_v60, %v2474_v23  ;;  %v2490_v23 = vld [vmem:[#allocation6 + $0xd98] sm:$0xff] }
 0x42c   :  { %v2494_v60 = vld [vmem:[#allocation6 + $0xdb8] sm:$0xff] }
 0x4bd   :  { %v2198_v61 = vpop.f32.mrb[20].mxu0  ;;  %v8800_v18 = vpop.f32.mrb[20].mxu1 }
 0x4be   :  { %v2200_v36 = vpop.f32.mrb[21].mxu0  ;;  %v8802_v14 = vpop.f32.mrb[21].mxu1 }
 0x4bf   :  { %2631 = vmatprep.mubr.f32.mxu0 %v2200_v36  ;;  %2809 = vmatprep.mubr.f32.mxu1 %v2200_v36  ;;  %v6303_v36 = vpack.c.bf16 %v2470_v58, %v2466_v33  ;;  %v2484_v58 = vld [vmem:[#allocation6 + $0xd68] sm:$0xff] }
 0x4c0   :  { %2632 = vmatmul.mubr.f32.vlgmr.msra.gmra.mrb[12].mxu0 %v2198_v61  ;;  %2810 = vmatmul.mubr.f32.vlgmr.msra.gmra.mrb[12].mxu1 %v2198_v61  ;;  %v2463_v61 = vld [vmem:[#allocation6 + $0xcc0] sm:$0xff] }
 0x4c1   :  { %6166 = vmatpush1.bf16.msra.mxu0 %v6165_v40  ;;  %6294 = vmatpush1.bf16.msra.mxu1 %v6293_v44  ;;  %v2204_v11 = vpop.f32.mrb[22].mxu0  ;;  %v8804_v28 = vpop.f32.mrb[22].mxu1  ;;  %v2467_v40 = vld [vmem:[#allocation6 + $0xce0] sm:$0xff] }
 0x4c2   :  { %6168 = vmatprep.subr.bf16.mxu0 %v6167_v9  ;;  %6296 = vmatprep.subr.bf16.mxu1 %v6295_v49  ;;  %v2206_v13 = vpop.f32.mrb[23].mxu0  ;;  %v8806_v19 = vpop.f32.mrb[23].mxu1  ;;  %v2465_v9 = vld [vmem:[#allocation6 + $0xcd0] sm:$0xff] }
 0x4c3   :  { %2637 = vmatprep.mubr.f32.mxu0 %v2206_v13  ;;  %2815 = vmatprep.mubr.f32.mxu1 %v2206_v13  ;;  %v2469_v49 = vld [vmem:[#allocation6 + $0xcf0] sm:$0xff]  ;;  %v2480_v13 = vld [vmem:[#allocation6 + $0xd48] sm:$0xff] }
 0x4c4   :  { %2638 = vmatmul.mubr.f32.gmra.mrb[14].mxu0 %v2204_v11  ;;  %2816 = vmatmul.mubr.f32.gmra.mrb[14].mxu1 %v2204_v11 }
 0x4c5   :  { %6170 = vmatpush1.bf16.msra.mxu0 %v6169_v24  ;;  %6298 = vmatpush1.bf16.msra.mxu1 %v6297_v41  ;;  %v2210_v44 = vpop.f32.mrb[24].mxu0  ;;  %v8808_v22 = vpop.f32.mrb[24].mxu1  ;;  %v6177_v24 = vpack.c.bf16 %v2467_v40, %v2463_v61  ;;  %v6305_v41 = vpack.c.bf16 %v2469_v49, %v2465_v9  ;;  %v6181_v61 = vpack.c.bf16 %v2475_v2, %v2471_v27  ;;  %v2481_v49 = vld [vmem:[#allocation6 + $0xd50] sm:$0xff]  ;;  %v2487_v27 = vld [vmem:[#allocation6 + $0xd80] sm:$0xff] }
 0x4c6   :  { %6172 = vmatprep.subr.bf16.mxu0 %v6171_v10  ;;  %6300 = vmatprep.subr.bf16.mxu1 %v6299_v29  ;;  %v2212_v5 = vpop.f32.mrb[25].mxu0  ;;  %v8810_v4 = vpop.f32.mrb[25].mxu1  ;;  %v6179_v29 = vpack.c.bf16 %v2476_v35, %v2472_v32  ;;  %v6309_v40 = vpack.c.bf16 %v2477_v1, %v2473_v53  ;;  %v2485_v32 = vld [vmem:[#allocation6 + $0xd70] sm:$0xff]  ;;  %v2492_v35 = vld [vmem:[#allocation6 + $0xda8] sm:$0xff]  ;;  %v2491_v2 = vld [vmem:[#allocation6 + $0xda0] sm:$0xff] }
 0x4c7   :  { %2643 = vmatprep.mubr.f32.mxu0 %v2212_v5  ;;  %2821 = vmatprep.mubr.f32.mxu1 %v2212_v5  ;;  %v2488_v5 = vld [vmem:[#allocation6 + $0xd88] sm:$0xff]  ;;  %v2493_v53 = vld [vmem:[#allocation6 + $0xdb0] sm:$0xff] }
 0x4c8   :  { %2644 = vmatmul.mubr.f32.gmra.mrb[16].mxu0 %v2210_v44  ;;  %2822 = vmatmul.mubr.f32.gmra.mrb[16].mxu1 %v2210_v44  ;;  %v2479_v44 = vld [vmem:[#allocation6 + $0xd40] sm:$0xff]  ;;  %v2496_v1 = vld [vmem:[#allocation6 + $0xdc8] sm:$0xff] }
 0x4c9   :  { %6174 = vmatpush1.bf16.msra.mxu0 %v6173_v54  ;;  %6302 = vmatpush1.bf16.msra.mxu1 %v6301_v47  ;;  %v2216_v11 = vpop.f32.mrb[26].mxu0  ;;  %v8812_v10 = vpop.f32.mrb[26].mxu1  ;;  %v2482_v54 = vld [vmem:[#allocation6 + $0xd58] sm:$0xff] }
 0x4ca   :  { %6176 = vmatprep.subr.bf16.mxu0 %v6175_v42  ;;  %6304 = vmatprep.subr.bf16.mxu1 %v6303_v36  ;;  %v2218_v46 = vpop.f32.mrb[27].mxu0  ;;  %v8814_v33 = vpop.f32.mrb[27].mxu1  ;;  %v2486_v47 = vld [vmem:[#allocation6 + $0xd78] sm:$0xff]  ;;  %v2483_v42 = vld [vmem:[#allocation6 + $0xd60] sm:$0xff]  ;;  %v6183_v36 = vpack.c.bf16 %v2484_v58, %v2480_v13  ;;  %v2500_v13 = vld [vmem:[#allocation6 + $0xde8] sm:$0xff] }
 0x4cb   :  { %2649 = vmatprep.mubr.f32.mxu0 %v2218_v46  ;;  %2827 = vmatprep.mubr.f32.mxu1 %v2218_v46  ;;  %v6311_v9 = vpack.c.bf16 %v2486_v47, %v2482_v54  ;;  %v2498_v46 = vld [vmem:[#allocation6 + $0xdd8] sm:$0xff]  ;;  %v6189_v54 = vpack.c.bf16 %v2491_v2, %v2487_v27  ;;  %v2495_v47 = vld [vmem:[#allocation6 + $0xdc0] sm:$0xff]  ;;  %v2505_v2 = vld [vmem:[#allocation6 + $0xe10] sm:$0xff] }
 0x4cc   :  { %2650 = vmatmul.mubr.f32.gmra.mrb[18].mxu0 %v2216_v11  ;;  %2828 = vmatmul.mubr.f32.gmra.mrb[18].mxu1 %v2216_v11  ;;  %v6187_v11 = vpack.c.bf16 %v2492_v35, %v2488_v5  ;;  %v2502_v58 = vld [vmem:[#allocation6 + $0xdf8] sm:$0xff] }
 0x4cd   :  { %6178 = vmatpush1.bf16.msra.mxu0 %v6177_v24  ;;  %6306 = vmatpush1.bf16.msra.mxu1 %v6305_v41  ;;  %v6185_v24 = vpack.c.bf16 %v2483_v42, %v2479_v44  ;;  %v6313_v41 = vpack.c.bf16 %v2485_v32, %v2481_v49  ;;  %v6319_v44 = vpack.c.bf16 %v2502_v58, %v2498_v46  ;;  %v2497_v42 = vld [vmem:[#allocation6 + $0xdd0] sm:$0xff]  ;;  %v2508_v49 = vld [vmem:[#allocation6 + $0xe28] sm:$0xff]  ;;  %v2506_v32 = vld [vmem:[#allocation6 + $0xe18] sm:$0xff] }
 0x4ce   :  { %6180 = vmatprep.subr.bf16.mxu0 %v6179_v29  ;;  %6308 = vmatprep.subr.bf16.mxu1 %v6307_v37  ;;  %v6315_v29 = vpack.c.bf16 %v2494_v60, %v2490_v23  ;;  %v2489_v37 = vld [vmem:[#allocation6 + $0xd90] sm:$0xff]  ;;  %v2510_v5 = vld [vmem:[#allocation6 + $0xe38] sm:$0xff]  ;;  %v2503_v60 = vld [vmem:[#allocation6 + $0xe00] sm:$0xff] }
 0x4cf   :  { %2720 = vmatprep.mubr.f32.mxu0 %v8802_v14  ;;  %2898 = vmatprep.mubr.f32.mxu1 %v8802_v14  ;;  %v6317_v14 = vpack.c.bf16 %v2493_v53, %v2489_v37  ;;  %v6323_v27 = vpack.c.bf16 %v2510_v5, %v2506_v32  ;;  %v2516_v37 = vld [vmem:[#allocation6 + $0xe68] sm:$0xff]  ;;  %v2514_v53 = vld [vmem:[#allocation6 + $0xe58] sm:$0xff]  ;;  %v2511_v58 = vld [vmem:[#allocation6 + $0xe40] sm:$0xff] }
 0x4d0   :  { %v2519_v5 = vld [vmem:[#allocation6 + $0xe80] sm:$0xff] }
 0x4d1   :  { %6182 = vmatpush1.bf16.msra.mxu0 %v6181_v61  ;;  %6310 = vmatpush1.bf16.msra.mxu1 %v6309_v40  ;;  %v2499_v61 = vld [vmem:[#allocation6 + $0xde0] sm:$0xff]  ;;  %v6191_v40 = vpack.c.bf16 %v2500_v13, %v2496_v1  ;;  %v2518_v1 = vld [vmem:[#allocation6 + $0xe78] sm:$0xff] }
 0x4d2   :  { %6184 = vmatprep.subr.bf16.mxu0 %v6183_v36  ;;  %6312 = vmatprep.subr.bf16.mxu1 %v6311_v9  ;;  %v2501_v36 = vld [vmem:[#allocation6 + $0xdf0] sm:$0xff]  ;;  %v2504_v9 = vld [vmem:[#allocation6 + $0xe08] sm:$0xff]  ;;  %v6193_v35 = vpack.c.bf16 %v2499_v61, %v2495_v47  ;;  %v6327_v47 = vpack.c.bf16 %v2518_v1, %v2514_v53  ;;  %v2527_v1 = vld [vmem:[#allocation6 + $0xec0] sm:$0xff] }
 0x4d3   :  { %v6321_v23 = vpack.c.bf16 %v2501_v36, %v2497_v42  ;;  %v2513_v61 = vld [vmem:[#allocation6 + $0xe50] sm:$0xff]  ;;  %v2524_v42 = vld [vmem:[#allocation6 + $0xea8] sm:$0xff]  ;;  %v2522_v36 = vld [vmem:[#allocation6 + $0xe98] sm:$0xff] }
 0x4d5   :  { %6186 = vmatpush1.bf16.msra.mxu0 %v6185_v24  ;;  %6314 = vmatpush1.bf16.msra.mxu1 %v6313_v41  ;;  %v2507_v24 = vld [vmem:[#allocation6 + $0xe20] sm:$0xff]  ;;  %v6195_v41 = vpack.c.bf16 %v2508_v49, %v2504_v9  ;;  %v2526_v9 = vld [vmem:[#allocation6 + $0xeb8] sm:$0xff] }
 0x4d6   :  { %6188 = vmatprep.subr.bf16.mxu0 %v6187_v11  ;;  %6316 = vmatprep.subr.bf16.mxu1 %v6315_v29  ;;  %v2509_v11 = vld [vmem:[#allocation6 + $0xe30] sm:$0xff]  ;;  %v2512_v29 = vld [vmem:[#allocation6 + $0xe48] sm:$0xff]  ;;  %v6197_v13 = vpack.c.bf16 %v2507_v24, %v2503_v60  ;;  %v6331_v60 = vpack.c.bf16 %v2526_v9, %v2522_v36  ;;  %v2535_v9 = vld [vmem:[#allocation6 + $0xf00] sm:$0xff] }
 0x4d7   :  { %v6325_v46 = vpack.c.bf16 %v2509_v11, %v2505_v2  ;;  %v2521_v24 = vld [vmem:[#allocation6 + $0xe90] sm:$0xff]  ;;  %v2532_v2 = vld [vmem:[#allocation6 + $0xee8] sm:$0xff]  ;;  %v2530_v11 = vld [vmem:[#allocation6 + $0xed8] sm:$0xff] }
 0x4d9   :  { %6190 = vmatpush1.bf16.msra.mxu0 %v6189_v54  ;;  %6318 = vmatpush1.bf16.msra.mxu1 %v6317_v14  ;;  %v2515_v54 = vld [vmem:[#allocation6 + $0xe60] sm:$0xff]  ;;  %v6199_v14 = vpack.c.bf16 %v2516_v37, %v2512_v29  ;;  %v2534_v29 = vld [vmem:[#allocation6 + $0xef8] sm:$0xff] }
 0x4da   :  { %6192 = vmatprep.subr.bf16.mxu0 %v6191_v40  ;;  %6320 = vmatprep.subr.bf16.mxu1 %v6319_v44  ;;  %v2517_v40 = vld [vmem:[#allocation6 + $0xe70] sm:$0xff]  ;;  %v2520_v44 = vld [vmem:[#allocation6 + $0xe88] sm:$0xff]  ;;  %v6201_v49 = vpack.c.bf16 %v2515_v54, %v2511_v58  ;;  %v6335_v58 = vpack.c.bf16 %v2534_v29, %v2530_v11  ;;  %v2543_v29 = vld [vmem:[#allocation6 + $0xf40] sm:$0xff] }
 0x4db   :  { %v6329_v32 = vpack.c.bf16 %v2517_v40, %v2513_v61  ;;  %v2529_v54 = vld [vmem:[#allocation6 + $0xed0] sm:$0xff]  ;;  %v2540_v61 = vld [vmem:[#allocation6 + $0xf28] sm:$0xff]  ;;  %v2538_v40 = vld [vmem:[#allocation6 + $0xf18] sm:$0xff] }
 0x4dd   :  { %6194 = vmatpush1.bf16.msra.mxu0 %v6193_v35  ;;  %6322 = vmatpush1.bf16.msra.mxu1 %v6321_v23  ;;  %v2523_v35 = vld [vmem:[#allocation6 + $0xea0] sm:$0xff]  ;;  %v6203_v23 = vpack.c.bf16 %v2524_v42, %v2520_v44  ;;  %v2542_v44 = vld [vmem:[#allocation6 + $0xf38] sm:$0xff] }
 0x4de   :  { %6196 = vmatprep.subr.bf16.mxu0 %v6195_v41  ;;  %6324 = vmatprep.subr.bf16.mxu1 %v6323_v27  ;;  %v2525_v41 = vld [vmem:[#allocation6 + $0xeb0] sm:$0xff]  ;;  %v2528_v27 = vld [vmem:[#allocation6 + $0xec8] sm:$0xff]  ;;  %v6205_v37 = vpack.c.bf16 %v2523_v35, %v2519_v5  ;;  %v6339_v5 = vpack.c.bf16 %v2542_v44, %v2538_v40  ;;  %v2551_v44 = vld [vmem:[#allocation6 + $0xf80] sm:$0xff] }
 0x4df   :  { %v6333_v53 = vpack.c.bf16 %v2525_v41, %v2521_v24  ;;  %v2537_v35 = vld [vmem:[#allocation6 + $0xf10] sm:$0xff]  ;;  %v2548_v24 = vld [vmem:[#allocation6 + $0xf68] sm:$0xff]  ;;  %v2546_v41 = vld [vmem:[#allocation6 + $0xf58] sm:$0xff] }
 0x4e1   :  { %6198 = vmatpush1.bf16.msra.mxu0 %v6197_v13  ;;  %6326 = vmatpush1.bf16.msra.mxu1 %v6325_v46  ;;  %v2531_v13 = vld [vmem:[#allocation6 + $0xee0] sm:$0xff]  ;;  %v6207_v46 = vpack.c.bf16 %v2532_v2, %v2528_v27  ;;  %v2550_v27 = vld [vmem:[#allocation6 + $0xf78] sm:$0xff] }
 0x4e2   :  { %6200 = vmatprep.subr.bf16.mxu0 %v6199_v14  ;;  %6328 = vmatprep.subr.bf16.mxu1 %v6327_v47  ;;  %v2533_v14 = vld [vmem:[#allocation6 + $0xef0] sm:$0xff]  ;;  %v2536_v47 = vld [vmem:[#allocation6 + $0xf08] sm:$0xff]  ;;  %v6209_v42 = vpack.c.bf16 %v2531_v13, %v2527_v1  ;;  %v6343_v1 = vpack.c.bf16 %v2550_v27, %v2546_v41  ;;  %v2559_v27 = vld [vmem:[#allocation6 + $0xfc0] sm:$0xff] }
 0x4e3   :  { %v6337_v36 = vpack.c.bf16 %v2533_v14, %v2529_v54  ;;  %v2545_v13 = vld [vmem:[#allocation6 + $0xf50] sm:$0xff]  ;;  %v2556_v54 = vld [vmem:[#allocation6 + $0xfa8] sm:$0xff]  ;;  %v2554_v14 = vld [vmem:[#allocation6 + $0xf98] sm:$0xff] }
 0x4e5   :  { %6202 = vmatpush1.bf16.msra.mxu0 %v6201_v49  ;;  %6330 = vmatpush1.bf16.msra.mxu1 %v6329_v32  ;;  %v2539_v49 = vld [vmem:[#allocation6 + $0xf20] sm:$0xff]  ;;  %v6211_v32 = vpack.c.bf16 %v2540_v61, %v2536_v47  ;;  %v2558_v47 = vld [vmem:[#allocation6 + $0xfb8] sm:$0xff] }
 0x4e6   :  { %6204 = vmatprep.subr.bf16.mxu0 %v6203_v23  ;;  %6332 = vmatprep.subr.bf16.mxu1 %v6331_v60  ;;  %v2541_v23 = vld [vmem:[#allocation6 + $0xf30] sm:$0xff]  ;;  %v2544_v60 = vld [vmem:[#allocation6 + $0xf48] sm:$0xff]  ;;  %v6213_v2 = vpack.c.bf16 %v2539_v49, %v2535_v9  ;;  %v6347_v9 = vpack.c.bf16 %v2558_v47, %v2554_v14  ;;  %v3142_v14 = vld [vmem:[#allocation6 + $0x1038] sm:$0xff] }
 0x4e7   :  { %v6341_v11 = vpack.c.bf16 %v2541_v23, %v2537_v35  ;;  %v2553_v49 = vld [vmem:[#allocation6 + $0xf90] sm:$0xff]  ;;  %v2564_v35 = vld [vmem:[#allocation6 + $0xfe8] sm:$0xff]  ;;  %v2562_v23 = vld [vmem:[#allocation6 + $0xfd8] sm:$0xff] }
 0x4e8   :  { %v3147_v47 = vld [vmem:[#allocation6 + $0x1060] sm:$0xff] }
 0x4e9   :  { %6206 = vmatpush1.bf16.msra.mxu0 %v6205_v37  ;;  %6334 = vmatpush1.bf16.msra.mxu1 %v6333_v53  ;;  %v2547_v37 = vld [vmem:[#allocation6 + $0xf60] sm:$0xff]  ;;  %v6215_v53 = vpack.c.bf16 %v2548_v24, %v2544_v60  ;;  %v2566_v60 = vld [vmem:[#allocation6 + $0xff8] sm:$0xff] }
 0x4ea   :  { %6208 = vmatprep.subr.bf16.mxu0 %v6207_v46  ;;  %6336 = vmatprep.subr.bf16.mxu1 %v6335_v58  ;;  %v2549_v46 = vld [vmem:[#allocation6 + $0xf70] sm:$0xff]  ;;  %v2552_v58 = vld [vmem:[#allocation6 + $0xf88] sm:$0xff]  ;;  %v6217_v61 = vpack.c.bf16 %v2547_v37, %v2543_v29  ;;  %v2563_v29 = vld [vmem:[#allocation6 + $0xfe0] sm:$0xff] }
 0x4eb   :  { %v6345_v40 = vpack.c.bf16 %v2549_v46, %v2545_v13  ;;  %v2561_v37 = vld [vmem:[#allocation6 + $0xfd0] sm:$0xff]  ;;  %v3136_v46 = vld [vmem:[#allocation6 + $0x1008] sm:$0xff] }
 0x4ed   :  { %6210 = vmatpush1.bf16.msra.mxu0 %v6209_v42  ;;  %6338 = vmatpush1.bf16.msra.mxu1 %v6337_v36  ;;  %v2555_v42 = vld [vmem:[#allocation6 + $0xfa0] sm:$0xff]  ;;  %v6219_v36 = vpack.c.bf16 %v2556_v54, %v2552_v58  ;;  %v3140_v58 = vld [vmem:[#allocation6 + $0x1028] sm:$0xff]  ;;  %v3138_v54 = vld [vmem:[#allocation6 + $0x1018] sm:$0xff] }
 0x4ee   :  { %6212 = vmatprep.subr.bf16.mxu0 %v6211_v32  ;;  %6340 = vmatprep.subr.bf16.mxu1 %v6339_v5  ;;  %v2557_v32 = vld [vmem:[#allocation6 + $0xfb0] sm:$0xff]  ;;  %v2560_v5 = vld [vmem:[#allocation6 + $0xfc8] sm:$0xff]  ;;  %v6221_v24 = vpack.c.bf16 %v2555_v42, %v2551_v44 }
 0x4ef   :  { %v6349_v41 = vpack.c.bf16 %v2557_v32, %v2553_v49  ;;  %v3145_v44 = vld [vmem:[#allocation6 + $0x1050] sm:$0xff]  ;;  %v3158_v49 = vld [vmem:[#allocation6 + $0x10b8] sm:$0xff]  ;;  %v2941_v32 = vld [vmem:[#allocation4 + $0x48] sm:$0xff] }
 0x4f0   :  { %v3149_v42 = vld [vmem:[#allocation6 + $0x1070] sm:$0xff] }
 0x4f1   :  { %6214 = vmatpush1.bf16.msra.mxu0 %v6213_v2  ;;  %6342 = vmatpush1.bf16.msra.mxu1 %v6341_v11  ;;  %v6223_v2 = vpack.c.bf16 %v2564_v35, %v2560_v5  ;;  %v6351_v11 = vpack.c.bf16 %v2566_v60, %v2562_v23  ;;  %v6505_v35 = vpack.c.bf16 %v3149_v42, %v3145_v44  ;;  %v3151_v23 = vld [vmem:[#allocation6 + $0x1080] sm:$0xff]  ;;  %v3180_v44 = vld [vmem:[#allocation6 + $0x1168] sm:$0xff]  ;;  %v3178_v42 = vld [vmem:[#allocation6 + $0x1158] sm:$0xff] }
 0x4f2   :  { %6216 = vmatprep.subr.bf16.mxu0 %v6215_v53  ;;  %6344 = vmatprep.subr.bf16.mxu1 %v6343_v1  ;;  %v2565_v53 = vld [vmem:[#allocation6 + $0xff0] sm:$0xff]  ;;  %v6225_v1 = vpack.c.bf16 %v2563_v29, %v2559_v27  ;;  %v3155_v60 = vld [vmem:[#allocation6 + $0x10a0] sm:$0xff]  ;;  %v3164_v29 = vld [vmem:[#allocation6 + $0x10e8] sm:$0xff] }
 0x4f3   :  { %v6353_v13 = vpack.c.bf16 %v2565_v53, %v2561_v37  ;;  %v3153_v27 = vld [vmem:[#allocation6 + $0x1090] sm:$0xff]  ;;  %v3162_v37 = vld [vmem:[#allocation6 + $0x10d8] sm:$0xff] }
 0x4f4   :  { %v3166_v53 = vld [vmem:[#allocation6 + $0x10f8] sm:$0xff] }
 0x4f5   :  { %6218 = vmatpush1.bf16.msra.mxu0 %v6217_v61  ;;  %6346 = vmatpush1.bf16.msra.mxu1 %v6345_v40 }
 0x4f6   :  { %6220 = vmatprep.subr.bf16.mxu0 %v6219_v36  ;;  %6348 = vmatprep.subr.bf16.mxu1 %v6347_v9  ;;  %v3152_v36 = vld [vmem:[#allocation6 + $0x1088] sm:$0xff]  ;;  %v3154_v9 = vld [vmem:[#allocation6 + $0x1098] sm:$0xff] }
 0x4f9   :  { %6222 = vmatpush1.bf16.msra.mxu0 %v6221_v24  ;;  %6350 = vmatpush1.bf16.msra.mxu1 %v6349_v41  ;;  %v6507_v41 = vpack.c.bf16 %v3158_v49, %v3154_v9  ;;  %v3175_v9 = vld [vmem:[#allocation6 + $0x1140] sm:$0xff] }
 0x4fa   :  { %6224 = vmatprep.subr.bf16.mxu0 %v6223_v2  ;;  %6352 = vmatprep.subr.bf16.mxu1 %v6351_v11  ;;  %v3157_v2 = vld [vmem:[#allocation6 + $0x10b0] sm:$0xff]  ;;  %v3160_v11 = vld [vmem:[#allocation6 + $0x10c8] sm:$0xff]  ;;  %v3179_v49 = vld [vmem:[#allocation6 + $0x1160] sm:$0xff] }
 0x4fd   :  { %6226 = vmatpush1.bf16.msra.mxu0 %v6225_v1  ;;  %6354 = vmatpush1.bf16.msra.mxu1 %v6353_v13  ;;  %v2942_v1 = vld [vmem:[#allocation4 + $0x50] sm:$0xff]  ;;  %v6381_v13 = vpack.c.bf16 %v3155_v60, %v3151_v23  ;;  %v3184_v60 = vld [vmem:[#allocation6 + $0x1188] sm:$0xff] }
 0x4fe   :  { %6356 = vmatprep.subr.bf16.mxu0 %v8706_v31  ;;  %6364 = vmatprep.subr.bf16.mxu1 %v8708_v55  ;;  %v6371_v55 = vpack.c.bf16 %v3140_v58, %v3136_v46  ;;  %v6499_v31 = vpack.c.bf16 %v3142_v14, %v3138_v54  ;;  %v6509_v46 = vpack.c.bf16 %v3157_v2, %v3153_v27  ;;  %v3159_v58 = vld [vmem:[#allocation6 + $0x10c0] sm:$0xff]  ;;  %v3181_v23 = vld [vmem:[#allocation6 + $0x1170] sm:$0xff]  ;;  %v3190_v27 = vld [vmem:[#allocation6 + $0x11b8] sm:$0xff] }
 0x4ff   :  { %v3163_v54 = vld [vmem:[#allocation6 + $0x10e0] sm:$0xff]  ;;  %v6383_v14 = vpack.c.bf16 %v3164_v29, %v3160_v11  ;;  %v6393_v2 = vpack.c.bf16 %v3179_v49, %v3175_v9  ;;  %v3212_v9 = vld [vmem:[#allocation6 + $0x1268] sm:$0xff]  ;;  %v3210_v49 = vld [vmem:[#allocation6 + $0x1258] sm:$0xff] }
 0x500   :  { %2721 = vmatmul.mubr.f32.vlgmr.msra.gmra.mrb[12].mxu0 %v8800_v18  ;;  %2899 = vmatmul.mubr.f32.vlgmr.msra.gmra.mrb[12].mxu1 %v8800_v18  ;;  %v3146_v18 = vld [vmem:[#allocation6 + $0x1058] sm:$0xff]  ;;  %v3183_v29 = vld [vmem:[#allocation6 + $0x1180] sm:$0xff] }
 0x501   :  { %6358 = vmatpush1.bf16.msra.mxu0 %v8710_v48  ;;  %6366 = vmatpush1.bf16.msra.mxu1 %v8712_v57  ;;  %v3135_v48 = vld [vmem:[#allocation6 + $0x1000] sm:$0xff] }
 0x502   :  { %6360 = vmatprep.subr.bf16.mxu0 %v8716_v20  ;;  %6368 = vmatprep.subr.bf16.mxu1 %v8720_v45  ;;  %v3139_v57 = vld [vmem:[#allocation6 + $0x1020] sm:$0xff]  ;;  %v3137_v20 = vld [vmem:[#allocation6 + $0x1010] sm:$0xff] }
 0x503   :  { %2726 = vmatprep.mubr.f32.mxu0 %v8806_v19  ;;  %2904 = vmatprep.mubr.f32.mxu1 %v8806_v19  ;;  %v3141_v45 = vld [vmem:[#allocation6 + $0x1030] sm:$0xff]  ;;  %v2940_v19 = vld [vmem:[#allocation4 + $0x40] sm:$0xff] }
 0x504   :  { %2727 = vmatmul.mubr.f32.gmra.mrb[14].mxu0 %v8804_v28  ;;  %2905 = vmatmul.mubr.f32.gmra.mrb[14].mxu1 %v8804_v28  ;;  %v3150_v28 = vld [vmem:[#allocation6 + $0x1078] sm:$0xff] }
 0x505   :  { %6362 = vmatpush1.bf16.msra.mxu0 %v8723_v59  ;;  %6370 = vmatpush1.bf16.msra.mxu1 %v8726_v6  ;;  %v3144_v59 = vld [vmem:[#allocation6 + $0x1048] sm:$0xff]  ;;  %v6503_v40 = vpack.c.bf16 %v3150_v28, %v3146_v18  ;;  %v6385_v18 = vpack.c.bf16 %v3163_v54, %v3159_v58 }
 0x506   :  { %2732 = vmatprep.mubr.f32.mxu0 %v8810_v4  ;;  %2910 = vmatprep.mubr.f32.mxu1 %v8810_v4  ;;  %v3148_v6 = vld [vmem:[#allocation6 + $0x1068] sm:$0xff]  ;;  %v6501_v4 = vpack.c.bf16 %v3141_v45, %v3137_v20  ;;  %v3170_v45 = vld [vmem:[#allocation6 + $0x1118] sm:$0xff] }
 0x507   :  { %6372 = vmatprep.subr.bf16.mxu0 %v6371_v55  ;;  %6500 = vmatprep.subr.bf16.mxu1 %v6499_v31  ;;  %v6375_v61 = vpack.c.bf16 %v3148_v6, %v3144_v59  ;;  %v6511_v55 = vpack.c.bf16 %v3166_v53, %v3162_v37  ;;  %v3161_v31 = vld [vmem:[#allocation6 + $0x10d0] sm:$0xff]  ;;  %v3172_v20 = vld [vmem:[#allocation6 + $0x1128] sm:$0xff]  ;;  %v3174_v59 = vld [vmem:[#allocation6 + $0x1138] sm:$0xff] }
 0x508   :  { %2733 = vmatmul.mubr.f32.gmra.mrb[16].mxu0 %v8808_v22  ;;  %2911 = vmatmul.mubr.f32.gmra.mrb[16].mxu1 %v8808_v22  ;;  %v6373_v22 = vpack.c.bf16 %v3139_v57, %v3135_v48  ;;  %v3165_v48 = vld [vmem:[#allocation6 + $0x10f0] sm:$0xff]  ;;  %v3168_v57 = vld [vmem:[#allocation6 + $0x1108] sm:$0xff]  ;;  %v2943_v6 = vld [vmem:[#allocation4 + $0x58] sm:$0xff] }
 0x509   :  { %2738 = vmatprep.mubr.f32.mxu0 %v8814_v33  ;;  %2916 = vmatprep.mubr.f32.mxu1 %v8814_v33  ;;  %v3143_v33 = vld [vmem:[#allocation6 + $0x1040] sm:$0xff]  ;;  %v6513_v28 = vpack.c.bf16 %v3165_v48, %v3161_v31  ;;  %v3192_v58 = vld [vmem:[#allocation6 + $0x11c8] sm:$0xff] }
 0x50a   :  { %v6377_v5 = vpack.c.bf16 %v3147_v47, %v3143_v33  ;;  %v6515_v33 = vpack.c.bf16 %v3174_v59, %v3170_v45  ;;  %v3169_v47 = vld [vmem:[#allocation6 + $0x1110] sm:$0xff]  ;;  %v3187_v37 = vld [vmem:[#allocation6 + $0x11a0] sm:$0xff]  ;;  %v3196_v54 = vld [vmem:[#allocation6 + $0x11e8] sm:$0xff] }
 0x50b   :  { %v6397_v31 = vpack.c.bf16 %v3187_v37, %v3183_v29  ;;  %v6399_v45 = vpack.c.bf16 %v3196_v54, %v3192_v58  ;;  %v3220_v29 = vld [vmem:[#allocation6 + $0x12a8] sm:$0xff]  ;;  %v3218_v37 = vld [vmem:[#allocation6 + $0x1298] sm:$0xff]  ;;  %v3219_v58 = vld [vmem:[#allocation6 + $0x12a0] sm:$0xff] }
 0x50c   :  { %2739 = vmatmul.mubr.f32.gmra.mrb[18].mxu0 %v8812_v10  ;;  %2917 = vmatmul.mubr.f32.gmra.mrb[18].mxu1 %v8812_v10  ;;  %v3156_v10 = vld [vmem:[#allocation6 + $0x10a8] sm:$0xff] }
 0x50d   :  { %3020 = vmatprep.mubr.f32.mxu0 %v9976_v15  ;;  %3109 = vmatprep.mubr.f32.mxu1 %v9976_v15  ;;  %v6379_v24 = vpack.c.bf16 %v3156_v10, %v3152_v36 }
 0x510   :  { %5291 = vmatmul.mubr.msk.f32.vlgmr.msra.gmra.mrb[28].mxu0 %vm1275_vm0, %v2940_v19  ;;  %5295 = vmatmul.mubr.msk.f32.vlgmr.msra.gmra.mrb[28].mxu1 %vm1275_vm0, %v2940_v19  ;;  %v3167_v19 = vld [vmem:[#allocation6 + $0x1100] sm:$0xff] }
 0x511   :  { %3026 = vmatprep.mubr.f32.mxu0 %v9976_v15  ;;  %3115 = vmatprep.mubr.f32.mxu1 %v9976_v15 }
 0x512   :  { %6374 = vmatpush1.bf16.msra.mxu0 %v6373_v22  ;;  %6502 = vmatpush1.bf16.msra.mxu1 %v6501_v4  ;;  %v3171_v22 = vld [vmem:[#allocation6 + $0x1120] sm:$0xff]  ;;  %v6387_v4 = vpack.c.bf16 %v3172_v20, %v3168_v57 }
 0x513   :  { %6376 = vmatprep.subr.bf16.mxu0 %v6375_v61  ;;  %6504 = vmatprep.subr.bf16.mxu1 %v6503_v40  ;;  %v3173_v61 = vld [vmem:[#allocation6 + $0x1130] sm:$0xff]  ;;  %v3176_v40 = vld [vmem:[#allocation6 + $0x1148] sm:$0xff]  ;;  %v6389_v36 = vpack.c.bf16 %v3171_v22, %v3167_v19  ;;  %v3191_v57 = vld [vmem:[#allocation6 + $0x11c0] sm:$0xff] }
 0x514   :  { %5292 = vmatmul.mubr.msk.f32.gmra.mrb[30].mxu0 %vm1275_vm0, %v2941_v32  ;;  %5296 = vmatmul.mubr.msk.f32.gmra.mrb[30].mxu1 %vm1275_vm0, %v2941_v32  ;;  %v6517_v10 = vpack.c.bf16 %v3173_v61, %v3169_v47  ;;  %v6391_v32 = vpack.c.bf16 %v3180_v44, %v3176_v40  ;;  %v3195_v20 = vld [vmem:[#allocation6 + $0x11e0] sm:$0xff]  ;;  %v3204_v19 = vld [vmem:[#allocation6 + $0x1228] sm:$0xff]  ;;  %v3202_v22 = vld [vmem:[#allocation6 + $0x1218] sm:$0xff] }
 0x515   :  { %3032 = vmatprep.mubr.f32.mxu0 %v9976_v15  ;;  %3121 = vmatprep.mubr.f32.mxu1 %v9976_v15  ;;  %v3199_v61 = vld [vmem:[#allocation6 + $0x1200] sm:$0xff] }
 0x516   :  { %6378 = vmatpush1.bf16.msra.mxu0 %v6377_v5  ;;  %6506 = vmatpush1.bf16.msra.mxu1 %v6505_v35  ;;  %v3177_v35 = vld [vmem:[#allocation6 + $0x1150] sm:$0xff]  ;;  %v3203_v40 = vld [vmem:[#allocation6 + $0x1220] sm:$0xff] }
 0x517   :  { %6380 = vmatprep.subr.bf16.mxu0 %v6379_v24  ;;  %6508 = vmatprep.subr.bf16.mxu1 %v6507_v41  ;;  %v3188_v24 = vld [vmem:[#allocation6 + $0x11a8] sm:$0xff]  ;;  %v3186_v41 = vld [vmem:[#allocation6 + $0x1198] sm:$0xff]  ;;  %v6521_v11 = vpack.c.bf16 %v3181_v23, %v3177_v35  ;;  %v3207_v23 = vld [vmem:[#allocation6 + $0x1240] sm:$0xff] }
 0x518   :  { %5293 = vmatmul.mubr.msk.f32.gmra.mrb[32].mxu0 %vm1275_vm0, %v2942_v1  ;;  %5297 = vmatmul.mubr.msk.f32.gmra.mrb[32].mxu1 %vm1275_vm0, %v2942_v1  ;;  %v6395_v53 = vpack.c.bf16 %v3188_v24, %v3184_v60  ;;  %v6523_v1 = vpack.c.bf16 %v3190_v27, %v3186_v41  ;;  %v3211_v60 = vld [vmem:[#allocation6 + $0x1260] sm:$0xff]  ;;  %v3209_v27 = vld [vmem:[#allocation6 + $0x1250] sm:$0xff] }
 0x519   :  { %3038 = vmatprep.mubr.f32.mxu0 %v9976_v15  ;;  %3127 = vmatprep.mubr.f32.mxu1 %v9976_v15  ;;  %v3182_v15 = vld [vmem:[#allocation6 + $0x1178] sm:$0xff] }
 0x51a   :  { %6382 = vmatpush1.bf16.msra.mxu0 %v6381_v13  ;;  %6510 = vmatpush1.bf16.msra.mxu1 %v6509_v46  ;;  %v6519_v5 = vpack.c.bf16 %v3182_v15, %v3178_v42  ;;  %v3185_v13 = vld [vmem:[#allocation6 + $0x1190] sm:$0xff] }
 0x51b   :  { %6384 = vmatprep.subr.bf16.mxu0 %v6383_v14  ;;  %6512 = vmatprep.subr.bf16.mxu1 %v6511_v55  ;;  %v3189_v46 = vld [vmem:[#allocation6 + $0x11b0] sm:$0xff]  ;;  %v3194_v14 = vld [vmem:[#allocation6 + $0x11d8] sm:$0xff] }
 0x51c   :  { %5294 = vmatmul.mubr.msk.f32.gmra.mrb[34].mxu0 %vm1275_vm0, %v2943_v6  ;;  %5298 = vmatmul.mubr.msk.f32.gmra.mrb[34].mxu1 %vm1275_vm0, %v2943_v6  ;;  %v3198_v55 = vld [vmem:[#allocation6 + $0x11f8] sm:$0xff]  ;;  %v6525_v48 = vpack.c.bf16 %v3189_v46, %v3185_v13  ;;  %v3193_v6 = vld [vmem:[#allocation6 + $0x11d0] sm:$0xff]  ;;  %v3215_v46 = vld [vmem:[#allocation6 + $0x1280] sm:$0xff] }
 0x51d   :  { %v6527_v59 = vpack.c.bf16 %v3198_v55, %v3194_v14  ;;  %v3201_v15 = vld [vmem:[#allocation6 + $0x1210] sm:$0xff] }
 0x51e   :  { %6386 = vmatpush1.bf16.msra.mxu0 %v6385_v18  ;;  %6514 = vmatpush1.bf16.msra.mxu1 %v6513_v28  ;;  %v3197_v18 = vld [vmem:[#allocation6 + $0x11f0] sm:$0xff]  ;;  %v3200_v28 = vld [vmem:[#allocation6 + $0x1208] sm:$0xff] }
 0x51f   :  { %6388 = vmatprep.subr.bf16.mxu0 %v6387_v4  ;;  %6516 = vmatprep.subr.bf16.mxu1 %v6515_v33  ;;  %v3206_v4 = vld [vmem:[#allocation6 + $0x1238] sm:$0xff]  ;;  %v6401_v33 = vpack.c.bf16 %v3195_v20, %v3191_v57  ;;  %v6529_v47 = vpack.c.bf16 %v3197_v18, %v3193_v6  ;;  %v6403_v44 = vpack.c.bf16 %v3204_v19, %v3200_v28  ;;  %v3217_v55 = vld [vmem:[#allocation6 + $0x1290] sm:$0xff]  ;;  %v3228_v57 = vld [vmem:[#allocation6 + $0x12e8] sm:$0xff] }
 0x520   :  { %v6531_v42 = vpack.c.bf16 %v3206_v4, %v3202_v22  ;;  %v3226_v20 = vld [vmem:[#allocation6 + $0x12d8] sm:$0xff]  ;;  %v3223_v18 = vld [vmem:[#allocation6 + $0x12c0] sm:$0xff]  ;;  %v3225_v4 = vld [vmem:[#allocation6 + $0x12d0] sm:$0xff] }
 0x521   :  { %v3227_v28 = vld [vmem:[#allocation6 + $0x12e0] sm:$0xff] }
 0x522   :  { %6390 = vmatpush1.bf16.msra.mxu0 %v6389_v36  ;;  %6518 = vmatpush1.bf16.msra.mxu1 %v6517_v10  ;;  %v3205_v36 = vld [vmem:[#allocation6 + $0x1230] sm:$0xff]  ;;  %v3208_v10 = vld [vmem:[#allocation6 + $0x1248] sm:$0xff] }
 0x523   :  { %6392 = vmatprep.subr.bf16.mxu0 %v6391_v32  ;;  %6520 = vmatprep.subr.bf16.mxu1 %v6519_v5  ;;  %v3214_v32 = vld [vmem:[#allocation6 + $0x1278] sm:$0xff]  ;;  %v6405_v5 = vpack.c.bf16 %v3203_v40, %v3199_v61  ;;  %v6533_v35 = vpack.c.bf16 %v3205_v36, %v3201_v15  ;;  %v6407_v24 = vpack.c.bf16 %v3212_v9, %v3208_v10  ;;  %v3236_v61 = vld [vmem:[#allocation6 + $0x1328] sm:$0xff]  ;;  %v3231_v36 = vld [vmem:[#allocation6 + $0x1300] sm:$0xff] }
 0x524   :  { %v6535_v41 = vpack.c.bf16 %v3214_v32, %v3210_v49  ;;  %v3234_v40 = vld [vmem:[#allocation6 + $0x1318] sm:$0xff]  ;;  %v3235_v10 = vld [vmem:[#allocation6 + $0x1320] sm:$0xff]  ;;  %v3233_v32 = vld [vmem:[#allocation6 + $0x1310] sm:$0xff] }
 0x526   :  { %6394 = vmatpush1.bf16.msra.mxu0 %v6393_v2  ;;  %6522 = vmatpush1.bf16.msra.mxu1 %v6521_v11  ;;  %v3213_v2 = vld [vmem:[#allocation6 + $0x1270] sm:$0xff]  ;;  %v3216_v11 = vld [vmem:[#allocation6 + $0x1288] sm:$0xff] }
 0x527   :  { %6396 = vmatprep.subr.bf16.mxu0 %v6395_v53  ;;  %6524 = vmatprep.subr.bf16.mxu1 %v6523_v1  ;;  %v3222_v53 = vld [vmem:[#allocation6 + $0x12b8] sm:$0xff]  ;;  %v6409_v1 = vpack.c.bf16 %v3211_v60, %v3207_v23  ;;  %v6537_v13 = vpack.c.bf16 %v3213_v2, %v3209_v27  ;;  %v6411_v54 = vpack.c.bf16 %v3220_v29, %v3216_v11  ;;  %v3244_v23 = vld [vmem:[#allocation6 + $0x1368] sm:$0xff]  ;;  %v3239_v2 = vld [vmem:[#allocation6 + $0x1340] sm:$0xff] }
 0x528   :  { %v6539_v14 = vpack.c.bf16 %v3222_v53, %v3218_v37  ;;  %v3242_v60 = vld [vmem:[#allocation6 + $0x1358] sm:$0xff]  ;;  %v3243_v11 = vld [vmem:[#allocation6 + $0x1360] sm:$0xff]  ;;  %v3241_v53 = vld [vmem:[#allocation6 + $0x1350] sm:$0xff] }
 0x52a   :  { %6398 = vmatpush1.bf16.msra.mxu0 %v6397_v31  ;;  %6526 = vmatpush1.bf16.msra.mxu1 %v6525_v48  ;;  %v3221_v31 = vld [vmem:[#allocation6 + $0x12b0] sm:$0xff]  ;;  %v3224_v48 = vld [vmem:[#allocation6 + $0x12c8] sm:$0xff] }
 0x52b   :  { %6400 = vmatprep.subr.bf16.mxu0 %v6399_v45  ;;  %6528 = vmatprep.subr.bf16.mxu1 %v6527_v59  ;;  %v3230_v45 = vld [vmem:[#allocation6 + $0x12f8] sm:$0xff]  ;;  %v6413_v59 = vpack.c.bf16 %v3219_v58, %v3215_v46  ;;  %v6541_v6 = vpack.c.bf16 %v3221_v31, %v3217_v55  ;;  %v6415_v19 = vpack.c.bf16 %v3228_v57, %v3224_v48  ;;  %v3252_v46 = vld [vmem:[#allocation6 + $0x13a8] sm:$0xff]  ;;  %v3247_v31 = vld [vmem:[#allocation6 + $0x1380] sm:$0xff] }
 0x52c   :  { %v6543_v22 = vpack.c.bf16 %v3230_v45, %v3226_v20  ;;  %v3250_v58 = vld [vmem:[#allocation6 + $0x1398] sm:$0xff]  ;;  %v3251_v48 = vld [vmem:[#allocation6 + $0x13a0] sm:$0xff]  ;;  %v3249_v45 = vld [vmem:[#allocation6 + $0x1390] sm:$0xff] }
 0x52e   :  { %6402 = vmatpush1.bf16.msra.mxu0 %v6401_v33  ;;  %6530 = vmatpush1.bf16.msra.mxu1 %v6529_v47  ;;  %v3229_v33 = vld [vmem:[#allocation6 + $0x12f0] sm:$0xff]  ;;  %v3232_v47 = vld [vmem:[#allocation6 + $0x1308] sm:$0xff] }
 0x52f   :  { %6404 = vmatprep.subr.bf16.mxu0 %v6403_v44  ;;  %6532 = vmatprep.subr.bf16.mxu1 %v6531_v42  ;;  %v3238_v44 = vld [vmem:[#allocation6 + $0x1338] sm:$0xff]  ;;  %v6417_v42 = vpack.c.bf16 %v3227_v28, %v3223_v18  ;;  %v6545_v15 = vpack.c.bf16 %v3229_v33, %v3225_v4  ;;  %v6419_v9 = vpack.c.bf16 %v3236_v61, %v3232_v47  ;;  %v3260_v18 = vld [vmem:[#allocation6 + $0x13e8] sm:$0xff]  ;;  %v3255_v33 = vld [vmem:[#allocation6 + $0x13c0] sm:$0xff] }
 0x530   :  { %v6547_v49 = vpack.c.bf16 %v3238_v44, %v3234_v40  ;;  %v3258_v28 = vld [vmem:[#allocation6 + $0x13d8] sm:$0xff]  ;;  %v3259_v40 = vld [vmem:[#allocation6 + $0x13e0] sm:$0xff]  ;;  %v3257_v44 = vld [vmem:[#allocation6 + $0x13d0] sm:$0xff] }
 0x532   :  { %6406 = vmatpush1.bf16.msra.mxu0 %v6405_v5  ;;  %6534 = vmatpush1.bf16.msra.mxu1 %v6533_v35  ;;  %v3237_v5 = vld [vmem:[#allocation6 + $0x1330] sm:$0xff]  ;;  %v3240_v35 = vld [vmem:[#allocation6 + $0x1348] sm:$0xff] }
 0x533   :  { %6408 = vmatprep.subr.bf16.mxu0 %v6407_v24  ;;  %6536 = vmatprep.subr.bf16.mxu1 %v6535_v41  ;;  %v3246_v24 = vld [vmem:[#allocation6 + $0x1378] sm:$0xff]  ;;  %v6421_v41 = vpack.c.bf16 %v3235_v10, %v3231_v36  ;;  %v6549_v27 = vpack.c.bf16 %v3237_v5, %v3233_v32  ;;  %v6423_v29 = vpack.c.bf16 %v3244_v23, %v3240_v35  ;;  %v3264_v10 = vld [vmem:[#allocation6 + $0x1408] sm:$0xff]  ;;  %v3263_v23 = vld [vmem:[#allocation6 + $0x1400] sm:$0xff] }
 0x534   :  { %v6551_v37 = vpack.c.bf16 %v3246_v24, %v3242_v60  ;;  %v3270_v5 = vld [vmem:[#allocation6 + $0x1438] sm:$0xff]  ;;  %v3267_v60 = vld [vmem:[#allocation6 + $0x1420] sm:$0xff]  ;;  %v3265_v24 = vld [vmem:[#allocation6 + $0x1410] sm:$0xff] }
 0x536   :  { %6410 = vmatpush1.bf16.msra.mxu0 %v6409_v1  ;;  %6538 = vmatpush1.bf16.msra.mxu1 %v6537_v13  ;;  %v3245_v1 = vld [vmem:[#allocation6 + $0x1370] sm:$0xff]  ;;  %v3248_v13 = vld [vmem:[#allocation6 + $0x1388] sm:$0xff] }
 0x537   :  { %6412 = vmatprep.subr.bf16.mxu0 %v6411_v54  ;;  %6540 = vmatprep.subr.bf16.mxu1 %v6539_v14  ;;  %v3254_v54 = vld [vmem:[#allocation6 + $0x13b8] sm:$0xff]  ;;  %v6425_v14 = vpack.c.bf16 %v3243_v11, %v3239_v2  ;;  %v6553_v55 = vpack.c.bf16 %v3245_v1, %v3241_v53  ;;  %v6427_v57 = vpack.c.bf16 %v3252_v46, %v3248_v13  ;;  %v3276_v2 = vld [vmem:[#allocation6 + $0x1468] sm:$0xff]  ;;  %v3271_v13 = vld [vmem:[#allocation6 + $0x1440] sm:$0xff] }
 0x538   :  { %v6555_v20 = vpack.c.bf16 %v3254_v54, %v3250_v58  ;;  %v3274_v11 = vld [vmem:[#allocation6 + $0x1458] sm:$0xff]  ;;  %v6437_v53 = vpack.c.bf16 %v3267_v60, %v3263_v23  ;;  %v3275_v46 = vld [vmem:[#allocation6 + $0x1460] sm:$0xff] }
 0x539   :  { %v3291_v23 = vld [vmem:[#allocation6 + $0x14e0] sm:$0xff] }
 0x53a   :  { %6414 = vmatpush1.bf16.msra.mxu0 %v6413_v59  ;;  %6542 = vmatpush1.bf16.msra.mxu1 %v6541_v6  ;;  %v3253_v59 = vld [vmem:[#allocation6 + $0x13b0] sm:$0xff]  ;;  %v3256_v6 = vld [vmem:[#allocation6 + $0x13c8] sm:$0xff] }
 0x53b   :  { %6416 = vmatprep.subr.bf16.mxu0 %v6415_v19  ;;  %6544 = vmatprep.subr.bf16.mxu1 %v6543_v22  ;;  %v3262_v19 = vld [vmem:[#allocation6 + $0x13f8] sm:$0xff]  ;;  %v6429_v22 = vpack.c.bf16 %v3251_v48, %v3247_v31  ;;  %v6557_v4 = vpack.c.bf16 %v3253_v59, %v3249_v45  ;;  %v6431_v47 = vpack.c.bf16 %v3260_v18, %v3256_v6  ;;  %v3273_v31 = vld [vmem:[#allocation6 + $0x1450] sm:$0xff]  ;;  %v3284_v45 = vld [vmem:[#allocation6 + $0x14a8] sm:$0xff] }
 0x53c   :  { %v6559_v61 = vpack.c.bf16 %v3262_v19, %v3258_v28  ;;  %v3277_v48 = vld [vmem:[#allocation6 + $0x1470] sm:$0xff]  ;;  %v3282_v59 = vld [vmem:[#allocation6 + $0x1498] sm:$0xff]  ;;  %v6441_v18 = vpack.c.bf16 %v3275_v46, %v3271_v13  ;;  %v3279_v19 = vld [vmem:[#allocation6 + $0x1480] sm:$0xff] }
 0x53d   :  { %v3286_v6 = vld [vmem:[#allocation6 + $0x14b8] sm:$0xff]  ;;  %v6569_v28 = vpack.c.bf16 %v3277_v48, %v3273_v31  ;;  %v3299_v31 = vld [vmem:[#allocation6 + $0x1520] sm:$0xff] }
 0x53e   :  { %6418 = vmatpush1.bf16.msra.mxu0 %v6417_v42  ;;  %6546 = vmatpush1.bf16.msra.mxu1 %v6545_v15  ;;  %v3261_v42 = vld [vmem:[#allocation6 + $0x13f0] sm:$0xff]  ;;  %v6433_v15 = vpack.c.bf16 %v3259_v40, %v3255_v33  ;;  %v3298_v13 = vld [vmem:[#allocation6 + $0x1518] sm:$0xff] }
 0x53f   :  { %6420 = vmatprep.subr.bf16.mxu0 %v6419_v9  ;;  %6548 = vmatprep.subr.bf16.mxu1 %v6547_v49  ;;  %v6561_v36 = vpack.c.bf16 %v3261_v42, %v3257_v44  ;;  %v3268_v9 = vld [vmem:[#allocation6 + $0x1428] sm:$0xff]  ;;  %v3266_v49 = vld [vmem:[#allocation6 + $0x1418] sm:$0xff]  ;;  %v3281_v40 = vld [vmem:[#allocation6 + $0x1490] sm:$0xff] }
 0x540   :  { %v6435_v32 = vpack.c.bf16 %v3268_v9, %v3264_v10  ;;  %v6563_v35 = vpack.c.bf16 %v3270_v5, %v3266_v49  ;;  %v3285_v44 = vld [vmem:[#allocation6 + $0x14b0] sm:$0xff]  ;;  %v3288_v42 = vld [vmem:[#allocation6 + $0x14c8] sm:$0xff]  ;;  %v3290_v9 = vld [vmem:[#allocation6 + $0x14d8] sm:$0xff] }
 0x541   :  { %v3292_v10 = vld [vmem:[#allocation6 + $0x14e8] sm:$0xff]  ;;  %v3294_v49 = vld [vmem:[#allocation6 + $0x14f8] sm:$0xff]  ;;  %v6573_v5 = vpack.c.bf16 %v3285_v44, %v3281_v40 }
 0x542   :  { %6422 = vmatpush1.bf16.msra.mxu0 %v6421_v41  ;;  %6550 = vmatpush1.bf16.msra.mxu1 %v6549_v27  ;;  %v3269_v41 = vld [vmem:[#allocation6 + $0x1430] sm:$0xff]  ;;  %v3272_v27 = vld [vmem:[#allocation6 + $0x1448] sm:$0xff]  ;;  %v3302_v46 = vld [vmem:[#allocation6 + $0x1538] sm:$0xff] }
 0x543   :  { %6424 = vmatprep.subr.bf16.mxu0 %v6423_v29  ;;  %6552 = vmatprep.subr.bf16.mxu1 %v6551_v37  ;;  %v3278_v29 = vld [vmem:[#allocation6 + $0x1478] sm:$0xff]  ;;  %v6565_v1 = vpack.c.bf16 %v3269_v41, %v3265_v24  ;;  %v6447_v41 = vpack.c.bf16 %v3292_v10, %v3288_v42  ;;  %v3303_v42 = vld [vmem:[#allocation6 + $0x1540] sm:$0xff] }
 0x546   :  { %6426 = vmatpush1.bf16.msra.mxu0 %v6425_v14  ;;  %6554 = vmatpush1.bf16.msra.mxu1 %v6553_v55  ;;  %v6439_v14 = vpack.c.bf16 %v3276_v2, %v3272_v27  ;;  %v6567_v55 = vpack.c.bf16 %v3278_v29, %v3274_v11  ;;  %v6575_v27 = vpack.c.bf16 %v3294_v49, %v3290_v9  ;;  %v3289_v2 = vld [vmem:[#allocation6 + $0x14d0] sm:$0xff]  ;;  %v3296_v29 = vld [vmem:[#allocation6 + $0x1508] sm:$0xff] }
 0x547   :  { %6428 = vmatprep.subr.bf16.mxu0 %v6427_v57  ;;  %6556 = vmatprep.subr.bf16.mxu1 %v6555_v20  ;;  %v3280_v57 = vld [vmem:[#allocation6 + $0x1488] sm:$0xff]  ;;  %v3293_v11 = vld [vmem:[#allocation6 + $0x14f0] sm:$0xff] }
 0x548   :  { %v3305_v49 = vld [vmem:[#allocation6 + $0x1550] sm:$0xff] }
 0x54a   :  { %6430 = vmatpush1.bf16.msra.mxu0 %v6429_v22  ;;  %6558 = vmatpush1.bf16.msra.mxu1 %v6557_v4  ;;  %v3283_v22 = vld [vmem:[#allocation6 + $0x14a0] sm:$0xff] }
 0x54b   :  { %6432 = vmatprep.subr.bf16.mxu0 %v6431_v47  ;;  %6560 = vmatprep.subr.bf16.mxu1 %v6559_v61  ;;  %v6443_v47 = vpack.c.bf16 %v3284_v45, %v3280_v57  ;;  %v6571_v61 = vpack.c.bf16 %v3286_v6, %v3282_v59  ;;  %v6579_v59 = vpack.c.bf16 %v3302_v46, %v3298_v13  ;;  %v3297_v6 = vld [vmem:[#allocation6 + $0x1510] sm:$0xff]  ;;  %v3320_v46 = vld [vmem:[#allocation6 + $0x15c8] sm:$0xff] }
 0x54c   :  { %v3317_v13 = vld [vmem:[#allocation6 + $0x15b0] sm:$0xff] }
 0x54e   :  { %6434 = vmatpush1.bf16.msra.mxu0 %v6433_v15  ;;  %6562 = vmatpush1.bf16.msra.mxu1 %v6561_v36 }
 0x54f   :  { %6436 = vmatprep.subr.bf16.mxu0 %v6435_v32  ;;  %6564 = vmatprep.subr.bf16.mxu1 %v6563_v35  ;;  %v6445_v32 = vpack.c.bf16 %v3283_v22, %v3279_v19  ;;  %v3287_v35 = vld [vmem:[#allocation6 + $0x14c0] sm:$0xff] }
 0x5e3   :  { %v3022_v37 = vpop.f32.mrb[28].mxu0  ;;  %v8856_v58 = vpop.f32.mrb[28].mxu1 }
 0x5e4   :  { %v3024_v54 = vpop.f32.mrb[29].mxu0  ;;  %v8858_v20 = vpop.f32.mrb[29].mxu1 }
 0x5e5   :  { %3455 = vmatprep.mubr.f32.mxu0 %v3024_v54  ;;  %3633 = vmatprep.mubr.f32.mxu1 %v3024_v54  ;;  %v6449_v54 = vpack.c.bf16 %v3291_v23, %v3287_v35  ;;  %v3316_v35 = vld [vmem:[#allocation6 + $0x15a8] sm:$0xff]  ;;  %v3314_v23 = vld [vmem:[#allocation6 + $0x1598] sm:$0xff] }
 0x5e6   :  { %3456 = vmatmul.mubr.f32.vlgmr.msra.gmra.mrb[12].mxu0 %v3022_v37  ;;  %3634 = vmatmul.mubr.f32.vlgmr.msra.gmra.mrb[12].mxu1 %v3022_v37 }
 0x5e7   :  { %6438 = vmatpush1.bf16.msra.mxu0 %v6437_v53  ;;  %6566 = vmatpush1.bf16.msra.mxu1 %v6565_v1  ;;  %v3028_v4 = vpop.f32.mrb[30].mxu0  ;;  %v8860_v33 = vpop.f32.mrb[30].mxu1  ;;  %v3300_v1 = vld [vmem:[#allocation6 + $0x1528] sm:$0xff] }
 0x5e8   :  { %6440 = vmatprep.subr.bf16.mxu0 %v6439_v14  ;;  %6568 = vmatprep.subr.bf16.mxu1 %v6567_v55  ;;  %v3030_v15 = vpop.f32.mrb[31].mxu0  ;;  %v8862_v36 = vpop.f32.mrb[31].mxu1  ;;  %v6577_v14 = vpack.c.bf16 %v3293_v11, %v3289_v2  ;;  %v3295_v55 = vld [vmem:[#allocation6 + $0x1500] sm:$0xff]  ;;  %v6451_v45 = vpack.c.bf16 %v3300_v1, %v3296_v29  ;;  %v3313_v1 = vld [vmem:[#allocation6 + $0x1590] sm:$0xff] }
 0x5e9   :  { %3461 = vmatprep.mubr.f32.mxu0 %v3030_v15  ;;  %3639 = vmatprep.mubr.f32.mxu1 %v3030_v15  ;;  %v6453_v40 = vpack.c.bf16 %v3299_v31, %v3295_v55  ;;  %v3307_v15 = vld [vmem:[#allocation6 + $0x1560] sm:$0xff]  ;;  %v3326_v55 = vld [vmem:[#allocation6 + $0x15f8] sm:$0xff] }
 0x5ea   :  { %3462 = vmatmul.mubr.f32.gmra.mrb[14].mxu0 %v3028_v4  ;;  %3640 = vmatmul.mubr.f32.gmra.mrb[14].mxu1 %v3028_v4  ;;  %v3308_v4 = vld [vmem:[#allocation6 + $0x1568] sm:$0xff]  ;;  %v3311_v2 = vld [vmem:[#allocation6 + $0x1580] sm:$0xff] }
 0x5eb   :  { %6442 = vmatpush1.bf16.msra.mxu0 %v6441_v18  ;;  %6570 = vmatpush1.bf16.msra.mxu1 %v6569_v28  ;;  %v3034_v60 = vpop.f32.mrb[32].mxu0  ;;  %v8864_v24 = vpop.f32.mrb[32].mxu1  ;;  %v3301_v18 = vld [vmem:[#allocation6 + $0x1530] sm:$0xff]  ;;  %v3304_v28 = vld [vmem:[#allocation6 + $0x1548] sm:$0xff]  ;;  %v3315_v11 = vld [vmem:[#allocation6 + $0x15a0] sm:$0xff] }
 0x5ec   :  { %6444 = vmatprep.subr.bf16.mxu0 %v6443_v47  ;;  %6572 = vmatprep.subr.bf16.mxu1 %v6571_v61  ;;  %v3036_v37 = vpop.f32.mrb[33].mxu0  ;;  %v8866_v53 = vpop.f32.mrb[33].mxu1  ;;  %v3306_v47 = vld [vmem:[#allocation6 + $0x1558] sm:$0xff]  ;;  %v6581_v44 = vpack.c.bf16 %v3301_v18, %v3297_v6  ;;  %v6455_v10 = vpack.c.bf16 %v3308_v4, %v3304_v28  ;;  %v6461_v31 = vpack.c.bf16 %v3315_v11, %v3311_v2  ;;  %v3321_v18 = vld [vmem:[#allocation6 + $0x15d0] sm:$0xff]  ;;  %v3332_v4 = vld [vmem:[#allocation6 + $0x1628] sm:$0xff] }
 0x5ed   :  { %3467 = vmatprep.mubr.f32.mxu0 %v3036_v37  ;;  %3645 = vmatprep.mubr.f32.mxu1 %v3036_v37  ;;  %v3310_v61 = vld [vmem:[#allocation6 + $0x1578] sm:$0xff]  ;;  %v3325_v28 = vld [vmem:[#allocation6 + $0x15f0] sm:$0xff]  ;;  %v3335_v2 = vld [vmem:[#allocation6 + $0x1640] sm:$0xff] }
 0x5ee   :  { %3468 = vmatmul.mubr.f32.gmra.mrb[16].mxu0 %v3034_v60  ;;  %3646 = vmatmul.mubr.f32.gmra.mrb[16].mxu1 %v3034_v60  ;;  %v6583_v9 = vpack.c.bf16 %v3310_v61, %v3306_v47  ;;  %v3318_v60 = vld [vmem:[#allocation6 + $0x15b8] sm:$0xff]  ;;  %v3339_v11 = vld [vmem:[#allocation6 + $0x1660] sm:$0xff] }
 0x5ef   :  { %6446 = vmatpush1.bf16.msra.mxu0 %v6445_v32  ;;  %6574 = vmatpush1.bf16.msra.mxu1 %v6573_v5  ;;  %v3040_v48 = vpop.f32.mrb[34].mxu0  ;;  %v8868_v57 = vpop.f32.mrb[34].mxu1  ;;  %v3309_v32 = vld [vmem:[#allocation6 + $0x1570] sm:$0xff]  ;;  %v3312_v5 = vld [vmem:[#allocation6 + $0x1588] sm:$0xff]  ;;  %v6587_v37 = vpack.c.bf16 %v3318_v60, %v3314_v23  ;;  %v3330_v47 = vld [vmem:[#allocation6 + $0x1618] sm:$0xff] }
 0x5f0   :  { %6448 = vmatprep.subr.bf16.mxu0 %v6447_v41  ;;  %6576 = vmatprep.subr.bf16.mxu1 %v6575_v27  ;;  %v3042_v19 = vpop.f32.mrb[35].mxu0  ;;  %v8870_v22 = vpop.f32.mrb[35].mxu1  ;;  %v6457_v41 = vpack.c.bf16 %v3307_v15, %v3303_v42  ;;  %v6585_v27 = vpack.c.bf16 %v3309_v32, %v3305_v49  ;;  %v6459_v29 = vpack.c.bf16 %v3316_v35, %v3312_v5  ;;  %v3334_v61 = vld [vmem:[#allocation6 + $0x1638] sm:$0xff]  ;;  %v3327_v42 = vld [vmem:[#allocation6 + $0x1600] sm:$0xff]  ;;  %v3329_v49 = vld [vmem:[#allocation6 + $0x1610] sm:$0xff] }
 0x5f1   :  { %3473 = vmatprep.mubr.f32.mxu0 %v3042_v19  ;;  %3651 = vmatprep.mubr.f32.mxu1 %v3042_v19  ;;  %v3328_v19 = vld [vmem:[#allocation6 + $0x1608] sm:$0xff]  ;;  %v3331_v15 = vld [vmem:[#allocation6 + $0x1620] sm:$0xff]  ;;  %v3333_v32 = vld [vmem:[#allocation6 + $0x1630] sm:$0xff] }
 0x5f2   :  { %3474 = vmatmul.mubr.f32.gmra.mrb[18].mxu0 %v3040_v48  ;;  %3652 = vmatmul.mubr.f32.gmra.mrb[18].mxu1 %v3040_v48  ;;  %v3319_v48 = vld [vmem:[#allocation6 + $0x15c0] sm:$0xff]  ;;  %v3336_v5 = vld [vmem:[#allocation6 + $0x1648] sm:$0xff]  ;;  %v3338_v23 = vld [vmem:[#allocation6 + $0x1658] sm:$0xff] }
 0x5f3   :  { %6450 = vmatpush1.bf16.msra.mxu0 %v6449_v54  ;;  %6578 = vmatpush1.bf16.msra.mxu1 %v6577_v14  ;;  %v3324_v54 = vld [vmem:[#allocation6 + $0x15e8] sm:$0xff]  ;;  %v3322_v14 = vld [vmem:[#allocation6 + $0x15d8] sm:$0xff] }
 0x5f4   :  { %6452 = vmatprep.subr.bf16.mxu0 %v6451_v45  ;;  %6580 = vmatprep.subr.bf16.mxu1 %v6579_v59  ;;  %v3323_v45 = vld [vmem:[#allocation6 + $0x15e0] sm:$0xff]  ;;  %v6463_v59 = vpack.c.bf16 %v3324_v54, %v3320_v46  ;;  %v6591_v6 = vpack.c.bf16 %v3326_v55, %v3322_v14  ;;  %v3340_v35 = vld [vmem:[#allocation6 + $0x1668] sm:$0xff]  ;;  %v3342_v60 = vld [vmem:[#allocation6 + $0x1678] sm:$0xff] }
 0x5f5   :  { %3544 = vmatprep.mubr.f32.mxu0 %v8858_v20  ;;  %3722 = vmatprep.mubr.f32.mxu1 %v8858_v20  ;;  %v6589_v20 = vpack.c.bf16 %v3317_v13, %v3313_v1  ;;  %v3337_v1 = vld [vmem:[#allocation6 + $0x1650] sm:$0xff]  ;;  %v3344_v46 = vld [vmem:[#allocation6 + $0x1688] sm:$0xff]  ;;  %v3346_v14 = vld [vmem:[#allocation6 + $0x1698] sm:$0xff] }
 0x5f6   :  { %v3341_v13 = vld [vmem:[#allocation6 + $0x1670] sm:$0xff]  ;;  %v3348_v54 = vld [vmem:[#allocation6 + $0x16a8] sm:$0xff]  ;;  %v3350_v55 = vld [vmem:[#allocation6 + $0x16b8] sm:$0xff] }
 0x5f7   :  { %6454 = vmatpush1.bf16.msra.mxu0 %v6453_v40  ;;  %6582 = vmatpush1.bf16.msra.mxu1 %v6581_v44  ;;  %v6465_v40 = vpack.c.bf16 %v3323_v45, %v3319_v48  ;;  %v6593_v44 = vpack.c.bf16 %v3325_v28, %v3321_v18  ;;  %v3343_v48 = vld [vmem:[#allocation6 + $0x1680] sm:$0xff]  ;;  %v3345_v18 = vld [vmem:[#allocation6 + $0x1690] sm:$0xff] }
 0x5f8   :  { %6456 = vmatprep.subr.bf16.mxu0 %v6455_v10  ;;  %6584 = vmatprep.subr.bf16.mxu1 %v6583_v9  ;;  %v6467_v10 = vpack.c.bf16 %v3332_v4, %v3328_v19  ;;  %v6595_v9 = vpack.c.bf16 %v3334_v61, %v3330_v47  ;;  %v3347_v45 = vld [vmem:[#allocation6 + $0x16a0] sm:$0xff]  ;;  %v3349_v28 = vld [vmem:[#allocation6 + $0x16b0] sm:$0xff]  ;;  %v3352_v19 = vld [vmem:[#allocation6 + $0x16c8] sm:$0xff] }
 0x5f9   :  { %v3356_v4 = vld [vmem:[#allocation6 + $0x16e8] sm:$0xff]  ;;  %v3354_v47 = vld [vmem:[#allocation6 + $0x16d8] sm:$0xff] }
 0x5fa   :  { %v3358_v61 = vld [vmem:[#allocation6 + $0x16f8] sm:$0xff] }
 0x5fb   :  { %6458 = vmatpush1.bf16.msra.mxu0 %v6457_v41  ;;  %6586 = vmatpush1.bf16.msra.mxu1 %v6585_v27  ;;  %v6469_v41 = vpack.c.bf16 %v3331_v15, %v3327_v42  ;;  %v6597_v27 = vpack.c.bf16 %v3333_v32, %v3329_v49  ;;  %v3351_v42 = vld [vmem:[#allocation6 + $0x16c0] sm:$0xff]  ;;  %v3353_v49 = vld [vmem:[#allocation6 + $0x16d0] sm:$0xff] }
 0x5fc   :  { %6460 = vmatprep.subr.bf16.mxu0 %v6459_v29  ;;  %6588 = vmatprep.subr.bf16.mxu1 %v6587_v37  ;;  %v6471_v29 = vpack.c.bf16 %v3340_v35, %v3336_v5  ;;  %v6599_v37 = vpack.c.bf16 %v3342_v60, %v3338_v23  ;;  %v3355_v15 = vld [vmem:[#allocation6 + $0x16e0] sm:$0xff]  ;;  %v3357_v32 = vld [vmem:[#allocation6 + $0x16f0] sm:$0xff]  ;;  %v3360_v5 = vld [vmem:[#allocation6 + $0x1708] sm:$0xff] }
 0x5fd   :  { %v3364_v35 = vld [vmem:[#allocation6 + $0x1728] sm:$0xff]  ;;  %v3362_v23 = vld [vmem:[#allocation6 + $0x1718] sm:$0xff] }
 0x5fe   :  { %v3366_v60 = vld [vmem:[#allocation6 + $0x1738] sm:$0xff] }
 0x5ff   :  { %6462 = vmatpush1.bf16.msra.mxu0 %v6461_v31  ;;  %6590 = vmatpush1.bf16.msra.mxu1 %v6589_v20  ;;  %v6473_v31 = vpack.c.bf16 %v3339_v11, %v3335_v2  ;;  %v6601_v20 = vpack.c.bf16 %v3341_v13, %v3337_v1  ;;  %v3359_v2 = vld [vmem:[#allocation6 + $0x1700] sm:$0xff]  ;;  %v3361_v1 = vld [vmem:[#allocation6 + $0x1710] sm:$0xff] }
 0x600   :  { %6464 = vmatprep.subr.bf16.mxu0 %v6463_v59  ;;  %6592 = vmatprep.subr.bf16.mxu1 %v6591_v6  ;;  %v6475_v59 = vpack.c.bf16 %v3348_v54, %v3344_v46  ;;  %v6603_v6 = vpack.c.bf16 %v3350_v55, %v3346_v14  ;;  %v3363_v11 = vld [vmem:[#allocation6 + $0x1720] sm:$0xff]  ;;  %v3365_v13 = vld [vmem:[#allocation6 + $0x1730] sm:$0xff]  ;;  %v3368_v46 = vld [vmem:[#allocation6 + $0x1748] sm:$0xff] }
 0x601   :  { %v3372_v54 = vld [vmem:[#allocation6 + $0x1768] sm:$0xff]  ;;  %v3370_v14 = vld [vmem:[#allocation6 + $0x1758] sm:$0xff] }
 0x602   :  { %v3374_v55 = vld [vmem:[#allocation6 + $0x1778] sm:$0xff] }
 0x603   :  { %6466 = vmatpush1.bf16.msra.mxu0 %v6465_v40  ;;  %6594 = vmatpush1.bf16.msra.mxu1 %v6593_v44  ;;  %v6477_v40 = vpack.c.bf16 %v3347_v45, %v3343_v48  ;;  %v6605_v44 = vpack.c.bf16 %v3349_v28, %v3345_v18  ;;  %v3367_v48 = vld [vmem:[#allocation6 + $0x1740] sm:$0xff]  ;;  %v3369_v18 = vld [vmem:[#allocation6 + $0x1750] sm:$0xff] }
 0x604   :  { %6468 = vmatprep.subr.bf16.mxu0 %v6467_v10  ;;  %6596 = vmatprep.subr.bf16.mxu1 %v6595_v9  ;;  %v6479_v10 = vpack.c.bf16 %v3356_v4, %v3352_v19  ;;  %v6607_v9 = vpack.c.bf16 %v3358_v61, %v3354_v47  ;;  %v3371_v45 = vld [vmem:[#allocation6 + $0x1760] sm:$0xff]  ;;  %v3373_v28 = vld [vmem:[#allocation6 + $0x1770] sm:$0xff]  ;;  %v3376_v19 = vld [vmem:[#allocation6 + $0x1788] sm:$0xff] }
 0x605   :  { %v3380_v4 = vld [vmem:[#allocation6 + $0x17a8] sm:$0xff]  ;;  %v3378_v47 = vld [vmem:[#allocation6 + $0x1798] sm:$0xff] }
 0x606   :  { %v3382_v61 = vld [vmem:[#allocation6 + $0x17b8] sm:$0xff] }
 0x607   :  { %6470 = vmatpush1.bf16.msra.mxu0 %v6469_v41  ;;  %6598 = vmatpush1.bf16.msra.mxu1 %v6597_v27  ;;  %v6481_v41 = vpack.c.bf16 %v3355_v15, %v3351_v42  ;;  %v6609_v27 = vpack.c.bf16 %v3357_v32, %v3353_v49  ;;  %v3375_v42 = vld [vmem:[#allocation6 + $0x1780] sm:$0xff]  ;;  %v3377_v49 = vld [vmem:[#allocation6 + $0x1790] sm:$0xff] }
 0x608   :  { %6472 = vmatprep.subr.bf16.mxu0 %v6471_v29  ;;  %6600 = vmatprep.subr.bf16.mxu1 %v6599_v37  ;;  %v6483_v29 = vpack.c.bf16 %v3364_v35, %v3360_v5  ;;  %v6611_v37 = vpack.c.bf16 %v3366_v60, %v3362_v23  ;;  %v3379_v15 = vld [vmem:[#allocation6 + $0x17a0] sm:$0xff]  ;;  %v3381_v32 = vld [vmem:[#allocation6 + $0x17b0] sm:$0xff]  ;;  %v3384_v5 = vld [vmem:[#allocation6 + $0x17c8] sm:$0xff] }
 0x609   :  { %v3388_v35 = vld [vmem:[#allocation6 + $0x17e8] sm:$0xff]  ;;  %v3386_v23 = vld [vmem:[#allocation6 + $0x17d8] sm:$0xff] }
 0x60a   :  { %v3390_v60 = vld [vmem:[#allocation6 + $0x17f8] sm:$0xff] }
 0x60b   :  { %6474 = vmatpush1.bf16.msra.mxu0 %v6473_v31  ;;  %6602 = vmatpush1.bf16.msra.mxu1 %v6601_v20  ;;  %v6485_v31 = vpack.c.bf16 %v3363_v11, %v3359_v2  ;;  %v6613_v20 = vpack.c.bf16 %v3365_v13, %v3361_v1  ;;  %v3383_v2 = vld [vmem:[#allocation6 + $0x17c0] sm:$0xff]  ;;  %v6495_v11 = vpack.c.bf16 %v3388_v35, %v3384_v5  ;;  %v3385_v1 = vld [vmem:[#allocation6 + $0x17d0] sm:$0xff]  ;;  %v10006_v5 = vld [vmem:[#allocation58_spill] sm:$0xff] }
 0x60c   :  { %6476 = vmatprep.subr.bf16.mxu0 %v6475_v59  ;;  %6604 = vmatprep.subr.bf16.mxu1 %v6603_v6  ;;  %v6487_v59 = vpack.c.bf16 %v3372_v54, %v3368_v46  ;;  %v6615_v6 = vpack.c.bf16 %v3374_v55, %v3370_v14  ;;  %v3389_v13 = vld [vmem:[#allocation6 + $0x17f0] sm:$0xff]  ;;  %v9985_v55 = vld [vmem:[#allocation32_spill] sm:$0xff] }
 0x60d   :  { %v6625_v54 = vpack.c.bf16 %v3389_v13, %v3385_v1  ;;  %v9984_v14 = vld [vmem:[#allocation31_spill] sm:$0xff]  ;;  %v10007_v35 = vld [vmem:[#allocation60_spill] sm:$0xff]  ;;  %v10016_v1 = vld [vmem:[#allocation69_spill] sm:$0xff] }
 0x60e   :  { %v10017_v13 = vld [vmem:[#allocation70_spill] sm:$0xff] }
 0x60f   :  { %6478 = vmatpush1.bf16.msra.mxu0 %v6477_v40  ;;  %6606 = vmatpush1.bf16.msra.mxu1 %v6605_v44  ;;  %v6489_v40 = vpack.c.bf16 %v3371_v45, %v3367_v48  ;;  %v6617_v44 = vpack.c.bf16 %v3373_v28, %v3369_v18  ;;  %v9988_v48 = vld [vmem:[#allocation35_spill] sm:$0xff]  ;;  %v9989_v45 = vld [vmem:[#allocation36_spill] sm:$0xff] }
 0x610   :  { %6480 = vmatprep.subr.bf16.mxu0 %v6479_v10  ;;  %6608 = vmatprep.subr.bf16.mxu1 %v6607_v9  ;;  %v6491_v10 = vpack.c.bf16 %v3380_v4, %v3376_v19  ;;  %v6619_v9 = vpack.c.bf16 %v3382_v61, %v3378_v47  ;;  %v9992_v18 = vld [vmem:[#allocation39_spill] sm:$0xff]  ;;  %v9993_v28 = vld [vmem:[#allocation40_spill] sm:$0xff]  ;;  %v9994_v19 = vld [vmem:[#allocation41_spill] sm:$0xff] }
 0x611   :  { %v9995_v4 = vld [vmem:[#allocation42_spill] sm:$0xff]  ;;  %v9996_v47 = vld [vmem:[#allocation43_spill] sm:$0xff]  ;;  %v9997_v61 = vld [vmem:[#allocation44_spill] sm:$0xff] }
 0x613   :  { %6482 = vmatpush1.bf16.msra.mxu0 %v6481_v41  ;;  %6610 = vmatpush1.bf16.msra.mxu1 %v6609_v27  ;;  %v6493_v41 = vpack.c.bf16 %v3379_v15, %v3375_v42  ;;  %v6621_v27 = vpack.c.bf16 %v3381_v32, %v3377_v49  ;;  %v10000_v42 = vld [vmem:[#allocation47_spill] sm:$0xff]  ;;  %v10001_v15 = vld [vmem:[#allocation48_spill] sm:$0xff]  ;;  %v10004_v49 = vld [vmem:[#allocation54_spill] sm:$0xff] }
 0x614   :  { %6484 = vmatprep.subr.bf16.mxu0 %v6483_v29  ;;  %6612 = vmatprep.subr.bf16.mxu1 %v6611_v37  ;;  %v6623_v29 = vpack.c.bf16 %v3390_v60, %v3386_v23  ;;  %v3387_v37 = vld [vmem:[#allocation6 + $0x17e0] sm:$0xff]  ;;  %v10005_v32 = vld [vmem:[#allocation55_spill] sm:$0xff]  ;;  %v10009_v60 = vld [vmem:[#allocation62_spill] sm:$0xff] }
 0x615   :  { %v6497_v46 = vpack.c.bf16 %v3387_v37, %v3383_v2  ;;  %v10008_v23 = vld [vmem:[#allocation61_spill] sm:$0xff]  ;;  %v10015_v37 = vld [vmem:[#allocation68_spill] sm:$0xff] }
 0x616   :  { %v10012_v2 = vld [vmem:[#allocation65_spill] sm:$0xff] }
 0x617   :  { %6486 = vmatpush1.bf16.msra.mxu0 %v6485_v31  ;;  %6614 = vmatpush1.bf16.msra.mxu1 %v6613_v20  ;;  %v9986_v31 = vld [vmem:[#allocation33_spill] sm:$0xff]  ;;  %v9987_v20 = vld [vmem:[#allocation34_spill] sm:$0xff] }
 0x618   :  { %6488 = vmatprep.subr.bf16.mxu0 %v6487_v59  ;;  %6616 = vmatprep.subr.bf16.mxu1 %v6615_v6  ;;  %v9990_v59 = vld [vmem:[#allocation37_spill] sm:$0xff]  ;;  %v9991_v6 = vld [vmem:[#allocation38_spill] sm:$0xff] }
 0x61b   :  { %6490 = vmatpush1.bf16.msra.mxu0 %v6489_v40  ;;  %6618 = vmatpush1.bf16.msra.mxu1 %v6617_v44  ;;  %v9998_v40 = vld [vmem:[#allocation45_spill] sm:$0xff]  ;;  %v9999_v44 = vld [vmem:[#allocation46_spill] sm:$0xff] }
 0x61c   :  { %6492 = vmatprep.subr.bf16.mxu0 %v6491_v10  ;;  %6620 = vmatprep.subr.bf16.mxu1 %v6619_v9  ;;  %v10002_v10 = vld [vmem:[#allocation50_spill] sm:$0xff]  ;;  %v10003_v9 = vld [vmem:[#allocation53_spill] sm:$0xff] }
 0x61f   :  { %6494 = vmatpush1.bf16.msra.mxu0 %v6493_v41  ;;  %6622 = vmatpush1.bf16.msra.mxu1 %v6621_v27  ;;  %v10010_v41 = vld [vmem:[#allocation63_spill] sm:$0xff]  ;;  %v10011_v27 = vld [vmem:[#allocation64_spill] sm:$0xff] }
 0x620   :  { %6496 = vmatprep.subr.bf16.mxu0 %v6495_v11  ;;  %6624 = vmatprep.subr.bf16.mxu1 %v6623_v29  ;;  %v10013_v11 = vld [vmem:[#allocation66_spill] sm:$0xff]  ;;  %v10014_v29 = vld [vmem:[#allocation67_spill] sm:$0xff] }
 0x623   :  { %6498 = vmatpush1.bf16.msra.mxu0 %v6497_v46  ;;  %6626 = vmatpush1.bf16.msra.mxu1 %v6625_v54  ;;  %v10018_v46 = vld [vmem:[#allocation71_spill] sm:$0xff]  ;;  %v10019_v54 = vld [vmem:[#allocation72_spill] sm:$0xff] }
 0x624   :  { %6628 = vmatprep.subr.bf16.mxu0 %v8024_v3  ;;  %6756 = vmatprep.subr.bf16.mxu1 %v8026_v7 }
 0x626   :  { %3545 = vmatmul.mubr.f32.vlgmr.msra.gmra.mrb[12].mxu0 %v8856_v58  ;;  %3723 = vmatmul.mubr.f32.vlgmr.msra.gmra.mrb[12].mxu1 %v8856_v58  ;;  %v9977_v58 = vld [vmem:[#allocation24_spill] sm:$0xff] }
 0x627   :  { %3550 = vmatprep.mubr.f32.mxu0 %v8862_v36  ;;  %3728 = vmatprep.mubr.f32.mxu1 %v8862_v36  ;;  %v9979_v36 = vld [vmem:[#allocation26_spill] sm:$0xff] }
 0x628   :  { %6630 = vmatpush1.bf16.msra.mxu0 %v8028_v8  ;;  %6758 = vmatpush1.bf16.msra.mxu1 %v8031_v12 }
 0x629   :  { %6632 = vmatprep.subr.bf16.mxu0 %v8035_v16  ;;  %6760 = vmatprep.subr.bf16.mxu1 %v8037_v17 }
 0x62a   :  { %3551 = vmatmul.mubr.f32.gmra.mrb[14].mxu0 %v8860_v33  ;;  %3729 = vmatmul.mubr.f32.gmra.mrb[14].mxu1 %v8860_v33  ;;  %v9978_v33 = vld [vmem:[#allocation25_spill] sm:$0xff] }
 0x62b   :  { %3556 = vmatprep.mubr.f32.mxu0 %v8866_v53  ;;  %3734 = vmatprep.mubr.f32.mxu1 %v8866_v53  ;;  %v9981_v53 = vld [vmem:[#allocation28_spill] sm:$0xff] }
 0x62c   :  { %6634 = vmatpush1.bf16.msra.mxu0 %v8040_v21  ;;  %6762 = vmatpush1.bf16.msra.mxu1 %v8044_v25 }
 0x62d   :  { %6636 = vmatprep.subr.bf16.mxu0 %v8046_v26  ;;  %6764 = vmatprep.subr.bf16.mxu1 %v8048_v30 }
 0x62e   :  { %3557 = vmatmul.mubr.f32.gmra.mrb[16].mxu0 %v8864_v24  ;;  %3735 = vmatmul.mubr.f32.gmra.mrb[16].mxu1 %v8864_v24  ;;  %v9980_v24 = vld [vmem:[#allocation27_spill] sm:$0xff] }
 0x62f   :  { %3562 = vmatprep.mubr.f32.mxu0 %v8870_v22  ;;  %3740 = vmatprep.mubr.f32.mxu1 %v8870_v22  ;;  %v9983_v22 = vld [vmem:[#allocation30_spill] sm:$0xff] }
 0x630   :  { %6638 = vmatpush1.bf16.msra.mxu0 %v8051_v34  ;;  %6766 = vmatpush1.bf16.msra.mxu1 %v8055_v38 }
 0x631   :  { %6640 = vmatprep.subr.bf16.mxu0 %v8057_v39  ;;  %6768 = vmatprep.subr.bf16.mxu1 %v8060_v43 }
 0x632   :  { %3563 = vmatmul.mubr.f32.gmra.mrb[18].mxu0 %v8868_v57  ;;  %3741 = vmatmul.mubr.f32.gmra.mrb[18].mxu1 %v8868_v57  ;;  %v9982_v57 = vld [vmem:[#allocation29_spill] sm:$0xff] }
 0x634   :  { %6642 = vmatpush1.bf16.msra.mxu0 %v8063_v50  ;;  %6770 = vmatpush1.bf16.msra.mxu1 %v8067_v51 }
 0x635   :  { %6644 = vmatprep.subr.bf16.mxu0 %v8069_v52  ;;  %6772 = vmatprep.subr.bf16.mxu1 %v8072_v56 }
 0x638   :  { %6646 = vmatpush1.bf16.msra.mxu0 %v8075_v62  ;;  %6774 = vmatpush1.bf16.msra.mxu1 %v8079_v63 }
 0x639   :  { %6648 = vmatprep.subr.bf16.mxu0 %v8081_v0  ;;  %6776 = vmatprep.subr.bf16.mxu1 %v9977_v58 }
 0x63c   :  { %6650 = vmatpush1.bf16.msra.mxu0 %v9978_v33  ;;  %6778 = vmatpush1.bf16.msra.mxu1 %v9979_v36 }
 0x63d   :  { %6652 = vmatprep.subr.bf16.mxu0 %v9980_v24  ;;  %6780 = vmatprep.subr.bf16.mxu1 %v9981_v53 }
 0x640   :  { %6654 = vmatpush1.bf16.msra.mxu0 %v9982_v57  ;;  %6782 = vmatpush1.bf16.msra.mxu1 %v9983_v22 }
 0x641   :  { %6656 = vmatprep.subr.bf16.mxu0 %v9984_v14  ;;  %6784 = vmatprep.subr.bf16.mxu1 %v9985_v55 }
 0x644   :  { %6658 = vmatpush1.bf16.msra.mxu0 %v9986_v31  ;;  %6786 = vmatpush1.bf16.msra.mxu1 %v9987_v20 }
 0x645   :  { %6660 = vmatprep.subr.bf16.mxu0 %v9988_v48  ;;  %6788 = vmatprep.subr.bf16.mxu1 %v9989_v45 }
 0x648   :  { %6662 = vmatpush1.bf16.msra.mxu0 %v9990_v59  ;;  %6790 = vmatpush1.bf16.msra.mxu1 %v9991_v6 }
 0x649   :  { %6664 = vmatprep.subr.bf16.mxu0 %v9992_v18  ;;  %6792 = vmatprep.subr.bf16.mxu1 %v9993_v28 }
 0x64c   :  { %6666 = vmatpush1.bf16.msra.mxu0 %v9994_v19  ;;  %6794 = vmatpush1.bf16.msra.mxu1 %v9995_v4 }
 0x64d   :  { %6668 = vmatprep.subr.bf16.mxu0 %v9996_v47  ;;  %6796 = vmatprep.subr.bf16.mxu1 %v9997_v61 }
 0x650   :  { %6670 = vmatpush1.bf16.msra.mxu0 %v9998_v40  ;;  %6798 = vmatpush1.bf16.msra.mxu1 %v9999_v44 }
 0x651   :  { %6672 = vmatprep.subr.bf16.mxu0 %v10000_v42  ;;  %6800 = vmatprep.subr.bf16.mxu1 %v10001_v15 }
 0x654   :  { %6674 = vmatpush1.bf16.msra.mxu0 %v10002_v10  ;;  %6802 = vmatpush1.bf16.msra.mxu1 %v10003_v9 }
 0x655   :  { %6676 = vmatprep.subr.bf16.mxu0 %v10004_v49  ;;  %6804 = vmatprep.subr.bf16.mxu1 %v10005_v32 }
 0x658   :  { %6678 = vmatpush1.bf16.msra.mxu0 %v10006_v5  ;;  %6806 = vmatpush1.bf16.msra.mxu1 %v10007_v35  ;;  %v10024_v5 = vld [vmem:[#allocation104_spill] sm:$0xff] }
 0x659   :  { %6680 = vmatprep.subr.bf16.mxu0 %v10008_v23  ;;  %6808 = vmatprep.subr.bf16.mxu1 %v10009_v60  ;;  %v10020_v60 = vld [vmem:[#allocation73_spill] sm:$0xff] }
 0x65c   :  { %6682 = vmatpush1.bf16.msra.mxu0 %v10010_v41  ;;  %6810 = vmatpush1.bf16.msra.mxu1 %v10011_v27  ;;  %v10021_v41 = vld [vmem:[#allocation74_spill] sm:$0xff]  ;;  %v8954_v27 = vld [vmem:[#allocation7] sm:$0xf] }
 0x65d   :  { %6684 = vmatprep.subr.bf16.mxu0 %v10012_v2  ;;  %6812 = vmatprep.subr.bf16.mxu1 %v10013_v11 }
 0x660   :  { %6686 = vmatpush1.bf16.msra.mxu0 %v10014_v29  ;;  %6814 = vmatpush1.bf16.msra.mxu1 %v10015_v37  ;;  %v10022_v37 = vld [vmem:[#allocation102_spill] sm:$0xff] }
 0x661   :  { %6688 = vmatprep.subr.bf16.mxu0 %v10016_v1  ;;  %6816 = vmatprep.subr.bf16.mxu1 %v10017_v13  ;;  %v2082_v1 = vrot.slane %v8954_v27, %v10022_v37 }
 0x664   :  { %6690 = vmatpush1.bf16.msra.mxu0 %v10018_v46  ;;  %6818 = vmatpush1.bf16.msra.mxu1 %v10019_v54  ;;  %v10023_v46 = vld [vmem:[#allocation105_spill] sm:$0xff] }
 0x665   :  { %6692 = vmatprep.subr.bf16.mxu0 %v10020_v60  ;;  %6820 = vmatprep.subr.bf16.mxu1 %v10021_v41  ;;  %v2086_v54 = vrot.slane %v8954_v27, %v10023_v46  ;;  %v2094_v60 = vrot.slane %v8954_v27, %v10024_v5 }
 0x6f9   :  { %v3546_v2 = vpop.f32.mrb[12].mxu0  ;;  %v8956_v11 = vpop.f32.mrb[12].mxu1 }
 0x6fa   :  { %v3548_v29 = vpop.f32.mrb[13].mxu0  ;;  %v3726_v23 = vpop.f32.mrb[13].mxu1  ;;  %v7395_v49 = vadd.f32 %v3546_v2, %v2082_v1 }
 0x6fb   :  { %v7396_v40 = vadd.f32 %v3548_v29, %v2086_v54  ;;  %v7404_v37 = vadd.f32 %v3726_v23, %v2094_v60 }
 0x6fc   :  { %v8968_v4 = vmax.f32 %v7395_v49, 0.0 }
 0x6fd   :  { %v3552_v35 = vpop.f32.mrb[14].mxu0  ;;  %v8960_v13 = vpop.f32.mrb[14].mxu1  ;;  %v8978_v18 = vmax.f32 %v7396_v40, 0.0  ;;  %v8980_v29 = vmax.f32 %v7404_v37, 0.0 }
 0x6fe   :  { %v3554_v41 = vpop.f32.mrb[15].mxu0  ;;  %v3732_v32 = vpop.f32.mrb[15].mxu1  ;;  %v7397_v9 = vadd.f32 %v3552_v35, %v2082_v1  ;;  %10025 = vst [vmem:[#allocation106_spill] sm:$0xff] %v8968_v4 }
 0x6ff   :  { %v7398_v10 = vadd.f32 %v3554_v41, %v2086_v54  ;;  %v7406_v15 = vadd.f32 %v3732_v32, %v2094_v60  ;;  %10028 = vst [vmem:[#allocation52_spill] sm:$0xff] %v8978_v18  ;;  %10029 = vst [vmem:[#allocation56_spill] sm:$0xff] %v8980_v29 }
 0x700   :  { %v8970_v19 = vmax.f32 %v7397_v9, 0.0 }
 0x701   :  { %v3558_v42 = vpop.f32.mrb[16].mxu0  ;;  %v8966_v44 = vpop.f32.mrb[16].mxu1  ;;  %v8972_v28 = vmax.f32 %v7398_v10, 0.0  ;;  %v8974_v5 = vmax.f32 %v7406_v15, 0.0 }
 0x702   :  { %v3560_v61 = vpop.f32.mrb[17].mxu0  ;;  %v3738_v47 = vpop.f32.mrb[17].mxu1  ;;  %v7399_v46 = vadd.f32 %v3558_v42, %v2082_v1 }
 0x703   :  { %10026 = vst [vmem:[#allocation49_spill] sm:$0xff] %v8972_v28  ;;  %10027 = vst [vmem:[#allocation51_spill] sm:$0xff] %v8974_v5  ;;  %v7400_v2 = vadd.f32 %v3560_v61, %v2086_v54  ;;  %v7408_v35 = vadd.f32 %v3738_v47, %v2094_v60  ;;  %v3781_v47 = vadd.f32 %v8970_v19, %v8968_v4 }
 0x704   :  { %v8982_v23 = vmax.f32 %v7399_v46, 0.0  ;;  %v3790_v61 = vadd.f32 %v8972_v28, %v8978_v18  ;;  %v3808_v40 = vadd.f32 %v8974_v5, %v8980_v29 }
 0x705   :  { %v3564_v41 = vpop.f32.mrb[18].mxu0  ;;  %v8976_v32 = vpop.f32.mrb[18].mxu1  ;;  %v8984_v59 = vmax.f32 %v7400_v2, 0.0  ;;  %v8986_v42 = vmax.f32 %v7408_v35, 0.0 }
 0x706   :  { %10030 = vst [vmem:[#allocation24_spill] sm:$0xff] %v8982_v23  ;;  %v7401_v49 = vadd.f32 %v3564_v41, %v2082_v1  ;;  %v3566_v6 = vpop.f32.mrb[19].mxu0  ;;  %v3744_v9 = vpop.f32.mrb[19].mxu1  ;;  %v3782_v37 = vadd.f32 %v3781_v47, %v8982_v23 }
 0x707   :  { %10031 = vst [vmem:[#allocation25_spill] sm:$0xff] %v8984_v59  ;;  %10032 = vst [vmem:[#allocation26_spill] sm:$0xff] %v8986_v42  ;;  %v7402_v15 = vadd.f32 %v3566_v6, %v2086_v54  ;;  %v7410_v10 = vadd.f32 %v3744_v9, %v2094_v60  ;;  %v3791_v46 = vadd.f32 %v3790_v61, %v8984_v59 }
 0x708   :  { %v8995_v1 = vmax.f32 %v7401_v49, 0.0  ;;  %v3809_v2 = vadd.f32 %v3808_v40, %v8986_v42 }
 0x709   :  { %v8999_v35 = vmax.f32 %v7402_v15, 0.0  ;;  %v9001_v6 = vmax.f32 %v7410_v10, 0.0 }
 0x70a   :  { %10033 = vst [vmem:[#allocation27_spill] sm:$0xff] %v8995_v1  ;;  %v3783_v60 = vadd.f32 %v3782_v37, %v8995_v1 }
 0x70b   :  { %10034 = vst [vmem:[#allocation28_spill] sm:$0xff] %v8999_v35  ;;  %v3792_v54 = vadd.f32 %v3791_v46, %v8999_v35  ;;  %v3810_v41 = vadd.f32 %v3809_v2, %v9001_v6  ;;  %v10035_v2 = vld [vmem:[#allocation75_spill] sm:$0xff] }
 0x70c   :  { %v3784_v9 = vrot.slane %v3783_v60, 4 }
 0x70d   :  { %v3793_v29 = vrot.slane %v3792_v54, 4  ;;  %v3811_v5 = vrot.slane %v3810_v41, 4 }
 0x70e   :  { %v3785_v47 = vadd.f32 %v3784_v9, %v3783_v60  ;;  %v10042_v60 = vld [vmem:[#allocation82_spill] sm:$0xff]  ;;  %v10048_v9 = vld [vmem:[#allocation88_spill] sm:$0xff] }
 0x70f   :  { %v3794_v49 = vadd.f32 %v3793_v29, %v3792_v54  ;;  %v3812_v23 = vadd.f32 %v3811_v5, %v3810_v41  ;;  %v10036_v29 = vld [vmem:[#allocation76_spill] sm:$0xff]  ;;  %v10037_v5 = vld [vmem:[#allocation77_spill] sm:$0xff]  ;;  %v10046_v54 = vld [vmem:[#allocation86_spill] sm:$0xff] }
 0x710   :  { %v3786_v4 = vrot.slane %v3785_v47, 2  ;;  %v10047_v41 = vld [vmem:[#allocation87_spill] sm:$0xff] }
 0x711   :  { %v3795_v61 = vrot.slane %v3794_v49, 2  ;;  %v3813_v45 = vrot.slane %v3812_v23, 2 }
 0x712   :  { %v3787_v40 = vadd.f32 %v3786_v4, %v3785_v47  ;;  %v10038_v4 = vld [vmem:[#allocation78_spill] sm:$0xff]  ;;  %v10049_v47 = vld [vmem:[#allocation89_spill] sm:$0xff] }
 0x713   :  { %v3796_v15 = vadd.f32 %v3795_v61, %v3794_v49  ;;  %v3814_v42 = vadd.f32 %v3813_v45, %v3812_v23  ;;  %v10039_v45 = vld [vmem:[#allocation79_spill] sm:$0xff]  ;;  %v10040_v23 = vld [vmem:[#allocation80_spill] sm:$0xff]  ;;  %v10050_v49 = vld [vmem:[#allocation90_spill] sm:$0xff] }
 0x714   :  { %v3788_v10 = vrot.slane %v3787_v40, 1  ;;  %v10051_v61 = vld [vmem:[#allocation91_spill] sm:$0xff] }
 0x715   :  { %v3797_v48 = vrot.slane %v3796_v15, 1  ;;  %v3815_v20 = vrot.slane %v3814_v42, 1 }
 0x716   :  { %v3789_v1 = vadd.f32 %v3788_v10, %v3787_v40  ;;  %v10052_v40 = vld [vmem:[#allocation92_spill] sm:$0xff]  ;;  %v10054_v10 = vld [vmem:[#allocation94_spill] sm:$0xff] }
 0x717   :  { %v3798_v37 = vadd.f32 %v3797_v48, %v3796_v15  ;;  %v3816_v46 = vadd.f32 %v3815_v20, %v3814_v42  ;;  %v10041_v48 = vld [vmem:[#allocation81_spill] sm:$0xff]  ;;  %v10044_v20 = vld [vmem:[#allocation84_spill] sm:$0xff] }
 0x718   :  { %v10045_v42 = vld [vmem:[#allocation85_spill] sm:$0xff] }
 0x719   :  { %3881 = vmatprep.mubr.f32.mxu0 %v3798_v37  ;;  %4023 = vmatprep.mubr.f32.mxu1 %v3798_v37  ;;  %v10053_v15 = vld [vmem:[#allocation93_spill] sm:$0xff]  ;;  %v10055_v37 = vld [vmem:[#allocation95_spill] sm:$0xff] }
 0x71a   :  { %3882 = vmatmul.mubr.f32.vlgmr.msra.gmra.mrb[36].mxu0 %v3789_v1  ;;  %4024 = vmatmul.mubr.f32.vlgmr.msra.gmra.mrb[36].mxu1 %v3789_v1  ;;  %v10043_v1 = vld [vmem:[#allocation83_spill] sm:$0xff] }
 0x71b   :  { %6694 = vmatpush1.bf16.msra.mxu0 %v10035_v2  ;;  %6822 = vmatpush1.bf16.msra.mxu1 %v10036_v29 }
 0x71c   :  { %3952 = vmatprep.mubr.f32.mxu0 %v3816_v46  ;;  %4094 = vmatprep.mubr.f32.mxu1 %v3816_v46  ;;  %v10056_v46 = vld [vmem:[#allocation96_spill] sm:$0xff] }
 0x71d   :  { %6696 = vmatprep.subr.bf16.mxu0 %v10037_v5  ;;  %6824 = vmatprep.subr.bf16.mxu1 %v10038_v4 }
 0x71f   :  { %6698 = vmatpush1.bf16.msra.mxu0 %v10039_v45  ;;  %6826 = vmatpush1.bf16.msra.mxu1 %v10040_v23 }
 0x720   :  { %6700 = vmatprep.subr.bf16.mxu0 %v10041_v48  ;;  %6828 = vmatprep.subr.bf16.mxu1 %v10042_v60 }
 0x723   :  { %6702 = vmatpush1.bf16.msra.mxu0 %v10043_v1  ;;  %6830 = vmatpush1.bf16.msra.mxu1 %v10044_v20 }
 0x724   :  { %6704 = vmatprep.subr.bf16.mxu0 %v10045_v42  ;;  %6832 = vmatprep.subr.bf16.mxu1 %v10046_v54  ;;  %v10057_v54 = vld [vmem:[#allocation97_spill] sm:$0xff] }
 0x727   :  { %6706 = vmatpush1.bf16.msra.mxu0 %v10047_v41  ;;  %6834 = vmatpush1.bf16.msra.mxu1 %v10048_v9  ;;  %v10058_v41 = vld [vmem:[#allocation98_spill] sm:$0xff]  ;;  %v10059_v9 = vld [vmem:[#allocation59_spill] sm:$0xff] }
 0x728   :  { %6708 = vmatprep.subr.bf16.mxu0 %v10049_v47  ;;  %6836 = vmatprep.subr.bf16.mxu1 %v10050_v49  ;;  %v2090_v47 = vrot.slane %v8954_v27, %v10059_v9  ;;  %v10060_v49 = vld [vmem:[#allocation99_spill] sm:$0xff]  ;;  %v10067_v9 = vld [vmem:[#allocation109_spill] sm:$0xff] }
 0x72a   :  { %v7409_v27 = vadd.f32 %v8976_v32, %v2090_v47  ;;  %v10071_v32 = vld [vmem:[#allocation112_spill] sm:$0xff] }
 0x72b   :  { %6710 = vmatpush1.bf16.msra.mxu0 %v10051_v61  ;;  %6838 = vmatpush1.bf16.msra.mxu1 %v10052_v40  ;;  %v10061_v61 = vld [vmem:[#allocation100_spill] sm:$0xff]  ;;  %v7405_v40 = vadd.f32 %v8960_v13, %v2090_v47  ;;  %v4110_v13 = vmul.f32 %v8972_v28, %v8972_v28  ;;  %v10072_v28 = vld [vmem:[#allocation113_spill] sm:$0xff] }
 0x72c   :  { %6712 = vmatprep.subr.bf16.mxu0 %v10053_v15  ;;  %6840 = vmatprep.subr.bf16.mxu1 %v10054_v10  ;;  %v10062_v15 = vld [vmem:[#allocation101_spill] sm:$0xff]  ;;  %v10063_v10 = vld [vmem:[#allocation103_spill] sm:$0xff] }
 0x72d   :  { %v9041_v42 = vmax.f32 %v7405_v40, 0.0  ;;  %v4114_v40 = vmul.f32 %v8984_v59, %v8984_v59 }
 0x72f   :  { %6714 = vmatpush1.bf16.msra.mxu0 %v10055_v37  ;;  %6842 = vmatpush1.bf16.msra.mxu1 %v10056_v46  ;;  %v7403_v37 = vadd.f32 %v8956_v11, %v2090_v47  ;;  %v7407_v46 = vadd.f32 %v8966_v44, %v2090_v47  ;;  %10066 = vst [vmem:[#allocation29_spill] sm:$0xff] %v9041_v42 }
 0x730   :  { %6716 = vmatprep.subr.bf16.mxu0 %v10057_v54  ;;  %6844 = vmatprep.subr.bf16.mxu1 %v10058_v41  ;;  %v10064_v54 = vld [vmem:[#allocation107_spill] sm:$0xff]  ;;  %v10065_v41 = vld [vmem:[#allocation108_spill] sm:$0xff]  ;;  %v4106_v44 = vmul.f32 %v8978_v18, %v8978_v18  ;;  %v4118_v18 = vmul.f32 %v8999_v35, %v8999_v35  ;;  %v10080_v35 = vld [vmem:[#allocation121_spill] sm:$0xff] }
 0x731   :  { %v9050_v11 = vmax.f32 %v7407_v46, 0.0 }
 0x732   :  { %v4130_v46 = vadd.f32 %v4110_v13, %v4106_v44  ;;  %v10079_v13 = vld [vmem:[#allocation120_spill] sm:$0xff] }
 0x733   :  { %6718 = vmatpush1.bf16.msra.mxu0 %v10060_v49  ;;  %6846 = vmatpush1.bf16.msra.mxu1 %v10061_v61  ;;  %v10068_v61 = vld [vmem:[#allocation110_spill] sm:$0xff] }
 0x734   :  { %6720 = vmatprep.subr.bf16.mxu0 %v10062_v15  ;;  %6848 = vmatprep.subr.bf16.mxu1 %v10063_v10  ;;  %v9048_v10 = vmax.f32 %v7403_v37, 0.0  ;;  %v10073_v37 = vld [vmem:[#allocation114_spill] sm:$0xff]  ;;  %v4131_v59 = vadd.f32 %v4130_v46, %v4114_v40  ;;  %v10082_v46 = vld [vmem:[#allocation123_spill] sm:$0xff] }
 0x736   :  { %10069 = vst [vmem:[#allocation30_spill] sm:$0xff] %v9048_v10  ;;  %v3799_v47 = vadd.f32 %v9041_v42, %v9048_v10  ;;  %v10076_v10 = vld [vmem:[#allocation117_spill] sm:$0xff]  ;;  %v10078_v42 = vld [vmem:[#allocation119_spill] sm:$0xff] }
 0x737   :  { %6722 = vmatpush1.bf16.msra.mxu0 %v10064_v54  ;;  %6850 = vmatpush1.bf16.msra.mxu1 %v10065_v41  ;;  %v10070_v41 = vld [vmem:[#allocation111_spill] sm:$0xff] }
 0x738   :  { %6724 = vmatprep.subr.bf16.mxu0 %v10067_v9  ;;  %6852 = vmatprep.subr.bf16.mxu1 %v10068_v61  ;;  %v9060_v61 = vmax.f32 %v7409_v27, 0.0  ;;  %v3800_v9 = vadd.f32 %v3799_v47, %v9050_v11  ;;  %v10074_v54 = vld [vmem:[#allocation115_spill] sm:$0xff]  ;;  %v10077_v27 = vld [vmem:[#allocation118_spill] sm:$0xff] }
 0x739   :  { %v10081_v47 = vld [vmem:[#allocation122_spill] sm:$0xff] }
 0x73b   :  { %6726 = vmatpush1.bf16.msra.mxu0 %v10070_v41  ;;  %6854 = vmatpush1.bf16.msra.mxu1 %v10071_v32  ;;  %v10075_v41 = vld [vmem:[#allocation116_spill] sm:$0xff]  ;;  %v3801_v32 = vadd.f32 %v3800_v9, %v9060_v61 }
 0x73c   :  { %6728 = vmatprep.subr.bf16.mxu0 %v10072_v28  ;;  %6856 = vmatprep.subr.bf16.mxu1 %v10073_v37  ;;  %v4132_v28 = vadd.f32 %v4131_v59, %v4118_v18  ;;  %v10086_v18 = vld [vmem:[#allocation127_spill] sm:$0xff] }
 0x73d   :  { %v3802_v44 = vrot.slane %v3801_v32, 4  ;;  %v10090_v37 = vld [vmem:[#allocation131_spill] sm:$0xff] }
 0x73e   :  { %v4133_v40 = vrot.slane %v4132_v28, 4 }
 0x73f   :  { %6730 = vmatpush1.bf16.msra.mxu0 %v10074_v54  ;;  %6858 = vmatpush1.bf16.msra.mxu1 %v10075_v41  ;;  %v10083_v41 = vld [vmem:[#allocation124_spill] sm:$0xff]  ;;  %v3803_v9 = vadd.f32 %v3802_v44, %v3801_v32  ;;  %v10084_v54 = vld [vmem:[#allocation125_spill] sm:$0xff]  ;;  %v10093_v44 = vld [vmem:[#allocation134_spill] sm:$0xff] }
 0x740   :  { %6732 = vmatprep.subr.bf16.mxu0 %v10076_v10  ;;  %6860 = vmatprep.subr.bf16.mxu1 %v10077_v27  ;;  %v10085_v10 = vld [vmem:[#allocation126_spill] sm:$0xff]  ;;  %v4134_v59 = vadd.f32 %v4133_v40, %v4132_v28  ;;  %v10088_v27 = vld [vmem:[#allocation129_spill] sm:$0xff]  ;;  %v10094_v40 = vld [vmem:[#allocation135_spill] sm:$0xff] }
 0x741   :  { %v10092_v32 = vld [vmem:[#allocation133_spill] sm:$0xff] }
 0x743   :  { %6734 = vmatpush1.bf16.msra.mxu0 %v10078_v42  ;;  %6862 = vmatpush1.bf16.msra.mxu1 %v10079_v13  ;;  %v10087_v42 = vld [vmem:[#allocation128_spill] sm:$0xff]  ;;  %v3804_v13 = vrot.slane %v3803_v9, 2 }
 0x744   :  { %6736 = vmatprep.subr.bf16.mxu0 %v10080_v35  ;;  %6864 = vmatprep.subr.bf16.mxu1 %v10081_v47  ;;  %v10089_v35 = vld [vmem:[#allocation130_spill] sm:$0xff]  ;;  %v4135_v47 = vrot.slane %v4134_v59, 2 }
 0x746   :  { %v4136_v28 = vadd.f32 %v4135_v47, %v4134_v59  ;;  %v10119_v47 = vld [vmem:[#allocation47_spill] sm:$0xff]  ;;  %v10121_v59 = vld [vmem:[#allocation50_spill] sm:$0xff] }
 0x747   :  { %6738 = vmatpush1.bf16.msra.mxu0 %v10082_v46  ;;  %6866 = vmatpush1.bf16.msra.mxu1 %v10083_v41  ;;  %v10091_v46 = vld [vmem:[#allocation132_spill] sm:$0xff]  ;;  %v10098_v41 = vld [vmem:[#allocation139_spill] sm:$0xff] }
 0x748   :  { %6740 = vmatprep.subr.bf16.mxu0 %v10084_v54  ;;  %6868 = vmatprep.subr.bf16.mxu1 %v10085_v10  ;;  %v3805_v10 = vadd.f32 %v3804_v13, %v3803_v9  ;;  %v4137_v54 = vrot.slane %v4136_v28, 1 }
 0x74a   :  { %v4138_v13 = vadd.f32 %v4137_v54, %v4136_v28 }
 0x74b   :  { %6742 = vmatpush1.bf16.msra.mxu0 %v10086_v18  ;;  %6870 = vmatpush1.bf16.msra.mxu1 %v10087_v42  ;;  %v10095_v18 = vld [vmem:[#allocation136_spill] sm:$0xff]  ;;  %v10096_v42 = vld [vmem:[#allocation137_spill] sm:$0xff] }
 0x74c   :  { %6744 = vmatprep.subr.bf16.mxu0 %v10088_v27  ;;  %6872 = vmatprep.subr.bf16.mxu1 %v10089_v35  ;;  %v10097_v27 = vld [vmem:[#allocation138_spill] sm:$0xff]  ;;  %v3806_v35 = vrot.slane %v3805_v10, 1 }
 0x74f   :  { %6746 = vmatpush1.bf16.msra.mxu0 %v10090_v37  ;;  %6874 = vmatpush1.bf16.msra.mxu1 %v10091_v46  ;;  %v10099_v37 = vld [vmem:[#allocation140_spill] sm:$0xff]  ;;  %v3807_v46 = vadd.f32 %v3806_v35, %v3805_v10  ;;  %v10117_v35 = vld [vmem:[#allocation45_spill] sm:$0xff]  ;;  %v10118_v10 = vld [vmem:[#allocation46_spill] sm:$0xff] }
 0x750   :  { %6748 = vmatprep.subr.bf16.mxu0 %v10092_v32  ;;  %6876 = vmatprep.subr.bf16.mxu1 %v10093_v44 }
 0x753   :  { %6750 = vmatpush1.bf16.msra.mxu0 %v10094_v40  ;;  %6878 = vmatpush1.bf16.msra.mxu1 %v10095_v18 }
 0x754   :  { %6752 = vmatprep.subr.bf16.mxu0 %v10096_v42  ;;  %6880 = vmatprep.subr.bf16.mxu1 %v10097_v27 }
 0x757   :  { %6754 = vmatpush1.bf16.msra.mxu0 %v10098_v41  ;;  %6882 = vmatpush1.bf16.msra.mxu1 %v10099_v37 }
 0x758   :  { %6884 = vmatprep.subr.bf16.mxu0 %v8024_v3  ;;  %7012 = vmatprep.subr.bf16.mxu1 %v8026_v7  ;;  %v4109_v3 = vmul.f32 %v8970_v19, %v8970_v19  ;;  %v10100_v7 = vld [vmem:[#allocation34_spill] sm:$0xff] }
 0x75a   :  { %3953 = vmatmul.mubr.f32.vlgmr.msra.gmra.mrb[36].mxu0 %v3807_v46  ;;  %4095 = vmatmul.mubr.f32.vlgmr.msra.gmra.mrb[36].mxu1 %v3807_v46  ;;  %v10120_v46 = vld [vmem:[#allocation48_spill] sm:$0xff] }
 0x75b   :  { %6886 = vmatpush1.bf16.msra.mxu0 %v8028_v8  ;;  %4221 = vmatprep.mubr.f32.mxu0 %v4138_v13  ;;  %v10101_v8 = vld [vmem:[#allocation35_spill] sm:$0xff] }
 0x75c   :  { %7014 = vmatpush1.bf16.msra.mxu1 %v8031_v12  ;;  %4363 = vmatprep.mubr.f32.mxu1 %v4138_v13  ;;  %v10102_v12 = vld [vmem:[#allocation36_spill] sm:$0xff]  ;;  %v10122_v13 = vld [vmem:[#allocation53_spill] sm:$0xff] }
 0x75d   :  { %6888 = vmatprep.subr.bf16.mxu0 %v8035_v16  ;;  %7016 = vmatprep.subr.bf16.mxu1 %v8037_v17  ;;  %v10103_v16 = vld [vmem:[#allocation106_spill] sm:$0xff] }
 0x75e   :  { %v4105_v17 = vmul.f32 %v10103_v16, %v10103_v16 }
 0x75f   :  { %6890 = vmatpush1.bf16.msra.mxu0 %v8040_v21  ;;  %v10104_v21 = vld [vmem:[#allocation51_spill] sm:$0xff] }
 0x760   :  { %7018 = vmatpush1.bf16.msra.mxu1 %v8044_v25  ;;  %6892 = vmatprep.subr.bf16.mxu0 %v8046_v26  ;;  %v4112_v25 = vmul.f32 %v10104_v21, %v10104_v21  ;;  %v10105_v26 = vld [vmem:[#allocation24_spill] sm:$0xff] }
 0x761   :  { %7020 = vmatprep.subr.bf16.mxu1 %v8048_v30  ;;  %v4113_v30 = vmul.f32 %v10105_v26, %v10105_v26 }
 0x763   :  { %6894 = vmatpush1.bf16.msra.mxu0 %v8051_v34  ;;  %v10106_v34 = vld [vmem:[#allocation56_spill] sm:$0xff] }
 0x764   :  { %7022 = vmatpush1.bf16.msra.mxu1 %v8055_v38  ;;  %6896 = vmatprep.subr.bf16.mxu0 %v8057_v39  ;;  %v4108_v38 = vmul.f32 %v10106_v34, %v10106_v34  ;;  %v10107_v39 = vld [vmem:[#allocation37_spill] sm:$0xff] }
 0x765   :  { %7024 = vmatprep.subr.bf16.mxu1 %v8060_v43  ;;  %v4121_v43 = vadd.f32 %v4109_v3, %v4105_v17  ;;  %v10123_v3 = vld [vmem:[#allocation54_spill] sm:$0xff]  ;;  %v10126_v17 = vld [vmem:[#allocation60_spill] sm:$0xff] }
 0x767   :  { %6898 = vmatpush1.bf16.msra.mxu0 %v8063_v50  ;;  %v10108_v50 = vld [vmem:[#allocation26_spill] sm:$0xff] }
 0x768   :  { %7026 = vmatpush1.bf16.msra.mxu1 %v8067_v51  ;;  %6900 = vmatprep.subr.bf16.mxu0 %v8069_v52  ;;  %v4116_v51 = vmul.f32 %v10108_v50, %v10108_v50  ;;  %v10109_v52 = vld [vmem:[#allocation27_spill] sm:$0xff] }
 0x769   :  { %7028 = vmatprep.subr.bf16.mxu1 %v8072_v56  ;;  %v4117_v56 = vmul.f32 %v10109_v52, %v10109_v52 }
 0x76b   :  { %6902 = vmatpush1.bf16.msra.mxu0 %v8075_v62  ;;  %v10110_v62 = vld [vmem:[#allocation38_spill] sm:$0xff] }
 0x76c   :  { %7030 = vmatpush1.bf16.msra.mxu1 %v8079_v63  ;;  %6904 = vmatprep.subr.bf16.mxu0 %v8081_v0  ;;  %v10111_v63 = vld [vmem:[#allocation39_spill] sm:$0xff]  ;;  %v10112_v0 = vld [vmem:[#allocation40_spill] sm:$0xff] }
 0x76d   :  { %7032 = vmatprep.subr.bf16.mxu1 %v9977_v58  ;;  %v4148_v58 = vadd.f32 %v4112_v25, %v4108_v38  ;;  %v10127_v25 = vld [vmem:[#allocation61_spill] sm:$0xff]  ;;  %v10128_v38 = vld [vmem:[#allocation62_spill] sm:$0xff] }
 0x76f   :  { %6906 = vmatpush1.bf16.msra.mxu0 %v9978_v33  ;;  %v4122_v33 = vadd.f32 %v4121_v43, %v4113_v30  ;;  %v10129_v43 = vld [vmem:[#allocation63_spill] sm:$0xff] }
 0x770   :  { %7034 = vmatpush1.bf16.msra.mxu1 %v9979_v36  ;;  %6908 = vmatprep.subr.bf16.mxu0 %v9980_v24  ;;  %v4120_v36 = vmul.f32 %v9001_v6, %v9001_v6  ;;  %v10113_v24 = vld [vmem:[#allocation41_spill] sm:$0xff] }
 0x771   :  { %7036 = vmatprep.subr.bf16.mxu1 %v9981_v53  ;;  %v4149_v53 = vadd.f32 %v4148_v58, %v4116_v51  ;;  %v10130_v51 = vld [vmem:[#allocation64_spill] sm:$0xff]  ;;  %v10133_v58 = vld [vmem:[#allocation67_spill] sm:$0xff] }
 0x773   :  { %6910 = vmatpush1.bf16.msra.mxu0 %v9982_v57  ;;  %v4123_v57 = vadd.f32 %v4122_v33, %v4117_v56  ;;  %v10131_v56 = vld [vmem:[#allocation65_spill] sm:$0xff]  ;;  %v10134_v33 = vld [vmem:[#allocation68_spill] sm:$0xff] }
 0x774   :  { %7038 = vmatpush1.bf16.msra.mxu1 %v9983_v22  ;;  %6912 = vmatprep.subr.bf16.mxu0 %v9984_v14  ;;  %v10114_v22 = vld [vmem:[#allocation42_spill] sm:$0xff]  ;;  %v10115_v14 = vld [vmem:[#allocation43_spill] sm:$0xff] }
 0x775   :  { %7040 = vmatprep.subr.bf16.mxu1 %v9985_v55  ;;  %v10116_v55 = vld [vmem:[#allocation44_spill] sm:$0xff]  ;;  %v4124_v54 = vrot.slane %v4123_v57, 4 }
 0x777   :  { %6914 = vmatpush1.bf16.msra.mxu0 %v9986_v31  ;;  %v4150_v31 = vadd.f32 %v4149_v53, %v4120_v36  ;;  %v4125_v28 = vadd.f32 %v4124_v54, %v4123_v57  ;;  %v10135_v36 = vld [vmem:[#allocation69_spill] sm:$0xff]  ;;  %v10136_v53 = vld [vmem:[#allocation70_spill] sm:$0xff] }
 0x778   :  { %7042 = vmatpush1.bf16.msra.mxu1 %v10100_v7  ;;  %6916 = vmatprep.subr.bf16.mxu0 %v10101_v8  ;;  %v10124_v7 = vld [vmem:[#allocation55_spill] sm:$0xff] }
 0x779   :  { %7044 = vmatprep.subr.bf16.mxu1 %v10102_v12  ;;  %v4151_v9 = vrot.slane %v4150_v31, 4  ;;  %v10125_v12 = vld [vmem:[#allocation58_spill] sm:$0xff]  ;;  %v4126_v30 = vrot.slane %v4125_v28, 2 }
 0x77b   :  { %6918 = vmatpush1.bf16.msra.mxu0 %v10107_v39  ;;  %v4152_v8 = vadd.f32 %v4151_v9, %v4150_v31  ;;  %v10139_v31 = vld [vmem:[#allocation73_spill] sm:$0xff]  ;;  %v10154_v9 = vld [vmem:[#allocation98_spill] sm:$0xff] }
 0x77c   :  { %7046 = vmatpush1.bf16.msra.mxu1 %v10110_v62  ;;  %6920 = vmatprep.subr.bf16.mxu0 %v10111_v63  ;;  %v4127_v62 = vadd.f32 %v4126_v30, %v4125_v28  ;;  %v10132_v63 = vld [vmem:[#allocation66_spill] sm:$0xff]  ;;  %v10156_v28 = vld [vmem:[#allocation103_spill] sm:$0xff]  ;;  %v4115_v30 = vmul.f32 %v9050_v11, %v9050_v11 }
 0x77d   :  { %7048 = vmatprep.subr.bf16.mxu1 %v10112_v0  ;;  %v4153_v39 = vrot.slane %v4152_v8, 2 }
 0x77f   :  { %6922 = vmatpush1.bf16.msra.mxu0 %v10113_v24  ;;  %v4154_v0 = vadd.f32 %v4153_v39, %v4152_v8  ;;  %v4128_v24 = vrot.slane %v4127_v62, 1  ;;  %v10159_v8 = vld [vmem:[#allocation108_spill] sm:$0xff]  ;;  %v4119_v39 = vmul.f32 %v9060_v61, %v9060_v61 }
 0x780   :  { %7050 = vmatpush1.bf16.msra.mxu1 %v10114_v22  ;;  %6924 = vmatprep.subr.bf16.mxu0 %v10115_v14  ;;  %v10137_v22 = vld [vmem:[#allocation71_spill] sm:$0xff]  ;;  %v10138_v14 = vld [vmem:[#allocation72_spill] sm:$0xff] }
 0x781   :  { %7052 = vmatprep.subr.bf16.mxu1 %v10116_v55  ;;  %v4155_v57 = vrot.slane %v4154_v0, 1  ;;  %v4129_v55 = vadd.f32 %v4128_v24, %v4127_v62  ;;  %v10171_v24 = vld [vmem:[#allocation119_spill] sm:$0xff] }
 0x783   :  { %6926 = vmatpush1.bf16.msra.mxu0 %v10117_v35  ;;  %v10140_v35 = vld [vmem:[#allocation74_spill] sm:$0xff]  ;;  %v4156_v54 = vadd.f32 %v4155_v57, %v4154_v0  ;;  %v10172_v57 = vld [vmem:[#allocation120_spill] sm:$0xff] }
 0x784   :  { %7054 = vmatpush1.bf16.msra.mxu1 %v10118_v10  ;;  %6928 = vmatprep.subr.bf16.mxu0 %v10119_v47  ;;  %v10143_v10 = vld [vmem:[#allocation87_spill] sm:$0xff]  ;;  %v10152_v47 = vld [vmem:[#allocation96_spill] sm:$0xff] }
 0x785   :  { %7056 = vmatprep.subr.bf16.mxu1 %v10120_v46  ;;  %v10153_v46 = vld [vmem:[#allocation97_spill] sm:$0xff] }
 0x787   :  { %6930 = vmatpush1.bf16.msra.mxu0 %v10121_v59  ;;  %v10155_v59 = vld [vmem:[#allocation100_spill] sm:$0xff] }
 0x788   :  { %7058 = vmatpush1.bf16.msra.mxu1 %v10122_v13  ;;  %6932 = vmatprep.subr.bf16.mxu0 %v10123_v3  ;;  %v10157_v13 = vld [vmem:[#allocation107_spill] sm:$0xff]  ;;  %v10158_v3 = vld [vmem:[#allocation29_spill] sm:$0xff] }
 0x789   :  { %7060 = vmatprep.subr.bf16.mxu1 %v10124_v7  ;;  %v4111_v7 = vmul.f32 %v10158_v3, %v10158_v3 }
 0x78b   :  { %6934 = vmatpush1.bf16.msra.mxu0 %v10125_v12  ;;  %v10160_v12 = vld [vmem:[#allocation109_spill] sm:$0xff] }
 0x78c   :  { %7062 = vmatpush1.bf16.msra.mxu1 %v10126_v17  ;;  %6936 = vmatprep.subr.bf16.mxu0 %v10127_v25  ;;  %v10161_v17 = vld [vmem:[#allocation110_spill] sm:$0xff] }
 0x78d   :  { %7064 = vmatprep.subr.bf16.mxu1 %v10128_v38  ;;  %v10162_v25 = vld [vmem:[#allocation30_spill] sm:$0xff] }
 0x78f   :  { %6938 = vmatpush1.bf16.msra.mxu0 %v10129_v43  ;;  %v10164_v43 = vld [vmem:[#allocation112_spill] sm:$0xff] }
 0x790   :  { %7066 = vmatpush1.bf16.msra.mxu1 %v10130_v51  ;;  %6940 = vmatprep.subr.bf16.mxu0 %v10131_v56  ;;  %v10165_v51 = vld [vmem:[#allocation113_spill] sm:$0xff]  ;;  %v10166_v56 = vld [vmem:[#allocation114_spill] sm:$0xff] }
 0x791   :  { %7068 = vmatprep.subr.bf16.mxu1 %v10132_v63  ;;  %v10167_v63 = vld [vmem:[#allocation115_spill] sm:$0xff] }
 0x793   :  { %6942 = vmatpush1.bf16.msra.mxu0 %v10133_v58  ;;  %v10168_v58 = vld [vmem:[#allocation116_spill] sm:$0xff] }
 0x794   :  { %7070 = vmatpush1.bf16.msra.mxu1 %v10134_v33  ;;  %6944 = vmatprep.subr.bf16.mxu0 %v10135_v36  ;;  %v10169_v33 = vld [vmem:[#allocation117_spill] sm:$0xff]  ;;  %v10170_v36 = vld [vmem:[#allocation118_spill] sm:$0xff] }
 0x795   :  { %7072 = vmatprep.subr.bf16.mxu1 %v10136_v53 }
 0x797   :  { %6946 = vmatpush1.bf16.msra.mxu0 %v10137_v22  ;;  %v10173_v22 = vld [vmem:[#allocation121_spill] sm:$0xff] }
 0x798   :  { %7074 = vmatpush1.bf16.msra.mxu1 %v10138_v14  ;;  %6948 = vmatprep.subr.bf16.mxu0 %v10139_v31  ;;  %v10174_v14 = vld [vmem:[#allocation122_spill] sm:$0xff] }
 0x799   :  { %7076 = vmatprep.subr.bf16.mxu1 %v10140_v35  ;;  %v10176_v35 = vld [vmem:[#allocation124_spill] sm:$0xff] }
 0x79a   :  { %4222 = vmatmul.mubr.f32.vlgmr.msra.gmra.mrb[38].mxu0 %v4129_v55 }
 0x79b   :  { %4364 = vmatmul.mubr.f32.vlgmr.msra.gmra.mrb[38].mxu1 %v4129_v55  ;;  %6950 = vmatpush1.bf16.msra.mxu0 %v10035_v2  ;;  %v10141_v2 = vld [vmem:[#allocation85_spill] sm:$0xff]  ;;  %v10175_v55 = vld [vmem:[#allocation123_spill] sm:$0xff] }
 0x79c   :  { %4292 = vmatprep.mubr.f32.mxu0 %v4156_v54  ;;  %7078 = vmatpush1.bf16.msra.mxu1 %v10036_v29  ;;  %v10142_v29 = vld [vmem:[#allocation86_spill] sm:$0xff] }
 0x79d   :  { %4434 = vmatprep.mubr.f32.mxu1 %v4156_v54  ;;  %6952 = vmatprep.subr.bf16.mxu0 %v10037_v5  ;;  %v10144_v5 = vld [vmem:[#allocation88_spill] sm:$0xff]  ;;  %v10177_v54 = vld [vmem:[#allocation125_spill] sm:$0xff] }
 0x79e   :  { %7080 = vmatprep.subr.bf16.mxu1 %v10038_v4  ;;  %v10145_v4 = vld [vmem:[#allocation89_spill] sm:$0xff] }
 0x79f   :  { %6954 = vmatpush1.bf16.msra.mxu0 %v10039_v45  ;;  %v10146_v45 = vld [vmem:[#allocation90_spill] sm:$0xff] }
 0x7a0   :  { %7082 = vmatpush1.bf16.msra.mxu1 %v10040_v23  ;;  %6956 = vmatprep.subr.bf16.mxu0 %v10041_v48  ;;  %v10147_v23 = vld [vmem:[#allocation91_spill] sm:$0xff]  ;;  %v10148_v48 = vld [vmem:[#allocation92_spill] sm:$0xff] }
 0x7a1   :  { %7084 = vmatprep.subr.bf16.mxu1 %v10042_v60  ;;  %v10149_v60 = vld [vmem:[#allocation93_spill] sm:$0xff] }
 0x7a3   :  { %6958 = vmatpush1.bf16.msra.mxu0 %v10043_v1  ;;  %v10150_v1 = vld [vmem:[#allocation94_spill] sm:$0xff] }
 0x7a4   :  { %7086 = vmatpush1.bf16.msra.mxu1 %v10044_v20  ;;  %6960 = vmatprep.subr.bf16.mxu0 %v10141_v2  ;;  %v10151_v20 = vld [vmem:[#allocation95_spill] sm:$0xff]  ;;  %v10178_v2 = vld [vmem:[#allocation126_spill] sm:$0xff] }
 0x7a5   :  { %7088 = vmatprep.subr.bf16.mxu1 %v10142_v29  ;;  %v10179_v29 = vld [vmem:[#allocation127_spill] sm:$0xff] }
 0x7a7   :  { %6962 = vmatpush1.bf16.msra.mxu0 %v10143_v10  ;;  %v10180_v10 = vld [vmem:[#allocation128_spill] sm:$0xff] }
 0x7a8   :  { %7090 = vmatpush1.bf16.msra.mxu1 %v10144_v5  ;;  %6964 = vmatprep.subr.bf16.mxu0 %v10145_v4  ;;  %v10181_v5 = vld [vmem:[#allocation129_spill] sm:$0xff] }
 0x7a9   :  { %7092 = vmatprep.subr.bf16.mxu1 %v10146_v45  ;;  %v10182_v45 = vld [vmem:[#allocation130_spill] sm:$0xff] }
 0x7ab   :  { %6966 = vmatpush1.bf16.msra.mxu0 %v10147_v23  ;;  %v10183_v23 = vld [vmem:[#allocation131_spill] sm:$0xff] }
 0x7ac   :  { %7094 = vmatpush1.bf16.msra.mxu1 %v10148_v48  ;;  %6968 = vmatprep.subr.bf16.mxu0 %v10149_v60  ;;  %v10184_v48 = vld [vmem:[#allocation132_spill] sm:$0xff] }
 0x7ad   :  { %7096 = vmatprep.subr.bf16.mxu1 %v10150_v1  ;;  %v4600_v1 = vld [vmem:[#allocation12 + $0x8] sm:$0xff] }
 0x7af   :  { %6970 = vmatpush1.bf16.msra.mxu0 %v10151_v20  ;;  %v4604_v20 = vld [vmem:[#allocation12 + $0x28] sm:$0xff] }
 0x7b0   :  { %7098 = vmatpush1.bf16.msra.mxu1 %v10152_v47  ;;  %6972 = vmatprep.subr.bf16.mxu0 %v10153_v46  ;;  %v4602_v47 = vld [vmem:[#allocation12 + $0x18] sm:$0xff] }
 0x7b1   :  { %7100 = vmatprep.subr.bf16.mxu1 %v10154_v9  ;;  %v4606_v46 = vld [vmem:[#allocation12 + $0x38] sm:$0xff] }
 0x7b3   :  { %6974 = vmatpush1.bf16.msra.mxu0 %v10060_v49  ;;  %v4107_v49 = vmul.f32 %v10162_v25, %v10162_v25 }
 0x7b4   :  { %7102 = vmatpush1.bf16.msra.mxu1 %v10155_v59  ;;  %6976 = vmatprep.subr.bf16.mxu0 %v10062_v15  ;;  %v10163_v15 = vld [vmem:[#allocation111_spill] sm:$0xff]  ;;  %v7139_v59 = vpack.c.bf16 %v4604_v20, %v4600_v1 }
 0x7b5   :  { %7104 = vmatprep.subr.bf16.mxu1 %v10156_v28  ;;  %v4139_v38 = vadd.f32 %v4111_v7, %v4107_v49  ;;  %v4599_v28 = vld [vmem:[#allocation12] sm:$0xff]  ;;  %v4601_v7 = vld [vmem:[#allocation12 + $0x10] sm:$0xff]  ;;  %v4614_v49 = vld [vmem:[#allocation12 + $0x78] sm:$0xff] }
 0x7b7   :  { %6978 = vmatpush1.bf16.msra.mxu0 %v10157_v13  ;;  %v4140_v62 = vadd.f32 %v4139_v38, %v4115_v30  ;;  %v4603_v13 = vld [vmem:[#allocation12 + $0x20] sm:$0xff] }
 0x7b8   :  { %7106 = vmatpush1.bf16.msra.mxu1 %v10159_v8  ;;  %6980 = vmatprep.subr.bf16.mxu0 %v10160_v12  ;;  %v4605_v8 = vld [vmem:[#allocation12 + $0x30] sm:$0xff]  ;;  %v4612_v12 = vld [vmem:[#allocation12 + $0x68] sm:$0xff]  ;;  %v4611_v38 = vld [vmem:[#allocation12 + $0x60] sm:$0xff] }
 0x7b9   :  { %7108 = vmatprep.subr.bf16.mxu1 %v10161_v17  ;;  %v4141_v0 = vadd.f32 %v4140_v62, %v4119_v39  ;;  %v4610_v17 = vld [vmem:[#allocation12 + $0x58] sm:$0xff]  ;;  %v4609_v39 = vld [vmem:[#allocation12 + $0x50] sm:$0xff] }
 0x7ba   :  { %v4618_v62 = vld [vmem:[#allocation12 + $0x98] sm:$0xff] }
 0x7bb   :  { %6982 = vmatpush1.bf16.msra.mxu0 %v10163_v15  ;;  %v4142_v53 = vrot.slane %v4141_v0, 4  ;;  %v4607_v15 = vld [vmem:[#allocation12 + $0x40] sm:$0xff] }
 0x7bc   :  { %7110 = vmatpush1.bf16.msra.mxu1 %v10164_v43  ;;  %6984 = vmatprep.subr.bf16.mxu0 %v10165_v51  ;;  %v4613_v43 = vld [vmem:[#allocation12 + $0x70] sm:$0xff]  ;;  %v4616_v51 = vld [vmem:[#allocation12 + $0x88] sm:$0xff] }
 0x7bd   :  { %7112 = vmatprep.subr.bf16.mxu1 %v10166_v56  ;;  %v4143_v31 = vadd.f32 %v4142_v53, %v4141_v0  ;;  %v4620_v56 = vld [vmem:[#allocation12 + $0xa8] sm:$0xff]  ;;  %v4621_v53 = vld [vmem:[#allocation12 + $0xb0] sm:$0xff] }
 0x7be   :  { %v7147_v0 = vpack.c.bf16 %v4620_v56, %v4616_v51  ;;  %v4645_v51 = vld [vmem:[#allocation12 + $0x170] sm:$0xff] }
 0x7bf   :  { %6986 = vmatpush1.bf16.msra.mxu0 %v10167_v63  ;;  %v4144_v4 = vrot.slane %v4143_v31, 2  ;;  %v4622_v63 = vld [vmem:[#allocation12 + $0xb8] sm:$0xff] }
 0x7c0   :  { %7114 = vmatpush1.bf16.msra.mxu1 %v10168_v58  ;;  %6988 = vmatprep.subr.bf16.mxu0 %v10169_v33  ;;  %v4615_v58 = vld [vmem:[#allocation12 + $0x80] sm:$0xff] }
 0x7c1   :  { %7116 = vmatprep.subr.bf16.mxu1 %v10170_v36  ;;  %v4145_v60 = vadd.f32 %v4144_v4, %v4143_v31  ;;  %v4619_v33 = vld [vmem:[#allocation12 + $0xa0] sm:$0xff]  ;;  %v4617_v36 = vld [vmem:[#allocation12 + $0x90] sm:$0xff] }
 0x7c2   :  { %v7149_v31 = vpack.c.bf16 %v4619_v33, %v4615_v58  ;;  %v4629_v4 = vld [vmem:[#allocation12 + $0xf0] sm:$0xff]  ;;  %v4647_v58 = vld [vmem:[#allocation12 + $0x180] sm:$0xff] }
 0x7c3   :  { %6990 = vmatpush1.bf16.msra.mxu0 %v10171_v24  ;;  %v4146_v9 = vrot.slane %v4145_v60, 1  ;;  %v7275_v24 = vpack.c.bf16 %v4622_v63, %v4618_v62  ;;  %v4648_v62 = vld [vmem:[#allocation12 + $0x188] sm:$0xff]  ;;  %v4651_v33 = vld [vmem:[#allocation12 + $0x1a0] sm:$0xff] }
 0x7c4   :  { %7118 = vmatpush1.bf16.msra.mxu1 %v10172_v57  ;;  %6992 = vmatprep.subr.bf16.mxu0 %v10173_v22  ;;  %v4624_v57 = vld [vmem:[#allocation12 + $0xc8] sm:$0xff] }
 0x7c5   :  { %7120 = vmatprep.subr.bf16.mxu1 %v10174_v14  ;;  %v4628_v22 = vld [vmem:[#allocation12 + $0xe8] sm:$0xff]  ;;  %v4626_v14 = vld [vmem:[#allocation12 + $0xd8] sm:$0xff] }
 0x7c6   :  { %v4652_v63 = vld [vmem:[#allocation12 + $0x1a8] sm:$0xff] }
 0x7c7   :  { %6994 = vmatpush1.bf16.msra.mxu0 %v10175_v55  ;;  %v4630_v55 = vld [vmem:[#allocation12 + $0xf8] sm:$0xff] }
 0x7c8   :  { %7122 = vmatpush1.bf16.msra.mxu1 %v10176_v35  ;;  %6996 = vmatprep.subr.bf16.mxu0 %v10177_v54  ;;  %v7277_v35 = vpack.c.bf16 %v4621_v53, %v4617_v36  ;;  %v7151_v54 = vpack.c.bf16 %v4628_v22, %v4624_v57  ;;  %v4649_v53 = vld [vmem:[#allocation12 + $0x190] sm:$0xff] }
 0x7c9   :  { %7124 = vmatprep.subr.bf16.mxu1 %v10178_v2  ;;  %v4623_v2 = vld [vmem:[#allocation12 + $0xc0] sm:$0xff]  ;;  %v4653_v57 = vld [vmem:[#allocation12 + $0x1b0] sm:$0xff] }
 0x7ca   :  { %v7293_v22 = vpack.c.bf16 %v4653_v57, %v4649_v53  ;;  %v4685_v53 = vld [vmem:[#allocation12 + $0x2b0] sm:$0xff] }
 0x7cb   :  { %6998 = vmatpush1.bf16.msra.mxu0 %v10179_v29  ;;  %v4627_v29 = vld [vmem:[#allocation12 + $0xe0] sm:$0xff] }
 0x7cc   :  { %7126 = vmatpush1.bf16.msra.mxu1 %v10180_v10  ;;  %7000 = vmatprep.subr.bf16.mxu0 %v10181_v5  ;;  %v4625_v10 = vld [vmem:[#allocation12 + $0xd0] sm:$0xff]  ;;  %v7279_v5 = vpack.c.bf16 %v4630_v55, %v4626_v14  ;;  %v7153_v1 = vpack.c.bf16 %v4627_v29, %v4623_v2  ;;  %v4656_v14 = vld [vmem:[#allocation12 + $0x1c8] sm:$0xff]  ;;  %v4655_v2 = vld [vmem:[#allocation12 + $0x1c0] sm:$0xff] }
 0x7cd   :  { %7128 = vmatprep.subr.bf16.mxu1 %v10182_v45  ;;  %v4632_v45 = vld [vmem:[#allocation12 + $0x108] sm:$0xff]  ;;  %v7281_v20 = vpack.c.bf16 %v4629_v4, %v4625_v10  ;;  %v4659_v29 = vld [vmem:[#allocation12 + $0x1e0] sm:$0xff]  ;;  %v4657_v4 = vld [vmem:[#allocation12 + $0x1d0] sm:$0xff] }
 0x7ce   :  { %v4660_v55 = vld [vmem:[#allocation12 + $0x1e8] sm:$0xff] }
 0x7cf   :  { %7002 = vmatpush1.bf16.msra.mxu0 %v10183_v23  ;;  %v4636_v23 = vld [vmem:[#allocation12 + $0x128] sm:$0xff] }
 0x7d0   :  { %7130 = vmatpush1.bf16.msra.mxu1 %v10184_v48  ;;  %7004 = vmatprep.subr.bf16.mxu0 %v10092_v32  ;;  %v7267_v32 = vpack.c.bf16 %v4606_v46, %v4602_v47  ;;  %v4634_v48 = vld [vmem:[#allocation12 + $0x118] sm:$0xff]  ;;  %v7155_v47 = vpack.c.bf16 %v4636_v23, %v4632_v45  ;;  %v4661_v45 = vld [vmem:[#allocation12 + $0x1f0] sm:$0xff] }
 0x7d1   :  { %7132 = vmatprep.subr.bf16.mxu1 %v10093_v44  ;;  %v4608_v44 = vld [vmem:[#allocation12 + $0x48] sm:$0xff]  ;;  %v7297_v23 = vpack.c.bf16 %v4661_v45, %v4657_v4  ;;  %v4689_v4 = vld [vmem:[#allocation12 + $0x2d0] sm:$0xff] }
 0x7d2   :  { %v7143_v30 = vpack.c.bf16 %v4612_v12, %v4608_v44  ;;  %v4693_v45 = vld [vmem:[#allocation12 + $0x2f0] sm:$0xff] }
 0x7d3   :  { %7006 = vmatpush1.bf16.msra.mxu0 %v10094_v40  ;;  %v7141_v40 = vpack.c.bf16 %v4603_v13, %v4599_v28  ;;  %v4633_v28 = vld [vmem:[#allocation12 + $0x110] sm:$0xff] }
 0x7d4   :  { %7134 = vmatpush1.bf16.msra.mxu1 %v10095_v18  ;;  %7008 = vmatprep.subr.bf16.mxu0 %v10096_v42  ;;  %v4147_v18 = vadd.f32 %v4146_v9, %v4145_v60  ;;  %v7269_v42 = vpack.c.bf16 %v4605_v8, %v4601_v7  ;;  %v4638_v60 = vld [vmem:[#allocation12 + $0x138] sm:$0xff]  ;;  %v4631_v9 = vld [vmem:[#allocation12 + $0x100] sm:$0xff]  ;;  %v4637_v8 = vld [vmem:[#allocation12 + $0x130] sm:$0xff] }
 0x7d5   :  { %7136 = vmatprep.subr.bf16.mxu1 %v10097_v27  ;;  %v7271_v27 = vpack.c.bf16 %v4614_v49, %v4610_v17  ;;  %v7283_v46 = vpack.c.bf16 %v4638_v60, %v4634_v48  ;;  %v7285_v17 = vpack.c.bf16 %v4637_v8, %v4633_v28  ;;  %v4640_v49 = vld [vmem:[#allocation12 + $0x148] sm:$0xff]  ;;  %v4669_v8 = vld [vmem:[#allocation12 + $0x230] sm:$0xff] }
 0x7d6   :  { %v4664_v48 = vld [vmem:[#allocation12 + $0x208] sm:$0xff] }
 0x7d7   :  { %7010 = vmatpush1.bf16.msra.mxu0 %v10098_v41  ;;  %v7145_v41 = vpack.c.bf16 %v4611_v38, %v4607_v15  ;;  %v4639_v15 = vld [vmem:[#allocation12 + $0x140] sm:$0xff]  ;;  %v4668_v60 = vld [vmem:[#allocation12 + $0x228] sm:$0xff] }
 0x7d8   :  { %7138 = vmatpush1.bf16.msra.mxu1 %v10099_v37  ;;  %7140 = vmatprep.subr.bf16.mxu0 %v7139_v59  ;;  %v7273_v37 = vpack.c.bf16 %v4613_v43, %v4609_v39  ;;  %v4635_v59 = vld [vmem:[#allocation12 + $0x120] sm:$0xff]  ;;  %v4641_v43 = vld [vmem:[#allocation12 + $0x150] sm:$0xff] }
 0x7d9   :  { %7268 = vmatprep.subr.bf16.mxu1 %v7267_v32  ;;  %v7157_v32 = vpack.c.bf16 %v4635_v59, %v4631_v9  ;;  %v4643_v38 = vld [vmem:[#allocation12 + $0x160] sm:$0xff]  ;;  %v7289_v56 = vpack.c.bf16 %v4645_v51, %v4641_v43  ;;  %v4673_v43 = vld [vmem:[#allocation12 + $0x250] sm:$0xff] }
 0x7da   :  { %4293 = vmatmul.mubr.f32.vlgmr.msra.gmra.mrb[38].mxu0 %v4147_v18  ;;  %v4667_v9 = vld [vmem:[#allocation12 + $0x220] sm:$0xff]  ;;  %v4677_v51 = vld [vmem:[#allocation12 + $0x270] sm:$0xff] }
 0x7db   :  { %4435 = vmatmul.mubr.f32.vlgmr.msra.gmra.mrb[38].mxu1 %v4147_v18  ;;  %7142 = vmatpush1.bf16.msra.mxu0 %v7141_v40  ;;  %v4644_v40 = vld [vmem:[#allocation12 + $0x168] sm:$0xff]  ;;  %v4642_v18 = vld [vmem:[#allocation12 + $0x158] sm:$0xff] }
 0x7dc   :  { %7270 = vmatpush1.bf16.msra.mxu1 %v7269_v42  ;;  %7144 = vmatprep.subr.bf16.mxu0 %v7143_v30  ;;  %v7159_v42 = vpack.c.bf16 %v4644_v40, %v4640_v49  ;;  %v4646_v30 = vld [vmem:[#allocation12 + $0x178] sm:$0xff]  ;;  %v4672_v49 = vld [vmem:[#allocation12 + $0x248] sm:$0xff] }
 0x7dd   :  { %7272 = vmatprep.subr.bf16.mxu1 %v7271_v27  ;;  %v7287_v39 = vpack.c.bf16 %v4646_v30, %v4642_v18  ;;  %v7161_v27 = vpack.c.bf16 %v4643_v38, %v4639_v15  ;;  %v4676_v40 = vld [vmem:[#allocation12 + $0x268] sm:$0xff]  ;;  %v4674_v18 = vld [vmem:[#allocation12 + $0x258] sm:$0xff]  ;;  %v4671_v15 = vld [vmem:[#allocation12 + $0x240] sm:$0xff] }
 0x7de   :  { %v4678_v30 = vld [vmem:[#allocation12 + $0x278] sm:$0xff]  ;;  %v4675_v38 = vld [vmem:[#allocation12 + $0x260] sm:$0xff] }
 0x7df   :  { %7146 = vmatpush1.bf16.msra.mxu0 %v7145_v41  ;;  %v4650_v41 = vld [vmem:[#allocation12 + $0x198] sm:$0xff] }
 0x7e0   :  { %7274 = vmatpush1.bf16.msra.mxu1 %v7273_v37  ;;  %7148 = vmatprep.subr.bf16.mxu0 %v7147_v0  ;;  %v7163_v37 = vpack.c.bf16 %v4652_v63, %v4648_v62  ;;  %v4654_v0 = vld [vmem:[#allocation12 + $0x1b8] sm:$0xff]  ;;  %v4680_v62 = vld [vmem:[#allocation12 + $0x288] sm:$0xff] }
 0x7e1   :  { %7276 = vmatprep.subr.bf16.mxu1 %v7275_v24  ;;  %v7291_v36 = vpack.c.bf16 %v4654_v0, %v4650_v41  ;;  %v7165_v24 = vpack.c.bf16 %v4651_v33, %v4647_v58  ;;  %v4684_v63 = vld [vmem:[#allocation12 + $0x2a8] sm:$0xff]  ;;  %v4686_v0 = vld [vmem:[#allocation12 + $0x2b8] sm:$0xff]  ;;  %v4679_v58 = vld [vmem:[#allocation12 + $0x280] sm:$0xff] }
 0x7e2   :  { %v7179_v41 = vpack.c.bf16 %v4684_v63, %v4680_v62  ;;  %v4716_v62 = vld [vmem:[#allocation12 + $0x3a8] sm:$0xff] }
 0x7e3   :  { %7150 = vmatpush1.bf16.msra.mxu0 %v7149_v31  ;;  %v4658_v31 = vld [vmem:[#allocation12 + $0x1d8] sm:$0xff] }
 0x7e4   :  { %7278 = vmatpush1.bf16.msra.mxu1 %v7277_v35  ;;  %7152 = vmatprep.subr.bf16.mxu0 %v7151_v54  ;;  %v7167_v35 = vpack.c.bf16 %v4660_v55, %v4656_v14  ;;  %v4662_v54 = vld [vmem:[#allocation12 + $0x1f8] sm:$0xff]  ;;  %v4688_v14 = vld [vmem:[#allocation12 + $0x2c8] sm:$0xff] }
 0x7e5   :  { %7280 = vmatprep.subr.bf16.mxu1 %v7279_v5  ;;  %v7295_v10 = vpack.c.bf16 %v4662_v54, %v4658_v31  ;;  %v7169_v5 = vpack.c.bf16 %v4659_v29, %v4655_v2  ;;  %v4692_v55 = vld [vmem:[#allocation12 + $0x2e8] sm:$0xff]  ;;  %v4690_v31 = vld [vmem:[#allocation12 + $0x2d8] sm:$0xff]  ;;  %v4687_v2 = vld [vmem:[#allocation12 + $0x2c0] sm:$0xff] }
 0x7e6   :  { %v4694_v54 = vld [vmem:[#allocation12 + $0x2f8] sm:$0xff]  ;;  %v4691_v29 = vld [vmem:[#allocation12 + $0x2e0] sm:$0xff] }
 0x7e7   :  { %7154 = vmatpush1.bf16.msra.mxu0 %v7153_v1  ;;  %v4666_v1 = vld [vmem:[#allocation12 + $0x218] sm:$0xff] }
 0x7e8   :  { %7282 = vmatpush1.bf16.msra.mxu1 %v7281_v20  ;;  %7156 = vmatprep.subr.bf16.mxu0 %v7155_v47  ;;  %v7171_v20 = vpack.c.bf16 %v4668_v60, %v4664_v48  ;;  %v4670_v47 = vld [vmem:[#allocation12 + $0x238] sm:$0xff]  ;;  %v4696_v48 = vld [vmem:[#allocation12 + $0x308] sm:$0xff] }
 0x7e9   :  { %7284 = vmatprep.subr.bf16.mxu1 %v7283_v46  ;;  %v4663_v46 = vld [vmem:[#allocation12 + $0x200] sm:$0xff]  ;;  %v7299_v59 = vpack.c.bf16 %v4670_v47, %v4666_v1  ;;  %v4700_v60 = vld [vmem:[#allocation12 + $0x328] sm:$0xff]  ;;  %v4698_v1 = vld [vmem:[#allocation12 + $0x318] sm:$0xff] }
 0x7ea   :  { %v7173_v28 = vpack.c.bf16 %v4667_v9, %v4663_v46  ;;  %v4702_v47 = vld [vmem:[#allocation12 + $0x338] sm:$0xff]  ;;  %v4695_v46 = vld [vmem:[#allocation12 + $0x300] sm:$0xff] }
 0x7eb   :  { %7158 = vmatpush1.bf16.msra.mxu0 %v7157_v32  ;;  %v4665_v32 = vld [vmem:[#allocation12 + $0x210] sm:$0xff]  ;;  %v4699_v9 = vld [vmem:[#allocation12 + $0x320] sm:$0xff] }
 0x7ec   :  { %7286 = vmatpush1.bf16.msra.mxu1 %v7285_v17  ;;  %7160 = vmatprep.subr.bf16.mxu0 %v7159_v42  ;;  %v7301_v17 = vpack.c.bf16 %v4669_v8, %v4665_v32  ;;  %v7175_v42 = vpack.c.bf16 %v4676_v40, %v4672_v49  ;;  %v4697_v32 = vld [vmem:[#allocation12 + $0x310] sm:$0xff]  ;;  %v4708_v40 = vld [vmem:[#allocation12 + $0x368] sm:$0xff] }
 0x7ed   :  { %7288 = vmatprep.subr.bf16.mxu1 %v7287_v39  ;;  %v7303_v39 = vpack.c.bf16 %v4678_v30, %v4674_v18  ;;  %v4701_v8 = vld [vmem:[#allocation12 + $0x330] sm:$0xff]  ;;  %v4706_v18 = vld [vmem:[#allocation12 + $0x358] sm:$0xff] }
 0x7ee   :  { %v7317_v49 = vpack.c.bf16 %v4701_v8, %v4697_v32 }
 0x7ef   :  { %7162 = vmatpush1.bf16.msra.mxu0 %v7161_v27  ;;  %v7177_v27 = vpack.c.bf16 %v4675_v38, %v4671_v15  ;;  %v4703_v38 = vld [vmem:[#allocation12 + $0x340] sm:$0xff] }
 0x7f0   :  { %7290 = vmatpush1.bf16.msra.mxu1 %v7289_v56  ;;  %7164 = vmatprep.subr.bf16.mxu0 %v7163_v37  ;;  %v7305_v56 = vpack.c.bf16 %v4677_v51, %v4673_v43  ;;  %v4682_v37 = vld [vmem:[#allocation12 + $0x298] sm:$0xff]  ;;  %v4709_v51 = vld [vmem:[#allocation12 + $0x370] sm:$0xff] }
 0x7f1   :  { %7292 = vmatprep.subr.bf16.mxu1 %v7291_v36  ;;  %v7307_v33 = vpack.c.bf16 %v4686_v0, %v4682_v37  ;;  %v4683_v36 = vld [vmem:[#allocation12 + $0x2a0] sm:$0xff]  ;;  %v4714_v37 = vld [vmem:[#allocation12 + $0x398] sm:$0xff] }
 0x7f2   :  { %v7181_v57 = vpack.c.bf16 %v4683_v36, %v4679_v58  ;;  %v4718_v0 = vld [vmem:[#allocation12 + $0x3b8] sm:$0xff]  ;;  %v4711_v58 = vld [vmem:[#allocation12 + $0x380] sm:$0xff] }
 0x7f3   :  { %7166 = vmatpush1.bf16.msra.mxu0 %v7165_v24  ;;  %v4681_v24 = vld [vmem:[#allocation12 + $0x290] sm:$0xff]  ;;  %v4715_v36 = vld [vmem:[#allocation12 + $0x3a0] sm:$0xff] }
 0x7f4   :  { %7294 = vmatpush1.bf16.msra.mxu1 %v7293_v22  ;;  %7168 = vmatprep.subr.bf16.mxu0 %v7167_v35  ;;  %v7309_v22 = vpack.c.bf16 %v4685_v53, %v4681_v24  ;;  %v7183_v35 = vpack.c.bf16 %v4692_v55, %v4688_v14  ;;  %v4713_v24 = vld [vmem:[#allocation12 + $0x390] sm:$0xff]  ;;  %v4722_v14 = vld [vmem:[#allocation12 + $0x3d8] sm:$0xff]  ;;  %v7197_v55 = vpack.c.bf16 %v4715_v36, %v4711_v58 }
 0x7f5   :  { %7296 = vmatprep.subr.bf16.mxu1 %v7295_v10  ;;  %v7311_v10 = vpack.c.bf16 %v4694_v54, %v4690_v31  ;;  %v4717_v53 = vld [vmem:[#allocation12 + $0x3b0] sm:$0xff]  ;;  %v4719_v54 = vld [vmem:[#allocation12 + $0x3c0] sm:$0xff] }
 0x7f6   :  { %v7325_v31 = vpack.c.bf16 %v4717_v53, %v4713_v24  ;;  %v10185_v24 = vld [vmem:[#allocation57_spill] sm:$0xff] }
 0x7f7   :  { %7170 = vmatpush1.bf16.msra.mxu0 %v7169_v5  ;;  %v7185_v5 = vpack.c.bf16 %v4691_v29, %v4687_v2 }
 0x7f8   :  { %7298 = vmatpush1.bf16.msra.mxu1 %v7297_v23  ;;  %7172 = vmatprep.subr.bf16.mxu0 %v7171_v20  ;;  %v7313_v23 = vpack.c.bf16 %v4693_v45, %v4689_v4  ;;  %v7187_v20 = vpack.c.bf16 %v4700_v60, %v4696_v48  ;;  %v4725_v4 = vld [vmem:[#allocation12 + $0x3f0] sm:$0xff]  ;;  %v4728_v48 = vld [vmem:[#allocation12 + $0x408] sm:$0xff] }
 0x7f9   :  { %7300 = vmatprep.subr.bf16.mxu1 %v7299_v59  ;;  %v7315_v59 = vpack.c.bf16 %v4702_v47, %v4698_v1  ;;  %v4732_v60 = vld [vmem:[#allocation12 + $0x428] sm:$0xff]  ;;  %v4730_v1 = vld [vmem:[#allocation12 + $0x418] sm:$0xff] }
 0x7fa   :  { %v4734_v47 = vld [vmem:[#allocation12 + $0x438] sm:$0xff] }
 0x7fb   :  { %7174 = vmatpush1.bf16.msra.mxu0 %v7173_v28  ;;  %v7189_v28 = vpack.c.bf16 %v4699_v9, %v4695_v46  ;;  %v7331_v46 = vpack.c.bf16 %v4734_v47, %v4730_v1 }
 0x7fc   :  { %7302 = vmatpush1.bf16.msra.mxu1 %v7301_v17  ;;  %7176 = vmatprep.subr.bf16.mxu0 %v7175_v42  ;;  %v4704_v17 = vld [vmem:[#allocation12 + $0x348] sm:$0xff]  ;;  %v4710_v42 = vld [vmem:[#allocation12 + $0x378] sm:$0xff] }
 0x7fd   :  { %7304 = vmatprep.subr.bf16.mxu1 %v7303_v39  ;;  %v7191_v30 = vpack.c.bf16 %v4708_v40, %v4704_v17  ;;  %v7319_v15 = vpack.c.bf16 %v4710_v42, %v4706_v18  ;;  %v4707_v39 = vld [vmem:[#allocation12 + $0x360] sm:$0xff] }
 0x7fe   :  { %v7193_v43 = vpack.c.bf16 %v4707_v39, %v4703_v38 }
 0x7ff   :  { %7178 = vmatpush1.bf16.msra.mxu0 %v7177_v27  ;;  %v4705_v27 = vld [vmem:[#allocation12 + $0x350] sm:$0xff] }
 0x800   :  { %7306 = vmatpush1.bf16.msra.mxu1 %v7305_v56  ;;  %7180 = vmatprep.subr.bf16.mxu0 %v7179_v41  ;;  %v4712_v56 = vld [vmem:[#allocation12 + $0x388] sm:$0xff]  ;;  %v7321_v63 = vpack.c.bf16 %v4709_v51, %v4705_v27 }
 0x801   :  { %7308 = vmatprep.subr.bf16.mxu1 %v7307_v33  ;;  %v7195_v41 = vpack.c.bf16 %v4716_v62, %v4712_v56  ;;  %v7323_v33 = vpack.c.bf16 %v4718_v0, %v4714_v37 }
 0x803   :  { %7182 = vmatpush1.bf16.msra.mxu0 %v7181_v57  ;;  %v4720_v57 = vld [vmem:[#allocation12 + $0x3c8] sm:$0xff] }
 0x804   :  { %7310 = vmatpush1.bf16.msra.mxu1 %v7309_v22  ;;  %7184 = vmatprep.subr.bf16.mxu0 %v7183_v35  ;;  %v4724_v22 = vld [vmem:[#allocation12 + $0x3e8] sm:$0xff]  ;;  %v4726_v35 = vld [vmem:[#allocation12 + $0x3f8] sm:$0xff] }
 0x805   :  { %7312 = vmatprep.subr.bf16.mxu1 %v7311_v10  ;;  %v7199_v2 = vpack.c.bf16 %v4724_v22, %v4720_v57  ;;  %v7327_v29 = vpack.c.bf16 %v4726_v35, %v4722_v14  ;;  %v4723_v10 = vld [vmem:[#allocation12 + $0x3e0] sm:$0xff] }
 0x806   :  { %v7201_v45 = vpack.c.bf16 %v4723_v10, %v4719_v54  ;;  %v3763_v14 = vld [vmem:[#allocation15] sm:$0xf]  ;;  %v10186_v35 = vld [vmem:[#allocation102_spill] sm:$0xff]  ;;  %v10188_v10 = vld [vmem:[#allocation104_spill] sm:$0xff] }
 0x807   :  { %7186 = vmatpush1.bf16.msra.mxu0 %v7185_v5  ;;  %v4721_v5 = vld [vmem:[#allocation12 + $0x3d0] sm:$0xff] }
 0x808   :  { %7314 = vmatpush1.bf16.msra.mxu1 %v7313_v23  ;;  %7188 = vmatprep.subr.bf16.mxu0 %v7187_v20  ;;  %v7329_v23 = vpack.c.bf16 %v4725_v4, %v4721_v5  ;;  %v7203_v20 = vpack.c.bf16 %v4732_v60, %v4728_v48  ;;  %v10189_v4 = vld [vmem:[#allocation105_spill] sm:$0xff] }
 0x809   :  { %7316 = vmatprep.subr.bf16.mxu1 %v7315_v59 }
 0x80b   :  { %7190 = vmatpush1.bf16.msra.mxu0 %v7189_v28 }
 0x80c   :  { %7318 = vmatpush1.bf16.msra.mxu1 %v7317_v49  ;;  %7192 = vmatprep.subr.bf16.mxu0 %v7191_v30 }
 0x80d   :  { %7320 = vmatprep.subr.bf16.mxu1 %v7319_v15 }
 0x80f   :  { %7194 = vmatpush1.bf16.msra.mxu0 %v7193_v43 }
 0x810   :  { %7322 = vmatpush1.bf16.msra.mxu1 %v7321_v63  ;;  %7196 = vmatprep.subr.bf16.mxu0 %v7195_v41 }
 0x811   :  { %7324 = vmatprep.subr.bf16.mxu1 %v7323_v33 }
 0x813   :  { %7198 = vmatpush1.bf16.msra.mxu0 %v7197_v55 }
 0x814   :  { %7326 = vmatpush1.bf16.msra.mxu1 %v7325_v31  ;;  %7200 = vmatprep.subr.bf16.mxu0 %v7199_v2  ;;  %v10187_v2 = vld [vmem:[#allocation59_spill] sm:$0xff] }
 0x815   :  { %7328 = vmatprep.subr.bf16.mxu1 %v7327_v29 }
 0x817   :  { %7202 = vmatpush1.bf16.msra.mxu0 %v7201_v45 }
 0x818   :  { %7330 = vmatpush1.bf16.msra.mxu1 %v7329_v23  ;;  %7204 = vmatprep.subr.bf16.mxu0 %v7203_v20 }
 0x819   :  { %7332 = vmatprep.subr.bf16.mxu1 %v7331_v46  ;;  %v9265_v46 = vld [vmem:[#allocation12 + $0x400] sm:$0xff] }
 0x82d   :  { %v9246_v13 = vpop.f32.mrb[36].mxu0  ;;  %v9248_v7 = vpop.f32.mrb[36].mxu1 }
 0x82e   :  { %v9250_v44 = vpop.f32.mrb[37].mxu0  ;;  %v9252_v12 = vpop.f32.mrb[37].mxu1  ;;  %v4101_v9 = vmul.f32 0.001953125, %v9246_v13  ;;  %v4103_v59 = vmul.f32 0.001953125, %v9248_v7 }
 0x82f   :  { %v4102_v28 = vmul.f32 0.001953125, %v9250_v44  ;;  %v4104_v32 = vmul.f32 0.001953125, %v9252_v12 }
 0x830   :  { %v4445_v17 = vmul.f32 %v4101_v9, %v4101_v9  ;;  %v4447_v42 = vmul.f32 %v4103_v59, %v4103_v59 }
 0x831   :  { %v4446_v30 = vmul.f32 %v4102_v28, %v4102_v28  ;;  %v4448_v27 = vmul.f32 %v4104_v32, %v4104_v32 }
 0x8ad   :  { %v4294_v8 = vpop.f32.mrb[38].mxu0 }
 0x8ae   :  { %v4441_v49 = vmul.f32 0.001953125, %v4294_v8  ;;  %v4436_v40 = vpop.f32.mrb[38].mxu1  ;;  %v4296_v18 = vpop.f32.mrb[39].mxu0  ;;  %v9267_v8 = vld [vmem:[#allocation12 + $0x420] sm:$0xff] }
 0x8af   :  { %v4443_v15 = vmul.f32 0.001953125, %v4436_v40  ;;  %v4442_v38 = vmul.f32 0.001953125, %v4296_v18  ;;  %v4438_v39 = vpop.f32.mrb[39].mxu1 }
 0x8b0   :  { %v4449_v43 = vsub.f32 %v4441_v49, %v4445_v17  ;;  %v4444_v51 = vmul.f32 0.001953125, %v4438_v39  ;;  %v9269_v17 = vld [vmem:[#allocation12 + $0x410] sm:$0xff]  ;;  %v7205_v39 = vpack.c.bf16 %v9267_v8, %v9265_v46  ;;  %v4750_v8 = vld [vmem:[#allocation12 + $0x4b8] sm:$0xff] }
 0x8b1   :  { %v4451_v13 = vsub.f32 %v4443_v15, %v4447_v42  ;;  %v4450_v56 = vsub.f32 %v4442_v38, %v4446_v30  ;;  %v9271_v49 = vld [vmem:[#allocation12 + $0x430] sm:$0xff]  ;;  %v9275_v42 = vld [vmem:[#allocation12 + $0x448] sm:$0xff]  ;;  %v9285_v30 = vld [vmem:[#allocation12 + $0x460] sm:$0xff] }
 0x8b2   :  { %v4453_v7 = vadd.f32 1e-05, %v4449_v43  ;;  %v4452_v62 = vsub.f32 %v4444_v51, %v4448_v27  ;;  %v3764_v38 = vld [vmem:[#allocation16] sm:$0xf]  ;;  %v7333_v27 = vpack.c.bf16 %v9271_v49, %v9269_v17 }
 0x8b3   :  { %v4455_v44 = vadd.f32 1e-05, %v4451_v13  ;;  %v4454_v63 = vadd.f32 1e-05, %v4450_v56  ;;  %v10190_v13 = vld [vmem:[#allocation52_spill] sm:$0xff] }
 0x8b4   :  { %7563 = vrsqrt.f32 %v4453_v7  ;;  %v4456_v12 = vadd.f32 1e-05, %v4452_v62 }
 0x8b5   :  { %7565 = vrsqrt.f32 %v4455_v44 }
 0x8b6   :  { %7567 = vrsqrt.f32 %v4454_v63  ;;  %v10191_v63 = vld [vmem:[#allocation49_spill] sm:$0xff] }
 0x8b7   :  { %7569 = vrsqrt.f32 %v4456_v12 }
 0x8be   :  { %v7564_v41 = vpop.eup %7563 }
 0x8bf   :  { %v7566_v37 = vpop.eup %7565 }
 0x8c0   :  { %v7568_v0 = vpop.eup %7567 }
 0x8c1   :  { %v7570_v58 = vpop.eup %7569  ;;  %v4465_v33 = vcombine.low %v7564_v41, %v7568_v0 }
 0x8c2   :  { %v4466_v36 = vcombine.low %v7566_v37, %v7570_v58  ;;  %v10192_v37 = vld [vmem:[#allocation25_spill] sm:$0xff] }
 0x8c3   :  { %v4473_v53 = vrot.slane %v4465_v33, %v10185_v24 }
 0x8c4   :  { %v4480_v57 = vrot.slane %v4466_v36, %v10185_v24  ;;  %v10193_v36 = vld [vmem:[#allocation28_spill] sm:$0xff] }
 0x8c6   :  { %v4481_v22 = vcombine.low %v4473_v53, %v4480_v57 }
 0x8c8   :  { %v4488_v55 = vrot.slane %v4481_v22, %v10185_v24 }
 0x8ca   :  { %v4490_v31 = vmul.f32 %v4488_v55, %v3763_v14 }
 0x8cc   :  { %v4495_v54 = vrot.slane %v4490_v31, %v10186_v35  ;;  %v4503_v29 = vrot.slane %v4490_v31, %v10187_v2  ;;  %v4507_v5 = vrot.slane %v4490_v31, %v10188_v10  ;;  %v4499_v45 = vrot.slane %v4490_v31, %v10189_v4 }
 0x8ce   :  { %v4512_v23 = vmul.f32 %v4495_v54, %v4101_v9  ;;  %v4513_v48 = vmul.f32 %v4499_v45, %v4102_v28  ;;  %v4514_v60 = vmul.f32 %v4503_v29, %v4103_v59  ;;  %v4515_v1 = vmul.f32 %v4507_v5, %v4104_v32  ;;  %v9277_v9 = vld [vmem:[#allocation12 + $0x468] sm:$0xff]  ;;  %v9279_v59 = vld [vmem:[#allocation12 + $0x458] sm:$0xff]  ;;  %v9283_v32 = vld [vmem:[#allocation12 + $0x440] sm:$0xff] }
 0x8cf   :  { %v9281_v28 = vld [vmem:[#allocation12 + $0x478] sm:$0xff]  ;;  %v7207_v43 = vpack.c.bf16 %v9277_v9, %v9275_v42  ;;  %v4547_v56 = vmul.f32 %v4499_v45, %v10190_v13  ;;  %v7209_v62 = vpack.c.bf16 %v9285_v30, %v9283_v32  ;;  %v4546_v44 = vmul.f32 %v4495_v54, %v10103_v16  ;;  %v4743_v42 = vld [vmem:[#allocation12 + $0x480] sm:$0xff] }
 0x8d0   :  { %v4520_v20 = vcombine.low %v4512_v23, %v4513_v48  ;;  %v4521_v47 = vcombine.low %v4514_v60, %v4515_v1  ;;  %v7335_v7 = vpack.c.bf16 %v9281_v28, %v9279_v59  ;;  %v4551_v12 = vmul.f32 %v4499_v45, %v10191_v63  ;;  %v4737_v48 = vld [vmem:[#allocation12 + $0x450] sm:$0xff]  ;;  %v4747_v28 = vld [vmem:[#allocation12 + $0x4a0] sm:$0xff]  ;;  %v4766_v32 = vld [vmem:[#allocation12 + $0x538] sm:$0xff] }
 0x8d1   :  { %v4550_v41 = vmul.f32 %v4495_v54, %v8970_v19  ;;  %v4555_v0 = vmul.f32 %v4499_v45, %v10192_v37  ;;  %v4554_v33 = vmul.f32 %v4495_v54, %v10105_v26  ;;  %v4558_v53 = vmul.f32 %v4495_v54, %v10109_v52  ;;  %v4741_v60 = vld [vmem:[#allocation12 + $0x470] sm:$0xff] }
 0x8d2   :  { %v4528_v40 = vrot.slane %v4520_v20, %v10185_v24  ;;  %v4535_v18 = vrot.slane %v4521_v47, %v10185_v24  ;;  %v4549_v57 = vmul.f32 %v4507_v5, %v10106_v34  ;;  %v4548_v22 = vmul.f32 %v4503_v29, %v10162_v25  ;;  %v4757_v37 = vld [vmem:[#allocation12 + $0x4f0] sm:$0xff] }
 0x8d3   :  { %v4553_v14 = vmul.f32 %v4507_v5, %v10104_v21  ;;  %v4552_v16 = vmul.f32 %v4503_v29, %v10158_v3  ;;  %v4556_v52 = vmul.f32 %v4503_v29, %v9050_v11  ;;  %v4561_v34 = vmul.f32 %v4507_v5, %v9001_v6 }
 0x8d4   :  { %v4536_v15 = vcombine.low %v4528_v40, %v4535_v18  ;;  %v4560_v25 = vmul.f32 %v4503_v29, %v9060_v61  ;;  %v4748_v29 = vld [vmem:[#allocation12 + $0x4a8] sm:$0xff]  ;;  %v7337_v18 = vpack.c.bf16 %v4741_v60, %v4737_v48  ;;  %v7213_v63 = vpack.c.bf16 %v4747_v28, %v4743_v42  ;;  %v4773_v48 = vld [vmem:[#allocation12 + $0x570] sm:$0xff] }
 0x8d5   :  { %v4776_v60 = vld [vmem:[#allocation12 + $0x588] sm:$0xff]  ;;  %v4781_v42 = vld [vmem:[#allocation12 + $0x5b0] sm:$0xff] }
 0x8d6   :  { %v4543_v51 = vrot.slane %v4536_v15, %v10185_v24  ;;  %v4559_v24 = vmul.f32 %v4499_v45, %v10193_v36  ;;  %v4557_v45 = vmul.f32 %v4507_v5, %v10108_v50  ;;  %v4744_v50 = vld [vmem:[#allocation12 + $0x488] sm:$0xff]  ;;  %v4746_v5 = vld [vmem:[#allocation12 + $0x498] sm:$0xff]  ;;  %v4745_v15 = vld [vmem:[#allocation12 + $0x490] sm:$0xff] }
 0x8d7   :  { %v7339_v13 = vpack.c.bf16 %v4750_v8, %v4746_v5  ;;  %v4764_v36 = vld [vmem:[#allocation12 + $0x528] sm:$0xff]  ;;  %v4779_v5 = vld [vmem:[#allocation12 + $0x5a0] sm:$0xff] }
 0x8d8   :  { %v4545_v58 = vsub.f32 %v3764_v38, %v4543_v51  ;;  %v4749_v38 = vld [vmem:[#allocation12 + $0x4b0] sm:$0xff]  ;;  %v7211_v51 = vpack.c.bf16 %v4748_v29, %v4744_v50  ;;  %v4775_v29 = vld [vmem:[#allocation12 + $0x580] sm:$0xff]  ;;  %v4784_v28 = vld [vmem:[#allocation12 + $0x5c8] sm:$0xff] }
 0x8da   :  { %v4570_v55 = vrot.slane %v4545_v58, %v10189_v4  ;;  %v4566_v19 = vrot.slane %v4545_v58, %v10186_v35  ;;  %v4578_v31 = vrot.slane %v4545_v58, %v10188_v10  ;;  %v4574_v26 = vrot.slane %v4545_v58, %v10187_v2 }
 0x8dc   :  { %v4584_v54 = vadd.f32 %v4570_v55, %v4547_v56  ;;  %v4583_v21 = vadd.f32 %v4566_v19, %v4546_v44  ;;  %v4588_v23 = vadd.f32 %v4570_v55, %v4551_v12  ;;  %v4587_v3 = vadd.f32 %v4566_v19, %v4550_v41  ;;  %v4752_v56 = vld [vmem:[#allocation12 + $0x4c8] sm:$0xff]  ;;  %v4758_v44 = vld [vmem:[#allocation12 + $0x4f8] sm:$0xff]  ;;  %v4751_v41 = vld [vmem:[#allocation12 + $0x4c0] sm:$0xff] }
 0x8dd   :  { %v4592_v1 = vadd.f32 %v4570_v55, %v4555_v0  ;;  %v4591_v20 = vadd.f32 %v4566_v19, %v4554_v33  ;;  %v9318_v47 = vadd.f32 %v4570_v55, %v4559_v24  ;;  %v9320_v46 = vadd.f32 %v4566_v19, %v4558_v53  ;;  %v4760_v33 = vld [vmem:[#allocation12 + $0x508] sm:$0xff]  ;;  %v4762_v24 = vld [vmem:[#allocation12 + $0x518] sm:$0xff]  ;;  %v4759_v53 = vld [vmem:[#allocation12 + $0x500] sm:$0xff] }
 0x8de   :  { %4941 = vmatprep.mubr.f32.mxu0 %v4584_v54  ;;  %5119 = vmatprep.mubr.f32.mxu1 %v4584_v54  ;;  %v9322_v11 = vadd.f32 %v4578_v31, %v4549_v57  ;;  %v9324_v6 = vadd.f32 %v4574_v26, %v4548_v22  ;;  %v9326_v61 = vadd.f32 %v4578_v31, %v4553_v14  ;;  %v4763_v57 = vld [vmem:[#allocation12 + $0x520] sm:$0xff]  ;;  %v4761_v22 = vld [vmem:[#allocation12 + $0x510] sm:$0xff] }
 0x8df   :  { %4942 = vmatmul.mubr.f32.vlgmr.msra.gmra.mrb[40].mxu0 %v4583_v21  ;;  %5120 = vmatmul.mubr.f32.vlgmr.msra.gmra.mrb[40].mxu1 %v4583_v21  ;;  %v9328_v17 = vadd.f32 %v4574_v26, %v4552_v16  ;;  %v9330_v49 = vadd.f32 %v4578_v31, %v4557_v45  ;;  %v9332_v40 = vadd.f32 %v4574_v26, %v4556_v52  ;;  %v4765_v14 = vld [vmem:[#allocation12 + $0x530] sm:$0xff]  ;;  %v4768_v16 = vld [vmem:[#allocation12 + $0x548] sm:$0xff]  ;;  %v4774_v45 = vld [vmem:[#allocation12 + $0x578] sm:$0xff] }
 0x8e0   :  { %7206 = vmatpush1.bf16.msra.mxu0 %v7205_v39  ;;  %7334 = vmatpush1.bf16.msra.mxu1 %v7333_v27  ;;  %v9334_v9 = vadd.f32 %v4578_v31, %v4561_v34  ;;  %v9336_v59 = vadd.f32 %v4574_v26, %v4560_v25  ;;  %v4756_v39 = vld [vmem:[#allocation12 + $0x4e8] sm:$0xff]  ;;  %v4754_v27 = vld [vmem:[#allocation12 + $0x4d8] sm:$0xff]  ;;  %v7341_v12 = vpack.c.bf16 %v4749_v38, %v4745_v15  ;;  %v4767_v25 = vld [vmem:[#allocation12 + $0x540] sm:$0xff] }
 0x8e1   :  { %4947 = vmatprep.mubr.f32.mxu0 %v4588_v23  ;;  %5125 = vmatprep.mubr.f32.mxu1 %v4588_v23  ;;  %v7215_v0 = vpack.c.bf16 %v4756_v39, %v4752_v56  ;;  %v7343_v58 = vpack.c.bf16 %v4758_v44, %v4754_v27  ;;  %v7219_v55 = vpack.c.bf16 %v4764_v36, %v4760_v33  ;;  %v4772_v31 = vld [vmem:[#allocation12 + $0x568] sm:$0xff]  ;;  %v4770_v26 = vld [vmem:[#allocation12 + $0x558] sm:$0xff]  ;;  %v4771_v54 = vld [vmem:[#allocation12 + $0x560] sm:$0xff] }
 0x8e2   :  { %7208 = vmatprep.subr.bf16.mxu0 %v7207_v43  ;;  %7336 = vmatprep.subr.bf16.mxu1 %v7335_v7  ;;  %v4755_v43 = vld [vmem:[#allocation12 + $0x4e0] sm:$0xff]  ;;  %v4753_v7 = vld [vmem:[#allocation12 + $0x4d0] sm:$0xff]  ;;  %v7347_v19 = vpack.c.bf16 %v4766_v32, %v4762_v24  ;;  %v7221_v52 = vpack.c.bf16 %v4763_v57, %v4759_v53  ;;  %v7349_v34 = vpack.c.bf16 %v4765_v14, %v4761_v22  ;;  %v4788_v15 = vld [vmem:[#allocation12 + $0x5e8] sm:$0xff] }
 0x8e3   :  { %4948 = vmatmul.mubr.f32.gmra.mrb[42].mxu0 %v4587_v3  ;;  %5126 = vmatmul.mubr.f32.gmra.mrb[42].mxu1 %v4587_v3  ;;  %v7217_v30 = vpack.c.bf16 %v4755_v43, %v4751_v41  ;;  %v7223_v21 = vpack.c.bf16 %v4772_v31, %v4768_v16  ;;  %v7351_v23 = vpack.c.bf16 %v4774_v45, %v4770_v26  ;;  %v4769_v3 = vld [vmem:[#allocation12 + $0x550] sm:$0xff]  ;;  %v4786_v38 = vld [vmem:[#allocation12 + $0x5d8] sm:$0xff]  ;;  %v4783_v39 = vld [vmem:[#allocation12 + $0x5c0] sm:$0xff] }
 0x8e4   :  { %7210 = vmatpush1.bf16.msra.mxu0 %v7209_v62  ;;  %7338 = vmatpush1.bf16.msra.mxu1 %v7337_v18  ;;  %v7345_v62 = vpack.c.bf16 %v4757_v37, %v4753_v7  ;;  %v7353_v50 = vpack.c.bf16 %v4773_v48, %v4769_v3  ;;  %v4777_v18 = vld [vmem:[#allocation12 + $0x590] sm:$0xff]  ;;  %v4787_v27 = vld [vmem:[#allocation12 + $0x5e0] sm:$0xff]  ;;  %v7231_v44 = vpack.c.bf16 %v4788_v15, %v4784_v28  ;;  %v4792_v43 = vld [vmem:[#allocation12 + $0x608] sm:$0xff] }
 0x8e5   :  { %4953 = vmatprep.mubr.f32.mxu0 %v4592_v1  ;;  %5131 = vmatprep.mubr.f32.mxu1 %v4592_v1  ;;  %v4780_v1 = vld [vmem:[#allocation12 + $0x5a8] sm:$0xff]  ;;  %v7357_v56 = vpack.c.bf16 %v4781_v42, %v4777_v18  ;;  %v4789_v41 = vld [vmem:[#allocation12 + $0x5f0] sm:$0xff]  ;;  %v4794_v37 = vld [vmem:[#allocation12 + $0x618] sm:$0xff] }
 0x8e6   :  { %7212 = vmatprep.subr.bf16.mxu0 %v7211_v51  ;;  %7340 = vmatprep.subr.bf16.mxu1 %v7339_v13  ;;  %v7227_v8 = vpack.c.bf16 %v4780_v1, %v4776_v60  ;;  %v4790_v51 = vld [vmem:[#allocation12 + $0x5f8] sm:$0xff]  ;;  %v7229_v13 = vpack.c.bf16 %v4779_v5, %v4775_v29  ;;  %v4796_v7 = vld [vmem:[#allocation12 + $0x628] sm:$0xff]  ;;  %v4791_v36 = vld [vmem:[#allocation12 + $0x600] sm:$0xff] }
 0x8e7   :  { %4954 = vmatmul.mubr.f32.gmra.mrb[44].mxu0 %v4591_v20  ;;  %5132 = vmatmul.mubr.f32.gmra.mrb[44].mxu1 %v4591_v20  ;;  %v4778_v20 = vld [vmem:[#allocation12 + $0x598] sm:$0xff]  ;;  %v4795_v24 = vld [vmem:[#allocation12 + $0x620] sm:$0xff]  ;;  %v7235_v32 = vpack.c.bf16 %v4796_v7, %v4792_v43  ;;  %v4797_v53 = vld [vmem:[#allocation12 + $0x630] sm:$0xff] }
 0x8e8   :  { %7214 = vmatpush1.bf16.msra.mxu0 %v7213_v63  ;;  %7342 = vmatpush1.bf16.msra.mxu1 %v7341_v12  ;;  %v7359_v63 = vpack.c.bf16 %v4790_v51, %v4786_v38  ;;  %v4785_v12 = vld [vmem:[#allocation12 + $0x5d0] sm:$0xff]  ;;  %v4800_v57 = vld [vmem:[#allocation12 + $0x648] sm:$0xff]  ;;  %v4802_v14 = vld [vmem:[#allocation12 + $0x658] sm:$0xff] }
 0x8e9   :  { %4959 = vmatprep.mubr.f32.mxu0 %v9318_v47  ;;  %5137 = vmatprep.mubr.f32.mxu1 %v9318_v47  ;;  %v4782_v47 = vld [vmem:[#allocation12 + $0x5b8] sm:$0xff]  ;;  %v7361_v33 = vpack.c.bf16 %v4789_v41, %v4785_v12  ;;  %v4804_v22 = vld [vmem:[#allocation12 + $0x668] sm:$0xff]  ;;  %v4799_v31 = vld [vmem:[#allocation12 + $0x640] sm:$0xff] }
 0x8ea   :  { %7216 = vmatprep.subr.bf16.mxu0 %v7215_v0  ;;  %7344 = vmatprep.subr.bf16.mxu1 %v7343_v58  ;;  %v4798_v0 = vld [vmem:[#allocation12 + $0x638] sm:$0xff]  ;;  %v7233_v58 = vpack.c.bf16 %v4787_v27, %v4783_v39  ;;  %v4803_v26 = vld [vmem:[#allocation12 + $0x660] sm:$0xff]  ;;  %v7239_v45 = vpack.c.bf16 %v4804_v22, %v4800_v57  ;;  %v4813_v29 = vld [vmem:[#allocation12 + $0x6b0] sm:$0xff] }
 0x8eb   :  { %4960 = vmatmul.mubr.f32.gmra.mrb[46].mxu0 %v9320_v46  ;;  %5138 = vmatmul.mubr.f32.gmra.mrb[46].mxu1 %v9320_v46  ;;  %v7225_v46 = vpack.c.bf16 %v4771_v54, %v4767_v25  ;;  %v4806_v16 = vld [vmem:[#allocation12 + $0x678] sm:$0xff]  ;;  %v4805_v25 = vld [vmem:[#allocation12 + $0x670] sm:$0xff]  ;;  %v4808_v54 = vld [vmem:[#allocation12 + $0x688] sm:$0xff]  ;;  %v7241_v48 = vpack.c.bf16 %v4803_v26, %v4799_v31 }
 0x8ec   :  { %7218 = vmatpush1.bf16.msra.mxu0 %v7217_v30  ;;  %7346 = vmatpush1.bf16.msra.mxu1 %v7345_v62  ;;  %v7363_v30 = vpack.c.bf16 %v4798_v0, %v4794_v37  ;;  %v4793_v62 = vld [vmem:[#allocation12 + $0x610] sm:$0xff]  ;;  %v4814_v3 = vld [vmem:[#allocation12 + $0x6b8] sm:$0xff]  ;;  %v4807_v1 = vld [vmem:[#allocation12 + $0x680] sm:$0xff] }
 0x8ed   :  { %5030 = vmatprep.mubr.f32.mxu0 %v9322_v11  ;;  %5208 = vmatprep.mubr.f32.mxu1 %v9322_v11  ;;  %v7355_v11 = vpack.c.bf16 %v4782_v47, %v4778_v20  ;;  %v4811_v20 = vld [vmem:[#allocation12 + $0x6a0] sm:$0xff]  ;;  %v4816_v5 = vld [vmem:[#allocation12 + $0x6c8] sm:$0xff]  ;;  %v4822_v18 = vld [vmem:[#allocation12 + $0x6f8] sm:$0xff] }
 0x8ee   :  { %7220 = vmatprep.subr.bf16.mxu0 %v7219_v55  ;;  %7348 = vmatprep.subr.bf16.mxu1 %v7347_v19  ;;  %v7237_v55 = vpack.c.bf16 %v4795_v24, %v4791_v36  ;;  %v7365_v19 = vpack.c.bf16 %v4797_v53, %v4793_v62  ;;  %v7245_v42 = vpack.c.bf16 %v4811_v20, %v4807_v1  ;;  %v4815_v15 = vld [vmem:[#allocation12 + $0x6c0] sm:$0xff]  ;;  %v4821_v39 = vld [vmem:[#allocation12 + $0x6f0] sm:$0xff]  ;;  %v4824_v27 = vld [vmem:[#allocation12 + $0x708] sm:$0xff] }
 0x8ef   :  { %v4819_v38 = vld [vmem:[#allocation12 + $0x6e0] sm:$0xff]  ;;  %v4830_v12 = vld [vmem:[#allocation12 + $0x738] sm:$0xff]  ;;  %v4829_v36 = vld [vmem:[#allocation12 + $0x730] sm:$0xff] }
 0x8f0   :  { %7222 = vmatpush1.bf16.msra.mxu0 %v7221_v52  ;;  %7350 = vmatpush1.bf16.msra.mxu1 %v7349_v34  ;;  %v7367_v52 = vpack.c.bf16 %v4806_v16, %v4802_v14  ;;  %v4801_v34 = vld [vmem:[#allocation12 + $0x650] sm:$0xff]  ;;  %v7249_v41 = vpack.c.bf16 %v4819_v38, %v4815_v15  ;;  %v4823_v7 = vld [vmem:[#allocation12 + $0x700] sm:$0xff]  ;;  %v4832_v24 = vld [vmem:[#allocation12 + $0x748] sm:$0xff] }
 0x8f1   :  { %7224 = vmatprep.subr.bf16.mxu0 %v7223_v21  ;;  %7352 = vmatprep.subr.bf16.mxu1 %v7351_v23  ;;  %v4812_v21 = vld [vmem:[#allocation12 + $0x6a8] sm:$0xff]  ;;  %v4810_v23 = vld [vmem:[#allocation12 + $0x698] sm:$0xff]  ;;  %v7369_v60 = vpack.c.bf16 %v4805_v25, %v4801_v34  ;;  %v4827_v37 = vld [vmem:[#allocation12 + $0x720] sm:$0xff] }
 0x8f2   :  { %v7243_v47 = vpack.c.bf16 %v4812_v21, %v4808_v54  ;;  %v4838_v62 = vld [vmem:[#allocation12 + $0x778] sm:$0xff]  ;;  %v7253_v53 = vpack.c.bf16 %v4827_v37, %v4823_v7  ;;  %v4831_v22 = vld [vmem:[#allocation12 + $0x740] sm:$0xff]  ;;  %v4837_v31 = vld [vmem:[#allocation12 + $0x770] sm:$0xff] }
 0x8f3   :  { %v4835_v14 = vld [vmem:[#allocation12 + $0x760] sm:$0xff]  ;;  %v4840_v26 = vld [vmem:[#allocation12 + $0x788] sm:$0xff]  ;;  %v4846_v34 = vld [vmem:[#allocation12 + $0x7b8] sm:$0xff] }
 0x8f4   :  { %7226 = vmatpush1.bf16.msra.mxu0 %v7225_v46  ;;  %7354 = vmatpush1.bf16.msra.mxu1 %v7353_v50  ;;  %v7371_v46 = vpack.c.bf16 %v4814_v3, %v4810_v23  ;;  %v4809_v50 = vld [vmem:[#allocation12 + $0x690] sm:$0xff]  ;;  %v7257_v25 = vpack.c.bf16 %v4835_v14, %v4831_v22  ;;  %v4839_v21 = vld [vmem:[#allocation12 + $0x780] sm:$0xff]  ;;  %v4848_v20 = vld [vmem:[#allocation12 + $0x7c8] sm:$0xff] }
 0x8f5   :  { %7228 = vmatprep.subr.bf16.mxu0 %v7227_v8  ;;  %7356 = vmatprep.subr.bf16.mxu1 %v7355_v11  ;;  %v4820_v8 = vld [vmem:[#allocation12 + $0x6e8] sm:$0xff]  ;;  %v4818_v11 = vld [vmem:[#allocation12 + $0x6d8] sm:$0xff]  ;;  %v7373_v28 = vpack.c.bf16 %v4813_v29, %v4809_v50  ;;  %v4843_v23 = vld [vmem:[#allocation12 + $0x7a0] sm:$0xff] }
 0x8f6   :  { %v7247_v51 = vpack.c.bf16 %v4820_v8, %v4816_v5  ;;  %v4845_v1 = vld [vmem:[#allocation12 + $0x7b0] sm:$0xff]  ;;  %v4854_v50 = vld [vmem:[#allocation12 + $0x7f8] sm:$0xff]  ;;  %v7261_v29 = vpack.c.bf16 %v4843_v23, %v4839_v21  ;;  %v4847_v8 = vld [vmem:[#allocation12 + $0x7c0] sm:$0xff] }
 0x8f7   :  { %v4853_v15 = vld [vmem:[#allocation12 + $0x7f0] sm:$0xff]  ;;  %v7577_v14 = vld [vmem:[%s9485_s0 + $0x28] sm:$0xff] }
 0x8f8   :  { %7230 = vmatpush1.bf16.msra.mxu0 %v7229_v13  ;;  %7358 = vmatpush1.bf16.msra.mxu1 %v7357_v56  ;;  %v7375_v13 = vpack.c.bf16 %v4822_v18, %v4818_v11  ;;  %v4817_v56 = vld [vmem:[#allocation12 + $0x6d0] sm:$0xff] }
 0x8f9   :  { %7232 = vmatprep.subr.bf16.mxu0 %v7231_v44  ;;  %7360 = vmatprep.subr.bf16.mxu1 %v7359_v63  ;;  %v4828_v44 = vld [vmem:[#allocation12 + $0x728] sm:$0xff]  ;;  %v4826_v63 = vld [vmem:[#allocation12 + $0x718] sm:$0xff]  ;;  %v7377_v43 = vpack.c.bf16 %v4821_v39, %v4817_v56 }
 0x8fa   :  { %v7251_v0 = vpack.c.bf16 %v4828_v44, %v4824_v27  ;;  %v7579_v23 = vld [vmem:[%s9485_s0 + $0x40] sm:$0xff] }
 0x8fc   :  { %7234 = vmatpush1.bf16.msra.mxu0 %v7233_v58  ;;  %7362 = vmatpush1.bf16.msra.mxu1 %v7361_v33  ;;  %v7379_v58 = vpack.c.bf16 %v4830_v12, %v4826_v63  ;;  %v4825_v33 = vld [vmem:[#allocation12 + $0x710] sm:$0xff]  ;;  %v7573_v12 = vld [vmem:[%s9485_s0 + $0x8] sm:$0xff] }
 0x8fd   :  { %7236 = vmatprep.subr.bf16.mxu0 %v7235_v32  ;;  %7364 = vmatprep.subr.bf16.mxu1 %v7363_v30  ;;  %v4836_v32 = vld [vmem:[#allocation12 + $0x768] sm:$0xff]  ;;  %v4834_v30 = vld [vmem:[#allocation12 + $0x758] sm:$0xff]  ;;  %v7381_v57 = vpack.c.bf16 %v4829_v36, %v4825_v33 }
 0x8fe   :  { %v7255_v16 = vpack.c.bf16 %v4836_v32, %v4832_v24 }
 0x900   :  { %7238 = vmatpush1.bf16.msra.mxu0 %v7237_v55  ;;  %7366 = vmatpush1.bf16.msra.mxu1 %v7365_v19  ;;  %v7383_v55 = vpack.c.bf16 %v4838_v62, %v4834_v30  ;;  %v4833_v19 = vld [vmem:[#allocation12 + $0x750] sm:$0xff] }
 0x901   :  { %7240 = vmatprep.subr.bf16.mxu0 %v7239_v45  ;;  %7368 = vmatprep.subr.bf16.mxu1 %v7367_v52  ;;  %v4844_v45 = vld [vmem:[#allocation12 + $0x7a8] sm:$0xff]  ;;  %v4842_v52 = vld [vmem:[#allocation12 + $0x798] sm:$0xff]  ;;  %v7385_v54 = vpack.c.bf16 %v4837_v31, %v4833_v19 }
 0x902   :  { %v7259_v3 = vpack.c.bf16 %v4844_v45, %v4840_v26  ;;  %v7575_v62 = vld [vmem:[%s9485_s0 + $0x20] sm:$0xff] }
 0x904   :  { %7242 = vmatpush1.bf16.msra.mxu0 %v7241_v48  ;;  %7370 = vmatpush1.bf16.msra.mxu1 %v7369_v60  ;;  %v7387_v48 = vpack.c.bf16 %v4846_v34, %v4842_v52  ;;  %v4841_v60 = vld [vmem:[#allocation12 + $0x790] sm:$0xff] }
 0x905   :  { %7244 = vmatprep.subr.bf16.mxu0 %v7243_v47  ;;  %7372 = vmatprep.subr.bf16.mxu1 %v7371_v46  ;;  %v4852_v47 = vld [vmem:[#allocation12 + $0x7e8] sm:$0xff]  ;;  %v4850_v46 = vld [vmem:[#allocation12 + $0x7d8] sm:$0xff]  ;;  %v7389_v5 = vpack.c.bf16 %v4845_v1, %v4841_v60 }
 0x906   :  { %v7263_v11 = vpack.c.bf16 %v4852_v47, %v4848_v20  ;;  %v7391_v18 = vpack.c.bf16 %v4854_v50, %v4850_v46  ;;  %v7581_v1 = vld [vmem:[%s9485_s0 + $0x48] sm:$0xff]  ;;  %v7582_v47 = vld [vmem:[%s9485_s0 + $0x58] sm:$0xff] }
 0x908   :  { %7246 = vmatpush1.bf16.msra.mxu0 %v7245_v42  ;;  %7374 = vmatpush1.bf16.msra.mxu1 %v7373_v28  ;;  %v4851_v42 = vld [vmem:[#allocation12 + $0x7e0] sm:$0xff]  ;;  %v4849_v28 = vld [vmem:[#allocation12 + $0x7d0] sm:$0xff] }
 0x909   :  { %7248 = vmatprep.subr.bf16.mxu0 %v7247_v51  ;;  %7376 = vmatprep.subr.bf16.mxu1 %v7375_v13  ;;  %v7265_v38 = vpack.c.bf16 %v4851_v42, %v4847_v8  ;;  %v7393_v51 = vpack.c.bf16 %v4853_v15, %v4849_v28  ;;  %v7583_v15 = vld [vmem:[%s9485_s0 + $0x60] sm:$0xff] }
 0x90c   :  { %7250 = vmatpush1.bf16.msra.mxu0 %v7249_v41  ;;  %7378 = vmatpush1.bf16.msra.mxu1 %v7377_v43  ;;  %v7574_v43 = vld [vmem:[%s9485_s0 + $0x18] sm:$0xff] }
 0x90d   :  { %7252 = vmatprep.subr.bf16.mxu0 %v7251_v0  ;;  %7380 = vmatprep.subr.bf16.mxu1 %v7379_v58 }
 0x910   :  { %7254 = vmatpush1.bf16.msra.mxu0 %v7253_v53  ;;  %7382 = vmatpush1.bf16.msra.mxu1 %v7381_v57  ;;  %v7576_v57 = vld [vmem:[%s9485_s0 + $0x30] sm:$0xff] }
 0x911   :  { %7256 = vmatprep.subr.bf16.mxu0 %v7255_v16  ;;  %7384 = vmatprep.subr.bf16.mxu1 %v7383_v55  ;;  %v7578_v55 = vld [vmem:[%s9485_s0 + $0x38] sm:$0xff] }
 0x914   :  { %7258 = vmatpush1.bf16.msra.mxu0 %v7257_v25  ;;  %7386 = vmatpush1.bf16.msra.mxu1 %v7385_v54 }
 0x915   :  { %7260 = vmatprep.subr.bf16.mxu0 %v7259_v3  ;;  %7388 = vmatprep.subr.bf16.mxu1 %v7387_v48  ;;  %v7580_v48 = vld [vmem:[%s9485_s0 + $0x50] sm:$0xff] }
 0x918   :  { %7262 = vmatpush1.bf16.msra.mxu0 %v7261_v29  ;;  %7390 = vmatpush1.bf16.msra.mxu1 %v7389_v5 }
 0x919   :  { %7264 = vmatprep.subr.bf16.mxu0 %v7263_v11  ;;  %7392 = vmatprep.subr.bf16.mxu1 %v7391_v18 }
 0x91c   :  { %7266 = vmatpush1.bf16.msra.mxu0 %v7265_v38  ;;  %7394 = vmatpush1.bf16.msra.mxu1 %v7393_v51  ;;  %v7584_v51 = vld [vmem:[%s9485_s0 + $0x70] sm:$0xff] }
 0x91f   :  { %5031 = vmatmul.mubr.f32.vlgmr.msra.gmra.mrb[40].mxu0 %v9324_v6  ;;  %5209 = vmatmul.mubr.f32.vlgmr.msra.gmra.mrb[40].mxu1 %v9324_v6  ;;  %v4855_v6 = vld [vmem:[#allocation13] sm:$0xf] }
 0x920   :  { %5036 = vmatprep.mubr.f32.mxu0 %v9326_v61  ;;  %5214 = vmatprep.mubr.f32.mxu1 %v9326_v61  ;;  %v9362_v61 = vrot.slane %v4855_v6, %v10186_v35 }
 0x923   :  { %5037 = vmatmul.mubr.f32.gmra.mrb[42].mxu0 %v9328_v17  ;;  %5215 = vmatmul.mubr.f32.gmra.mrb[42].mxu1 %v9328_v17  ;;  %v9365_v17 = vrot.slane %v4855_v6, %v10187_v2  ;;  %v7571_v2 = vld [vmem:[%s9485_s0] sm:$0xff] }
 0x924   :  { %5042 = vmatprep.mubr.f32.mxu0 %v9330_v49  ;;  %5220 = vmatprep.mubr.f32.mxu1 %v9330_v49  ;;  %v9368_v49 = vrot.slane %v4855_v6, %v10189_v4 }
 0x927   :  { %5043 = vmatmul.mubr.f32.gmra.mrb[44].mxu0 %v9332_v40  ;;  %5221 = vmatmul.mubr.f32.gmra.mrb[44].mxu1 %v9332_v40  ;;  %v9371_v40 = vrot.slane %v4855_v6, %v10188_v10  ;;  %v7572_v10 = vld [vmem:[%s9485_s0 + $0x10] sm:$0xff] }
 0x928   :  { %5048 = vmatprep.mubr.f32.mxu0 %v9334_v9  ;;  %5226 = vmatprep.mubr.f32.mxu1 %v9334_v9 }
 0x92b   :  { %5049 = vmatmul.mubr.f32.gmra.mrb[46].mxu0 %v9336_v59  ;;  %5227 = vmatmul.mubr.f32.gmra.mrb[46].mxu1 %v9336_v59 }
 0x9f2   :  { %v5032_v13 = vpop.f32.mrb[40].mxu0  ;;  %v5210_v56 = vpop.f32.mrb[40].mxu1 }
 0x9f3   :  { %v7411_v9 = vadd.f32 %v5032_v13, %v9362_v61  ;;  %v7419_v39 = vadd.f32 %v5210_v56, %v9365_v17  ;;  %v5034_v59 = vpop.f32.mrb[41].mxu0  ;;  %v5212_v27 = vpop.f32.mrb[41].mxu1 }
 0x9f4   :  { %v7412_v35 = vadd.f32 %v5034_v59, %v9368_v49  ;;  %v7420_v44 = vadd.f32 %v5212_v27, %v9371_v40 }
 0x9f5   :  { %v5233_v4 = vadd.f32 %v7571_v2, %v7411_v9  ;;  %v5235_v63 = vadd.f32 %v7572_v10, %v7419_v39 }
 0x9f6   :  { %v5234_v41 = vadd.f32 %v7573_v12, %v7412_v35  ;;  %v5236_v7 = vadd.f32 %v7574_v43, %v7420_v44  ;;  %v5038_v37 = vpop.f32.mrb[42].mxu0  ;;  %v5216_v0 = vpop.f32.mrb[42].mxu1 }
 0x9f7   :  { %5249 = vst [vmem:[%s9496_s11] sm:$0xff] %v5233_v4  ;;  %5251 = vst [vmem:[%s9496_s11 + $0x10] sm:$0xff] %v5235_v63  ;;  %v7413_v58 = vadd.f32 %v5038_v37, %v9362_v61  ;;  %v7421_v33 = vadd.f32 %v5216_v0, %v9365_v17  ;;  %v5040_v36 = vpop.f32.mrb[43].mxu0  ;;  %v5218_v24 = vpop.f32.mrb[43].mxu1 }
 0x9f8   :  { %5250 = vst [vmem:[%s9496_s11 + $0x8] sm:$0xff] %v5234_v41  ;;  %5252 = vst [vmem:[%s9496_s11 + $0x18] sm:$0xff] %v5236_v7  ;;  %v7414_v32 = vadd.f32 %v5040_v36, %v9368_v49  ;;  %v7422_v30 = vadd.f32 %v5218_v24, %v9371_v40 }
 0x9f9   :  { %v5237_v53 = vadd.f32 %v7575_v62, %v7413_v58  ;;  %v5239_v22 = vadd.f32 %v7576_v57, %v7421_v33 }
 0x9fa   :  { %v5238_v16 = vadd.f32 %v7577_v14, %v7414_v32  ;;  %v5240_v19 = vadd.f32 %v7578_v55, %v7422_v30  ;;  %v5044_v31 = vpop.f32.mrb[44].mxu0  ;;  %v5222_v26 = vpop.f32.mrb[44].mxu1 }
 0x9fb   :  { %5253 = vst [vmem:[%s9496_s11 + $0x20] sm:$0xff] %v5237_v53  ;;  %5255 = vst [vmem:[%s9496_s11 + $0x30] sm:$0xff] %v5239_v22  ;;  %v7415_v45 = vadd.f32 %v5044_v31, %v9362_v61  ;;  %v7423_v52 = vadd.f32 %v5222_v26, %v9365_v17  ;;  %v5046_v34 = vpop.f32.mrb[45].mxu0  ;;  %v5224_v25 = vpop.f32.mrb[45].mxu1 }
 0x9fc   :  { %5254 = vst [vmem:[%s9496_s11 + $0x28] sm:$0xff] %v5238_v16  ;;  %5256 = vst [vmem:[%s9496_s11 + $0x38] sm:$0xff] %v5240_v19  ;;  %v7416_v54 = vadd.f32 %v5046_v34, %v9368_v49  ;;  %v7424_v21 = vadd.f32 %v5224_v25, %v9371_v40 }
 0x9fd   :  { %v5241_v3 = vadd.f32 %v7579_v23, %v7415_v45  ;;  %v5243_v60 = vadd.f32 %v7580_v48, %v7423_v52 }
 0x9fe   :  { %v5242_v20 = vadd.f32 %v7581_v1, %v7416_v54  ;;  %v5244_v46 = vadd.f32 %v7582_v47, %v7424_v21  ;;  %v5050_v50 = vpop.f32.mrb[46].mxu0  ;;  %v5228_v29 = vpop.f32.mrb[46].mxu1 }
 0x9ff   :  { %5257 = vst [vmem:[%s9496_s11 + $0x40] sm:$0xff] %v5241_v3  ;;  %5259 = vst [vmem:[%s9496_s11 + $0x50] sm:$0xff] %v5243_v60  ;;  %v7417_v5 = vadd.f32 %v5050_v50, %v9362_v61  ;;  %v7425_v8 = vadd.f32 %v5228_v29, %v9365_v17  ;;  %v5052_v11 = vpop.f32.mrb[47].mxu0  ;;  %v5230_v18 = vpop.f32.mrb[47].mxu1  ;;  %v7585_v61 = vld [vmem:[%s9485_s0 + $0x68] sm:$0xff] }
 0xa00   :  { %5258 = vst [vmem:[%s9496_s11 + $0x48] sm:$0xff] %v5242_v20  ;;  %5260 = vst [vmem:[%s9496_s11 + $0x58] sm:$0xff] %v5244_v46  ;;  %v7418_v42 = vadd.f32 %v5052_v11, %v9368_v49  ;;  %v7426_v28 = vadd.f32 %v5230_v18, %v9371_v40  ;;  %v7586_v49 = vld [vmem:[%s9485_s0 + $0x78] sm:$0xff] }
 0xa01   :  { %v5245_v38 = vadd.f32 %v7583_v15, %v7417_v5  ;;  %v5247_v6 = vadd.f32 %v7584_v51, %v7425_v8 }
 0xa02   :  { %v5246_v17 = vadd.f32 %v7585_v61, %v7418_v42  ;;  %v5248_v40 = vadd.f32 %v7586_v49, %v7426_v28 }
 0xa03   :  { %5261 = vst [vmem:[%s9496_s11 + $0x60] sm:$0xff] %v5245_v38  ;;  %5263 = vst [vmem:[%s9496_s11 + $0x70] sm:$0xff] %v5247_v6 }
 0xa04   :  { %5262 = vst [vmem:[%s9496_s11 + $0x68] sm:$0xff] %v5246_v17  ;;  %5264 = vst [vmem:[%s9496_s11 + $0x78] sm:$0xff] %v5248_v40 }
 0xa05   :  { %5269 = vsyncpa [#allocation3], 1 }
 0xa06   :  { %5270 = vsyncpa [#allocation5], 1 }
 0xa07   :  { %5271 = vsyncpa [#allocation8], 1 }
 0xa08   :  { %5272 = vsyncpa [#allocation11], 1 }
 0xa09   :  { %5273 = vsyncpa [#allocation14], 1 }
 0xa0a   :  { %5274 = vsyncpa [#allocation17], 1 }

</bundles_post_ra>
